<compile_context>
chip_gen: v6e
topology: v6e:2x2x1
jax: 0.10.0
libtpu: 0.0.40
codegen_flags: <defaults>
</compile_context>

<pallas_src>
import jax
import jax.numpy as jnp
from jax.experimental import pallas as pl
from jax.experimental.pallas import tpu as pltpu

L_IN = 48                     # input length implied by fc1 = Linear(32*12, 64)
C1, C2 = 16, 32               # conv1 / conv2 output channels
L1P, L2P = L_IN // 2, L_IN // 4   # 24, 12 (lengths after pool1 / pool2)
HID = 64
NUM_CLASSES = 6
OUT_PAD = 128                 # lane-dense padded output width

F1W = 2 * L1P * C1            # 768: conv1 band output, [even | odd] phases
P1W = L1P * C1                # 384: pooled-1 feature width
F2W = 2 * L2P * C2            # 768: conv2 band output, [even | odd] phases
P2W = L2P * C2                # 384: pooled-2 feature width

TB = 512                      # batch rows per grid step (multiple of 256/128)
DOT_DTYPE = jnp.bfloat16      # MXU operand dtype (accumulation stays f32)


def hand_kernel(x_ref, w1_ref, b1_ref, w2_ref, b2_ref,
                wf1_ref, bf1_ref, wf2_ref, bf2_ref, out_ref):
    # conv1 + ReLU: banded matmul; even/odd output positions occupy the two
    # lane halves so the following max-pool is a plain elementwise max.
    h1 = jnp.dot(x_ref[...], w1_ref[...], preferred_element_type=jnp.float32)
    h1 = jnp.maximum(h1 + b1_ref[...], 0.0)                    # (TB, 768) f32
    p1 = jnp.maximum(h1[:, :P1W], h1[:, P1W:])                 # MaxPool1d(2,2) -> (TB, 384)

    # conv2 + ReLU (banded, even/odd phases again), f32 accumulation.
    h2 = jnp.dot(p1.astype(DOT_DTYPE), w2_ref[...],
                 preferred_element_type=jnp.float32)
    h2 = jnp.maximum(h2 + b2_ref[...], 0.0)                    # (TB, 768) f32
    p2 = jnp.maximum(h2[:, :P2W], h2[:, P2W:])                 # MaxPool1d(2,2) -> (TB, 384)

    # fc1 (+ folded channel-major flatten permutation) + ReLU.
    y1 = jnp.dot(p2.astype(DOT_DTYPE), wf1_ref[...],
                 preferred_element_type=jnp.float32)
    y1 = jnp.maximum(y1 + bf1_ref[...], 0.0)                   # (TB, 64)

    # fc2, zero-padded to 128 output lanes for a lane-dense store.
    y2 = jnp.dot(y1.astype(DOT_DTYPE), wf2_ref[...],
                 preferred_element_type=jnp.float32)
    out_ref[...] = y2 + bf2_ref[...]                           # (TB, 128)


def init_params(key):
    """Deterministic synthetic params with torch-equivalent shapes."""
    ks = jax.random.split(key, 8)
    conv1_w = jax.random.normal(ks[0], (C1, 1, 3), jnp.float32) * 0.2
    conv1_b = jax.random.normal(ks[1], (C1,), jnp.float32) * 0.1
    conv2_w = jax.random.normal(ks[2], (C2, C1, 3), jnp.float32) * 0.1
    conv2_b = jax.random.normal(ks[3], (C2,), jnp.float32) * 0.1
    fc1_w = jax.random.normal(ks[4], (HID, C2 * L2P), jnp.float32) * 0.05
    fc1_b = jax.random.normal(ks[5], (HID,), jnp.float32) * 0.1
    fc2_w = jax.random.normal(ks[6], (NUM_CLASSES, HID), jnp.float32) * 0.1
    fc2_b = jax.random.normal(ks[7], (HID,), jnp.float32)[:NUM_CLASSES] * 0.1
    return conv1_w, conv1_b, conv2_w, conv2_b, fc1_w, fc1_b, fc2_w, fc2_b


def _build_banded_params(params):
    """Fold conv padding, pool down-select and flatten into dense matrices."""
    conv1_w, conv1_b, conv2_w, conv2_b, fc1_w, fc1_b, fc2_w, fc2_b = params

    # conv1 band: (48, 768). output lane = half*384 + lp*16 + c, with conv
    # position l = 2*lp + half (so even/odd phases fill the two lane halves).
    l_in = jnp.arange(L_IN)[:, None, None, None]
    half = jnp.arange(2)[None, :, None, None]
    lp = jnp.arange(L1P)[None, None, :, None]
    c = jnp.arange(C1)[None, None, None, :]
    k = l_in - (2 * lp + half) + 1
    w1_2d = conv1_w[:, 0, :]                                    # (16, 3)
    w1band = jnp.where((k >= 0) & (k < 3), w1_2d[c, jnp.clip(k, 0, 2)], 0.0)
    w1band = w1band.reshape(L_IN, F1W)                          # (48, 768)
    b1big = jnp.tile(conv1_b, 2 * L1P).reshape(1, F1W)          # (1, 768)

    # conv2 band: (384, 768). input lane = lp*16 + c_in (pooled-1 layout);
    # output lane = half2*384 + lp2*32 + c_out, conv position l2 = 2*lp2+half2.
    lp_in = jnp.arange(L1P)[:, None, None, None, None]
    c_in = jnp.arange(C1)[None, :, None, None, None]
    half2 = jnp.arange(2)[None, None, :, None, None]
    lp2 = jnp.arange(L2P)[None, None, None, :, None]
    c_out = jnp.arange(C2)[None, None, None, None, :]
    k2 = lp_in - (2 * lp2 + half2) + 1
    w2band = jnp.where((k2 >= 0) & (k2 < 3),
                       conv2_w[c_out, c_in, jnp.clip(k2, 0, 2)], 0.0)
    w2band = w2band.reshape(P1W, F2W)                           # (384, 768)
    b2big = jnp.tile(conv2_b, 2 * L2P).reshape(1, F2W)          # (1, 768)

    # fc1 band: (384, 64). Input lane = l3*32 + c (pooled-2 layout); torch
    # flatten index is c*12 + l3, so fold that permutation into the weight.
    l3 = jnp.arange(L2P)[:, None, None]
    cc = jnp.arange(C2)[None, :, None]
    jj = jnp.arange(HID)[None, None, :]
    wf1band = fc1_w[jj, cc * L2P + l3].reshape(P2W, HID)        # (384, 64)
    bf1 = fc1_b.reshape(1, HID)

    # fc2 padded to 128 lanes for a lane-dense output store.
    wf2pad = jnp.zeros((HID, OUT_PAD), jnp.float32).at[:, :NUM_CLASSES].set(fc2_w.T)
    bf2pad = jnp.zeros((1, OUT_PAD), jnp.float32).at[:, :NUM_CLASSES].set(fc2_b)

    return (w1band.astype(DOT_DTYPE), b1big,
            w2band.astype(DOT_DTYPE), b2big,
            wf1band.astype(DOT_DTYPE), bf1,
            wf2pad.astype(DOT_DTYPE), bf2pad)


def hand_model_forward(x, params, block_b=TB):
    B = x.shape[0]
    assert x.shape[1] == L_IN
    (w1band, b1big, w2band, b2big,
     wf1band, bf1, wf2pad, bf2pad) = _build_banded_params(params)

    nb = pl.cdiv(B, block_b)
    b_pad = nb * block_b
    xp = jnp.pad(x.astype(jnp.float32), ((0, b_pad - B), (0, 0))).astype(DOT_DTYPE)

    const = lambda shape: pl.BlockSpec(shape, lambda i: (0, 0))
    out = pl.pallas_call(
        hand_kernel,
        out_shape=jax.ShapeDtypeStruct((b_pad, OUT_PAD), jnp.float32),
        grid=(nb,),
        in_specs=[
            pl.BlockSpec((block_b, L_IN), lambda i: (i, 0)),   # x (batch-tiled)
            const((L_IN, F1W)),        # conv1 band
            const((1, F1W)),           # conv1 bias (broadcast over lanes)
            const((P1W, F2W)),         # conv2 band (pool-1 select folded in)
            const((1, F2W)),           # conv2 bias
            const((P2W, HID)),         # fc1 (pool-2 select + flatten folded in)
            const((1, HID)),           # fc1 bias
            const((HID, OUT_PAD)),     # fc2 weight, padded to 128 lanes
            const((1, OUT_PAD)),       # fc2 bias, padded
        ],
        out_specs=pl.BlockSpec((block_b, OUT_PAD), lambda i: (i, 0)),
        compiler_params=pltpu.CompilerParams(dimension_semantics=("parallel",)),
    )(xp, w1band, b1big, w2band, b2big, wf1band, bf1, wf2pad, bf2pad)
    return out[:B, :NUM_CLASSES]


def reference_forward(x, params):
    """Pure-JAX f32 mirror of the PyTorch forward, for correctness checking."""
    conv1_w, conv1_b, conv2_w, conv2_b, fc1_w, fc1_b, fc2_w, fc2_b = params

    def conv1d(h, w, b):  # h: (B, Cin, L), w: (Cout, Cin, 3), pad=1
        hp = jnp.pad(h, ((0, 0), (0, 0), (1, 1)))
        L = h.shape[2]
        out = sum(jnp.einsum('bil,oi->bol', hp[:, :, k:k + L], w[:, :, k])
                  for k in range(3))
        return out + b[None, :, None]

    h = x.astype(jnp.float32)[:, None, :]
    h = jax.nn.relu(conv1d(h, conv1_w, conv1_b))
    h = jnp.max(h.reshape(h.shape[0], h.shape[1], -1, 2), axis=-1)
    h = jax.nn.relu(conv1d(h, conv2_w, conv2_b))
    h = jnp.max(h.reshape(h.shape[0], h.shape[1], -1, 2), axis=-1)
    v = h.reshape(h.shape[0], -1)
    y = jax.nn.relu(v @ fc1_w.T + fc1_b)
    return y @ fc2_w.T + fc2_b


if __name__ == "__main__":
    key = jax.random.PRNGKey(0)
    k_x, k_p = jax.random.split(key)
    B = 2
    x = jax.random.normal(k_x, (B, L_IN), jnp.float32)
    params = init_params(k_p)

    out = jax.block_until_ready(hand_model_forward(x, params))
    ref = reference_forward(x, params)

    assert out.shape == (B, NUM_CLASSES), out.shape
    # Tolerance reflects bf16 MXU operands (f32 accumulation) vs. f32 reference.
    assert jnp.allclose(out, ref, atol=3e-2, rtol=3e-2), (
        f"max abs err {jnp.max(jnp.abs(out - ref))}")
    print("KERNEL_OK")
</pallas_src>

<mosaic_0001>
module attributes {stable_mosaic.version = 11 : i64} {
  func.func @hand_kernel(%arg0: i32, %arg1: memref<512x48xbf16, #tpu.memory_space<vmem>>, %arg2: memref<48x768xbf16, #tpu.memory_space<vmem>>, %arg3: memref<1x768xf32, #tpu.memory_space<vmem>>, %arg4: memref<384x768xbf16, #tpu.memory_space<vmem>>, %arg5: memref<1x768xf32, #tpu.memory_space<vmem>>, %arg6: memref<384x64xbf16, #tpu.memory_space<vmem>>, %arg7: memref<1x64xf32, #tpu.memory_space<vmem>>, %arg8: memref<64x128xbf16, #tpu.memory_space<vmem>>, %arg9: memref<1x128xf32, #tpu.memory_space<vmem>>, %arg10: memref<512x128xf32, #tpu.memory_space<vmem>>) attributes {dimension_semantics = [#tpu.dimension_semantics<parallel>], iteration_bounds = array<i64: 1>, scalar_prefetch = 0 : i64, scratch_operands = 0 : i64, tpu.core_type = #tpu.core_type<tc>, window_params = [{transform_indices = @transform_0, window_bounds = array<i64: 512, 48>}, {pipeline_mode = #tpu.pipeline_mode<synchronous>, transform_indices = @transform_1, window_bounds = array<i64: 48, 768>}, {pipeline_mode = #tpu.pipeline_mode<synchronous>, transform_indices = @transform_2, window_bounds = array<i64: 1, 768>}, {pipeline_mode = #tpu.pipeline_mode<synchronous>, transform_indices = @transform_3, window_bounds = array<i64: 384, 768>}, {pipeline_mode = #tpu.pipeline_mode<synchronous>, transform_indices = @transform_4, window_bounds = array<i64: 1, 768>}, {pipeline_mode = #tpu.pipeline_mode<synchronous>, transform_indices = @transform_5, window_bounds = array<i64: 384, 64>}, {pipeline_mode = #tpu.pipeline_mode<synchronous>, transform_indices = @transform_6, window_bounds = array<i64: 1, 64>}, {pipeline_mode = #tpu.pipeline_mode<synchronous>, transform_indices = @transform_7, window_bounds = array<i64: 64, 128>}, {pipeline_mode = #tpu.pipeline_mode<synchronous>, transform_indices = @transform_8, window_bounds = array<i64: 1, 128>}, {transform_indices = @transform_9, window_bounds = array<i64: 512, 128>}]} {
    %c0 = arith.constant 0 : index
    %c0_0 = arith.constant 0 : index
    %0 = vector.load %arg1[%c0, %c0_0] : memref<512x48xbf16, #tpu.memory_space<vmem>>, vector<512x48xbf16>
    %c0_1 = arith.constant 0 : index
    %c0_2 = arith.constant 0 : index
    %1 = vector.load %arg2[%c0_1, %c0_2] : memref<48x768xbf16, #tpu.memory_space<vmem>>, vector<48x768xbf16>
    %cst = arith.constant dense<0.000000e+00> : vector<512x768xf32>
    %2 = tpu.matmul %0, %1, %cst {dimension_numbers = #tpu.dot_dimension_numbers<[1], [0], [0], [1], [0, 0, 1, 1], [], []>} : vector<512x48xbf16>, vector<48x768xbf16>, vector<512x768xf32> -> vector<512x768xf32>
    %c0_3 = arith.constant 0 : index
    %c0_4 = arith.constant 0 : index
    %3 = vector.load %arg3[%c0_3, %c0_4] : memref<1x768xf32, #tpu.memory_space<vmem>>, vector<1x768xf32>
    %4 = vector.broadcast %3 : vector<1x768xf32> to vector<512x768xf32>
    %5 = arith.addf %2, %4 : vector<512x768xf32>
    %cst_5 = arith.constant 0.000000e+00 : f32
    %6 = vector.broadcast %cst_5 : f32 to vector<512x768xf32>
    %7 = arith.maximumf %5, %6 : vector<512x768xf32>
    %8 = vector.extract_strided_slice %7 {offsets = [0, 0], sizes = [512, 384], strides = [1, 1]} : vector<512x768xf32> to vector<512x384xf32>
    %9 = vector.extract_strided_slice %7 {offsets = [0, 384], sizes = [512, 384], strides = [1, 1]} : vector<512x768xf32> to vector<512x384xf32>
    %10 = arith.maximumf %8, %9 : vector<512x384xf32>
    %11 = arith.truncf %10 : vector<512x384xf32> to vector<512x384xbf16>
    %c0_6 = arith.constant 0 : index
    %c0_7 = arith.constant 0 : index
    %12 = vector.load %arg4[%c0_6, %c0_7] : memref<384x768xbf16, #tpu.memory_space<vmem>>, vector<384x768xbf16>
    %cst_8 = arith.constant dense<0.000000e+00> : vector<512x768xf32>
    %13 = tpu.matmul %11, %12, %cst_8 {dimension_numbers = #tpu.dot_dimension_numbers<[1], [0], [0], [1], [0, 0, 1, 1], [], []>} : vector<512x384xbf16>, vector<384x768xbf16>, vector<512x768xf32> -> vector<512x768xf32>
    %c0_9 = arith.constant 0 : index
    %c0_10 = arith.constant 0 : index
    %14 = vector.load %arg5[%c0_9, %c0_10] : memref<1x768xf32, #tpu.memory_space<vmem>>, vector<1x768xf32>
    %15 = vector.broadcast %14 : vector<1x768xf32> to vector<512x768xf32>
    %16 = arith.addf %13, %15 : vector<512x768xf32>
    %cst_11 = arith.constant 0.000000e+00 : f32
    %17 = vector.broadcast %cst_11 : f32 to vector<512x768xf32>
    %18 = arith.maximumf %16, %17 : vector<512x768xf32>
    %19 = vector.extract_strided_slice %18 {offsets = [0, 0], sizes = [512, 384], strides = [1, 1]} : vector<512x768xf32> to vector<512x384xf32>
    %20 = vector.extract_strided_slice %18 {offsets = [0, 384], sizes = [512, 384], strides = [1, 1]} : vector<512x768xf32> to vector<512x384xf32>
    %21 = arith.maximumf %19, %20 : vector<512x384xf32>
    %22 = arith.truncf %21 : vector<512x384xf32> to vector<512x384xbf16>
    %c0_12 = arith.constant 0 : index
    %c0_13 = arith.constant 0 : index
    %23 = vector.load %arg6[%c0_12, %c0_13] : memref<384x64xbf16, #tpu.memory_space<vmem>>, vector<384x64xbf16>
    %cst_14 = arith.constant dense<0.000000e+00> : vector<512x64xf32>
    %24 = tpu.matmul %22, %23, %cst_14 {dimension_numbers = #tpu.dot_dimension_numbers<[1], [0], [0], [1], [0, 0, 1, 1], [], []>} : vector<512x384xbf16>, vector<384x64xbf16>, vector<512x64xf32> -> vector<512x64xf32>
    %c0_15 = arith.constant 0 : index
    %c0_16 = arith.constant 0 : index
    %25 = vector.load %arg7[%c0_15, %c0_16] : memref<1x64xf32, #tpu.memory_space<vmem>>, vector<1x64xf32>
    %26 = vector.broadcast %25 : vector<1x64xf32> to vector<512x64xf32>
    %27 = arith.addf %24, %26 : vector<512x64xf32>
    %cst_17 = arith.constant 0.000000e+00 : f32
    %28 = vector.broadcast %cst_17 : f32 to vector<512x64xf32>
    %29 = arith.maximumf %27, %28 : vector<512x64xf32>
    %30 = arith.truncf %29 : vector<512x64xf32> to vector<512x64xbf16>
    %c0_18 = arith.constant 0 : index
    %c0_19 = arith.constant 0 : index
    %31 = vector.load %arg8[%c0_18, %c0_19] : memref<64x128xbf16, #tpu.memory_space<vmem>>, vector<64x128xbf16>
    %cst_20 = arith.constant dense<0.000000e+00> : vector<512x128xf32>
    %32 = tpu.matmul %30, %31, %cst_20 {dimension_numbers = #tpu.dot_dimension_numbers<[1], [0], [0], [1], [0, 0, 1, 1], [], []>} : vector<512x64xbf16>, vector<64x128xbf16>, vector<512x128xf32> -> vector<512x128xf32>
    %c0_21 = arith.constant 0 : index
    %c0_22 = arith.constant 0 : index
    %33 = vector.load %arg9[%c0_21, %c0_22] : memref<1x128xf32, #tpu.memory_space<vmem>>, vector<1x128xf32>
    %34 = vector.broadcast %33 : vector<1x128xf32> to vector<512x128xf32>
    %35 = arith.addf %32, %34 : vector<512x128xf32>
    %c0_23 = arith.constant 0 : index
    %c0_24 = arith.constant 0 : index
    %36 = vector.load %arg10[%c0_23, %c0_24] : memref<512x128xf32, #tpu.memory_space<vmem>>, vector<512x128xf32>
    tpu.vector_store %arg10[%c0_23, %c0_24], %35 {strides = array<i32>} : memref<512x128xf32, #tpu.memory_space<vmem>>, vector<512x128xf32>,
    return
  }
  func.func @transform_0(%arg0: i32) -> (i32, i32) {
    %c0_i32 = arith.constant 0 : i32
    %c0_i32_0 = arith.constant 0 : i32
    return %arg0, %c0_i32 : i32, i32
  }
  func.func @transform_1(%arg0: i32) -> (i32, i32) {
    %c0_i32 = arith.constant 0 : i32
    %c0_i32_0 = arith.constant 0 : i32
    %c0_i32_1 = arith.constant 0 : i32
    return %c0_i32, %c0_i32_0 : i32, i32
  }
  func.func @transform_2(%arg0: i32) -> (i32, i32) {
    %c0_i32 = arith.constant 0 : i32
    %c0_i32_0 = arith.constant 0 : i32
    %c0_i32_1 = arith.constant 0 : i32
    return %c0_i32, %c0_i32_0 : i32, i32
  }
  func.func @transform_3(%arg0: i32) -> (i32, i32) {
    %c0_i32 = arith.constant 0 : i32
    %c0_i32_0 = arith.constant 0 : i32
    %c0_i32_1 = arith.constant 0 : i32
    return %c0_i32, %c0_i32_0 : i32, i32
  }
  func.func @transform_4(%arg0: i32) -> (i32, i32) {
    %c0_i32 = arith.constant 0 : i32
    %c0_i32_0 = arith.constant 0 : i32
    %c0_i32_1 = arith.constant 0 : i32
    return %c0_i32, %c0_i32_0 : i32, i32
  }
  func.func @transform_5(%arg0: i32) -> (i32, i32) {
    %c0_i32 = arith.constant 0 : i32
    %c0_i32_0 = arith.constant 0 : i32
    %c0_i32_1 = arith.constant 0 : i32
    return %c0_i32, %c0_i32_0 : i32, i32
  }
  func.func @transform_6(%arg0: i32) -> (i32, i32) {
    %c0_i32 = arith.constant 0 : i32
    %c0_i32_0 = arith.constant 0 : i32
    %c0_i32_1 = arith.constant 0 : i32
    return %c0_i32, %c0_i32_0 : i32, i32
  }
  func.func @transform_7(%arg0: i32) -> (i32, i32) {
    %c0_i32 = arith.constant 0 : i32
    %c0_i32_0 = arith.constant 0 : i32
    %c0_i32_1 = arith.constant 0 : i32
    return %c0_i32, %c0_i32_0 : i32, i32
  }
  func.func @transform_8(%arg0: i32) -> (i32, i32) {
    %c0_i32 = arith.constant 0 : i32
    %c0_i32_0 = arith.constant 0 : i32
    %c0_i32_1 = arith.constant 0 : i32
    return %c0_i32, %c0_i32_0 : i32, i32
  }
  func.func @transform_9(%arg0: i32) -> (i32, i32) {
    %c0_i32 = arith.constant 0 : i32
    %c0_i32_0 = arith.constant 0 : i32
    return %arg0, %c0_i32 : i32, i32
  }
}

</mosaic_0001>

<bundles_post_ra>
// kernel: tpu_custom_call.1
= control target key start
LH: loop header
LB: loop body
LE: loop exit
PB: predicated region body
PF: predicated region fallthrough
CT: control target
= control target key end

     0   :  { %14 = vsyncpa [#allocation3], 0  ;;  %s12991_s0 = inlined_call_operand.vmem [shape: bf16[512,48], index: 0, kind: input, shape index: {}]   ;;  %s12992_s1 = inlined_call_operand.vmem [shape: bf16[48,768], index: 1, kind: input, shape index: {}]   ;;  %s12993_s2 = inlined_call_operand.vmem [shape: f32[1,768], index: 2, kind: input, shape index: {}]   ;;  %s12994_s3 = inlined_call_operand.hbm [shape: bf16[384,768], index: 3, kind: input, shape index: {}]   ;;  %s12995_s4 = inlined_call_operand.vmem [shape: f32[1,768], index: 4, kind: input, shape index: {}]   ;;  %s12996_s5 = inlined_call_operand.vmem [shape: bf16[384,64], index: 5, kind: input, shape index: {}]   ;;  %s12997_s6 = inlined_call_operand.vmem [shape: f32[1,64], index: 6, kind: input, shape index: {}]   ;;  %s12998_s7 = inlined_call_operand.vmem [shape: bf16[64,128], index: 7, kind: input, shape index: {}]   ;;  %s12999_s8 = inlined_call_operand.vmem [shape: f32[1,128], index: 8, kind: input, shape index: {}]   ;;  %s13000_s9 = inlined_call_operand.hbm [shape: f32[512,128], index: 9, kind: output, shape index: {}]  }
   0x1   :  { %15 = vsyncpa [#allocation4], 0  ;;  %s8274_s30 = smov [#allocation2]  }
   0x2   :  { %s27_s10 = sshll.u32 %s8274_s30, 4  ;;  %s28_s10 = int_to_ptr.vmem [resolvable:$true] %s27_s10 }
   0x3   :  { %s8238_s11 = scalar_lea.vmem %s28_s10, 18432  ;;  %p8243_p1 = scmp.lt.s32.totalorder %s28_s10, %s28_s10 }
   0x4   :  { %p8239_p0 = scmp.ne.s32.totalorder %s28_s10, %s8238_s11  ;;  %p8244_p2 = scmp.lt.s32.totalorder %s8238_s11, %s8238_s11 }
   0x6   :  { %p8245_p3 = por %p8244_p2, %p8243_p1 }
   0x8   :  { %p8246_p4 = pnand %p8245_p3, %p8239_p0 }
   0xa   :  { %8249 = shalt.err (!%p8246_p4)
}
   0xb   :  { %s8275_s12 = smov 384   ;;  %s8276_s13 = smov 24  }
   0xc   :  { %33 = dma.hbm_to_vmem [thread:$0]  %s12994_s3, 18432, %s28_s10, [#allocation3], %s8275_s12, %s8275_s12, %s8276_s13  }
   0xd   :  { %8270 = dma.done.wait [#allocation3], 18432  }
   0xe   :  { %8271 = vsyncadd [#allocation3], 4294948864  ;;  %v13003_v0 = vmov 0   ;;  %v7892_v1 = vld [vmem:[%s12992_s1 + $0x64] ss:$24 sps:$4 sm:$0xff]   ;;  %vm412_vm0 = vcmask 392192   ;;  %v132_v55 = vlaneseq }
   0xf   :  { %541 = vmatprep.mubr.bf16.mxu0 %v13003_v0  ;;  %894 = vmatprep.mubr.bf16.mxu1 %v13003_v0  ;;  %v7894_v2 = vld [vmem:[%s12992_s1 + $0x6c] ss:$24 sps:$4 sm:$0xff]   ;;  %v7896_v3 = vld [vmem:[%s12992_s1 + $0x60] ss:$24 sps:$4 sm:$0xff]   ;;  %v7900_v6 = vld [vmem:[%s12992_s1 + $0x3c] ss:$24 sps:$4 sm:$0xff]  }
  0x10   :  { %519 = vmatprep.subr.bf16.mxu0 %v7892_v1  ;;  %v7897_v4 = vld [vmem:[%s12992_s1 + $0x68] ss:$24 sps:$4 sm:$0xff]   ;;  %872 = vmatprep.subr.bf16.mxu1 %v7894_v2  ;;  %v7898_v5 = vld [vmem:[%s12992_s1 + $0x34] ss:$24 sps:$4 sm:$0xff]   ;;  %v7903_v8 = vld [vmem:[%s12992_s1 + $0x38] ss:$24 sps:$4 sm:$0xff]  }
  0x11   :  { %520 = vmatpush1.bf16.msra.mxu0 %v7896_v3  ;;  %873 = vmatpush1.bf16.msra.mxu1 %v7897_v4  ;;  %v7902_v7 = vld [vmem:[%s12992_s1 + $0x30] ss:$24 sps:$4 sm:$0xff]   ;;  %v7904_v9 = vld [vmem:[%s12992_s1 + $0x4] ss:$24 sps:$4 sm:$0xff]   ;;  %v7908_v11 = vld [vmem:[%s12992_s1] ss:$24 sps:$4 sm:$0xff]  }
  0x12   :  { %521 = vmatprep.subr.bf16.mxu0 %v7898_v5  ;;  %874 = vmatprep.subr.bf16.mxu1 %v7900_v6  ;;  %v7906_v10 = vld [vmem:[%s12992_s1 + $0xc] ss:$24 sps:$4 sm:$0xff]   ;;  %v7909_v12 = vld [vmem:[%s12992_s1 + $0x8] ss:$24 sps:$4 sm:$0xff]   ;;  %v7915_v19 = vld [vmem:[%s12991_s0 + $0x10] sm:$0xff]   ;;  %v8554_v57 = vshrl.u32 %v132_v55, 7 }
  0x13   :  { %v7913_v13 = vld [vmem:[%s12992_s1 + $0x74] ss:$24 sps:$4 sm:$0xff]   ;;  %v7910_v14 = vld [vmem:[%s12991_s0] sm:$0xff]   ;;  %v7911_v15 = vld [vmem:[%s12992_s1 + $0x70] ss:$24 sps:$4 sm:$0xff]   ;;  %vm6838_vm1 = vcmask 523264  }
  0x14   :  { %v7914_v16 = vld [vmem:[%s12991_s0 + $0x8] sm:$0xff]   ;;  %v7926_v17 = vld [vmem:[%s12992_s1 + $0x44] ss:$24 sps:$4 sm:$0xff]   ;;  %v7924_v18 = vld [vmem:[%s12992_s1 + $0x40] ss:$24 sps:$4 sm:$0xff]   ;;  %13210 = vst [vmem:[#allocation8_spill] sm:$0xff] %v8554_v57 }
  0x15   :  { %522 = vmatpush1.bf16.msra.mxu0 %v7902_v7  ;;  %875 = vmatpush1.bf16.msra.mxu1 %v7903_v8  ;;  %v7916_v20 = vld [vmem:[%s12991_s0 + $0x18] sm:$0xff]   ;;  %v7917_v21 = vld [vmem:[%s12991_s0 + $0x20] sm:$0xff]   ;;  %v7918_v22 = vld [vmem:[%s12991_s0 + $0x28] sm:$0xff]   ;;  %v13002_v60 = vsub.s32 0, %v8554_v57  ;;  %v13001_v62 = vsub.s32 3, %v8554_v57 }
  0x16   :  { %523 = vmatprep.subr.bf16.mxu0 %v7904_v9  ;;  %876 = vmatprep.subr.bf16.mxu1 %v7906_v10  ;;  %v7938_v23 = vld [vmem:[%s12992_s1 + $0x10] ss:$24 sps:$4 sm:$0xff]   ;;  %v7940_v24 = vld [vmem:[%s12992_s1 + $0x14] ss:$24 sps:$4 sm:$0xff]   ;;  %v7920_v26 = vld [vmem:[%s12991_s0 + $0x38] sm:$0xff]  }
  0x17   :  { %v7919_v25 = vld [vmem:[%s12991_s0 + $0x30] sm:$0xff]   ;;  %v7921_v27 = vld [vmem:[%s12991_s0 + $0x40] sm:$0xff]   ;;  %v7922_v28 = vld [vmem:[%s12991_s0 + $0x48] sm:$0xff]  }
  0x18   :  { %v7923_v29 = vld [vmem:[%s12991_s0 + $0x50] sm:$0xff]   ;;  %v7927_v30 = vld [vmem:[%s12991_s0 + $0x58] sm:$0xff]   ;;  %v7928_v33 = vld [vmem:[%s12991_s0 + $0x60] sm:$0xff]  }
  0x19   :  { %524 = vmatpush1.bf16.msra.mxu0 %v7908_v11  ;;  %877 = vmatpush1.bf16.msra.mxu1 %v7909_v12  ;;  %v7948_v31 = vld [vmem:[#allocation2 + $0x154] ss:$24 sps:$4 sm:$0xff]   ;;  %v7946_v32 = vld [vmem:[#allocation2 + $0x150] ss:$24 sps:$4 sm:$0xff]   ;;  %v7953_v35 = vld [vmem:[#allocation2 + $0x124] ss:$24 sps:$4 sm:$0xff]  }
  0x1a   :  { %1225 = vmatprep.subr.bf16.mxu0 %v7913_v13  ;;  %3136 = vmatprep.subr.bf16.mxu1 %v7948_v31  ;;  %v7929_v34 = vld [vmem:[%s12991_s0 + $0x68] sm:$0xff]   ;;  %v7951_v36 = vld [vmem:[#allocation2 + $0x120] ss:$24 sps:$4 sm:$0xff]   ;;  %v7930_v37 = vld [vmem:[%s12991_s0 + $0x70] sm:$0xff]  }
  0x1b   :  { %v7931_v38 = vld [vmem:[%s12991_s0 + $0x78] sm:$0xff]   ;;  %v7958_v39 = vld [vmem:[#allocation2 + $0xf4] ss:$24 sps:$4 sm:$0xff]   ;;  %v7956_v40 = vld [vmem:[#allocation2 + $0xf0] ss:$24 sps:$4 sm:$0xff]  }
  0x1c   :  { %7355 = vmatmul.mubr.msk.bf16.vlgmr.msra.gmra.mxu0 %vm412_vm0, %v7910_v14  ;;  %7387 = vmatmul.mubr.msk.bf16.vlgmr.msra.gmra.mxu1 %vm412_vm0, %v7910_v14  ;;  %v7932_v41 = vld [vmem:[%s12991_s0 + $0x80] sm:$0xff]   ;;  %v7933_v42 = vld [vmem:[%s12991_s0 + $0x88] sm:$0xff]   ;;  %v7934_v46 = vld [vmem:[%s12991_s0 + $0x90] sm:$0xff]  }
  0x1d   :  { %1226 = vmatpush1.bf16.msra.mxu0 %v7911_v15  ;;  %551 = vmatprep.mubr.bf16.mxu0 %v13003_v0  ;;  %v7962_v43 = vld [vmem:[#allocation2 + $0xc4] ss:$24 sps:$4 sm:$0xff]   ;;  %v7960_v44 = vld [vmem:[#allocation2 + $0xc0] ss:$24 sps:$4 sm:$0xff]   ;;  %v7965_v45 = vld [vmem:[#allocation2 + $0x454] ss:$24 sps:$4 sm:$0xff]  }
  0x1e   :  { %904 = vmatprep.mubr.bf16.mxu1 %v13003_v0  ;;  %1227 = vmatprep.subr.bf16.mxu0 %v7926_v17  ;;  %v7935_v47 = vld [vmem:[%s12991_s0 + $0x98] sm:$0xff]   ;;  %v7968_v48 = vld [vmem:[#allocation2 + $0x94] ss:$24 sps:$4 sm:$0xff]   ;;  %v7966_v49 = vld [vmem:[#allocation2 + $0x90] ss:$24 sps:$4 sm:$0xff]  }
  0x1f   :  { %3137 = vmatpush1.bf16.msra.mxu1 %v7946_v32  ;;  %v7936_v50 = vld [vmem:[%s12991_s0 + $0xa0] sm:$0xff]   ;;  %v7937_v51 = vld [vmem:[%s12991_s0 + $0xa8] sm:$0xff]   ;;  %v7941_v54 = vld [vmem:[%s12991_s0 + $0xb0] sm:$0xff]  }
  0x20   :  { %3138 = vmatprep.subr.bf16.mxu1 %v7953_v35  ;;  %v7971_v52 = vld [vmem:[#allocation2 + $0x64] ss:$24 sps:$4 sm:$0xff]   ;;  %v7969_v53 = vld [vmem:[#allocation2 + $0x60] ss:$24 sps:$4 sm:$0xff]   ;;  %v7977_v58 = vld [vmem:[#allocation2 + $0x34] ss:$24 sps:$4 sm:$0xff]  }
  0x21   :  { %1228 = vmatpush1.bf16.msra.mxu0 %v7924_v18  ;;  %v7942_v56 = vld [vmem:[%s12991_s0 + $0xb8] sm:$0xff]   ;;  %v7975_v59 = vld [vmem:[#allocation2 + $0x30] ss:$24 sps:$4 sm:$0xff]   ;;  %v130_v61 = vld [vmem:[%s12993_s2] sm:$0x3f] }
  0x22   :  { %1229 = vmatprep.subr.bf16.mxu0 %v7940_v24  ;;  %v7943_v63 = vld [vmem:[%s12991_s0 + $0xc0] sm:$0xff]   ;;  %v8570_v1 = vrot.slane %v130_v61, %v13002_v60  ;;  %v8574_v2 = vrot.slane %v130_v61, %v13001_v62  ;;  %v7944_v11 = vld [vmem:[%s12991_s0 + $0xc8] sm:$0xff]   ;;  %v7945_v32 = vld [vmem:[%s12991_s0 + $0xd0] sm:$0xff]  }
  0x23   :  { %3139 = vmatpush1.bf16.msra.mxu1 %v7951_v36  ;;  %v7980_v17 = vld [vmem:[#allocation2 + $0x4] ss:$24 sps:$4 sm:$0xff]   ;;  %v7986_v61 = vld [vmem:[#allocation2 + $0x2d4] ss:$24 sps:$4 sm:$0xff]  }
  0x24   :  { %7356 = vmatmul.mubr.msk.bf16.gmra.mxu0 %vm412_vm0, %v7914_v16  ;;  %7388 = vmatmul.mubr.msk.bf16.gmra.mxu1 %vm412_vm0, %v7914_v16 }
  0x25   :  { %561 = vmatprep.mubr.bf16.mxu0 %v13003_v0  ;;  %914 = vmatprep.mubr.bf16.mxu1 %v13003_v0 }
  0x26   :  { %1230 = vmatpush1.bf16.msra.mxu0 %v7938_v23  ;;  %3140 = vmatprep.subr.bf16.mxu1 %v7958_v39 }
  0x27   :  { %3141 = vmatpush1.bf16.msra.mxu1 %v7956_v40  ;;  %3489 = vmatprep.subr.bf16.mxu0 %v7965_v45 }
  0x28   :  { %3142 = vmatprep.subr.bf16.mxu1 %v7962_v43 }
  0x2b   :  { %3143 = vmatpush1.bf16.msra.mxu1 %v7960_v44 }
  0x2c   :  { %7357 = vmatmul.mubr.msk.bf16.gmra.mxu0 %vm412_vm0, %v7915_v19  ;;  %7389 = vmatmul.mubr.msk.bf16.gmra.mxu1 %vm412_vm0, %v7915_v19  ;;  %v7978_v19 = vld [vmem:[#allocation2] ss:$24 sps:$4 sm:$0xff]  }
  0x2d   :  { %571 = vmatprep.mubr.bf16.mxu0 %v13003_v0  ;;  %924 = vmatprep.mubr.bf16.mxu1 %v13003_v0 }
  0x2e   :  { %3144 = vmatprep.subr.bf16.mxu1 %v7968_v48 }
  0x2f   :  { %3145 = vmatpush1.bf16.msra.mxu1 %v7966_v49 }
  0x30   :  { %3146 = vmatprep.subr.bf16.mxu1 %v7971_v52  ;;  %v7949_v52 = vld [vmem:[%s12991_s0 + $0xd8] sm:$0xff]  }
  0x33   :  { %3147 = vmatpush1.bf16.msra.mxu1 %v7969_v53 }
  0x34   :  { %7358 = vmatmul.mubr.msk.bf16.gmra.mxu0 %vm412_vm0, %v7916_v20  ;;  %7390 = vmatmul.mubr.msk.bf16.gmra.mxu1 %vm412_vm0, %v7916_v20 }
  0x35   :  { %581 = vmatprep.mubr.bf16.mxu0 %v13003_v0  ;;  %934 = vmatprep.mubr.bf16.mxu1 %v13003_v0 }
  0x36   :  { %3148 = vmatprep.subr.bf16.mxu1 %v7977_v58 }
  0x37   :  { %3149 = vmatpush1.bf16.msra.mxu1 %v7975_v59 }
  0x38   :  { %3150 = vmatprep.subr.bf16.mxu1 %v7980_v17 }
  0x3b   :  { %3151 = vmatpush1.bf16.msra.mxu1 %v7978_v19 }
  0x3c   :  { %7359 = vmatmul.mubr.msk.bf16.gmra.mxu0 %vm412_vm0, %v7917_v21  ;;  %7391 = vmatmul.mubr.msk.bf16.gmra.mxu1 %vm412_vm0, %v7917_v21 }
  0x3d   :  { %591 = vmatprep.mubr.bf16.mxu0 %v13003_v0  ;;  %944 = vmatprep.mubr.bf16.mxu1 %v13003_v0 }
  0x3e   :  { %3152 = vmatprep.subr.bf16.mxu1 %v7986_v61 }
  0x44   :  { %7360 = vmatmul.mubr.msk.bf16.gmra.mxu0 %vm412_vm0, %v7918_v22  ;;  %7392 = vmatmul.mubr.msk.bf16.gmra.mxu1 %vm412_vm0, %v7918_v22 }
  0x45   :  { %601 = vmatprep.mubr.bf16.mxu0 %v13003_v0  ;;  %954 = vmatprep.mubr.bf16.mxu1 %v13003_v0 }
  0x4c   :  { %7361 = vmatmul.mubr.msk.bf16.gmra.mxu0 %vm412_vm0, %v7919_v25  ;;  %7393 = vmatmul.mubr.msk.bf16.gmra.mxu1 %vm412_vm0, %v7919_v25 }
  0x4d   :  { %611 = vmatprep.mubr.bf16.mxu0 %v13003_v0  ;;  %964 = vmatprep.mubr.bf16.mxu1 %v13003_v0 }
  0x54   :  { %7362 = vmatmul.mubr.msk.bf16.gmra.mxu0 %vm412_vm0, %v7920_v26  ;;  %7394 = vmatmul.mubr.msk.bf16.gmra.mxu1 %vm412_vm0, %v7920_v26 }
  0x55   :  { %621 = vmatprep.mubr.bf16.mxu0 %v13003_v0  ;;  %974 = vmatprep.mubr.bf16.mxu1 %v13003_v0 }
  0x5c   :  { %7363 = vmatmul.mubr.msk.bf16.gmra.mxu0 %vm412_vm0, %v7921_v27  ;;  %7395 = vmatmul.mubr.msk.bf16.gmra.mxu1 %vm412_vm0, %v7921_v27 }
  0x5d   :  { %631 = vmatprep.mubr.bf16.mxu0 %v13003_v0  ;;  %984 = vmatprep.mubr.bf16.mxu1 %v13003_v0 }
  0x64   :  { %7364 = vmatmul.mubr.msk.bf16.gmra.mxu0 %vm412_vm0, %v7922_v28  ;;  %7396 = vmatmul.mubr.msk.bf16.gmra.mxu1 %vm412_vm0, %v7922_v28 }
  0x65   :  { %641 = vmatprep.mubr.bf16.mxu0 %v13003_v0  ;;  %994 = vmatprep.mubr.bf16.mxu1 %v13003_v0 }
  0x6c   :  { %7365 = vmatmul.mubr.msk.bf16.gmra.mxu0 %vm412_vm0, %v7923_v29  ;;  %7397 = vmatmul.mubr.msk.bf16.gmra.mxu1 %vm412_vm0, %v7923_v29 }
  0x6d   :  { %651 = vmatprep.mubr.bf16.mxu0 %v13003_v0  ;;  %1004 = vmatprep.mubr.bf16.mxu1 %v13003_v0 }
  0x74   :  { %7366 = vmatmul.mubr.msk.bf16.gmra.mxu0 %vm412_vm0, %v7927_v30  ;;  %7398 = vmatmul.mubr.msk.bf16.gmra.mxu1 %vm412_vm0, %v7927_v30 }
  0x75   :  { %661 = vmatprep.mubr.bf16.mxu0 %v13003_v0  ;;  %1014 = vmatprep.mubr.bf16.mxu1 %v13003_v0 }
  0x7c   :  { %7367 = vmatmul.mubr.msk.bf16.gmra.mxu0 %vm412_vm0, %v7928_v33  ;;  %7399 = vmatmul.mubr.msk.bf16.gmra.mxu1 %vm412_vm0, %v7928_v33 }
  0x7d   :  { %671 = vmatprep.mubr.bf16.mxu0 %v13003_v0  ;;  %1024 = vmatprep.mubr.bf16.mxu1 %v13003_v0 }
  0x84   :  { %7368 = vmatmul.mubr.msk.bf16.gmra.mxu0 %vm412_vm0, %v7929_v34  ;;  %7400 = vmatmul.mubr.msk.bf16.gmra.mxu1 %vm412_vm0, %v7929_v34 }
  0x85   :  { %681 = vmatprep.mubr.bf16.mxu0 %v13003_v0  ;;  %1034 = vmatprep.mubr.bf16.mxu1 %v13003_v0 }
  0x8c   :  { %7369 = vmatmul.mubr.msk.bf16.gmra.mxu0 %vm412_vm0, %v7930_v37  ;;  %7401 = vmatmul.mubr.msk.bf16.gmra.mxu1 %vm412_vm0, %v7930_v37 }
  0x8d   :  { %691 = vmatprep.mubr.bf16.mxu0 %v13003_v0  ;;  %1044 = vmatprep.mubr.bf16.mxu1 %v13003_v0 }
  0x94   :  { %7370 = vmatmul.mubr.msk.bf16.gmra.mxu0 %vm412_vm0, %v7931_v38  ;;  %7402 = vmatmul.mubr.msk.bf16.gmra.mxu1 %vm412_vm0, %v7931_v38 }
  0x95   :  { %701 = vmatprep.mubr.bf16.mxu0 %v13003_v0  ;;  %1054 = vmatprep.mubr.bf16.mxu1 %v13003_v0 }
  0x9c   :  { %7371 = vmatmul.mubr.msk.bf16.gmra.mxu0 %vm412_vm0, %v7932_v41  ;;  %7403 = vmatmul.mubr.msk.bf16.gmra.mxu1 %vm412_vm0, %v7932_v41 }
  0x9d   :  { %711 = vmatprep.mubr.bf16.mxu0 %v13003_v0  ;;  %1064 = vmatprep.mubr.bf16.mxu1 %v13003_v0 }
  0xa4   :  { %7372 = vmatmul.mubr.msk.bf16.gmra.mxu0 %vm412_vm0, %v7933_v42  ;;  %7404 = vmatmul.mubr.msk.bf16.gmra.mxu1 %vm412_vm0, %v7933_v42 }
  0xa5   :  { %721 = vmatprep.mubr.bf16.mxu0 %v13003_v0  ;;  %1074 = vmatprep.mubr.bf16.mxu1 %v13003_v0 }
  0xac   :  { %7373 = vmatmul.mubr.msk.bf16.gmra.mxu0 %vm412_vm0, %v7934_v46  ;;  %7405 = vmatmul.mubr.msk.bf16.gmra.mxu1 %vm412_vm0, %v7934_v46 }
  0xad   :  { %731 = vmatprep.mubr.bf16.mxu0 %v13003_v0  ;;  %1084 = vmatprep.mubr.bf16.mxu1 %v13003_v0 }
  0xb4   :  { %7374 = vmatmul.mubr.msk.bf16.gmra.mxu0 %vm412_vm0, %v7935_v47  ;;  %7406 = vmatmul.mubr.msk.bf16.gmra.mxu1 %vm412_vm0, %v7935_v47 }
  0xb5   :  { %741 = vmatprep.mubr.bf16.mxu0 %v13003_v0  ;;  %1094 = vmatprep.mubr.bf16.mxu1 %v13003_v0 }
  0xbc   :  { %7375 = vmatmul.mubr.msk.bf16.gmra.mxu0 %vm412_vm0, %v7936_v50  ;;  %7407 = vmatmul.mubr.msk.bf16.gmra.mxu1 %vm412_vm0, %v7936_v50 }
  0xbd   :  { %751 = vmatprep.mubr.bf16.mxu0 %v13003_v0  ;;  %1104 = vmatprep.mubr.bf16.mxu1 %v13003_v0 }
  0xc4   :  { %7376 = vmatmul.mubr.msk.bf16.gmra.mxu0 %vm412_vm0, %v7937_v51  ;;  %7408 = vmatmul.mubr.msk.bf16.gmra.mxu1 %vm412_vm0, %v7937_v51 }
  0xc5   :  { %761 = vmatprep.mubr.bf16.mxu0 %v13003_v0  ;;  %1114 = vmatprep.mubr.bf16.mxu1 %v13003_v0 }
  0xcc   :  { %7377 = vmatmul.mubr.msk.bf16.gmra.mxu0 %vm412_vm0, %v7941_v54  ;;  %7409 = vmatmul.mubr.msk.bf16.gmra.mxu1 %vm412_vm0, %v7941_v54 }
  0xcd   :  { %771 = vmatprep.mubr.bf16.mxu0 %v13003_v0  ;;  %1124 = vmatprep.mubr.bf16.mxu1 %v13003_v0 }
  0xd4   :  { %7378 = vmatmul.mubr.msk.bf16.gmra.mxu0 %vm412_vm0, %v7942_v56  ;;  %7410 = vmatmul.mubr.msk.bf16.gmra.mxu1 %vm412_vm0, %v7942_v56 }
  0xd5   :  { %781 = vmatprep.mubr.bf16.mxu0 %v13003_v0  ;;  %1134 = vmatprep.mubr.bf16.mxu1 %v13003_v0 }
  0xdc   :  { %v543_v3 = vpop.f32.mrf.mxu0  ;;  %7379 = vmatmul.mubr.msk.bf16.gmra.mxu0 %vm412_vm0, %v7943_v63  ;;  %v8577_v4 = vpop.f32.mrf.mxu1  ;;  %7411 = vmatmul.mubr.msk.bf16.gmra.mxu1 %vm412_vm0, %v7943_v63 }
  0xdd   :  { %v544_v5 = vadd.f32 %v543_v3, %v8570_v1  ;;  %791 = vmatprep.mubr.bf16.mxu0 %v13003_v0  ;;  %1144 = vmatprep.mubr.bf16.mxu1 %v13003_v0  ;;  %v7984_v3 = vld [vmem:[#allocation2 + $0x2d0] ss:$24 sps:$4 sm:$0xff]  }
  0xde   :  { %v8583_v6 = vpop.f32.mrf.mxu0  ;;  %v898_v7 = vpop.f32.mrf.mxu1  ;;  %3153 = vmatpush2.bf16.msra.mxu1 %v7984_v3 }
  0xdf   :  { %v899_v8 = vadd.f32 %v898_v7, %v8574_v2  ;;  %v1568_v12 = vmax.f32 %v544_v5, 0.0 }
  0xe0   :  { %v547_v9 = vpop.f32.mrf.mxu0  ;;  %v8586_v10 = vpop.f32.mrf.mxu1 }
  0xe1   :  { %v1571_v13 = vmax.f32 %v899_v8, 0.0  ;;  %v548_v14 = vadd.f32 %v547_v9, %v8570_v1 }
  0xe2   :  { %v8592_v15 = vpop.f32.mrf.mxu0  ;;  %v902_v16 = vpop.f32.mrf.mxu1 }
  0xe3   :  { %v1952_v18 = vmax.f32 %v1568_v12, %v1571_v13  ;;  %v903_v20 = vadd.f32 %v902_v16, %v8574_v2  ;;  %v1574_v24 = vmax.f32 %v548_v14, 0.0 }
  0xe4   :  { %v553_v21 = vpop.f32.mrf.mxu0  ;;  %7380 = vmatmul.mubr.msk.bf16.gmra.mxu0 %vm412_vm0, %v7944_v11  ;;  %v8596_v22 = vpop.f32.mrf.mxu1  ;;  %7412 = vmatmul.mubr.msk.bf16.gmra.mxu1 %vm412_vm0, %v7944_v11 }
  0xe5   :  { %v554_v23 = vadd.f32 %v553_v21, %v8570_v1  ;;  %801 = vmatprep.mubr.bf16.mxu0 %v13003_v0  ;;  %1154 = vmatprep.mubr.bf16.mxu1 %v13003_v0  ;;  %v1577_v25 = vmax.f32 %v903_v20, 0.0  ;;  %v7950_v20 = vld [vmem:[%s12991_s0 + $0xe0] sm:$0xff]  }
  0xe6   :  { %v8602_v26 = vpop.f32.mrf.mxu0  ;;  %v908_v27 = vpop.f32.mrf.mxu1 }
  0xe7   :  { %v909_v28 = vadd.f32 %v908_v27, %v8574_v2  ;;  %v1955_v29 = vmax.f32 %v1574_v24, %v1577_v25  ;;  %v1580_v33 = vmax.f32 %v554_v23, 0.0 }
  0xe8   :  { %v557_v30 = vpop.f32.mrf.mxu0  ;;  %v8605_v31 = vpop.f32.mrf.mxu1 }
  0xe9   :  { %v1583_v34 = vmax.f32 %v909_v28, 0.0  ;;  %v8610_v35 = vpack.c.bf16 %v1955_v29, %v1952_v18  ;;  %v558_v36 = vadd.f32 %v557_v30, %v8570_v1 }
  0xea   :  { %v8613_v37 = vpop.f32.mrf.mxu0  ;;  %v912_v38 = vpop.f32.mrf.mxu1 }
  0xeb   :  { %v1958_v39 = vmax.f32 %v1580_v33, %v1583_v34  ;;  %v913_v40 = vadd.f32 %v912_v38, %v8574_v2  ;;  %v1586_v44 = vmax.f32 %v558_v36, 0.0 }
  0xec   :  { %v563_v41 = vpop.f32.mrf.mxu0  ;;  %7381 = vmatmul.mubr.msk.bf16.gmra.mxu0 %vm412_vm0, %v7945_v32  ;;  %v8617_v42 = vpop.f32.mrf.mxu1  ;;  %7413 = vmatmul.mubr.msk.bf16.gmra.mxu1 %vm412_vm0, %v7945_v32 }
  0xed   :  { %v564_v43 = vadd.f32 %v563_v41, %v8570_v1  ;;  %811 = vmatprep.mubr.bf16.mxu0 %v13003_v0  ;;  %1164 = vmatprep.mubr.bf16.mxu1 %v13003_v0  ;;  %v1589_v45 = vmax.f32 %v913_v40, 0.0 }
  0xee   :  { %v8623_v46 = vpop.f32.mrf.mxu0  ;;  %v918_v47 = vpop.f32.mrf.mxu1 }
  0xef   :  { %v919_v48 = vadd.f32 %v918_v47, %v8574_v2  ;;  %v1961_v49 = vmax.f32 %v1586_v44, %v1589_v45  ;;  %v1592_v53 = vmax.f32 %v564_v43, 0.0  ;;  %v7954_v45 = vld [vmem:[%s12991_s0 + $0xe8] sm:$0xff]  }
  0xf0   :  { %v567_v50 = vpop.f32.mrf.mxu0  ;;  %v8626_v51 = vpop.f32.mrf.mxu1 }
  0xf1   :  { %v1595_v54 = vmax.f32 %v919_v48, 0.0  ;;  %v8631_v55 = vpack.c.bf16 %v1961_v49, %v1958_v39  ;;  %v568_v56 = vadd.f32 %v567_v50, %v8570_v1 }
  0xf2   :  { %v8634_v58 = vpop.f32.mrf.mxu0  ;;  %v922_v59 = vpop.f32.mrf.mxu1 }
  0xf3   :  { %v1964_v63 = vmax.f32 %v1592_v53, %v1595_v54  ;;  %v923_v5 = vadd.f32 %v922_v59, %v8574_v2  ;;  %v1598_v11 = vmax.f32 %v568_v56, 0.0  ;;  %v7989_v53 = vld [vmem:[#allocation2 + $0x2a4] ss:$24 sps:$4 sm:$0xff]   ;;  %v7987_v54 = vld [vmem:[#allocation2 + $0x2a0] ss:$24 sps:$4 sm:$0xff]  }
  0xf4   :  { %v573_v7 = vpop.f32.mrf.mxu0  ;;  %7382 = vmatmul.mubr.msk.bf16.gmra.mxu0 %vm412_vm0, %v7949_v52  ;;  %v8638_v8 = vpop.f32.mrf.mxu1  ;;  %7414 = vmatmul.mubr.msk.bf16.gmra.mxu1 %vm412_vm0, %v7949_v52 }
  0xf5   :  { %v574_v9 = vadd.f32 %v573_v7, %v8570_v1  ;;  %821 = vmatprep.mubr.bf16.mxu0 %v13003_v0  ;;  %1174 = vmatprep.mubr.bf16.mxu1 %v13003_v0  ;;  %v1601_v12 = vmax.f32 %v923_v5, 0.0 }
  0xf6   :  { %v8644_v13 = vpop.f32.mrf.mxu0  ;;  %v928_v14 = vpop.f32.mrf.mxu1  ;;  %3154 = vmatprep.subr.bf16.mxu1 %v7989_v53 }
  0xf7   :  { %v929_v16 = vadd.f32 %v928_v14, %v8574_v2  ;;  %v1967_v17 = vmax.f32 %v1598_v11, %v1601_v12  ;;  %v1604_v21 = vmax.f32 %v574_v9, 0.0  ;;  %3155 = vmatpush2.bf16.msra.mxu1 %v7987_v54 }
  0xf8   :  { %v577_v18 = vpop.f32.mrf.mxu0  ;;  %v8647_v19 = vpop.f32.mrf.mxu1 }
  0xf9   :  { %v1607_v23 = vmax.f32 %v929_v16, 0.0  ;;  %v8652_v24 = vpack.c.bf16 %v1967_v17, %v1964_v63  ;;  %v578_v25 = vadd.f32 %v577_v18, %v8570_v1 }
  0xfa   :  { %v8655_v27 = vpop.f32.mrf.mxu0  ;;  %v932_v28 = vpop.f32.mrf.mxu1 }
  0xfb   :  { %13211 = vst [vmem:[#allocation9_spill] sm:$0xff] %v8652_v24  ;;  %v1970_v29 = vmax.f32 %v1604_v21, %v1607_v23  ;;  %v933_v30 = vadd.f32 %v932_v28, %v8574_v2  ;;  %v1610_v34 = vmax.f32 %v578_v25, 0.0 }
  0xfc   :  { %v583_v32 = vpop.f32.mrf.mxu0  ;;  %7383 = vmatmul.mubr.msk.bf16.gmra.mxu0 %vm412_vm0, %v7950_v20  ;;  %v8659_v33 = vpop.f32.mrf.mxu1  ;;  %7415 = vmatmul.mubr.msk.bf16.gmra.mxu1 %vm412_vm0, %v7950_v20  ;;  %v7955_v20 = vld [vmem:[%s12991_s0 + $0xf0] sm:$0xff]  }
  0xfd   :  { %831 = vmatprep.mubr.bf16.mxu0 %v13003_v0  ;;  %1184 = vmatprep.mubr.bf16.mxu1 %v13003_v0  ;;  %v1613_v36 = vmax.f32 %v933_v30, 0.0  ;;  %v584_v48 = vadd.f32 %v583_v32, %v8570_v1 }
  0xfe   :  { %v8664_v38 = vpop.f32.mrf.mxu0  ;;  %v938_v39 = vpop.f32.mrf.mxu1 }
  0xff   :  { %v1973_v40 = vmax.f32 %v1610_v34, %v1613_v36  ;;  %v939_v41 = vadd.f32 %v938_v39, %v8574_v2  ;;  %v1616_v3 = vmax.f32 %v584_v48, 0.0 }
 0x100   :  { %v587_v43 = vpop.f32.mrf.mxu0  ;;  %v8667_v44 = vpop.f32.mrf.mxu1 }
 0x101   :  { %v8672_v47 = vpack.c.bf16 %v1973_v40, %v1970_v29  ;;  %v588_v49 = vadd.f32 %v587_v43, %v8570_v1  ;;  %v1619_v56 = vmax.f32 %v939_v41, 0.0 }
 0x102   :  { %v8676_v50 = vpop.f32.mrf.mxu0  ;;  %v942_v52 = vpop.f32.mrf.mxu1 }
 0x103   :  { %13212 = vst [vmem:[#allocation10_spill] sm:$0xff] %v8672_v47  ;;  %v943_v59 = vadd.f32 %v942_v52, %v8574_v2  ;;  %v1622_v5 = vmax.f32 %v588_v49, 0.0  ;;  %v1976_v12 = vmax.f32 %v1616_v3, %v1619_v56  ;;  %v7959_v56 = vld [vmem:[%s12991_s0 + $0xf8] sm:$0xff]  }
 0x104   :  { %v593_v61 = vpop.f32.mrf.mxu0  ;;  %7384 = vmatmul.mubr.msk.bf16.gmra.mxu0 %vm412_vm0, %v7954_v45  ;;  %v8680_v63 = vpop.f32.mrf.mxu1  ;;  %7416 = vmatmul.mubr.msk.bf16.gmra.mxu1 %vm412_vm0, %v7954_v45 }
 0x105   :  { %841 = vmatprep.mubr.bf16.mxu0 %v13003_v0  ;;  %1194 = vmatprep.mubr.bf16.mxu1 %v13003_v0  ;;  %v1625_v7 = vmax.f32 %v943_v59, 0.0  ;;  %v594_v23 = vadd.f32 %v593_v61, %v8570_v1 }
 0x106   :  { %v8685_v9 = vpop.f32.mrf.mxu0  ;;  %v948_v11 = vpop.f32.mrf.mxu1 }
 0x107   :  { %v1979_v14 = vmax.f32 %v1622_v5, %v1625_v7  ;;  %v949_v16 = vadd.f32 %v948_v11, %v8574_v2  ;;  %v1628_v39 = vmax.f32 %v594_v23, 0.0  ;;  %v7993_v11 = vld [vmem:[#allocation2 + $0x270] ss:$24 sps:$4 sm:$0xff]  }
 0x108   :  { %v597_v17 = vpop.f32.mrf.mxu0  ;;  %v8688_v18 = vpop.f32.mrf.mxu1 }
 0x109   :  { %v8693_v21 = vpack.c.bf16 %v1979_v14, %v1976_v12  ;;  %v598_v25 = vadd.f32 %v597_v17, %v8570_v1  ;;  %v1631_v30 = vmax.f32 %v949_v16, 0.0  ;;  %v7995_v12 = vld [vmem:[#allocation2 + $0x274] ss:$24 sps:$4 sm:$0xff]  }
 0x10a   :  { %v8697_v28 = vpop.f32.mrf.mxu0  ;;  %v952_v29 = vpop.f32.mrf.mxu1  ;;  %3156 = vmatprep.subr.bf16.mxu1 %v7995_v12 }
 0x10b   :  { %13213 = vst [vmem:[#allocation11_spill] sm:$0xff] %v8693_v21  ;;  %v953_v32 = vadd.f32 %v952_v29, %v8574_v2  ;;  %v1634_v40 = vmax.f32 %v598_v25, 0.0  ;;  %v1982_v48 = vmax.f32 %v1628_v39, %v1631_v30  ;;  %3157 = vmatpush2.bf16.msra.mxu1 %v7993_v11 }
 0x10c   :  { %v603_v34 = vpop.f32.mrf.mxu0  ;;  %7385 = vmatmul.mubr.msk.bf16.gmra.mxu0 %vm412_vm0, %v7955_v20  ;;  %v8701_v36 = vpop.f32.mrf.mxu1  ;;  %7417 = vmatmul.mubr.msk.bf16.gmra.mxu1 %vm412_vm0, %v7955_v20 }
 0x10d   :  { %851 = vmatprep.mubr.bf16.mxu0 %v13003_v0  ;;  %1204 = vmatprep.mubr.bf16.mxu1 %v13003_v0  ;;  %v1637_v41 = vmax.f32 %v953_v32, 0.0  ;;  %v604_v61 = vadd.f32 %v603_v34, %v8570_v1 }
 0x10e   :  { %v8706_v43 = vpop.f32.mrf.mxu0  ;;  %v958_v45 = vpop.f32.mrf.mxu1 }
 0x10f   :  { %v1985_v49 = vmax.f32 %v1634_v40, %v1637_v41  ;;  %v959_v52 = vadd.f32 %v958_v45, %v8574_v2  ;;  %v1640_v23 = vmax.f32 %v604_v61, 0.0 }
 0x110   :  { %v607_v53 = vpop.f32.mrf.mxu0  ;;  %v8709_v54 = vpop.f32.mrf.mxu1 }
 0x111   :  { %v8714_v59 = vpack.c.bf16 %v1985_v49, %v1982_v48  ;;  %v608_v3 = vadd.f32 %v607_v53, %v8570_v1  ;;  %v1643_v14 = vmax.f32 %v959_v52, 0.0  ;;  %v7963_v48 = vld [vmem:[#allocation2 + $0x450] ss:$24 sps:$4 sm:$0xff]  }
 0x112   :  { %v8718_v5 = vpop.f32.mrf.mxu0  ;;  %v962_v7 = vpop.f32.mrf.mxu1 }
 0x113   :  { %13214 = vst [vmem:[#allocation12_spill] sm:$0xff] %v8714_v59  ;;  %v963_v16 = vadd.f32 %v962_v7, %v8574_v2  ;;  %v1646_v25 = vmax.f32 %v608_v3, 0.0  ;;  %v1988_v34 = vmax.f32 %v1640_v23, %v1643_v14  ;;  %v7974_v3 = vld [vmem:[#allocation2 + $0x424] ss:$24 sps:$4 sm:$0xff]  }
 0x114   :  { %v613_v17 = vpop.f32.mrf.mxu0  ;;  %7386 = vmatmul.mubr.msk.bf16.gmra.mxu0 %vm412_vm0, %v7959_v56  ;;  %v8722_v20 = vpop.f32.mrf.mxu1  ;;  %7418 = vmatmul.mubr.msk.bf16.gmra.mxu1 %vm412_vm0, %v7959_v56 }
 0x115   :  { %1247 = vmatprep.mubr.bf16.mxu0 %v13003_v0  ;;  %v1649_v29 = vmax.f32 %v963_v16, 0.0  ;;  %v614_v52 = vadd.f32 %v613_v17, %v8570_v1  ;;  %v8195_v16 = vld [vmem:[%s12991_s0] sm:$0xff]  }
 0x116   :  { %v8726_v30 = vpop.f32.mrf.mxu0  ;;  %v968_v32 = vpop.f32.mrf.mxu1  ;;  %v7972_v17 = vld [vmem:[#allocation2 + $0x420] ss:$24 sps:$4 sm:$0xff]  }
 0x117   :  { %v1991_v39 = vmax.f32 %v1646_v25, %v1649_v29  ;;  %v969_v40 = vadd.f32 %v968_v32, %v8574_v2  ;;  %v1652_v23 = vmax.f32 %v614_v52, 0.0 }
 0x118   :  { %v617_v41 = vpop.f32.mrf.mxu0  ;;  %v8729_v45 = vpop.f32.mrf.mxu1 }
 0x119   :  { %13215 = vst [vmem:[#allocation13_spill] sm:$0xff] %v8729_v45  ;;  %v8731_v49 = vpack.c.bf16 %v1991_v39, %v1988_v34  ;;  %v618_v53 = vadd.f32 %v617_v41, %v8570_v1  ;;  %v1655_v7 = vmax.f32 %v969_v40, 0.0  ;;  %v7983_v39 = vld [vmem:[#allocation2 + $0x3f4] ss:$24 sps:$4 sm:$0xff]  }
 0x11a   :  { %v8735_v56 = vpop.f32.mrf.mxu0  ;;  %v972_v61 = vpop.f32.mrf.mxu1 }
 0x11b   :  { %13216 = vst [vmem:[#allocation14_spill] sm:$0xff] %v8731_v49  ;;  %v973_v11 = vadd.f32 %v972_v61, %v8574_v2  ;;  %v1658_v25 = vmax.f32 %v618_v53, 0.0  ;;  %v1994_v40 = vmax.f32 %v1652_v23, %v1655_v7  ;;  %v7996_v7 = vld [vmem:[#allocation2 + $0x240] ss:$24 sps:$4 sm:$0xff]   ;;  %v7998_v23 = vld [vmem:[#allocation2 + $0x244] ss:$24 sps:$4 sm:$0xff]  }
 0x11c   :  { %v623_v12 = vpop.f32.mrf.mxu0  ;;  %v8738_v14 = vpop.f32.mrf.mxu1  ;;  %7419 = vmatmul.mubr.msk.bf16.vlgmr.msra.gmra.mxu0 %vm412_vm0, %v8195_v16  ;;  %3158 = vmatprep.subr.bf16.mxu1 %v7998_v23  ;;  %v7999_v23 = vld [vmem:[#allocation2 + $0x390] ss:$24 sps:$4 sm:$0xff]  }
 0x11d   :  { %13217 = vst [vmem:[#allocation15_spill] sm:$0xff] %v8738_v14  ;;  %3490 = vmatpush1.bf16.msra.mxu0 %v7963_v48  ;;  %1257 = vmatprep.mubr.bf16.mxu0 %v13003_v0  ;;  %v1661_v29 = vmax.f32 %v973_v11, 0.0  ;;  %v7981_v48 = vld [vmem:[#allocation2 + $0x3f0] ss:$24 sps:$4 sm:$0xff]   ;;  %v624_v52 = vadd.f32 %v623_v12, %v8570_v1  ;;  %v7990_v12 = vld [vmem:[#allocation2 + $0x3c0] ss:$24 sps:$4 sm:$0xff]  }
 0x11e   :  { %v8745_v32 = vpop.f32.mrf.mxu0  ;;  %v978_v34 = vpop.f32.mrf.mxu1  ;;  %3491 = vmatprep.subr.bf16.mxu0 %v7974_v3  ;;  %v7992_v3 = vld [vmem:[#allocation2 + $0x3c4] ss:$24 sps:$4 sm:$0xff]   ;;  %3159 = vmatpush2.bf16.msra.mxu1 %v7996_v7 }
 0x11f   :  { %13218 = vst [vmem:[#allocation16_spill] sm:$0xff] %v8745_v32  ;;  %v1997_v41 = vmax.f32 %v1658_v25, %v1661_v29  ;;  %v979_v61 = vadd.f32 %v978_v34, %v8574_v2 }
 0x120   :  { %v627_v62 = vpop.f32.mrf.mxu0  ;;  %v8748_v60 = vpop.f32.mrf.mxu1 }
 0x121   :  { %13219 = vst [vmem:[#allocation17_spill] sm:$0xff] %v8748_v60  ;;  %3492 = vmatpush1.bf16.msra.mxu0 %v7972_v17  ;;  %v8750_v16 = vpack.c.bf16 %v1997_v41, %v1994_v40  ;;  %v628_v53 = vadd.f32 %v627_v62, %v8570_v1  ;;  %v1667_v25 = vmax.f32 %v979_v61, 0.0  ;;  %v8196_v17 = vld [vmem:[%s12991_s0 + $0x8] sm:$0xff]   ;;  %v13223_v62 = vmov 0  }
 0x122   :  { %v8754_v11 = vpop.f32.mrf.mxu0  ;;  %v982_v0 = vpop.f32.mrf.mxu1  ;;  %3493 = vmatprep.subr.bf16.mxu0 %v7983_v39  ;;  %v1664_v39 = vmax.f32 %v624_v52, 0.0 }
 0x123   :  { %13220 = vst [vmem:[#allocation18_spill] sm:$0xff] %v8750_v16  ;;  %13221 = vst [vmem:[#allocation19_spill] sm:$0xff] %v8754_v11  ;;  %v983_v29 = vadd.f32 %v982_v0, %v8574_v2  ;;  %v1670_v40 = vmax.f32 %v628_v53, 0.0  ;;  %v8001_v16 = vld [vmem:[#allocation2 + $0x394] ss:$24 sps:$4 sm:$0xff]  }
 0x124   :  { %v633_v34 = vpop.f32.mrf.mxu0  ;;  %v8757_v60 = vpop.f32.mrf.mxu1  ;;  %7420 = vmatmul.mubr.msk.bf16.gmra.mxu0 %vm412_vm0, %v8196_v17 }
 0x125   :  { %13222 = vst [vmem:[#allocation20_spill] sm:$0xff] %v8757_v60  ;;  %1267 = vmatprep.mubr.bf16.mxu0 %v13223_v62  ;;  %3494 = vmatpush1.bf16.msra.mxu0 %v7981_v48  ;;  %v1673_v41 = vmax.f32 %v983_v29, 0.0  ;;  %v2000_v60 = vmax.f32 %v1664_v39, %v1667_v25  ;;  %v634_v52 = vadd.f32 %v633_v34, %v8570_v1 }
 0x126   :  { %v8764_v61 = vpop.f32.mrf.mxu0  ;;  %v988_v0 = vpop.f32.mrf.mxu1  ;;  %3495 = vmatprep.subr.bf16.mxu0 %v7992_v3 }
 0x127   :  { %13224 = vst [vmem:[#allocation21_spill] sm:$0xff] %v8764_v61  ;;  %v2003_v14 = vmax.f32 %v1670_v40, %v1673_v41  ;;  %v989_v11 = vadd.f32 %v988_v0, %v8574_v2 }
 0x128   :  { %v637_v32 = vpop.f32.mrf.mxu0  ;;  %v8767_v17 = vpop.f32.mrf.mxu1 }
 0x129   :  { %13225 = vst [vmem:[#allocation22_spill] sm:$0xff] %v8767_v17  ;;  %3496 = vmatpush1.bf16.msra.mxu0 %v7990_v12  ;;  %v8769_v48 = vpack.c.bf16 %v2003_v14, %v2000_v60  ;;  %v638_v53 = vadd.f32 %v637_v32, %v8570_v1  ;;  %v1679_v7 = vmax.f32 %v989_v11, 0.0  ;;  %v8197_v12 = vld [vmem:[%s12991_s0 + $0x10] sm:$0xff]   ;;  %v1676_v60 = vmax.f32 %v634_v52, 0.0 }
 0x12a   :  { %v8773_v29 = vpop.f32.mrf.mxu0  ;;  %v992_v3 = vpop.f32.mrf.mxu1  ;;  %3497 = vmatprep.subr.bf16.mxu0 %v8001_v16 }
 0x12b   :  { %13226 = vst [vmem:[#allocation23_spill] sm:$0xff] %v8769_v48  ;;  %13227 = vst [vmem:[#allocation24_spill] sm:$0xff] %v8773_v29  ;;  %v993_v25 = vadd.f32 %v992_v3, %v8574_v2  ;;  %v1682_v14 = vmax.f32 %v638_v53, 0.0  ;;  %v2006_v11 = vmax.f32 %v1676_v60, %v1679_v7  ;;  %v8002_v53 = vld [vmem:[#allocation2 + $0x210] ss:$24 sps:$4 sm:$0xff]  }
 0x12c   :  { %v643_v39 = vpop.f32.mrf.mxu0  ;;  %v8776_v40 = vpop.f32.mrf.mxu1  ;;  %7421 = vmatmul.mubr.msk.bf16.gmra.mxu0 %vm412_vm0, %v8197_v12  ;;  %v8010_v29 = vld [vmem:[#allocation2 + $0x364] ss:$24 sps:$4 sm:$0xff]  }
 0x12d   :  { %13228 = vst [vmem:[#allocation25_spill] sm:$0xff] %v8776_v40  ;;  %1277 = vmatprep.mubr.bf16.mxu0 %v13223_v62  ;;  %3498 = vmatpush1.bf16.msra.mxu0 %v7999_v23  ;;  %v1685_v32 = vmax.f32 %v993_v25, 0.0  ;;  %v644_v12 = vadd.f32 %v643_v39, %v8570_v1  ;;  %v8004_v25 = vld [vmem:[#allocation2 + $0x214] ss:$24 sps:$4 sm:$0xff]  }
 0x12e   :  { %v8783_v34 = vpop.f32.mrf.mxu0  ;;  %v998_v16 = vpop.f32.mrf.mxu1  ;;  %3160 = vmatprep.subr.bf16.mxu1 %v8004_v25  ;;  %3499 = vmatprep.subr.bf16.mxu0 %v8010_v29 }
 0x12f   :  { %13229 = vst [vmem:[#allocation26_spill] sm:$0xff] %v8783_v34  ;;  %v2009_v41 = vmax.f32 %v1682_v14, %v1685_v32  ;;  %v999_v0 = vadd.f32 %v998_v16, %v8574_v2  ;;  %v8198_v32 = vld [vmem:[%s12991_s0 + $0x18] sm:$0xff]   ;;  %3161 = vmatpush2.bf16.msra.mxu1 %v8002_v53  ;;  %v1688_v39 = vmax.f32 %v644_v12, 0.0 }
 0x130   :  { %v647_v3 = vpop.f32.mrf.mxu0  ;;  %v8786_v40 = vpop.f32.mrf.mxu1 }
 0x131   :  { %13230 = vst [vmem:[#allocation27_spill] sm:$0xff] %v8786_v40  ;;  %v8788_v48 = vpack.c.bf16 %v2009_v41, %v2006_v11  ;;  %v648_v17 = vadd.f32 %v647_v3, %v8570_v1  ;;  %v1691_v34 = vmax.f32 %v999_v0, 0.0 }
 0x132   :  { %v8792_v23 = vpop.f32.mrf.mxu0  ;;  %v1002_v52 = vpop.f32.mrf.mxu1 }
 0x133   :  { %13231 = vst [vmem:[#allocation28_spill] sm:$0xff] %v8788_v48  ;;  %13232 = vst [vmem:[#allocation29_spill] sm:$0xff] %v8792_v23  ;;  %v1003_v7 = vadd.f32 %v1002_v52, %v8574_v2  ;;  %v1694_v16 = vmax.f32 %v648_v17, 0.0  ;;  %v2012_v3 = vmax.f32 %v1688_v39, %v1691_v34  ;;  %v8199_v39 = vld [vmem:[%s12991_s0 + $0x20] sm:$0xff]  }
 0x134   :  { %v653_v60 = vpop.f32.mrf.mxu0  ;;  %v8795_v14 = vpop.f32.mrf.mxu1  ;;  %7422 = vmatmul.mubr.msk.bf16.gmra.mxu0 %vm412_vm0, %v8198_v32 }
 0x135   :  { %13233 = vst [vmem:[#allocation30_spill] sm:$0xff] %v8795_v14  ;;  %1287 = vmatprep.mubr.bf16.mxu0 %v13223_v62  ;;  %v1697_v11 = vmax.f32 %v1003_v7, 0.0  ;;  %v654_v25 = vadd.f32 %v653_v60, %v8570_v1 }
 0x136   :  { %v8802_v41 = vpop.f32.mrf.mxu0  ;;  %v1008_v0 = vpop.f32.mrf.mxu1 }
 0x137   :  { %13234 = vst [vmem:[#allocation31_spill] sm:$0xff] %v8802_v41  ;;  %v2015_v52 = vmax.f32 %v1694_v16, %v1697_v11  ;;  %v1009_v14 = vadd.f32 %v1008_v0, %v8574_v2  ;;  %v1700_v60 = vmax.f32 %v654_v25, 0.0 }
 0x138   :  { %v657_v48 = vpop.f32.mrf.mxu0  ;;  %v8805_v40 = vpop.f32.mrf.mxu1 }
 0x139   :  { %13235 = vst [vmem:[#allocation32_spill] sm:$0xff] %v8805_v40  ;;  %v8807_v23 = vpack.c.bf16 %v2015_v52, %v2012_v3  ;;  %v658_v32 = vadd.f32 %v657_v48, %v8570_v1  ;;  %v1703_v12 = vmax.f32 %v1009_v14, 0.0 }
 0x13a   :  { %v8811_v53 = vpop.f32.mrf.mxu0  ;;  %v1012_v17 = vpop.f32.mrf.mxu1 }
 0x13b   :  { %13236 = vst [vmem:[#allocation33_spill] sm:$0xff] %v8807_v23  ;;  %13237 = vst [vmem:[#allocation34_spill] sm:$0xff] %v8811_v53  ;;  %v1013_v7 = vadd.f32 %v1012_v17, %v8574_v2  ;;  %v1706_v16 = vmax.f32 %v658_v32, 0.0  ;;  %v2018_v14 = vmax.f32 %v1700_v60, %v1703_v12  ;;  %v8005_v32 = vld [vmem:[#allocation2 + $0x1e0] ss:$24 sps:$4 sm:$0xff]  }
 0x13c   :  { %v663_v41 = vpop.f32.mrf.mxu0  ;;  %v8814_v34 = vpop.f32.mrf.mxu1  ;;  %7423 = vmatmul.mubr.msk.bf16.gmra.mxu0 %vm412_vm0, %v8199_v39 }
 0x13d   :  { %13238 = vst [vmem:[#allocation35_spill] sm:$0xff] %v8814_v34  ;;  %1297 = vmatprep.mubr.bf16.mxu0 %v13223_v62  ;;  %v1709_v48 = vmax.f32 %v1013_v7, 0.0  ;;  %v664_v40 = vadd.f32 %v663_v41, %v8570_v1  ;;  %v8007_v7 = vld [vmem:[#allocation2 + $0x1e4] ss:$24 sps:$4 sm:$0xff]  }
 0x13e   :  { %v8821_v11 = vpop.f32.mrf.mxu0  ;;  %v1018_v0 = vpop.f32.mrf.mxu1  ;;  %3162 = vmatprep.subr.bf16.mxu1 %v8007_v7 }
 0x13f   :  { %13239 = vst [vmem:[#allocation36_spill] sm:$0xff] %v8821_v11  ;;  %v2021_v3 = vmax.f32 %v1706_v16, %v1709_v48  ;;  %v1019_v52 = vadd.f32 %v1018_v0, %v8574_v2  ;;  %v8008_v11 = vld [vmem:[#allocation2 + $0x360] ss:$24 sps:$4 sm:$0xff]   ;;  %v8200_v0 = vld [vmem:[%s12991_s0 + $0x28] sm:$0xff]   ;;  %v1712_v41 = vmax.f32 %v664_v40, 0.0  ;;  %3163 = vmatpush2.bf16.msra.mxu1 %v8005_v32 }
 0x140   :  { %v667_v17 = vpop.f32.mrf.mxu0  ;;  %v8824_v34 = vpop.f32.mrf.mxu1  ;;  %3500 = vmatpush1.bf16.msra.mxu0 %v8008_v11 }
 0x141   :  { %13240 = vst [vmem:[#allocation37_spill] sm:$0xff] %v8824_v34  ;;  %v8826_v23 = vpack.c.bf16 %v2021_v3, %v2018_v14  ;;  %v668_v39 = vadd.f32 %v667_v17, %v8570_v1  ;;  %v1715_v12 = vmax.f32 %v1019_v52, 0.0 }
 0x142   :  { %v8830_v53 = vpop.f32.mrf.mxu0  ;;  %v1022_v25 = vpop.f32.mrf.mxu1 }
 0x143   :  { %13241 = vst [vmem:[#allocation38_spill] sm:$0xff] %v8826_v23  ;;  %13242 = vst [vmem:[#allocation39_spill] sm:$0xff] %v8830_v53  ;;  %v1023_v60 = vadd.f32 %v1022_v25, %v8574_v2  ;;  %v1718_v14 = vmax.f32 %v668_v39, 0.0  ;;  %v2024_v25 = vmax.f32 %v1712_v41, %v1715_v12  ;;  %v8201_v41 = vld [vmem:[%s12991_s0 + $0x30] sm:$0xff]  }
 0x144   :  { %v673_v16 = vpop.f32.mrf.mxu0  ;;  %v8833_v48 = vpop.f32.mrf.mxu1  ;;  %7424 = vmatmul.mubr.msk.bf16.gmra.mxu0 %vm412_vm0, %v8200_v0 }
 0x145   :  { %13243 = vst [vmem:[#allocation40_spill] sm:$0xff] %v8833_v48  ;;  %1307 = vmatprep.mubr.bf16.mxu0 %v13223_v62  ;;  %v1721_v3 = vmax.f32 %v1023_v60, 0.0  ;;  %v674_v7 = vadd.f32 %v673_v16, %v8570_v1 }
 0x146   :  { %v8840_v17 = vpop.f32.mrf.mxu0  ;;  %v1028_v52 = vpop.f32.mrf.mxu1 }
 0x147   :  { %13244 = vst [vmem:[#allocation41_spill] sm:$0xff] %v8840_v17  ;;  %v2027_v48 = vmax.f32 %v1718_v14, %v1721_v3  ;;  %v1029_v23 = vadd.f32 %v1028_v52, %v8574_v2  ;;  %v1724_v16 = vmax.f32 %v674_v7, 0.0  ;;  %v8019_v17 = vld [vmem:[#allocation2 + $0x334] ss:$24 sps:$4 sm:$0xff]  }
 0x148   :  { %v677_v34 = vpop.f32.mrf.mxu0  ;;  %v8843_v53 = vpop.f32.mrf.mxu1  ;;  %3501 = vmatprep.subr.bf16.mxu0 %v8019_v17 }
 0x149   :  { %13245 = vst [vmem:[#allocation42_spill] sm:$0xff] %v8843_v53  ;;  %v8845_v0 = vpack.c.bf16 %v2027_v48, %v2024_v25  ;;  %v678_v29 = vadd.f32 %v677_v34, %v8570_v1  ;;  %v1727_v60 = vmax.f32 %v1029_v23, 0.0 }
 0x14a   :  { %v8849_v40 = vpop.f32.mrf.mxu0  ;;  %v1032_v39 = vpop.f32.mrf.mxu1 }
 0x14b   :  { %13246 = vst [vmem:[#allocation43_spill] sm:$0xff] %v8845_v0  ;;  %13247 = vst [vmem:[#allocation44_spill] sm:$0xff] %v8849_v40  ;;  %v1033_v32 = vadd.f32 %v1032_v39, %v8574_v2  ;;  %v1730_v48 = vmax.f32 %v678_v29, 0.0  ;;  %v2030_v23 = vmax.f32 %v1724_v16, %v1727_v60  ;;  %v8011_v29 = vld [vmem:[#allocation2 + $0x1b0] ss:$24 sps:$4 sm:$0xff]  }
 0x14c   :  { %v683_v11 = vpop.f32.mrf.mxu0  ;;  %v8852_v12 = vpop.f32.mrf.mxu1  ;;  %7425 = vmatmul.mubr.msk.bf16.gmra.mxu0 %vm412_vm0, %v8201_v41 }
 0x14d   :  { %13248 = vst [vmem:[#allocation45_spill] sm:$0xff] %v8852_v12  ;;  %1317 = vmatprep.mubr.bf16.mxu0 %v13223_v62  ;;  %v1733_v34 = vmax.f32 %v1033_v32, 0.0  ;;  %v684_v53 = vadd.f32 %v683_v11, %v8570_v1  ;;  %v8013_v32 = vld [vmem:[#allocation2 + $0x1b4] ss:$24 sps:$4 sm:$0xff]  }
 0x14e   :  { %v8859_v14 = vpop.f32.mrf.mxu0  ;;  %v1038_v3 = vpop.f32.mrf.mxu1  ;;  %3164 = vmatprep.subr.bf16.mxu1 %v8013_v32 }
 0x14f   :  { %13249 = vst [vmem:[#allocation46_spill] sm:$0xff] %v8859_v14  ;;  %v2033_v52 = vmax.f32 %v1730_v48, %v1733_v34  ;;  %v1039_v25 = vadd.f32 %v1038_v3, %v8574_v2  ;;  %v8202_v34 = vld [vmem:[%s12991_s0 + $0x38] sm:$0xff]   ;;  %3165 = vmatpush2.bf16.msra.mxu1 %v8011_v29  ;;  %v1736_v11 = vmax.f32 %v684_v53, 0.0 }
 0x150   :  { %v687_v39 = vpop.f32.mrf.mxu0  ;;  %v8862_v12 = vpop.f32.mrf.mxu1 }
 0x151   :  { %13250 = vst [vmem:[#allocation47_spill] sm:$0xff] %v8862_v12  ;;  %v8864_v0 = vpack.c.bf16 %v2033_v52, %v2030_v23  ;;  %v688_v41 = vadd.f32 %v687_v39, %v8570_v1  ;;  %v1739_v14 = vmax.f32 %v1039_v25, 0.0 }
 0x152   :  { %v8868_v40 = vpop.f32.mrf.mxu0  ;;  %v1042_v7 = vpop.f32.mrf.mxu1 }
 0x153   :  { %13251 = vst [vmem:[#allocation48_spill] sm:$0xff] %v8864_v0  ;;  %13252 = vst [vmem:[#allocation49_spill] sm:$0xff] %v8868_v40  ;;  %v1043_v60 = vadd.f32 %v1042_v7, %v8574_v2  ;;  %v1742_v3 = vmax.f32 %v688_v41, 0.0  ;;  %v2036_v39 = vmax.f32 %v1736_v11, %v1739_v14  ;;  %v8203_v11 = vld [vmem:[%s12991_s0 + $0x40] sm:$0xff]  }
 0x154   :  { %v693_v16 = vpop.f32.mrf.mxu0  ;;  %v8871_v48 = vpop.f32.mrf.mxu1  ;;  %7426 = vmatmul.mubr.msk.bf16.gmra.mxu0 %vm412_vm0, %v8202_v34 }
 0x155   :  { %13253 = vst [vmem:[#allocation50_spill] sm:$0xff] %v8871_v48  ;;  %1327 = vmatprep.mubr.bf16.mxu0 %v13223_v62  ;;  %v1745_v23 = vmax.f32 %v1043_v60, 0.0  ;;  %v694_v32 = vadd.f32 %v693_v16, %v8570_v1 }
 0x156   :  { %v8878_v52 = vpop.f32.mrf.mxu0  ;;  %v1048_v25 = vpop.f32.mrf.mxu1 }
 0x157   :  { %13254 = vst [vmem:[#allocation51_spill] sm:$0xff] %v8878_v52  ;;  %v2039_v7 = vmax.f32 %v1742_v3, %v1745_v23  ;;  %v1049_v48 = vadd.f32 %v1048_v25, %v8574_v2  ;;  %v1748_v16 = vmax.f32 %v694_v32, 0.0 }
 0x158   :  { %v697_v0 = vpop.f32.mrf.mxu0  ;;  %v8881_v12 = vpop.f32.mrf.mxu1 }
 0x159   :  { %13255 = vst [vmem:[#allocation52_spill] sm:$0xff] %v8881_v12  ;;  %v8883_v40 = vpack.c.bf16 %v2039_v7, %v2036_v39  ;;  %v698_v34 = vadd.f32 %v697_v0, %v8570_v1  ;;  %v1751_v41 = vmax.f32 %v1049_v48, 0.0 }
 0x15a   :  { %v8887_v29 = vpop.f32.mrf.mxu0  ;;  %v1052_v53 = vpop.f32.mrf.mxu1 }
 0x15b   :  { %13256 = vst [vmem:[#allocation53_spill] sm:$0xff] %v8883_v40  ;;  %13257 = vst [vmem:[#allocation54_spill] sm:$0xff] %v8887_v29  ;;  %v1053_v60 = vadd.f32 %v1052_v53, %v8574_v2  ;;  %v1754_v3 = vmax.f32 %v698_v34, 0.0  ;;  %v2042_v48 = vmax.f32 %v1748_v16, %v1751_v41  ;;  %v8014_v34 = vld [vmem:[#allocation2 + $0x180] ss:$24 sps:$4 sm:$0xff]  }
 0x15c   :  { %v703_v52 = vpop.f32.mrf.mxu0  ;;  %v8890_v14 = vpop.f32.mrf.mxu1  ;;  %7427 = vmatmul.mubr.msk.bf16.gmra.mxu0 %vm412_vm0, %v8203_v11 }
 0x15d   :  { %13258 = vst [vmem:[#allocation55_spill] sm:$0xff] %v8890_v14  ;;  %1337 = vmatprep.mubr.bf16.mxu0 %v13223_v62  ;;  %v1757_v0 = vmax.f32 %v1053_v60, 0.0  ;;  %v704_v12 = vadd.f32 %v703_v52, %v8570_v1  ;;  %v8016_v60 = vld [vmem:[#allocation2 + $0x184] ss:$24 sps:$4 sm:$0xff]  }
 0x15e   :  { %v8897_v23 = vpop.f32.mrf.mxu0  ;;  %v1058_v25 = vpop.f32.mrf.mxu1  ;;  %3166 = vmatprep.subr.bf16.mxu1 %v8016_v60 }
 0x15f   :  { %13259 = vst [vmem:[#allocation56_spill] sm:$0xff] %v8897_v23  ;;  %v2045_v39 = vmax.f32 %v1754_v3, %v1757_v0  ;;  %v1059_v7 = vadd.f32 %v1058_v25, %v8574_v2  ;;  %v8017_v23 = vld [vmem:[#allocation2 + $0x330] ss:$24 sps:$4 sm:$0xff]   ;;  %v1760_v52 = vmax.f32 %v704_v12, 0.0  ;;  %3167 = vmatpush2.bf16.msra.mxu1 %v8014_v34 }
 0x160   :  { %v707_v53 = vpop.f32.mrf.mxu0  ;;  %v8900_v14 = vpop.f32.mrf.mxu1  ;;  %v8204_v25 = vld [vmem:[%s12991_s0 + $0x48] sm:$0xff]   ;;  %3502 = vmatpush1.bf16.msra.mxu0 %v8017_v23 }
 0x161   :  { %13260 = vst [vmem:[#allocation57_spill] sm:$0xff] %v8900_v14  ;;  %v8902_v40 = vpack.c.bf16 %v2045_v39, %v2042_v48  ;;  %v708_v11 = vadd.f32 %v707_v53, %v8570_v1  ;;  %v1763_v41 = vmax.f32 %v1059_v7, 0.0 }
 0x162   :  { %v8906_v29 = vpop.f32.mrf.mxu0  ;;  %v1062_v32 = vpop.f32.mrf.mxu1 }
 0x163   :  { %13261 = vst [vmem:[#allocation58_spill] sm:$0xff] %v8902_v40  ;;  %13262 = vst [vmem:[#allocation59_spill] sm:$0xff] %v8906_v29  ;;  %v1063_v16 = vadd.f32 %v1062_v32, %v8574_v2  ;;  %v1766_v48 = vmax.f32 %v708_v11, 0.0  ;;  %v2048_v32 = vmax.f32 %v1760_v52, %v1763_v41  ;;  %v8205_v52 = vld [vmem:[%s12991_s0 + $0x50] sm:$0xff]  }
 0x164   :  { %v713_v3 = vpop.f32.mrf.mxu0  ;;  %v8909_v0 = vpop.f32.mrf.mxu1  ;;  %7428 = vmatmul.mubr.msk.bf16.gmra.mxu0 %vm412_vm0, %v8204_v25 }
 0x165   :  { %13263 = vst [vmem:[#allocation60_spill] sm:$0xff] %v8909_v0  ;;  %1347 = vmatprep.mubr.bf16.mxu0 %v13223_v62  ;;  %v1769_v39 = vmax.f32 %v1063_v16, 0.0  ;;  %v714_v60 = vadd.f32 %v713_v3, %v8570_v1 }
 0x166   :  { %v8916_v53 = vpop.f32.mrf.mxu0  ;;  %v1068_v7 = vpop.f32.mrf.mxu1 }
 0x167   :  { %13264 = vst [vmem:[#allocation61_spill] sm:$0xff] %v8916_v53  ;;  %v2051_v0 = vmax.f32 %v1766_v48, %v1769_v39  ;;  %v1069_v40 = vadd.f32 %v1068_v7, %v8574_v2  ;;  %v1772_v3 = vmax.f32 %v714_v60, 0.0 }
 0x168   :  { %v717_v14 = vpop.f32.mrf.mxu0  ;;  %v8919_v29 = vpop.f32.mrf.mxu1 }
 0x169   :  { %13265 = vst [vmem:[#allocation62_spill] sm:$0xff] %v8919_v29  ;;  %v8921_v25 = vpack.c.bf16 %v2051_v0, %v2048_v32  ;;  %v718_v17 = vadd.f32 %v717_v14, %v8570_v1  ;;  %v1775_v16 = vmax.f32 %v1069_v40, 0.0 }
 0x16a   :  { %v8925_v12 = vpop.f32.mrf.mxu0  ;;  %v1072_v11 = vpop.f32.mrf.mxu1 }
 0x16b   :  { %13266 = vst [vmem:[#allocation63_spill] sm:$0xff] %v8921_v25  ;;  %13267 = vst [vmem:[#allocation64_spill] sm:$0xff] %v8925_v12  ;;  %v1073_v34 = vadd.f32 %v1072_v11, %v8574_v2  ;;  %v1778_v0 = vmax.f32 %v718_v17, 0.0  ;;  %v2054_v40 = vmax.f32 %v1772_v3, %v1775_v16  ;;  %v8022_v25 = vld [vmem:[#allocation2 + $0x15c] ss:$24 sps:$4 sm:$0xff]  }
 0x16c   :  { %v723_v23 = vpop.f32.mrf.mxu0  ;;  %v8928_v41 = vpop.f32.mrf.mxu1  ;;  %7429 = vmatmul.mubr.msk.bf16.gmra.mxu0 %vm412_vm0, %v8205_v52  ;;  %3842 = vmatprep.subr.bf16.mxu1 %v8022_v25 }
 0x16d   :  { %13268 = vst [vmem:[#allocation65_spill] sm:$0xff] %v8928_v41  ;;  %1357 = vmatprep.mubr.bf16.mxu0 %v13223_v62  ;;  %v1781_v14 = vmax.f32 %v1073_v34, 0.0  ;;  %v724_v52 = vadd.f32 %v723_v23, %v8570_v1 }
 0x16e   :  { %v8935_v48 = vpop.f32.mrf.mxu0  ;;  %v1078_v39 = vpop.f32.mrf.mxu1 }
 0x16f   :  { %13269 = vst [vmem:[#allocation66_spill] sm:$0xff] %v8935_v48  ;;  %v2057_v7 = vmax.f32 %v1778_v0, %v1781_v14  ;;  %v1079_v32 = vadd.f32 %v1078_v39, %v8574_v2  ;;  %v8206_v14 = vld [vmem:[%s12991_s0 + $0x58] sm:$0xff]   ;;  %v1784_v23 = vmax.f32 %v724_v52, 0.0 }
 0x170   :  { %v727_v11 = vpop.f32.mrf.mxu0  ;;  %v8938_v41 = vpop.f32.mrf.mxu1 }
 0x171   :  { %13270 = vst [vmem:[#allocation67_spill] sm:$0xff] %v8938_v41  ;;  %v8940_v29 = vpack.c.bf16 %v2057_v7, %v2054_v40  ;;  %v728_v12 = vadd.f32 %v727_v11, %v8570_v1  ;;  %v1787_v34 = vmax.f32 %v1079_v32, 0.0 }
 0x172   :  { %v8944_v60 = vpop.f32.mrf.mxu0  ;;  %v1082_v17 = vpop.f32.mrf.mxu1 }
 0x173   :  { %13271 = vst [vmem:[#allocation68_spill] sm:$0xff] %v8940_v29  ;;  %13272 = vst [vmem:[#allocation69_spill] sm:$0xff] %v8944_v60  ;;  %v1083_v16 = vadd.f32 %v1082_v17, %v8574_v2  ;;  %v1790_v39 = vmax.f32 %v728_v12, 0.0  ;;  %v2060_v32 = vmax.f32 %v1784_v23, %v1787_v34  ;;  %v8207_v23 = vld [vmem:[%s12991_s0 + $0x60] sm:$0xff]  }
 0x174   :  { %v733_v3 = vpop.f32.mrf.mxu0  ;;  %v8947_v0 = vpop.f32.mrf.mxu1  ;;  %7430 = vmatmul.mubr.msk.bf16.gmra.mxu0 %vm412_vm0, %v8206_v14 }
 0x175   :  { %13273 = vst [vmem:[#allocation70_spill] sm:$0xff] %v8947_v0  ;;  %1367 = vmatprep.mubr.bf16.mxu0 %v13223_v62  ;;  %v1793_v40 = vmax.f32 %v1083_v16, 0.0  ;;  %v734_v60 = vadd.f32 %v733_v3, %v8570_v1 }
 0x176   :  { %v8954_v7 = vpop.f32.mrf.mxu0  ;;  %v1088_v25 = vpop.f32.mrf.mxu1 }
 0x177   :  { %13274 = vst [vmem:[#allocation71_spill] sm:$0xff] %v8954_v7  ;;  %v2063_v11 = vmax.f32 %v1790_v39, %v1793_v40  ;;  %v1089_v17 = vadd.f32 %v1088_v25, %v8574_v2  ;;  %v1796_v3 = vmax.f32 %v734_v60, 0.0 }
 0x178   :  { %v737_v29 = vpop.f32.mrf.mxu0  ;;  %v8957_v0 = vpop.f32.mrf.mxu1 }
 0x179   :  { %13275 = vst [vmem:[#allocation72_spill] sm:$0xff] %v8957_v0  ;;  %v8959_v41 = vpack.c.bf16 %v2063_v11, %v2060_v32  ;;  %v738_v14 = vadd.f32 %v737_v29, %v8570_v1  ;;  %v1799_v52 = vmax.f32 %v1089_v17, 0.0  ;;  %v8025_v0 = vld [vmem:[#allocation2 + $0x304] ss:$24 sps:$4 sm:$0xff]  }
 0x17a   :  { %v8963_v48 = vpop.f32.mrf.mxu0  ;;  %v1092_v12 = vpop.f32.mrf.mxu1  ;;  %3503 = vmatprep.subr.bf16.mxu0 %v8025_v0 }
 0x17b   :  { %13276 = vst [vmem:[#allocation73_spill] sm:$0xff] %v8959_v41  ;;  %13277 = vst [vmem:[#allocation74_spill] sm:$0xff] %v8963_v48  ;;  %v1093_v16 = vadd.f32 %v1092_v12, %v8574_v2  ;;  %v1802_v39 = vmax.f32 %v738_v14, 0.0  ;;  %v2066_v32 = vmax.f32 %v1796_v3, %v1799_v52  ;;  %v8023_v41 = vld [vmem:[#allocation2 + $0x300] ss:$24 sps:$4 sm:$0xff]  }
 0x17c   :  { %v743_v7 = vpop.f32.mrf.mxu0  ;;  %v8966_v34 = vpop.f32.mrf.mxu1  ;;  %7431 = vmatmul.mubr.msk.bf16.gmra.mxu0 %vm412_vm0, %v8207_v23 }
 0x17d   :  { %13278 = vst [vmem:[#allocation75_spill] sm:$0xff] %v8966_v34  ;;  %1377 = vmatprep.mubr.bf16.mxu0 %v13223_v62  ;;  %v1805_v29 = vmax.f32 %v1093_v16, 0.0  ;;  %v744_v23 = vadd.f32 %v743_v7, %v8570_v1  ;;  %3504 = vmatpush1.bf16.msra.mxu0 %v8023_v41 }
 0x17e   :  { %v8973_v40 = vpop.f32.mrf.mxu0  ;;  %v1098_v25 = vpop.f32.mrf.mxu1 }
 0x17f   :  { %13279 = vst [vmem:[#allocation76_spill] sm:$0xff] %v8973_v40  ;;  %v2069_v11 = vmax.f32 %v1802_v39, %v1805_v29  ;;  %v1099_v17 = vadd.f32 %v1098_v25, %v8574_v2  ;;  %v8208_v29 = vld [vmem:[%s12991_s0 + $0x68] sm:$0xff]   ;;  %v1808_v7 = vmax.f32 %v744_v23, 0.0 }
 0x180   :  { %v747_v12 = vpop.f32.mrf.mxu0  ;;  %v8976_v34 = vpop.f32.mrf.mxu1 }
 0x181   :  { %13280 = vst [vmem:[#allocation77_spill] sm:$0xff] %v8976_v34  ;;  %v8978_v48 = vpack.c.bf16 %v2069_v11, %v2066_v32  ;;  %v748_v60 = vadd.f32 %v747_v12, %v8570_v1  ;;  %v1811_v40 = vmax.f32 %v1099_v17, 0.0 }
 0x182   :  { %v8982_v14 = vpop.f32.mrf.mxu0  ;;  %v1102_v16 = vpop.f32.mrf.mxu1 }
 0x183   :  { %13281 = vst [vmem:[#allocation78_spill] sm:$0xff] %v8978_v48  ;;  %13282 = vst [vmem:[#allocation79_spill] sm:$0xff] %v8982_v14  ;;  %v1103_v52 = vadd.f32 %v1102_v16, %v8574_v2  ;;  %v1814_v25 = vmax.f32 %v748_v60, 0.0  ;;  %v2072_v17 = vmax.f32 %v1808_v7, %v1811_v40  ;;  %v8209_v7 = vld [vmem:[%s12991_s0 + $0x70] sm:$0xff]  }
 0x184   :  { %v753_v3 = vpop.f32.mrf.mxu0  ;;  %v8985_v39 = vpop.f32.mrf.mxu1  ;;  %7432 = vmatmul.mubr.msk.bf16.gmra.mxu0 %vm412_vm0, %v8208_v29 }
 0x185   :  { %13283 = vst [vmem:[#allocation80_spill] sm:$0xff] %v8985_v39  ;;  %1387 = vmatprep.mubr.bf16.mxu0 %v13223_v62  ;;  %v1817_v32 = vmax.f32 %v1103_v52, 0.0  ;;  %v754_v29 = vadd.f32 %v753_v3, %v8570_v1 }
 0x186   :  { %v8992_v11 = vpop.f32.mrf.mxu0  ;;  %v1108_v0 = vpop.f32.mrf.mxu1 }
 0x187   :  { %13284 = vst [vmem:[#allocation81_spill] sm:$0xff] %v8992_v11  ;;  %v2075_v12 = vmax.f32 %v1814_v25, %v1817_v32  ;;  %v1109_v16 = vadd.f32 %v1108_v0, %v8574_v2  ;;  %v1820_v3 = vmax.f32 %v754_v29, 0.0 }
 0x188   :  { %v757_v39 = vpop.f32.mrf.mxu0  ;;  %v8995_v48 = vpop.f32.mrf.mxu1 }
 0x189   :  { %13285 = vst [vmem:[#allocation82_spill] sm:$0xff] %v8995_v48  ;;  %v8997_v34 = vpack.c.bf16 %v2075_v12, %v2072_v17  ;;  %v758_v14 = vadd.f32 %v757_v39, %v8570_v1  ;;  %v1823_v60 = vmax.f32 %v1109_v16, 0.0 }
 0x18a   :  { %v9001_v41 = vpop.f32.mrf.mxu0  ;;  %v1112_v23 = vpop.f32.mrf.mxu1 }
 0x18b   :  { %13286 = vst [vmem:[#allocation83_spill] sm:$0xff] %v8997_v34  ;;  %13287 = vst [vmem:[#allocation84_spill] sm:$0xff] %v9001_v41  ;;  %v1113_v52 = vadd.f32 %v1112_v23, %v8574_v2  ;;  %v1826_v25 = vmax.f32 %v758_v14, 0.0  ;;  %v2078_v17 = vmax.f32 %v1820_v3, %v1823_v60  ;;  %v8210_v3 = vld [vmem:[%s12991_s0 + $0x78] sm:$0xff]  }
 0x18c   :  { %v763_v11 = vpop.f32.mrf.mxu0  ;;  %v9004_v40 = vpop.f32.mrf.mxu1  ;;  %7433 = vmatmul.mubr.msk.bf16.gmra.mxu0 %vm412_vm0, %v8209_v7 }
 0x18d   :  { %13288 = vst [vmem:[#allocation85_spill] sm:$0xff] %v9004_v40  ;;  %1397 = vmatprep.mubr.bf16.mxu0 %v13223_v62  ;;  %v1829_v39 = vmax.f32 %v1113_v52, 0.0  ;;  %v764_v48 = vadd.f32 %v763_v11, %v8570_v1 }
 0x18e   :  { %v9011_v32 = vpop.f32.mrf.mxu0  ;;  %v1118_v0 = vpop.f32.mrf.mxu1 }
 0x18f   :  { %13289 = vst [vmem:[#allocation86_spill] sm:$0xff] %v9011_v32  ;;  %v2081_v12 = vmax.f32 %v1826_v25, %v1829_v39  ;;  %v1119_v16 = vadd.f32 %v1118_v0, %v8574_v2  ;;  %v1832_v11 = vmax.f32 %v764_v48, 0.0 }
 0x190   :  { %v767_v23 = vpop.f32.mrf.mxu0  ;;  %v9014_v40 = vpop.f32.mrf.mxu1 }
 0x191   :  { %13290 = vst [vmem:[#allocation87_spill] sm:$0xff] %v9014_v40  ;;  %v9016_v34 = vpack.c.bf16 %v2081_v12, %v2078_v17  ;;  %v768_v7 = vadd.f32 %v767_v23, %v8570_v1  ;;  %v1835_v29 = vmax.f32 %v1119_v16, 0.0 }
 0x192   :  { %v9020_v41 = vpop.f32.mrf.mxu0  ;;  %v1122_v14 = vpop.f32.mrf.mxu1 }
 0x193   :  { %13291 = vst [vmem:[#allocation88_spill] sm:$0xff] %v9016_v34  ;;  %13292 = vst [vmem:[#allocation89_spill] sm:$0xff] %v9020_v41  ;;  %v1123_v52 = vadd.f32 %v1122_v14, %v8574_v2  ;;  %v1838_v25 = vmax.f32 %v768_v7, 0.0  ;;  %v2084_v12 = vmax.f32 %v1832_v11, %v1835_v29  ;;  %v8211_v11 = vld [vmem:[%s12991_s0 + $0x80] sm:$0xff]  }
 0x194   :  { %v773_v32 = vpop.f32.mrf.mxu0  ;;  %v9023_v60 = vpop.f32.mrf.mxu1  ;;  %7434 = vmatmul.mubr.msk.bf16.gmra.mxu0 %vm412_vm0, %v8210_v3 }
 0x195   :  { %13293 = vst [vmem:[#allocation90_spill] sm:$0xff] %v9023_v60  ;;  %1407 = vmatprep.mubr.bf16.mxu0 %v13223_v62  ;;  %v1841_v39 = vmax.f32 %v1123_v52, 0.0  ;;  %v774_v40 = vadd.f32 %v773_v32, %v8570_v1 }
 0x196   :  { %v9030_v0 = vpop.f32.mrf.mxu0  ;;  %v1128_v17 = vpop.f32.mrf.mxu1 }
 0x197   :  { %13294 = vst [vmem:[#allocation91_spill] sm:$0xff] %v9030_v0  ;;  %v2087_v16 = vmax.f32 %v1838_v25, %v1841_v39  ;;  %v1129_v23 = vadd.f32 %v1128_v17, %v8574_v2  ;;  %v1844_v32 = vmax.f32 %v774_v40, 0.0 }
 0x198   :  { %v777_v14 = vpop.f32.mrf.mxu0  ;;  %v9033_v60 = vpop.f32.mrf.mxu1 }
 0x199   :  { %13295 = vst [vmem:[#allocation92_spill] sm:$0xff] %v9033_v60  ;;  %v9035_v34 = vpack.c.bf16 %v2087_v16, %v2084_v12  ;;  %v778_v3 = vadd.f32 %v777_v14, %v8570_v1  ;;  %v1847_v7 = vmax.f32 %v1129_v23, 0.0 }
 0x19a   :  { %v9039_v41 = vpop.f32.mrf.mxu0  ;;  %v1132_v48 = vpop.f32.mrf.mxu1 }
 0x19b   :  { %13296 = vst [vmem:[#allocation93_spill] sm:$0xff] %v9035_v34  ;;  %13297 = vst [vmem:[#allocation94_spill] sm:$0xff] %v9039_v41  ;;  %v1133_v52 = vadd.f32 %v1132_v48, %v8574_v2  ;;  %v1850_v25 = vmax.f32 %v778_v3, 0.0  ;;  %v2090_v16 = vmax.f32 %v1844_v32, %v1847_v7  ;;  %v8037_v3 = vld [vmem:[#allocation2 + $0x45c] ss:$24 sps:$4 sm:$0xff]  }
 0x19c   :  { %v783_v0 = vpop.f32.mrf.mxu0  ;;  %v9042_v29 = vpop.f32.mrf.mxu1  ;;  %7435 = vmatmul.mubr.msk.bf16.gmra.mxu0 %vm412_vm0, %v8211_v11  ;;  %4195 = vmatprep.subr.bf16.mxu0 %v8037_v3 }
 0x19d   :  { %13298 = vst [vmem:[#allocation95_spill] sm:$0xff] %v9042_v29  ;;  %1417 = vmatprep.mubr.bf16.mxu0 %v13223_v62  ;;  %v1853_v39 = vmax.f32 %v1133_v52, 0.0  ;;  %v784_v60 = vadd.f32 %v783_v0, %v8570_v1 }
 0x19e   :  { %v9049_v17 = vpop.f32.mrf.mxu0  ;;  %v1138_v12 = vpop.f32.mrf.mxu1 }
 0x19f   :  { %13299 = vst [vmem:[#allocation96_spill] sm:$0xff] %v9049_v17  ;;  %v2093_v23 = vmax.f32 %v1850_v25, %v1853_v39  ;;  %v1139_v14 = vadd.f32 %v1138_v12, %v8574_v2  ;;  %v8212_v25 = vld [vmem:[%s12991_s0 + $0x88] sm:$0xff]   ;;  %v1856_v0 = vmax.f32 %v784_v60, 0.0 }
 0x1a0   :  { %v787_v48 = vpop.f32.mrf.mxu0  ;;  %v9052_v29 = vpop.f32.mrf.mxu1 }
 0x1a1   :  { %13300 = vst [vmem:[#allocation97_spill] sm:$0xff] %v9052_v29  ;;  %v9054_v34 = vpack.c.bf16 %v2093_v23, %v2090_v16  ;;  %v788_v11 = vadd.f32 %v787_v48, %v8570_v1  ;;  %v1859_v52 = vmax.f32 %v1139_v14, 0.0 }
 0x1a2   :  { %v9058_v41 = vpop.f32.mrf.mxu0  ;;  %v1142_v40 = vpop.f32.mrf.mxu1 }
 0x1a3   :  { %13301 = vst [vmem:[#allocation98_spill] sm:$0xff] %v9054_v34  ;;  %13302 = vst [vmem:[#allocation99_spill] sm:$0xff] %v9058_v41  ;;  %v1143_v17 = vadd.f32 %v1142_v40, %v8574_v2  ;;  %v1862_v39 = vmax.f32 %v788_v11, 0.0  ;;  %v2096_v14 = vmax.f32 %v1856_v0, %v1859_v52  ;;  %v8213_v0 = vld [vmem:[%s12991_s0 + $0x90] sm:$0xff]  }
 0x1a4   :  { %v793_v7 = vpop.f32.mrf.mxu0  ;;  %v9061_v32 = vpop.f32.mrf.mxu1  ;;  %7436 = vmatmul.mubr.msk.bf16.gmra.mxu0 %vm412_vm0, %v8212_v25 }
 0x1a5   :  { %13303 = vst [vmem:[#allocation100_spill] sm:$0xff] %v9061_v32  ;;  %1427 = vmatprep.mubr.bf16.mxu0 %v13223_v62  ;;  %v1865_v12 = vmax.f32 %v1143_v17, 0.0  ;;  %v794_v25 = vadd.f32 %v793_v7, %v8570_v1 }
 0x1a6   :  { %v9068_v16 = vpop.f32.mrf.mxu0  ;;  %v1148_v23 = vpop.f32.mrf.mxu1 }
 0x1a7   :  { %13304 = vst [vmem:[#allocation101_spill] sm:$0xff] %v9068_v16  ;;  %v2099_v48 = vmax.f32 %v1862_v39, %v1865_v12  ;;  %v1149_v40 = vadd.f32 %v1148_v23, %v8574_v2  ;;  %v1868_v7 = vmax.f32 %v794_v25, 0.0 }
 0x1a8   :  { %v797_v32 = vpop.f32.mrf.mxu0  ;;  %v9071_v34 = vpop.f32.mrf.mxu1 }
 0x1a9   :  { %13305 = vst [vmem:[#allocation102_spill] sm:$0xff] %v9071_v34  ;;  %v9073_v29 = vpack.c.bf16 %v2099_v48, %v2096_v14  ;;  %v798_v3 = vadd.f32 %v797_v32, %v8570_v1  ;;  %v1871_v17 = vmax.f32 %v1149_v40, 0.0 }
 0x1aa   :  { %v9077_v41 = vpop.f32.mrf.mxu0  ;;  %v1152_v60 = vpop.f32.mrf.mxu1 }
 0x1ab   :  { %13306 = vst [vmem:[#allocation103_spill] sm:$0xff] %v9073_v29  ;;  %13307 = vst [vmem:[#allocation104_spill] sm:$0xff] %v9077_v41  ;;  %v1153_v11 = vadd.f32 %v1152_v60, %v8574_v2  ;;  %v1874_v39 = vmax.f32 %v798_v3, 0.0  ;;  %v2102_v14 = vmax.f32 %v1868_v7, %v1871_v17  ;;  %v8214_v7 = vld [vmem:[%s12991_s0 + $0x98] sm:$0xff]  }
 0x1ac   :  { %v803_v16 = vpop.f32.mrf.mxu0  ;;  %v9080_v52 = vpop.f32.mrf.mxu1  ;;  %7437 = vmatmul.mubr.msk.bf16.gmra.mxu0 %vm412_vm0, %v8213_v0 }
 0x1ad   :  { %13308 = vst [vmem:[#allocation105_spill] sm:$0xff] %v9080_v52  ;;  %1437 = vmatprep.mubr.bf16.mxu0 %v13223_v62  ;;  %v1877_v32 = vmax.f32 %v1153_v11, 0.0  ;;  %v804_v34 = vadd.f32 %v803_v16, %v8570_v1 }
 0x1ae   :  { %v9087_v12 = vpop.f32.mrf.mxu0  ;;  %v1158_v23 = vpop.f32.mrf.mxu1 }
 0x1af   :  { %13309 = vst [vmem:[#allocation106_spill] sm:$0xff] %v9087_v12  ;;  %v2105_v48 = vmax.f32 %v1874_v39, %v1877_v32  ;;  %v1159_v40 = vadd.f32 %v1158_v23, %v8574_v2  ;;  %v1880_v16 = vmax.f32 %v804_v34, 0.0 }
 0x1b0   :  { %v807_v60 = vpop.f32.mrf.mxu0  ;;  %v9090_v52 = vpop.f32.mrf.mxu1 }
 0x1b1   :  { %13310 = vst [vmem:[#allocation107_spill] sm:$0xff] %v9090_v52  ;;  %v9092_v29 = vpack.c.bf16 %v2105_v48, %v2102_v14  ;;  %v808_v0 = vadd.f32 %v807_v60, %v8570_v1  ;;  %v1883_v3 = vmax.f32 %v1159_v40, 0.0 }
 0x1b2   :  { %v9096_v41 = vpop.f32.mrf.mxu0  ;;  %v1162_v25 = vpop.f32.mrf.mxu1 }
 0x1b3   :  { %13311 = vst [vmem:[#allocation108_spill] sm:$0xff] %v9092_v29  ;;  %13312 = vst [vmem:[#allocation109_spill] sm:$0xff] %v9096_v41  ;;  %v1163_v11 = vadd.f32 %v1162_v25, %v8574_v2  ;;  %v1886_v39 = vmax.f32 %v808_v0, 0.0  ;;  %v2108_v48 = vmax.f32 %v1880_v16, %v1883_v3  ;;  %v8215_v16 = vld [vmem:[%s12991_s0 + $0xa0] sm:$0xff]  }
 0x1b4   :  { %v813_v12 = vpop.f32.mrf.mxu0  ;;  %v9099_v17 = vpop.f32.mrf.mxu1  ;;  %7438 = vmatmul.mubr.msk.bf16.gmra.mxu0 %vm412_vm0, %v8214_v7 }
 0x1b5   :  { %13313 = vst [vmem:[#allocation110_spill] sm:$0xff] %v9099_v17  ;;  %1447 = vmatprep.mubr.bf16.mxu0 %v13223_v62  ;;  %v1889_v32 = vmax.f32 %v1163_v11, 0.0  ;;  %v814_v52 = vadd.f32 %v813_v12, %v8570_v1 }
 0x1b6   :  { %v9106_v23 = vpop.f32.mrf.mxu0  ;;  %v1168_v14 = vpop.f32.mrf.mxu1 }
 0x1b7   :  { %13314 = vst [vmem:[#allocation111_spill] sm:$0xff] %v9106_v23  ;;  %v2111_v40 = vmax.f32 %v1886_v39, %v1889_v32  ;;  %v1169_v60 = vadd.f32 %v1168_v14, %v8574_v2  ;;  %v1892_v12 = vmax.f32 %v814_v52, 0.0 }
 0x1b8   :  { %v817_v25 = vpop.f32.mrf.mxu0  ;;  %v9109_v17 = vpop.f32.mrf.mxu1 }
 0x1b9   :  { %13315 = vst [vmem:[#allocation112_spill] sm:$0xff] %v9109_v17  ;;  %v9111_v29 = vpack.c.bf16 %v2111_v40, %v2108_v48  ;;  %v818_v7 = vadd.f32 %v817_v25, %v8570_v1  ;;  %v1895_v0 = vmax.f32 %v1169_v60, 0.0 }
 0x1ba   :  { %v9115_v41 = vpop.f32.mrf.mxu0  ;;  %v1172_v34 = vpop.f32.mrf.mxu1 }
 0x1bb   :  { %13316 = vst [vmem:[#allocation113_spill] sm:$0xff] %v9111_v29  ;;  %13317 = vst [vmem:[#allocation114_spill] sm:$0xff] %v9115_v41  ;;  %v1173_v11 = vadd.f32 %v1172_v34, %v8574_v2  ;;  %v1898_v39 = vmax.f32 %v818_v7, 0.0  ;;  %v2114_v40 = vmax.f32 %v1892_v12, %v1895_v0  ;;  %v8216_v12 = vld [vmem:[%s12991_s0 + $0xa8] sm:$0xff]  }
 0x1bc   :  { %v823_v23 = vpop.f32.mrf.mxu0  ;;  %v9118_v3 = vpop.f32.mrf.mxu1  ;;  %7439 = vmatmul.mubr.msk.bf16.gmra.mxu0 %vm412_vm0, %v8215_v16 }
 0x1bd   :  { %13318 = vst [vmem:[#allocation115_spill] sm:$0xff] %v9118_v3  ;;  %1457 = vmatprep.mubr.bf16.mxu0 %v13223_v62  ;;  %v1901_v32 = vmax.f32 %v1173_v11, 0.0  ;;  %v824_v17 = vadd.f32 %v823_v23, %v8570_v1 }
 0x1be   :  { %v9125_v14 = vpop.f32.mrf.mxu0  ;;  %v1178_v48 = vpop.f32.mrf.mxu1 }
 0x1bf   :  { %13319 = vst [vmem:[#allocation116_spill] sm:$0xff] %v9125_v14  ;;  %v2117_v60 = vmax.f32 %v1898_v39, %v1901_v32  ;;  %v1179_v25 = vadd.f32 %v1178_v48, %v8574_v2  ;;  %v1904_v23 = vmax.f32 %v824_v17, 0.0 }
 0x1c0   :  { %v827_v34 = vpop.f32.mrf.mxu0  ;;  %v9128_v3 = vpop.f32.mrf.mxu1 }
 0x1c1   :  { %13320 = vst [vmem:[#allocation117_spill] sm:$0xff] %v9128_v3  ;;  %v9130_v29 = vpack.c.bf16 %v2117_v60, %v2114_v40  ;;  %v828_v16 = vadd.f32 %v827_v34, %v8570_v1  ;;  %v1907_v7 = vmax.f32 %v1179_v25, 0.0 }
 0x1c2   :  { %v9134_v41 = vpop.f32.mrf.mxu0  ;;  %v1182_v52 = vpop.f32.mrf.mxu1 }
 0x1c3   :  { %13321 = vst [vmem:[#allocation118_spill] sm:$0xff] %v9130_v29  ;;  %13322 = vst [vmem:[#allocation119_spill] sm:$0xff] %v9134_v41  ;;  %v1183_v11 = vadd.f32 %v1182_v52, %v8574_v2  ;;  %v1910_v39 = vmax.f32 %v828_v16, 0.0  ;;  %v2120_v60 = vmax.f32 %v1904_v23, %v1907_v7  ;;  %v8217_v23 = vld [vmem:[%s12991_s0 + $0xb0] sm:$0xff]  }
 0x1c4   :  { %v833_v14 = vpop.f32.mrf.mxu0  ;;  %v9137_v0 = vpop.f32.mrf.mxu1  ;;  %7440 = vmatmul.mubr.msk.bf16.gmra.mxu0 %vm412_vm0, %v8216_v12 }
 0x1c5   :  { %13323 = vst [vmem:[#allocation120_spill] sm:$0xff] %v9137_v0  ;;  %1467 = vmatprep.mubr.bf16.mxu0 %v13223_v62  ;;  %v1913_v32 = vmax.f32 %v1183_v11, 0.0  ;;  %v834_v3 = vadd.f32 %v833_v14, %v8570_v1 }
 0x1c6   :  { %v9144_v48 = vpop.f32.mrf.mxu0  ;;  %v1188_v40 = vpop.f32.mrf.mxu1 }
 0x1c7   :  { %13324 = vst [vmem:[#allocation121_spill] sm:$0xff] %v9144_v48  ;;  %v2123_v25 = vmax.f32 %v1910_v39, %v1913_v32  ;;  %v1189_v34 = vadd.f32 %v1188_v40, %v8574_v2  ;;  %v1916_v14 = vmax.f32 %v834_v3, 0.0 }
 0x1c8   :  { %v837_v52 = vpop.f32.mrf.mxu0  ;;  %v9147_v0 = vpop.f32.mrf.mxu1 }
 0x1c9   :  { %13325 = vst [vmem:[#allocation122_spill] sm:$0xff] %v9147_v0  ;;  %v9149_v29 = vpack.c.bf16 %v2123_v25, %v2120_v60  ;;  %v838_v12 = vadd.f32 %v837_v52, %v8570_v1  ;;  %v1919_v16 = vmax.f32 %v1189_v34, 0.0 }
 0x1ca   :  { %v9153_v41 = vpop.f32.mrf.mxu0  ;;  %v1192_v17 = vpop.f32.mrf.mxu1 }
 0x1cb   :  { %13326 = vst [vmem:[#allocation123_spill] sm:$0xff] %v9149_v29  ;;  %13327 = vst [vmem:[#allocation124_spill] sm:$0xff] %v9153_v41  ;;  %v1193_v11 = vadd.f32 %v1192_v17, %v8574_v2  ;;  %v1922_v39 = vmax.f32 %v838_v12, 0.0  ;;  %v2126_v25 = vmax.f32 %v1916_v14, %v1919_v16  ;;  %v8218_v14 = vld [vmem:[%s12991_s0 + $0xb8] sm:$0xff]  }
 0x1cc   :  { %v843_v48 = vpop.f32.mrf.mxu0  ;;  %v9156_v7 = vpop.f32.mrf.mxu1  ;;  %7441 = vmatmul.mubr.msk.bf16.gmra.mxu0 %vm412_vm0, %v8217_v23 }
 0x1cd   :  { %13328 = vst [vmem:[#allocation125_spill] sm:$0xff] %v9156_v7  ;;  %1477 = vmatprep.mubr.bf16.mxu0 %v13223_v62  ;;  %v1925_v32 = vmax.f32 %v1193_v11, 0.0  ;;  %v844_v0 = vadd.f32 %v843_v48, %v8570_v1  ;;  %v13028_v48 = vsub.s32 4, %v8554_v57 }
 0x1ce   :  { %v9163_v40 = vpop.f32.mrf.mxu0  ;;  %v1198_v60 = vpop.f32.mrf.mxu1 }
 0x1cf   :  { %13329 = vst [vmem:[#allocation126_spill] sm:$0xff] %v9163_v40  ;;  %v2129_v34 = vmax.f32 %v1922_v39, %v1925_v32  ;;  %v1199_v52 = vadd.f32 %v1198_v60, %v8574_v2  ;;  %v13029_v39 = vsub.s32 1, %v8554_v57  ;;  %v1928_v32 = vmax.f32 %v844_v0, 0.0  ;;  %v8219_v0 = vld [vmem:[%s12993_s2] sm:$0x3f] }
 0x1d0   :  { %v847_v17 = vpop.f32.mrf.mxu0  ;;  %v9166_v7 = vpop.f32.mrf.mxu1 }
 0x1d1   :  { %13330 = vst [vmem:[#allocation127_spill] sm:$0xff] %v9166_v7  ;;  %v9168_v29 = vpack.c.bf16 %v2129_v34, %v2126_v25  ;;  %v848_v23 = vadd.f32 %v847_v17, %v8570_v1  ;;  %v1931_v12 = vmax.f32 %v1199_v52, 0.0  ;;  %v13030_v17 = vsub.s32 5, %v8554_v57 }
 0x1d2   :  { %v9172_v41 = vpop.f32.mrf.mxu0  ;;  %v1202_v3 = vpop.f32.mrf.mxu1 }
 0x1d3   :  { %13331 = vst [vmem:[#allocation128_spill] sm:$0xff] %v9168_v29  ;;  %13332 = vst [vmem:[#allocation129_spill] sm:$0xff] %v9172_v41  ;;  %v1203_v11 = vadd.f32 %v1202_v3, %v8574_v2  ;;  %v1934_v60 = vmax.f32 %v848_v23, 0.0  ;;  %v9196_v23 = vrot.slane %v8219_v0, %v13028_v48  ;;  %v13338_v48 = vsub.s32 2, %v8554_v57 }
 0x1d4   :  { %v853_v40 = vpop.f32.mrf.mxu0  ;;  %v9175_v16 = vpop.f32.mrf.mxu1  ;;  %7442 = vmatmul.mubr.msk.bf16.gmra.mxu0 %vm412_vm0, %v8218_v14 }
 0x1d5   :  { %13333 = vst [vmem:[#allocation130_spill] sm:$0xff] %v9175_v16  ;;  %1487 = vmatprep.mubr.bf16.mxu0 %v13223_v62  ;;  %v1937_v25 = vmax.f32 %v1203_v11, 0.0  ;;  %v2132_v16 = vmax.f32 %v1928_v32, %v1931_v12  ;;  %v9200_v11 = vrot.slane %v8219_v0, %v13029_v39  ;;  %v854_v12 = vadd.f32 %v853_v40, %v8570_v1  ;;  %v8220_v40 = vld [vmem:[%s12991_s0 + $0xc0] sm:$0xff]  }
 0x1d6   :  { %v9184_v34 = vpop.f32.mrf.mxu0  ;;  %v1208_v52 = vpop.f32.mrf.mxu1 }
 0x1d7   :  { %13334 = vst [vmem:[#allocation131_spill] sm:$0xff] %v9184_v34  ;;  %v2135_v29 = vmax.f32 %v1934_v60, %v1937_v25  ;;  %v1209_v14 = vadd.f32 %v1208_v52, %v8574_v2  ;;  %v9210_v52 = vrot.slane %v8219_v0, %v13030_v17 }
 0x1d8   :  { %v857_v7 = vpop.f32.mrf.mxu0  ;;  %v9189_v41 = vpop.f32.mrf.mxu1 }
 0x1d9   :  { %13335 = vst [vmem:[#allocation132_spill] sm:$0xff] %v9189_v41  ;;  %v9202_v3 = vpack.c.bf16 %v2135_v29, %v2132_v16  ;;  %v858_v32 = vadd.f32 %v857_v7, %v8570_v1  ;;  %v9214_v41 = vrot.slane %v8219_v0, %v13338_v48  ;;  %v1943_v34 = vmax.f32 %v1209_v14, 0.0 }
 0x1da   :  { %v9206_v60 = vpop.f32.mrf.mxu0  ;;  %v1212_v25 = vpop.f32.mrf.mxu1  ;;  %v546_v7 = vadd.f32 %v8583_v6, %v9200_v11  ;;  %v1940_v16 = vmax.f32 %v854_v12, 0.0 }
 0x1db   :  { %13336 = vst [vmem:[#allocation133_spill] sm:$0xff] %v9202_v3  ;;  %13337 = vst [vmem:[#allocation134_spill] sm:$0xff] %v9206_v60  ;;  %v1213_v39 = vadd.f32 %v1212_v25, %v8574_v2  ;;  %v1946_v48 = vmax.f32 %v858_v32, 0.0  ;;  %v550_v2 = vadd.f32 %v8592_v15, %v9200_v11  ;;  %v897_v17 = vadd.f32 %v8577_v4, %v9214_v41 }
 0x1dc   :  { %v1249_v29 = vpop.f32.mrf.mxu0  ;;  %7443 = vmatmul.mubr.msk.bf16.gmra.mxu0 %vm412_vm0, %v8220_v40  ;;  %v2138_v40 = vmax.f32 %v1940_v16, %v1943_v34  ;;  %v1569_v12 = vmax.f32 %v546_v7, 0.0  ;;  %v556_v7 = vadd.f32 %v8602_v26, %v9200_v11 }
 0x1dd   :  { %v1250_v1 = vadd.f32 %v1249_v29, %v9196_v23  ;;  %1497 = vmatprep.mubr.bf16.mxu0 %v13223_v62  ;;  %v1949_v0 = vmax.f32 %v1213_v39, 0.0  ;;  %v901_v29 = vadd.f32 %v8586_v10, %v9214_v41  ;;  %v1575_v53 = vmax.f32 %v550_v2, 0.0  ;;  %v8221_v10 = vld [vmem:[%s12991_s0 + $0xc8] sm:$0xff]  }
 0x1de   :  { %v1251_v14 = vpop.f32.mrf.mxu0  ;;  %v1570_v49 = vmax.f32 %v897_v17, 0.0  ;;  %v560_v17 = vadd.f32 %v8613_v37, %v9200_v11 }
 0x1df   :  { %v1252_v25 = vadd.f32 %v1251_v14, %v9210_v52  ;;  %v2141_v3 = vmax.f32 %v1946_v48, %v1949_v0  ;;  %v1572_v60 = vmax.f32 %v1250_v1, 0.0  ;;  %v1576_v4 = vmax.f32 %v901_v29, 0.0  ;;  %v8028_v29 = vld [vmem:[#allocation2 + $0x12c] ss:$24 sps:$4 sm:$0xff]  }
 0x1e0   :  { %v1253_v57 = vpop.f32.mrf.mxu0 }
 0x1e1   :  { %v1254_v6 = vadd.f32 %v1253_v57, %v9196_v23  ;;  %v9233_v39 = vpack.c.bf16 %v2141_v3, %v2138_v40  ;;  %v1573_v15 = vmax.f32 %v1252_v25, 0.0  ;;  %v1953_v34 = vmax.f32 %v1569_v12, %v1572_v60  ;;  %v8020_v60 = vld [vmem:[#allocation2 + $0x158] ss:$24 sps:$4 sm:$0xff]  }
 0x1e2   :  { %v1255_v32 = vpop.f32.mrf.mxu0  ;;  %v1587_v12 = vmax.f32 %v560_v17, 0.0 }
 0x1e3   :  { %v1578_v61 = vmax.f32 %v1254_v6, 0.0  ;;  %v1256_v14 = vadd.f32 %v1255_v32, %v9210_v52  ;;  %v1954_v48 = vmax.f32 %v1570_v49, %v1573_v15  ;;  %v1581_v49 = vmax.f32 %v556_v7, 0.0 }
 0x1e4   :  { %v1259_v45 = vpop.f32.mrf.mxu0  ;;  %7444 = vmatmul.mubr.msk.bf16.gmra.mxu0 %vm412_vm0, %v8221_v10 }
 0x1e5   :  { %v1956_v57 = vmax.f32 %v1575_v53, %v1578_v61  ;;  %v1579_v1 = vmax.f32 %v1256_v14, 0.0  ;;  %v1260_v3 = vadd.f32 %v1259_v45, %v9196_v23  ;;  %1507 = vmatprep.mubr.bf16.mxu0 %v13223_v62  ;;  %v907_v61 = vadd.f32 %v8596_v22, %v9214_v41 }
 0x1e6   :  { %v1261_v16 = vpop.f32.mrf.mxu0  ;;  %v911_v45 = vadd.f32 %v8605_v31, %v9214_v41  ;;  %v8026_v31 = vld [vmem:[#allocation2 + $0x128] ss:$24 sps:$4 sm:$0xff]  }
 0x1e7   :  { %v1957_v0 = vmax.f32 %v1576_v4, %v1579_v1  ;;  %v1262_v2 = vadd.f32 %v1261_v16, %v9210_v52  ;;  %v9247_v25 = vpack.c.bf16 %v1956_v57, %v1953_v34  ;;  %v1584_v40 = vmax.f32 %v1260_v3, 0.0  ;;  %v8222_v34 = vld [vmem:[%s12991_s0 + $0xd0] sm:$0xff]  }
 0x1e8   :  { %v1263_v53 = vpop.f32.mrf.mxu0  ;;  %v1582_v14 = vmax.f32 %v907_v61, 0.0  ;;  %v1588_v4 = vmax.f32 %v911_v45, 0.0  ;;  %v8031_v57 = vld [vmem:[#allocation2 + $0xfc] ss:$24 sps:$4 sm:$0xff]   ;;  %v566_v16 = vadd.f32 %v8623_v46, %v9200_v11  ;;  %v8034_v46 = vld [vmem:[#allocation2 + $0xcc] ss:$24 sps:$4 sm:$0xff]  }
 0x1e9   :  { %v9253_v26 = vpack.c.bf16 %v1957_v0, %v1954_v48  ;;  %v1264_v37 = vadd.f32 %v1263_v53, %v9196_v23  ;;  %3168 = vmatprep.mubr.bf16.mxu1 %v9247_v25  ;;  %v1585_v32 = vmax.f32 %v1262_v2, 0.0  ;;  %v1959_v1 = vmax.f32 %v1581_v49, %v1584_v40  ;;  %v8029_v53 = vld [vmem:[#allocation2 + $0xf8] ss:$24 sps:$4 sm:$0xff]  }
 0x1ea   :  { %v1265_v6 = vpop.f32.mrf.mxu0  ;;  %3169 = vmatmul.mubr.bf16.vlgmr.msra.gmra.mxu1 %v8610_v35  ;;  %v570_v48 = vadd.f32 %v8634_v58, %v9200_v11  ;;  %v921_v40 = vadd.f32 %v8626_v51, %v9214_v41  ;;  %v8032_v51 = vld [vmem:[#allocation2 + $0xc8] ss:$24 sps:$4 sm:$0xff]  }
 0x1eb   :  { %13339 = vst [vmem:[#allocation135_spill] sm:$0xff] %v9253_v26  ;;  %v1590_v15 = vmax.f32 %v1264_v37, 0.0  ;;  %v1266_v22 = vadd.f32 %v1265_v6, %v9210_v52  ;;  %3843 = vmatpush1.bf16.msra.mxu1 %v8020_v60  ;;  %v1960_v2 = vmax.f32 %v1582_v14, %v1585_v32 }
 0x1ec   :  { %v1269_v10 = vpop.f32.mrf.mxu0  ;;  %7445 = vmatmul.mubr.msk.bf16.gmra.mxu0 %vm412_vm0, %v8222_v34  ;;  %3844 = vmatprep.subr.bf16.mxu1 %v8028_v29  ;;  %v917_v29 = vadd.f32 %v8617_v42, %v9214_v41  ;;  %v8223_v34 = vld [vmem:[%s12991_s0 + $0xd8] sm:$0xff]  }
 0x1ed   :  { %v1962_v3 = vmax.f32 %v1587_v12, %v1590_v15  ;;  %v1591_v7 = vmax.f32 %v1266_v22, 0.0  ;;  %v1270_v17 = vadd.f32 %v1269_v10, %v9196_v23  ;;  %1517 = vmatprep.mubr.bf16.mxu0 %v13223_v62  ;;  %v1593_v12 = vmax.f32 %v566_v16, 0.0 }
 0x1ee   :  { %v1271_v0 = vpop.f32.mrf.mxu0  ;;  %v1599_v15 = vmax.f32 %v570_v48, 0.0  ;;  %v1594_v14 = vmax.f32 %v917_v29, 0.0  ;;  %v576_v16 = vadd.f32 %v8644_v13, %v9200_v11  ;;  %v580_v48 = vadd.f32 %v8655_v27, %v9200_v11  ;;  %v8038_v29 = vld [vmem:[#allocation2 + $0x98] ss:$24 sps:$4 sm:$0xff]   ;;  %v8043_v13 = vld [vmem:[#allocation2 + $0x6c] ss:$24 sps:$4 sm:$0xff]  }
 0x1ef   :  { %v1963_v60 = vmax.f32 %v1588_v4, %v1591_v7  ;;  %v1272_v61 = vadd.f32 %v1271_v0, %v9210_v52  ;;  %v9270_v45 = vpack.c.bf16 %v1962_v3, %v1959_v1  ;;  %3845 = vmatpush1.bf16.msra.mxu1 %v8026_v31  ;;  %v1596_v58 = vmax.f32 %v1270_v17, 0.0 }
 0x1f0   :  { %v1273_v37 = vpop.f32.mrf.mxu0  ;;  %3846 = vmatprep.subr.bf16.mxu1 %v8031_v57  ;;  %v1600_v4 = vmax.f32 %v921_v40, 0.0  ;;  %v8040_v57 = vld [vmem:[#allocation2 + $0x9c] ss:$24 sps:$4 sm:$0xff]   ;;  %v927_v40 = vadd.f32 %v8638_v8, %v9214_v41 }
 0x1f1   :  { %v9276_v49 = vpack.c.bf16 %v1963_v60, %v1960_v2  ;;  %v1274_v6 = vadd.f32 %v1273_v37, %v9196_v23  ;;  %3178 = vmatprep.mubr.bf16.mxu1 %v9270_v45  ;;  %v1597_v22 = vmax.f32 %v1272_v61, 0.0  ;;  %v1965_v1 = vmax.f32 %v1593_v12, %v1596_v58 }
 0x1f2   :  { %v1275_v32 = vpop.f32.mrf.mxu0  ;;  %3179 = vmatmul.mubr.bf16.gmra.mxu1 %v8631_v55  ;;  %v931_v37 = vadd.f32 %v8647_v19, %v9214_v41  ;;  %v1605_v12 = vmax.f32 %v576_v16, 0.0  ;;  %v8041_v19 = vld [vmem:[#allocation2 + $0x68] ss:$24 sps:$4 sm:$0xff]  }
 0x1f3   :  { %13340 = vst [vmem:[#allocation136_spill] sm:$0xff] %v9276_v49  ;;  %v1602_v42 = vmax.f32 %v1274_v6, 0.0  ;;  %v1276_v31 = vadd.f32 %v1275_v32, %v9210_v52  ;;  %3847 = vmatpush1.bf16.msra.mxu1 %v8029_v53  ;;  %v1966_v2 = vmax.f32 %v1594_v14, %v1597_v22 }
 0x1f4   :  { %v1279_v10 = vpop.f32.mrf.mxu0  ;;  %7446 = vmatmul.mubr.msk.bf16.gmra.mxu0 %vm412_vm0, %v8223_v34  ;;  %3848 = vmatprep.subr.bf16.mxu1 %v8034_v46 }
 0x1f5   :  { %v1968_v3 = vmax.f32 %v1599_v15, %v1602_v42  ;;  %v1603_v7 = vmax.f32 %v1276_v31, 0.0  ;;  %v1280_v17 = vadd.f32 %v1279_v10, %v9196_v23  ;;  %1527 = vmatprep.mubr.bf16.mxu0 %v13223_v62  ;;  %v1611_v15 = vmax.f32 %v580_v48, 0.0  ;;  %v8049_v10 = vld [vmem:[#allocation2 + $0x3c] ss:$24 sps:$4 sm:$0xff]  }
 0x1f6   :  { %v1281_v0 = vpop.f32.mrf.mxu0  ;;  %v1606_v31 = vmax.f32 %v927_v40, 0.0  ;;  %v941_v40 = vadd.f32 %v8667_v44, %v9214_v41  ;;  %v8050_v44 = vld [vmem:[#allocation2 + $0x8] ss:$24 sps:$4 sm:$0xff]  }
 0x1f7   :  { %v1969_v60 = vmax.f32 %v1600_v4, %v1603_v7  ;;  %v1282_v61 = vadd.f32 %v1281_v0, %v9210_v52  ;;  %v9293_v53 = vpack.c.bf16 %v1968_v3, %v1965_v1  ;;  %3849 = vmatpush1.bf16.msra.mxu1 %v8032_v51  ;;  %v1608_v27 = vmax.f32 %v1280_v17, 0.0  ;;  %v8224_v4 = vld [vmem:[%s12991_s0 + $0xe0] sm:$0xff]  }
 0x1f8   :  { %v1283_v46 = vpop.f32.mrf.mxu0  ;;  %3850 = vmatprep.subr.bf16.mxu1 %v8040_v57  ;;  %v1612_v51 = vmax.f32 %v931_v37, 0.0  ;;  %v586_v7 = vadd.f32 %v8664_v38, %v9200_v11  ;;  %v590_v17 = vadd.f32 %v8676_v50, %v9200_v11  ;;  %v8052_v38 = vld [vmem:[#allocation2 + $0xc] ss:$24 sps:$4 sm:$0xff]  }
 0x1f9   :  { %v9299_v58 = vpack.c.bf16 %v1969_v60, %v1966_v2  ;;  %v1284_v6 = vadd.f32 %v1283_v46, %v9196_v23  ;;  %3188 = vmatprep.mubr.bf16.mxu1 %v9293_v53  ;;  %v1609_v22 = vmax.f32 %v1282_v61, 0.0  ;;  %v1971_v34 = vmax.f32 %v1605_v12, %v1608_v27  ;;  %v8047_v61 = vld [vmem:[#allocation2 + $0x38] ss:$24 sps:$4 sm:$0xff]  }
 0x1fa   :  { %v1285_v32 = vpop.f32.mrf.mxu0  ;;  %3189 = vmatmul.mubr.bf16.gmra.mxu1 %v8652_v24  ;;  %v1617_v27 = vmax.f32 %v586_v7, 0.0  ;;  %v1623_v12 = vmax.f32 %v590_v17, 0.0 }
 0x1fb   :  { %13341 = vst [vmem:[#allocation137_spill] sm:$0xff] %v9299_v58  ;;  %v1614_v8 = vmax.f32 %v1284_v6, 0.0  ;;  %v1286_v42 = vadd.f32 %v1285_v32, %v9210_v52  ;;  %3851 = vmatpush1.bf16.msra.mxu1 %v8038_v29  ;;  %v1972_v48 = vmax.f32 %v1606_v31, %v1609_v22  ;;  %v937_v29 = vadd.f32 %v8659_v33, %v9214_v41  ;;  %v8058_v31 = vld [vmem:[#allocation2 + $0x2dc] ss:$24 sps:$4 sm:$0xff]  }
 0x1fc   :  { %v1289_v14 = vpop.f32.mrf.mxu0  ;;  %7447 = vmatmul.mubr.msk.bf16.gmra.mxu0 %vm412_vm0, %v8224_v4  ;;  %3852 = vmatprep.subr.bf16.mxu1 %v8043_v13 }
 0x1fd   :  { %v1974_v57 = vmax.f32 %v1611_v15, %v1614_v8  ;;  %v1615_v1 = vmax.f32 %v1286_v42, 0.0  ;;  %v1290_v3 = vadd.f32 %v1289_v14, %v9196_v23  ;;  %1537 = vmatprep.mubr.bf16.mxu0 %v13223_v62  ;;  %v1618_v22 = vmax.f32 %v937_v29, 0.0 }
 0x1fe   :  { %v1291_v16 = vpop.f32.mrf.mxu0  ;;  %v1624_v8 = vmax.f32 %v941_v40, 0.0 }
 0x1ff   :  { %v1975_v0 = vmax.f32 %v1612_v51, %v1615_v1  ;;  %v1292_v2 = vadd.f32 %v1291_v16, %v9210_v52  ;;  %v9316_v60 = vpack.c.bf16 %v1974_v57, %v1971_v34  ;;  %3853 = vmatpush1.bf16.msra.mxu1 %v8041_v19  ;;  %v1620_v50 = vmax.f32 %v1290_v3, 0.0  ;;  %v8225_v19 = vld [vmem:[%s12991_s0 + $0xe8] sm:$0xff]  }
 0x200   :  { %v1293_v37 = vpop.f32.mrf.mxu0  ;;  %3854 = vmatprep.subr.bf16.mxu1 %v8049_v10  ;;  %v596_v34 = vadd.f32 %v8685_v9, %v9200_v11  ;;  %v600_v57 = vadd.f32 %v8697_v28, %v9200_v11  ;;  %v8061_v9 = vld [vmem:[#allocation2 + $0x2ac] ss:$24 sps:$4 sm:$0xff]  }
 0x201   :  { %13342 = vst [vmem:[#allocation138_spill] sm:$0xff] %v9316_v60  ;;  %v9322_v46 = vpack.c.bf16 %v1975_v0, %v1972_v48  ;;  %v1294_v13 = vadd.f32 %v1293_v37, %v9196_v23  ;;  %3198 = vmatprep.mubr.bf16.mxu1 %v9316_v60  ;;  %v1621_v32 = vmax.f32 %v1292_v2, 0.0  ;;  %v1977_v51 = vmax.f32 %v1617_v27, %v1620_v50  ;;  %v8056_v48 = vld [vmem:[#allocation2 + $0x2d8] ss:$24 sps:$4 sm:$0xff]  }
 0x202   :  { %v1295_v6 = vpop.f32.mrf.mxu0  ;;  %3199 = vmatmul.mubr.bf16.gmra.mxu1 %v8672_v47  ;;  %v947_v0 = vadd.f32 %v8680_v63, %v9214_v41  ;;  %v951_v2 = vadd.f32 %v8688_v18, %v9214_v41  ;;  %v1629_v37 = vmax.f32 %v596_v34, 0.0  ;;  %v1635_v50 = vmax.f32 %v600_v57, 0.0  ;;  %v8059_v18 = vld [vmem:[#allocation2 + $0x2a8] ss:$24 sps:$4 sm:$0xff]  }
 0x203   :  { %13343 = vst [vmem:[#allocation139_spill] sm:$0xff] %v9322_v46  ;;  %v1626_v33 = vmax.f32 %v1294_v13, 0.0  ;;  %v1296_v15 = vadd.f32 %v1295_v6, %v9210_v52  ;;  %3855 = vmatpush1.bf16.msra.mxu1 %v8047_v61  ;;  %v1978_v3 = vmax.f32 %v1618_v22, %v1621_v32  ;;  %v957_v34 = vadd.f32 %v8701_v36, %v9214_v41 }
 0x204   :  { %v1299_v42 = vpop.f32.mrf.mxu0  ;;  %7448 = vmatmul.mubr.msk.bf16.gmra.mxu0 %vm412_vm0, %v8225_v19  ;;  %3856 = vmatprep.subr.bf16.mxu1 %v8052_v38  ;;  %v1630_v6 = vmax.f32 %v947_v0, 0.0  ;;  %v610_v19 = vadd.f32 %v8718_v5, %v9200_v11  ;;  %v961_v57 = vadd.f32 %v8709_v54, %v9214_v41 }
 0x205   :  { %v1980_v14 = vmax.f32 %v1623_v12, %v1626_v33  ;;  %v1627_v4 = vmax.f32 %v1296_v15, 0.0  ;;  %v1300_v10 = vadd.f32 %v1299_v42, %v9196_v23  ;;  %1547 = vmatprep.mubr.bf16.mxu0 %v13223_v62  ;;  %v1636_v12 = vmax.f32 %v951_v2, 0.0  ;;  %v8226_v33 = vld [vmem:[%s12991_s0 + $0xf0] sm:$0xff]  }
 0x206   :  { %v1301_v1 = vpop.f32.mrf.mxu0  ;;  %v606_v42 = vadd.f32 %v8706_v43, %v9200_v11  ;;  %v1647_v2 = vmax.f32 %v610_v19, 0.0  ;;  %v1642_v54 = vmax.f32 %v957_v34, 0.0  ;;  %v8046_v34 = vld [vmem:[#allocation2 + $0x42c] ss:$24 sps:$4 sm:$0xff]  }
 0x207   :  { %v1981_v7 = vmax.f32 %v1624_v8, %v1627_v4  ;;  %v1302_v17 = vadd.f32 %v1301_v1, %v9210_v52  ;;  %v9339_v16 = vpack.c.bf16 %v1980_v14, %v1977_v51  ;;  %3857 = vmatpush1.bf16.msra.mxu1 %v8050_v44  ;;  %v1632_v28 = vmax.f32 %v1300_v10, 0.0 }
 0x208   :  { %v1303_v61 = vpop.f32.mrf.mxu0  ;;  %3858 = vmatprep.subr.bf16.mxu1 %v8058_v31 }
 0x209   :  { %13344 = vst [vmem:[#allocation140_spill] sm:$0xff] %v9339_v16  ;;  %v9345_v29 = vpack.c.bf16 %v1981_v7, %v1978_v3  ;;  %v1304_v40 = vadd.f32 %v1303_v61, %v9196_v23  ;;  %3208 = vmatprep.mubr.bf16.mxu1 %v9339_v16  ;;  %v1633_v13 = vmax.f32 %v1302_v17, 0.0  ;;  %v1983_v15 = vmax.f32 %v1629_v37, %v1632_v28  ;;  %v8065_v7 = vld [vmem:[#allocation2 + $0x278] ss:$24 sps:$4 sm:$0xff]   ;;  %v8067_v17 = vld [vmem:[#allocation2 + $0x27c] ss:$24 sps:$4 sm:$0xff]  }
 0x20a   :  { %v1305_v38 = vpop.f32.mrf.mxu0  ;;  %3209 = vmatmul.mubr.bf16.gmra.mxu1 %v8693_v21  ;;  %v1648_v28 = vmax.f32 %v961_v57, 0.0  ;;  %v8227_v37 = vld [vmem:[%s12991_s0 + $0xf8] sm:$0xff]  }
 0x20b   :  { %13345 = vst [vmem:[#allocation141_spill] sm:$0xff] %v9345_v29  ;;  %v1638_v63 = vmax.f32 %v1304_v40, 0.0  ;;  %v1306_v27 = vadd.f32 %v1305_v38, %v9210_v52  ;;  %3859 = vmatpush2.bf16.msra.mxu1 %v8056_v48  ;;  %v1984_v51 = vmax.f32 %v1630_v6, %v1633_v13  ;;  %v1641_v48 = vmax.f32 %v606_v42, 0.0 }
 0x20c   :  { %v1309_v32 = vpop.f32.mrf.mxu0  ;;  %7449 = vmatmul.mubr.msk.bf16.gmra.mxu0 %vm412_vm0, %v8226_v33  ;;  %3860 = vmatprep.subr.bf16.mxu1 %v8061_v9 }
 0x20d   :  { %v1986_v44 = vmax.f32 %v1635_v50, %v1638_v63  ;;  %v1639_v22 = vmax.f32 %v1306_v27, 0.0  ;;  %v1310_v8 = vadd.f32 %v1309_v32, %v9196_v23  ;;  %1557 = vmatprep.mubr.bf16.mxu0 %v13223_v62  ;;  %v616_v27 = vadd.f32 %v8726_v30, %v9200_v11 }
 0x20e   :  { %v1311_v31 = vpop.f32.mrf.mxu0 }
 0x20f   :  { %v1987_v14 = vmax.f32 %v1636_v12, %v1639_v22  ;;  %v1312_v4 = vadd.f32 %v1311_v31, %v9210_v52  ;;  %v9362_v10 = vpack.c.bf16 %v1986_v44, %v1983_v15  ;;  %3861 = vmatpush2.bf16.msra.mxu1 %v8059_v18  ;;  %v1644_v43 = vmax.f32 %v1310_v8, 0.0  ;;  %v13349_v22 = vld [vmem:[#allocation13_spill] sm:$0xff] }
 0x210   :  { %v1313_v1 = vpop.f32.mrf.mxu0  ;;  %3862 = vmatprep.subr.bf16.mxu1 %v8067_v17  ;;  %v620_v18 = vadd.f32 %v8735_v56, %v9200_v11  ;;  %v967_v44 = vadd.f32 %v8722_v20, %v9214_v41  ;;  %v971_v8 = vadd.f32 %v13349_v22, %v9214_v41  ;;  %v8035_v56 = vld [vmem:[#allocation2 + $0x458] ss:$24 sps:$4 sm:$0xff]  }
 0x211   :  { %13346 = vst [vmem:[#allocation142_spill] sm:$0xff] %v9362_v10  ;;  %v9368_v3 = vpack.c.bf16 %v1987_v14, %v1984_v51  ;;  %v1314_v5 = vadd.f32 %v1313_v1, %v9196_v23  ;;  %3218 = vmatprep.mubr.bf16.mxu1 %v9362_v10  ;;  %v1645_v61 = vmax.f32 %v1312_v4, 0.0  ;;  %v1989_v38 = vmax.f32 %v1641_v48, %v1644_v43  ;;  %v13351_v4 = vld [vmem:[#allocation14_spill] sm:$0xff] }
 0x212   :  { %v1315_v0 = vpop.f32.mrf.mxu0  ;;  %3219 = vmatmul.mubr.bf16.gmra.mxu1 %v8714_v59  ;;  %v1653_v51 = vmax.f32 %v616_v27, 0.0  ;;  %v1659_v57 = vmax.f32 %v620_v18, 0.0  ;;  %v13355_v18 = vld [vmem:[#allocation15_spill] sm:$0xff] }
 0x213   :  { %13347 = vst [vmem:[#allocation143_spill] sm:$0xff] %v9368_v3  ;;  %v1650_v36 = vmax.f32 %v1314_v5, 0.0  ;;  %v1316_v9 = vadd.f32 %v1315_v0, %v9210_v52  ;;  %3863 = vmatpush2.bf16.msra.mxu1 %v8065_v7  ;;  %v1990_v12 = vmax.f32 %v1642_v54, %v1645_v61  ;;  %v1654_v5 = vmax.f32 %v967_v44, 0.0  ;;  %v8053_v44 = vld [vmem:[#allocation2 + $0x3f8] ss:$24 sps:$4 sm:$0xff]  }
 0x214   :  { %v1319_v40 = vpop.f32.mrf.mxu0  ;;  %7450 = vmatmul.mubr.msk.bf16.gmra.mxu0 %vm412_vm0, %v8227_v37  ;;  %v1660_v7 = vmax.f32 %v971_v8, 0.0 }
 0x215   :  { %v1992_v50 = vmax.f32 %v1647_v2, %v1650_v36  ;;  %v1651_v13 = vmax.f32 %v1316_v9, 0.0  ;;  %v1320_v63 = vadd.f32 %v1319_v40, %v9196_v23  ;;  %3521 = vmatprep.mubr.bf16.mxu0 %v13223_v62  ;;  %v8044_v36 = vld [vmem:[#allocation2 + $0x428] ss:$24 sps:$4 sm:$0xff]  }
 0x216   :  { %v1321_v6 = vpop.f32.mrf.mxu0  ;;  %v13352_v9 = vld [vmem:[#allocation16_spill] sm:$0xff] }
 0x217   :  { %v1993_v32 = vmax.f32 %v1648_v28, %v1651_v13  ;;  %v1322_v33 = vadd.f32 %v1321_v6, %v9210_v52  ;;  %v9385_v15 = vpack.c.bf16 %v1992_v50, %v1989_v38  ;;  %v1656_v30 = vmax.f32 %v1320_v63, 0.0  ;;  %v13353_v28 = vld [vmem:[#allocation19_spill] sm:$0xff] }
 0x218   :  { %v1323_v42 = vpop.f32.mrf.mxu0  ;;  %v626_v54 = vadd.f32 %v13352_v9, %v9200_v11  ;;  %v630_v40 = vadd.f32 %v13353_v28, %v9200_v11  ;;  %v8055_v38 = vld [vmem:[#allocation2 + $0x3fc] ss:$24 sps:$4 sm:$0xff]   ;;  %v977_v6 = vadd.f32 %v13355_v18, %v9214_v41  ;;  %v13359_v9 = vld [vmem:[#allocation21_spill] sm:$0xff]  ;;  %v13360_v28 = vld [vmem:[#allocation24_spill] sm:$0xff] }
 0x219   :  { %13348 = vst [vmem:[#allocation144_spill] sm:$0xff] %v9385_v15  ;;  %v9391_v19 = vpack.c.bf16 %v1993_v32, %v1990_v12  ;;  %v1324_v31 = vadd.f32 %v1323_v42, %v9196_v23  ;;  %3228 = vmatprep.mubr.bf16.mxu1 %v9385_v15  ;;  %v1657_v1 = vmax.f32 %v1322_v33, 0.0  ;;  %v1995_v48 = vmax.f32 %v1653_v51, %v1656_v30  ;;  %v13356_v12 = vld [vmem:[#allocation17_spill] sm:$0xff] }
 0x21a   :  { %v1325_v14 = vpop.f32.mrf.mxu0  ;;  %3229 = vmatmul.mubr.bf16.gmra.mxu1 %v13351_v4  ;;  %v981_v32 = vadd.f32 %v13356_v12, %v9214_v41  ;;  %v8068_v30 = vld [vmem:[#allocation2 + $0x248] ss:$24 sps:$4 sm:$0xff]  }
 0x21b   :  { %13350 = vst [vmem:[#allocation13_spill] sm:$0xff] %v9391_v19  ;;  %v1662_v20 = vmax.f32 %v1324_v31, 0.0  ;;  %v1326_v43 = vadd.f32 %v1325_v14, %v9210_v52  ;;  %v1996_v50 = vmax.f32 %v1654_v5, %v1657_v1  ;;  %v8070_v31 = vld [vmem:[#allocation2 + $0x24c] ss:$24 sps:$4 sm:$0xff]   ;;  %v13358_v14 = vld [vmem:[#allocation18_spill] sm:$0xff]  ;;  %v1666_v5 = vmax.f32 %v977_v6, 0.0 }
 0x21c   :  { %v1329_v17 = vpop.f32.mrf.mxu0  ;;  %3522 = vmatmul.mubr.bf16.vlgmr.msra.gmra.mxu0 %v9253_v26  ;;  %3864 = vmatprep.subr.bf16.mxu1 %v8070_v31  ;;  %v13362_v6 = vld [vmem:[#allocation20_spill] sm:$0xff]  ;;  %v8071_v31 = vld [vmem:[#allocation2 + $0x398] ss:$24 sps:$4 sm:$0xff]  }
 0x21d   :  { %v1998_v0 = vmax.f32 %v1659_v57, %v1662_v20  ;;  %v1663_v2 = vmax.f32 %v1326_v43, 0.0  ;;  %v1330_v61 = vadd.f32 %v1329_v17, %v9196_v23  ;;  %4196 = vmatpush1.bf16.msra.mxu0 %v8035_v56  ;;  %3531 = vmatprep.mubr.bf16.mxu0 %v13223_v62  ;;  %v1665_v56 = vmax.f32 %v626_v54, 0.0 }
 0x21e   :  { %v1331_v37 = vpop.f32.mrf.mxu0  ;;  %4197 = vmatprep.subr.bf16.mxu0 %v8046_v34  ;;  %v8064_v34 = vld [vmem:[#allocation2 + $0x3cc] ss:$24 sps:$4 sm:$0xff]   ;;  %v1671_v57 = vmax.f32 %v630_v40, 0.0  ;;  %3865 = vmatpush2.bf16.msra.mxu1 %v8068_v30  ;;  %v636_v54 = vadd.f32 %v13359_v9, %v9200_v11  ;;  %v640_v40 = vadd.f32 %v13360_v28, %v9200_v11  ;;  %v987_v12 = vadd.f32 %v13362_v6, %v9214_v41 }
 0x21f   :  { %v1999_v13 = vmax.f32 %v1660_v7, %v1663_v2  ;;  %v1332_v63 = vadd.f32 %v1331_v37, %v9210_v52  ;;  %v9405_v27 = vpack.c.bf16 %v1998_v0, %v1995_v48  ;;  %v1668_v8 = vmax.f32 %v1330_v61, 0.0 }
 0x220   :  { %v1333_v33 = vpop.f32.mrf.mxu0  ;;  %v1672_v7 = vmax.f32 %v981_v32, 0.0  ;;  %v13363_v32 = vld [vmem:[#allocation22_spill] sm:$0xff] }
 0x221   :  { %13354 = vst [vmem:[#allocation16_spill] sm:$0xff] %v9405_v27  ;;  %v9411_v22 = vpack.c.bf16 %v1999_v13, %v1996_v50  ;;  %v1334_v42 = vadd.f32 %v1333_v33, %v9196_v23  ;;  %3238 = vmatprep.mubr.bf16.mxu1 %v9405_v27  ;;  %4198 = vmatpush1.bf16.msra.mxu0 %v8044_v36  ;;  %v1669_v1 = vmax.f32 %v1332_v63, 0.0  ;;  %v8062_v36 = vld [vmem:[#allocation2 + $0x3c8] ss:$24 sps:$4 sm:$0xff]  }
 0x222   :  { %v1335_v51 = vpop.f32.mrf.mxu0  ;;  %3239 = vmatmul.mubr.bf16.gmra.mxu1 %v13358_v14  ;;  %4199 = vmatprep.subr.bf16.mxu0 %v8055_v38  ;;  %v2001_v48 = vmax.f32 %v1665_v56, %v1668_v8  ;;  %v8073_v38 = vld [vmem:[#allocation2 + $0x39c] ss:$24 sps:$4 sm:$0xff]   ;;  %v991_v33 = vadd.f32 %v13363_v32, %v9214_v41  ;;  %v1677_v56 = vmax.f32 %v636_v54, 0.0  ;;  %v13367_v54 = vld [vmem:[#allocation29_spill] sm:$0xff] }
 0x223   :  { %13357 = vst [vmem:[#allocation19_spill] sm:$0xff] %v9411_v22  ;;  %v1674_v20 = vmax.f32 %v1334_v42, 0.0  ;;  %v1336_v43 = vadd.f32 %v1335_v51, %v9210_v52  ;;  %v2002_v50 = vmax.f32 %v1666_v5, %v1669_v1  ;;  %v1678_v5 = vmax.f32 %v987_v12, 0.0  ;;  %v13370_v12 = vld [vmem:[#allocation27_spill] sm:$0xff] }
 0x224   :  { %v1339_v17 = vpop.f32.mrf.mxu0  ;;  %3532 = vmatmul.mubr.bf16.gmra.mxu0 %v9276_v49  ;;  %v650_v28 = vadd.f32 %v13367_v54, %v9200_v11  ;;  %v1001_v32 = vadd.f32 %v13370_v12, %v9214_v41  ;;  %v13373_v54 = vld [vmem:[#allocation31_spill] sm:$0xff] }
 0x225   :  { %v2004_v0 = vmax.f32 %v1671_v57, %v1674_v20  ;;  %v1675_v2 = vmax.f32 %v1336_v43, 0.0  ;;  %v1340_v61 = vadd.f32 %v1339_v17, %v9196_v23  ;;  %3541 = vmatprep.mubr.bf16.mxu0 %v13223_v62  ;;  %4200 = vmatpush1.bf16.msra.mxu0 %v8053_v44  ;;  %v1683_v57 = vmax.f32 %v640_v40, 0.0 }
 0x226   :  { %v1341_v37 = vpop.f32.mrf.mxu0  ;;  %4201 = vmatprep.subr.bf16.mxu0 %v8064_v34  ;;  %v13365_v34 = vld [vmem:[#allocation23_spill] sm:$0xff] }
 0x227   :  { %v2005_v13 = vmax.f32 %v1672_v7, %v1675_v2  ;;  %v1342_v63 = vadd.f32 %v1341_v37, %v9210_v52  ;;  %v9425_v18 = vpack.c.bf16 %v2004_v0, %v2001_v48  ;;  %v1680_v42 = vmax.f32 %v1340_v61, 0.0 }
 0x228   :  { %v1343_v44 = vpop.f32.mrf.mxu0  ;;  %v1684_v7 = vmax.f32 %v991_v33, 0.0 }
 0x229   :  { %13361 = vst [vmem:[#allocation15_spill] sm:$0xff] %v9425_v18  ;;  %v9431_v8 = vpack.c.bf16 %v2005_v13, %v2002_v50  ;;  %v1344_v30 = vadd.f32 %v1343_v44, %v9196_v23  ;;  %3248 = vmatprep.mubr.bf16.mxu1 %v9425_v18  ;;  %4202 = vmatpush1.bf16.msra.mxu0 %v8062_v36  ;;  %v1681_v1 = vmax.f32 %v1342_v63, 0.0  ;;  %v13366_v36 = vld [vmem:[#allocation26_spill] sm:$0xff]  ;;  %v13369_v63 = vld [vmem:[#allocation25_spill] sm:$0xff] }
 0x22a   :  { %v1345_v51 = vpop.f32.mrf.mxu0  ;;  %3249 = vmatmul.mubr.bf16.gmra.mxu1 %v13365_v34  ;;  %4203 = vmatprep.subr.bf16.mxu0 %v8073_v38  ;;  %v2007_v48 = vmax.f32 %v1677_v56, %v1680_v42  ;;  %v646_v9 = vadd.f32 %v13366_v36, %v9200_v11  ;;  %v997_v6 = vadd.f32 %v13369_v63, %v9214_v41  ;;  %v8076_v56 = vld [vmem:[#allocation2 + $0x21c] ss:$24 sps:$4 sm:$0xff]  }
 0x22b   :  { %13364 = vst [vmem:[#allocation17_spill] sm:$0xff] %v9431_v8  ;;  %v1686_v20 = vmax.f32 %v1344_v30, 0.0  ;;  %v1346_v43 = vadd.f32 %v1345_v51, %v9210_v52  ;;  %v2008_v37 = vmax.f32 %v1678_v5, %v1681_v1  ;;  %v13372_v1 = vld [vmem:[#allocation28_spill] sm:$0xff]  ;;  %3866 = vmatprep.subr.bf16.mxu1 %v8076_v56 }
 0x22c   :  { %v1349_v17 = vpop.f32.mrf.mxu0  ;;  %3542 = vmatmul.mubr.bf16.gmra.mxu0 %v9299_v58  ;;  %v1689_v51 = vmax.f32 %v646_v9, 0.0 }
 0x22d   :  { %v2010_v0 = vmax.f32 %v1683_v57, %v1686_v20  ;;  %v1687_v2 = vmax.f32 %v1346_v43, 0.0  ;;  %v1350_v61 = vadd.f32 %v1349_v17, %v9196_v23  ;;  %3551 = vmatprep.mubr.bf16.mxu0 %v13223_v62  ;;  %4204 = vmatpush1.bf16.msra.mxu0 %v8071_v31  ;;  %v8074_v31 = vld [vmem:[#allocation2 + $0x218] ss:$24 sps:$4 sm:$0xff]   ;;  %v1695_v20 = vmax.f32 %v650_v28, 0.0 }
 0x22e   :  { %v1351_v40 = vpop.f32.mrf.mxu0  ;;  %v1690_v17 = vmax.f32 %v997_v6, 0.0  ;;  %3867 = vmatpush2.bf16.msra.mxu1 %v8074_v31  ;;  %v656_v28 = vadd.f32 %v13373_v54, %v9200_v11 }
 0x22f   :  { %v2011_v38 = vmax.f32 %v1684_v7, %v1687_v2  ;;  %v1352_v50 = vadd.f32 %v1351_v40, %v9210_v52  ;;  %v9445_v13 = vpack.c.bf16 %v2010_v0, %v2007_v48  ;;  %v1692_v42 = vmax.f32 %v1350_v61, 0.0  ;;  %v13374_v40 = vld [vmem:[#allocation34_spill] sm:$0xff] }
 0x230   :  { %v1353_v33 = vpop.f32.mrf.mxu0  ;;  %v1696_v48 = vmax.f32 %v1001_v32, 0.0  ;;  %v13376_v32 = vld [vmem:[#allocation30_spill] sm:$0xff] }
 0x231   :  { %13368 = vst [vmem:[#allocation21_spill] sm:$0xff] %v9445_v13  ;;  %v9451_v44 = vpack.c.bf16 %v2011_v38, %v2008_v37  ;;  %v1354_v30 = vadd.f32 %v1353_v33, %v9196_v23  ;;  %3258 = vmatprep.mubr.bf16.mxu1 %v9445_v13  ;;  %v1693_v43 = vmax.f32 %v1352_v50, 0.0  ;;  %v2013_v2 = vmax.f32 %v1689_v51, %v1692_v42  ;;  %v13377_v42 = vld [vmem:[#allocation32_spill] sm:$0xff] }
 0x232   :  { %v1355_v57 = vpop.f32.mrf.mxu0  ;;  %3259 = vmatmul.mubr.bf16.gmra.mxu1 %v13372_v1  ;;  %v660_v37 = vadd.f32 %v13374_v40, %v9200_v11  ;;  %v1007_v33 = vadd.f32 %v13376_v32, %v9214_v41 }
 0x233   :  { %13371 = vst [vmem:[#allocation24_spill] sm:$0xff] %v9451_v44  ;;  %v1698_v5 = vmax.f32 %v1354_v30, 0.0  ;;  %v1356_v7 = vadd.f32 %v1355_v57, %v9210_v52  ;;  %v2014_v50 = vmax.f32 %v1690_v17, %v1693_v43  ;;  %v1011_v30 = vadd.f32 %v13377_v42, %v9214_v41 }
 0x234   :  { %v1359_v0 = vpop.f32.mrf.mxu0  ;;  %3552 = vmatmul.mubr.bf16.gmra.mxu0 %v9322_v46 }
 0x235   :  { %v2016_v61 = vmax.f32 %v1695_v20, %v1698_v5  ;;  %v1699_v36 = vmax.f32 %v1356_v7, 0.0  ;;  %v1360_v9 = vadd.f32 %v1359_v0, %v9196_v23  ;;  %3561 = vmatprep.mubr.bf16.mxu0 %v13223_v62  ;;  %v1701_v20 = vmax.f32 %v656_v28, 0.0  ;;  %v13379_v5 = vld [vmem:[#allocation33_spill] sm:$0xff]  ;;  %v13380_v28 = vld [vmem:[#allocation36_spill] sm:$0xff] }
 0x236   :  { %v1361_v38 = vpop.f32.mrf.mxu0  ;;  %v1707_v7 = vmax.f32 %v660_v37, 0.0  ;;  %v13381_v37 = vld [vmem:[#allocation39_spill] sm:$0xff] }
 0x237   :  { %v2017_v63 = vmax.f32 %v1696_v48, %v1699_v36  ;;  %v1362_v6 = vadd.f32 %v1361_v38, %v9210_v52  ;;  %v9465_v12 = vpack.c.bf16 %v2016_v61, %v2013_v2  ;;  %v1704_v51 = vmax.f32 %v1360_v9, 0.0 }
 0x238   :  { %v1363_v31 = vpop.f32.mrf.mxu0  ;;  %v1702_v2 = vmax.f32 %v1007_v33, 0.0  ;;  %v1708_v61 = vmax.f32 %v1011_v30, 0.0 }
 0x239   :  { %13375 = vst [vmem:[#allocation20_spill] sm:$0xff] %v9465_v12  ;;  %v9471_v56 = vpack.c.bf16 %v2017_v63, %v2014_v50  ;;  %v1364_v57 = vadd.f32 %v1363_v31, %v9196_v23  ;;  %3268 = vmatprep.mubr.bf16.mxu1 %v9465_v12  ;;  %v1705_v17 = vmax.f32 %v1362_v6, 0.0  ;;  %v2019_v54 = vmax.f32 %v1701_v20, %v1704_v51  ;;  %v13383_v31 = vld [vmem:[#allocation35_spill] sm:$0xff] }
 0x23a   :  { %v1365_v43 = vpop.f32.mrf.mxu0  ;;  %3269 = vmatmul.mubr.bf16.gmra.mxu1 %v13379_v5  ;;  %v666_v50 = vadd.f32 %v13380_v28, %v9200_v11  ;;  %v670_v63 = vadd.f32 %v13381_v37, %v9200_v11  ;;  %v1017_v51 = vadd.f32 %v13383_v31, %v9214_v41 }
 0x23b   :  { %13378 = vst [vmem:[#allocation22_spill] sm:$0xff] %v9471_v56  ;;  %v1710_v48 = vmax.f32 %v1364_v57, 0.0  ;;  %v1366_v0 = vadd.f32 %v1365_v43, %v9210_v52  ;;  %v2020_v32 = vmax.f32 %v1702_v2, %v1705_v17  ;;  %v13384_v57 = vld [vmem:[#allocation37_spill] sm:$0xff] }
 0x23c   :  { %v1369_v36 = vpop.f32.mrf.mxu0  ;;  %3562 = vmatmul.mubr.bf16.gmra.mxu0 %v9345_v29  ;;  %v1021_v20 = vadd.f32 %v13384_v57, %v9214_v41  ;;  %v8077_v17 = vld [vmem:[#allocation2 + $0x1e8] ss:$24 sps:$4 sm:$0xff]   ;;  %v8079_v2 = vld [vmem:[#allocation2 + $0x1ec] ss:$24 sps:$4 sm:$0xff]   ;;  %v1719_v28 = vmax.f32 %v670_v63, 0.0 }
 0x23d   :  { %v2022_v9 = vmax.f32 %v1707_v7, %v1710_v48  ;;  %v1711_v40 = vmax.f32 %v1366_v0, 0.0  ;;  %v1370_v38 = vadd.f32 %v1369_v36, %v9196_v23  ;;  %3571 = vmatprep.mubr.bf16.mxu0 %v13223_v62  ;;  %3868 = vmatprep.subr.bf16.mxu1 %v8079_v2  ;;  %v13387_v63 = vld [vmem:[#allocation41_spill] sm:$0xff] }
 0x23e   :  { %v1371_v6 = vpop.f32.mrf.mxu0  ;;  %3869 = vmatpush2.bf16.msra.mxu1 %v8077_v17 }
 0x23f   :  { %v2023_v33 = vmax.f32 %v1708_v61, %v1711_v40  ;;  %v1372_v42 = vadd.f32 %v1371_v6, %v9210_v52  ;;  %v9485_v30 = vpack.c.bf16 %v2022_v9, %v2019_v54  ;;  %v1716_v48 = vmax.f32 %v1370_v38, 0.0  ;;  %v13386_v54 = vld [vmem:[#allocation38_spill] sm:$0xff]  ;;  %v8080_v9 = vld [vmem:[#allocation2 + $0x368] ss:$24 sps:$4 sm:$0xff]   ;;  %v8082_v40 = vld [vmem:[#allocation2 + $0x36c] ss:$24 sps:$4 sm:$0xff]  }
 0x240   :  { %v1373_v43 = vpop.f32.mrf.mxu0  ;;  %v1713_v61 = vmax.f32 %v666_v50, 0.0  ;;  %v1720_v38 = vmax.f32 %v1021_v20, 0.0  ;;  %4205 = vmatprep.subr.bf16.mxu0 %v8082_v40 }
 0x241   :  { %13382 = vst [vmem:[#allocation26_spill] sm:$0xff] %v9485_v30  ;;  %v9491_v7 = vpack.c.bf16 %v2023_v33, %v2020_v32  ;;  %v1374_v0 = vadd.f32 %v1373_v43, %v9196_v23  ;;  %3278 = vmatprep.mubr.bf16.mxu1 %v9485_v30  ;;  %v1717_v37 = vmax.f32 %v1372_v42, 0.0  ;;  %v1714_v32 = vmax.f32 %v1017_v51, 0.0  ;;  %4206 = vmatpush1.bf16.msra.mxu0 %v8080_v9 }
 0x242   :  { %v1375_v36 = vpop.f32.mrf.mxu0  ;;  %3279 = vmatmul.mubr.bf16.gmra.mxu1 %v13386_v54  ;;  %v2025_v57 = vmax.f32 %v1713_v61, %v1716_v48  ;;  %v676_v42 = vadd.f32 %v13387_v63, %v9200_v11  ;;  %v13390_v61 = vld [vmem:[#allocation40_spill] sm:$0xff] }
 0x243   :  { %13385 = vst [vmem:[#allocation29_spill] sm:$0xff] %v9491_v7  ;;  %v1722_v6 = vmax.f32 %v1374_v0, 0.0  ;;  %v1376_v31 = vadd.f32 %v1375_v36, %v9210_v52  ;;  %v13388_v0 = vld [vmem:[#allocation44_spill] sm:$0xff]  ;;  %v2026_v20 = vmax.f32 %v1714_v32, %v1717_v37  ;;  %v13393_v32 = vld [vmem:[#allocation43_spill] sm:$0xff] }
 0x244   :  { %v1379_v33 = vpop.f32.mrf.mxu0  ;;  %3572 = vmatmul.mubr.bf16.gmra.mxu0 %v9368_v3  ;;  %v680_v2 = vadd.f32 %v13388_v0, %v9200_v11  ;;  %v1725_v9 = vmax.f32 %v676_v42, 0.0  ;;  %v13394_v42 = vld [vmem:[#allocation46_spill] sm:$0xff] }
 0x245   :  { %v2028_v43 = vmax.f32 %v1719_v28, %v1722_v6  ;;  %v1723_v50 = vmax.f32 %v1376_v31, 0.0  ;;  %v1380_v29 = vadd.f32 %v1379_v33, %v9196_v23  ;;  %3581 = vmatprep.mubr.bf16.mxu0 %v13223_v62  ;;  %v1027_v28 = vadd.f32 %v13390_v61, %v9214_v41  ;;  %v13391_v6 = vld [vmem:[#allocation42_spill] sm:$0xff] }
 0x246   :  { %v1381_v51 = vpop.f32.mrf.mxu0  ;;  %v1031_v17 = vadd.f32 %v13391_v6, %v9214_v41 }
 0x247   :  { %v2029_v36 = vmax.f32 %v1720_v38, %v1723_v50  ;;  %v1382_v40 = vadd.f32 %v1381_v51, %v9210_v52  ;;  %v9505_v48 = vpack.c.bf16 %v2028_v43, %v2025_v57  ;;  %v1728_v63 = vmax.f32 %v1380_v29, 0.0 }
 0x248   :  { %v1383_v31 = vpop.f32.mrf.mxu0  ;;  %v1731_v38 = vmax.f32 %v680_v2, 0.0  ;;  %v1726_v51 = vmax.f32 %v1027_v28, 0.0  ;;  %v1732_v61 = vmax.f32 %v1031_v17, 0.0  ;;  %v13395_v2 = vld [vmem:[#allocation49_spill] sm:$0xff] }
 0x249   :  { %13389 = vst [vmem:[#allocation25_spill] sm:$0xff] %v9505_v48  ;;  %v9511_v33 = vpack.c.bf16 %v2029_v36, %v2026_v20  ;;  %v1384_v0 = vadd.f32 %v1383_v31, %v9196_v23  ;;  %3288 = vmatprep.mubr.bf16.mxu1 %v9505_v48  ;;  %v1729_v57 = vmax.f32 %v1382_v40, 0.0  ;;  %v2031_v20 = vmax.f32 %v1725_v9, %v1728_v63  ;;  %v13397_v63 = vld [vmem:[#allocation45_spill] sm:$0xff] }
 0x24a   :  { %v1385_v37 = vpop.f32.mrf.mxu0  ;;  %3289 = vmatmul.mubr.bf16.gmra.mxu1 %v13393_v32  ;;  %v686_v32 = vadd.f32 %v13394_v42, %v9200_v11  ;;  %v690_v40 = vadd.f32 %v13395_v2, %v9200_v11  ;;  %v1037_v9 = vadd.f32 %v13397_v63, %v9214_v41 }
 0x24b   :  { %13392 = vst [vmem:[#allocation27_spill] sm:$0xff] %v9511_v33  ;;  %v1734_v43 = vmax.f32 %v1384_v0, 0.0  ;;  %v1386_v50 = vadd.f32 %v1385_v37, %v9210_v52  ;;  %v2032_v37 = vmax.f32 %v1726_v51, %v1729_v57  ;;  %v8083_v57 = vld [vmem:[#allocation2 + $0x1b8] ss:$24 sps:$4 sm:$0xff]   ;;  %v8085_v51 = vld [vmem:[#allocation2 + $0x1bc] ss:$24 sps:$4 sm:$0xff]  }
 0x24c   :  { %v1389_v6 = vpop.f32.mrf.mxu0  ;;  %3582 = vmatmul.mubr.bf16.gmra.mxu0 %v9391_v19  ;;  %3870 = vmatprep.subr.bf16.mxu1 %v8085_v51 }
 0x24d   :  { %v2034_v29 = vmax.f32 %v1731_v38, %v1734_v43  ;;  %v1735_v36 = vmax.f32 %v1386_v50, 0.0  ;;  %v1390_v31 = vadd.f32 %v1389_v6, %v9196_v23  ;;  %3591 = vmatprep.mubr.bf16.mxu0 %v13223_v62  ;;  %v13398_v38 = vld [vmem:[#allocation47_spill] sm:$0xff]  ;;  %3871 = vmatpush2.bf16.msra.mxu1 %v8083_v57 }
 0x24e   :  { %v1391_v0 = vpop.f32.mrf.mxu0  ;;  %v1041_v43 = vadd.f32 %v13398_v38, %v9214_v41  ;;  %v1738_v38 = vmax.f32 %v1037_v9, 0.0 }
 0x24f   :  { %v2035_v28 = vmax.f32 %v1732_v61, %v1735_v36  ;;  %v1392_v17 = vadd.f32 %v1391_v0, %v9210_v52  ;;  %v9525_v3 = vpack.c.bf16 %v2034_v29, %v2031_v20  ;;  %v1740_v42 = vmax.f32 %v1390_v31, 0.0  ;;  %v13400_v20 = vld [vmem:[#allocation48_spill] sm:$0xff] }
 0x250   :  { %v1393_v50 = vpop.f32.mrf.mxu0  ;;  %v1737_v61 = vmax.f32 %v686_v32, 0.0  ;;  %v1743_v29 = vmax.f32 %v690_v40, 0.0  ;;  %v13401_v40 = vld [vmem:[#allocation51_spill] sm:$0xff] }
 0x251   :  { %13396 = vst [vmem:[#allocation31_spill] sm:$0xff] %v9525_v3  ;;  %v9531_v6 = vpack.c.bf16 %v2035_v28, %v2032_v37  ;;  %v1394_v19 = vadd.f32 %v1393_v50, %v9196_v23  ;;  %3298 = vmatprep.mubr.bf16.mxu1 %v9525_v3  ;;  %v1741_v2 = vmax.f32 %v1392_v17, 0.0  ;;  %v1744_v37 = vmax.f32 %v1041_v43, 0.0 }
 0x252   :  { %v1395_v36 = vpop.f32.mrf.mxu0  ;;  %3299 = vmatmul.mubr.bf16.gmra.mxu1 %v13400_v20  ;;  %v2037_v31 = vmax.f32 %v1737_v61, %v1740_v42  ;;  %v696_v17 = vadd.f32 %v13401_v40, %v9200_v11  ;;  %v13404_v42 = vld [vmem:[#allocation50_spill] sm:$0xff]  ;;  %v13405_v61 = vld [vmem:[#allocation52_spill] sm:$0xff] }
 0x253   :  { %13399 = vst [vmem:[#allocation34_spill] sm:$0xff] %v9531_v6  ;;  %v1746_v0 = vmax.f32 %v1394_v19, 0.0  ;;  %v1396_v63 = vadd.f32 %v1395_v36, %v9210_v52  ;;  %v13402_v19 = vld [vmem:[#allocation54_spill] sm:$0xff]  ;;  %v2038_v9 = vmax.f32 %v1738_v38, %v1741_v2  ;;  %v1047_v57 = vadd.f32 %v13404_v42, %v9214_v41  ;;  %v13407_v38 = vld [vmem:[#allocation53_spill] sm:$0xff] }
 0x254   :  { %v1399_v28 = vpop.f32.mrf.mxu0  ;;  %3592 = vmatmul.mubr.bf16.gmra.mxu0 %v9411_v22  ;;  %v700_v36 = vadd.f32 %v13402_v19, %v9200_v11  ;;  %v1749_v2 = vmax.f32 %v696_v17, 0.0  ;;  %v13408_v17 = vld [vmem:[#allocation56_spill] sm:$0xff] }
 0x255   :  { %v2040_v50 = vmax.f32 %v1743_v29, %v1746_v0  ;;  %v1747_v3 = vmax.f32 %v1396_v63, 0.0  ;;  %v1400_v32 = vadd.f32 %v1399_v28, %v9196_v23  ;;  %3601 = vmatprep.mubr.bf16.mxu0 %v13223_v62  ;;  %v1051_v29 = vadd.f32 %v13405_v61, %v9214_v41 }
 0x256   :  { %v1401_v51 = vpop.f32.mrf.mxu0 }
 0x257   :  { %v2041_v43 = vmax.f32 %v1744_v37, %v1747_v3  ;;  %v1402_v20 = vadd.f32 %v1401_v51, %v9210_v52  ;;  %v9545_v22 = vpack.c.bf16 %v2040_v50, %v2037_v31  ;;  %v1752_v28 = vmax.f32 %v1400_v32, 0.0 }
 0x258   :  { %v1403_v0 = vpop.f32.mrf.mxu0  ;;  %v1755_v37 = vmax.f32 %v700_v36, 0.0  ;;  %v1750_v51 = vmax.f32 %v1047_v57, 0.0  ;;  %v1756_v42 = vmax.f32 %v1051_v29, 0.0 }
 0x259   :  { %13403 = vst [vmem:[#allocation30_spill] sm:$0xff] %v9545_v22  ;;  %v9551_v63 = vpack.c.bf16 %v2041_v43, %v2038_v9  ;;  %v1404_v40 = vadd.f32 %v1403_v0, %v9196_v23  ;;  %3308 = vmatprep.mubr.bf16.mxu1 %v9545_v22  ;;  %v1753_v31 = vmax.f32 %v1402_v20, 0.0  ;;  %v2043_v9 = vmax.f32 %v1749_v2, %v1752_v28  ;;  %v13409_v20 = vld [vmem:[#allocation59_spill] sm:$0xff] }
 0x25a   :  { %v1405_v3 = vpop.f32.mrf.mxu0  ;;  %3309 = vmatmul.mubr.bf16.gmra.mxu1 %v13407_v38  ;;  %v706_v38 = vadd.f32 %v13408_v17, %v9200_v11  ;;  %v710_v36 = vadd.f32 %v13409_v20, %v9200_v11  ;;  %v13411_v28 = vld [vmem:[#allocation55_spill] sm:$0xff] }
 0x25b   :  { %13406 = vst [vmem:[#allocation32_spill] sm:$0xff] %v9551_v63  ;;  %v1758_v50 = vmax.f32 %v1404_v40, 0.0  ;;  %v1406_v19 = vadd.f32 %v1405_v3, %v9210_v52  ;;  %v2044_v3 = vmax.f32 %v1750_v51, %v1753_v31  ;;  %v1057_v2 = vadd.f32 %v13411_v28, %v9214_v41  ;;  %v8086_v31 = vld [vmem:[#allocation2 + $0x188] ss:$24 sps:$4 sm:$0xff]   ;;  %v8088_v51 = vld [vmem:[#allocation2 + $0x18c] ss:$24 sps:$4 sm:$0xff]  }
 0x25c   :  { %v1409_v61 = vpop.f32.mrf.mxu0  ;;  %3602 = vmatmul.mubr.bf16.gmra.mxu0 %v9431_v8  ;;  %v8091_v20 = vld [vmem:[#allocation2 + $0x33c] ss:$24 sps:$4 sm:$0xff]   ;;  %3872 = vmatprep.subr.bf16.mxu1 %v8088_v51 }
 0x25d   :  { %v2046_v32 = vmax.f32 %v1755_v37, %v1758_v50  ;;  %v1759_v43 = vmax.f32 %v1406_v19, 0.0  ;;  %v1410_v0 = vadd.f32 %v1409_v61, %v9196_v23  ;;  %3611 = vmatprep.mubr.bf16.mxu0 %v13223_v62  ;;  %v13412_v37 = vld [vmem:[#allocation57_spill] sm:$0xff]  ;;  %4207 = vmatprep.subr.bf16.mxu0 %v8091_v20 }
 0x25e   :  { %v1411_v40 = vpop.f32.mrf.mxu0  ;;  %v1061_v50 = vadd.f32 %v13412_v37, %v9214_v41  ;;  %3873 = vmatpush2.bf16.msra.mxu1 %v8086_v31 }
 0x25f   :  { %v2047_v57 = vmax.f32 %v1756_v42, %v1759_v43  ;;  %v1412_v29 = vadd.f32 %v1411_v40, %v9210_v52  ;;  %v9565_v22 = vpack.c.bf16 %v2046_v32, %v2043_v9  ;;  %v1764_v17 = vmax.f32 %v1410_v0, 0.0  ;;  %v13414_v9 = vld [vmem:[#allocation58_spill] sm:$0xff] }
 0x260   :  { %v1413_v19 = vpop.f32.mrf.mxu0  ;;  %v1761_v42 = vmax.f32 %v706_v38, 0.0  ;;  %v8089_v32 = vld [vmem:[#allocation2 + $0x338] ss:$24 sps:$4 sm:$0xff]   ;;  %v1767_v40 = vmax.f32 %v710_v36, 0.0  ;;  %v1768_v0 = vmax.f32 %v1061_v50, 0.0  ;;  %v13415_v36 = vld [vmem:[#allocation61_spill] sm:$0xff] }
 0x261   :  { %13410 = vst [vmem:[#allocation36_spill] sm:$0xff] %v9565_v22  ;;  %v9571_v61 = vpack.c.bf16 %v2047_v57, %v2044_v3  ;;  %v1414_v8 = vadd.f32 %v1413_v19, %v9196_v23  ;;  %3318 = vmatprep.mubr.bf16.mxu1 %v9565_v22  ;;  %v1765_v28 = vmax.f32 %v1412_v29, 0.0  ;;  %v1762_v3 = vmax.f32 %v1057_v2, 0.0  ;;  %v13416_v29 = vld [vmem:[#allocation64_spill] sm:$0xff]  ;;  %4208 = vmatpush1.bf16.msra.mxu0 %v8089_v32 }
 0x262   :  { %v1415_v43 = vpop.f32.mrf.mxu0  ;;  %3319 = vmatmul.mubr.bf16.gmra.mxu1 %v13414_v9  ;;  %v2049_v19 = vmax.f32 %v1761_v42, %v1764_v17  ;;  %v720_v51 = vadd.f32 %v13416_v29, %v9200_v11 }
 0x263   :  { %13413 = vst [vmem:[#allocation39_spill] sm:$0xff] %v9571_v61  ;;  %v1770_v48 = vmax.f32 %v1414_v8, 0.0  ;;  %v1416_v37 = vadd.f32 %v1415_v43, %v9210_v52  ;;  %v716_v8 = vadd.f32 %v13415_v36, %v9200_v11  ;;  %v2050_v50 = vmax.f32 %v1762_v3, %v1765_v28  ;;  %v13421_v3 = vld [vmem:[#allocation63_spill] sm:$0xff] }
 0x264   :  { %v1419_v57 = vpop.f32.mrf.mxu0  ;;  %3612 = vmatmul.mubr.bf16.gmra.mxu0 %v9451_v44 }
 0x265   :  { %v2052_v22 = vmax.f32 %v1767_v40, %v1770_v48  ;;  %v1771_v38 = vmax.f32 %v1416_v37, 0.0  ;;  %v1420_v54 = vadd.f32 %v1419_v57, %v9196_v23  ;;  %3621 = vmatprep.mubr.bf16.mxu0 %v13223_v62  ;;  %v13418_v48 = vld [vmem:[#allocation60_spill] sm:$0xff]  ;;  %v13419_v40 = vld [vmem:[#allocation62_spill] sm:$0xff]  ;;  %v1773_v32 = vmax.f32 %v716_v8, 0.0 }
 0x266   :  { %v1421_v2 = vpop.f32.mrf.mxu0  ;;  %v1067_v42 = vadd.f32 %v13418_v48, %v9214_v41  ;;  %v1071_v31 = vadd.f32 %v13419_v40, %v9214_v41  ;;  %v13422_v8 = vld [vmem:[#allocation66_spill] sm:$0xff] }
 0x267   :  { %v2053_v43 = vmax.f32 %v1768_v0, %v1771_v38  ;;  %v1422_v20 = vadd.f32 %v1421_v2, %v9210_v52  ;;  %v9585_v17 = vpack.c.bf16 %v2052_v22, %v2049_v19  ;;  %v1776_v36 = vmax.f32 %v1420_v54, 0.0 }
 0x268   :  { %v1423_v37 = vpop.f32.mrf.mxu0  ;;  %v1779_v22 = vmax.f32 %v720_v51, 0.0  ;;  %v1774_v2 = vmax.f32 %v1067_v42, 0.0  ;;  %v1780_v48 = vmax.f32 %v1071_v31, 0.0  ;;  %v13423_v51 = vld [vmem:[#allocation69_spill] sm:$0xff] }
 0x269   :  { %13417 = vst [vmem:[#allocation35_spill] sm:$0xff] %v9585_v17  ;;  %v9591_v57 = vpack.c.bf16 %v2053_v43, %v2050_v50  ;;  %v1424_v29 = vadd.f32 %v1423_v37, %v9196_v23  ;;  %3328 = vmatprep.mubr.bf16.mxu1 %v9585_v17  ;;  %v1777_v0 = vmax.f32 %v1422_v20, 0.0  ;;  %v2055_v50 = vmax.f32 %v1773_v32, %v1776_v36  ;;  %v8094_v36 = vld [vmem:[#allocation2 + $0x164] ss:$24 sps:$4 sm:$0xff]   ;;  %v13425_v32 = vld [vmem:[#allocation65_spill] sm:$0xff] }
 0x26a   :  { %v1425_v28 = vpop.f32.mrf.mxu0  ;;  %3329 = vmatmul.mubr.bf16.gmra.mxu1 %v13421_v3  ;;  %v726_v3 = vadd.f32 %v13422_v8, %v9200_v11  ;;  %v730_v20 = vadd.f32 %v13423_v51, %v9200_v11  ;;  %4548 = vmatprep.subr.bf16.mxu1 %v8094_v36 }
 0x26b   :  { %13420 = vst [vmem:[#allocation37_spill] sm:$0xff] %v9591_v57  ;;  %v1782_v19 = vmax.f32 %v1424_v29, 0.0  ;;  %v1426_v38 = vadd.f32 %v1425_v28, %v9210_v52  ;;  %v2056_v28 = vmax.f32 %v1774_v2, %v1777_v0 }
 0x26c   :  { %v1429_v40 = vpop.f32.mrf.mxu0  ;;  %3622 = vmatmul.mubr.bf16.gmra.mxu0 %v9471_v56  ;;  %v1785_v0 = vmax.f32 %v726_v3, 0.0  ;;  %v13429_v3 = vld [vmem:[#allocation71_spill] sm:$0xff] }
 0x26d   :  { %v2058_v54 = vmax.f32 %v1779_v22, %v1782_v19  ;;  %v1783_v43 = vmax.f32 %v1426_v38, 0.0  ;;  %v1430_v37 = vadd.f32 %v1429_v40, %v9196_v23  ;;  %3631 = vmatprep.mubr.bf16.mxu0 %v13223_v62  ;;  %v1077_v22 = vadd.f32 %v13425_v32, %v9214_v41  ;;  %v13426_v19 = vld [vmem:[#allocation67_spill] sm:$0xff] }
 0x26e   :  { %v1431_v29 = vpop.f32.mrf.mxu0  ;;  %v1081_v38 = vadd.f32 %v13426_v19, %v9214_v41  ;;  %v736_v36 = vadd.f32 %v13429_v3, %v9200_v11 }
 0x26f   :  { %v2059_v42 = vmax.f32 %v1780_v48, %v1783_v43  ;;  %v1432_v31 = vadd.f32 %v1431_v29, %v9210_v52  ;;  %v9605_v44 = vpack.c.bf16 %v2058_v54, %v2055_v50  ;;  %v1788_v8 = vmax.f32 %v1430_v37, 0.0  ;;  %v13428_v48 = vld [vmem:[#allocation68_spill] sm:$0xff] }
 0x270   :  { %v1433_v40 = vpop.f32.mrf.mxu0  ;;  %v1791_v50 = vmax.f32 %v730_v20, 0.0  ;;  %v1786_v32 = vmax.f32 %v1077_v22, 0.0  ;;  %v1792_v19 = vmax.f32 %v1081_v38, 0.0  ;;  %v13430_v20 = vld [vmem:[#allocation74_spill] sm:$0xff] }
 0x271   :  { %13424 = vst [vmem:[#allocation41_spill] sm:$0xff] %v9605_v44  ;;  %v9611_v56 = vpack.c.bf16 %v2059_v42, %v2056_v28  ;;  %v1434_v51 = vadd.f32 %v1433_v40, %v9196_v23  ;;  %3338 = vmatprep.mubr.bf16.mxu1 %v9605_v44  ;;  %v1789_v54 = vmax.f32 %v1432_v31, 0.0  ;;  %v2061_v37 = vmax.f32 %v1785_v0, %v1788_v8  ;;  %v13432_v8 = vld [vmem:[#allocation70_spill] sm:$0xff] }
 0x272   :  { %v1435_v2 = vpop.f32.mrf.mxu0  ;;  %3339 = vmatmul.mubr.bf16.gmra.mxu1 %v13428_v48  ;;  %v740_v31 = vadd.f32 %v13430_v20, %v9200_v11  ;;  %v1087_v0 = vadd.f32 %v13432_v8, %v9214_v41 }
 0x273   :  { %13427 = vst [vmem:[#allocation44_spill] sm:$0xff] %v9611_v56  ;;  %v1794_v43 = vmax.f32 %v1434_v51, 0.0  ;;  %v1436_v29 = vadd.f32 %v1435_v2, %v9210_v52  ;;  %v2062_v2 = vmax.f32 %v1786_v32, %v1789_v54  ;;  %v1797_v54 = vmax.f32 %v736_v36, 0.0  ;;  %v13436_v36 = vld [vmem:[#allocation76_spill] sm:$0xff] }
 0x274   :  { %v1439_v17 = vpop.f32.mrf.mxu0  ;;  %3632 = vmatmul.mubr.bf16.gmra.mxu0 %v9491_v7 }
 0x275   :  { %v2064_v28 = vmax.f32 %v1791_v50, %v1794_v43  ;;  %v1795_v42 = vmax.f32 %v1436_v29, 0.0  ;;  %v1440_v40 = vadd.f32 %v1439_v17, %v9196_v23  ;;  %3641 = vmatprep.mubr.bf16.mxu0 %v13223_v62  ;;  %v13433_v17 = vld [vmem:[#allocation72_spill] sm:$0xff] }
 0x276   :  { %v1441_v51 = vpop.f32.mrf.mxu0  ;;  %v1091_v50 = vadd.f32 %v13433_v17, %v9214_v41 }
 0x277   :  { %v2065_v22 = vmax.f32 %v1792_v19, %v1795_v42  ;;  %v1442_v38 = vadd.f32 %v1441_v51, %v9210_v52  ;;  %v9625_v48 = vpack.c.bf16 %v2064_v28, %v2061_v37  ;;  %v1800_v3 = vmax.f32 %v1440_v40, 0.0  ;;  %v13435_v19 = vld [vmem:[#allocation73_spill] sm:$0xff] }
 0x278   :  { %v1443_v43 = vpop.f32.mrf.mxu0  ;;  %v1803_v37 = vmax.f32 %v740_v31, 0.0  ;;  %v1798_v51 = vmax.f32 %v1087_v0, 0.0  ;;  %v1804_v8 = vmax.f32 %v1091_v50, 0.0  ;;  %v13437_v31 = vld [vmem:[#allocation79_spill] sm:$0xff] }
 0x279   :  { %13431 = vst [vmem:[#allocation40_spill] sm:$0xff] %v9625_v48  ;;  %v9631_v29 = vpack.c.bf16 %v2065_v22, %v2062_v2  ;;  %v1444_v7 = vadd.f32 %v1443_v43, %v9196_v23  ;;  %3348 = vmatprep.mubr.bf16.mxu1 %v9625_v48  ;;  %v1801_v28 = vmax.f32 %v1442_v38, 0.0  ;;  %v2067_v2 = vmax.f32 %v1797_v54, %v1800_v3  ;;  %v8095_v3 = vld [vmem:[#allocation2 + $0x308] ss:$24 sps:$4 sm:$0xff]   ;;  %v8097_v54 = vld [vmem:[#allocation2 + $0x30c] ss:$24 sps:$4 sm:$0xff]  }
 0x27a   :  { %v1445_v32 = vpop.f32.mrf.mxu0  ;;  %3349 = vmatmul.mubr.bf16.gmra.mxu1 %v13435_v19  ;;  %v746_v19 = vadd.f32 %v13436_v36, %v9200_v11  ;;  %4209 = vmatprep.subr.bf16.mxu0 %v8097_v54 }
 0x27b   :  { %13434 = vst [vmem:[#allocation42_spill] sm:$0xff] %v9631_v29  ;;  %v1806_v42 = vmax.f32 %v1444_v7, 0.0  ;;  %v1446_v20 = vadd.f32 %v1445_v32, %v9210_v52  ;;  %v750_v7 = vadd.f32 %v13437_v31, %v9200_v11  ;;  %v2068_v32 = vmax.f32 %v1798_v51, %v1801_v28  ;;  %4210 = vmatpush1.bf16.msra.mxu0 %v8095_v3 }
 0x27c   :  { %v1449_v17 = vpop.f32.mrf.mxu0  ;;  %3642 = vmatmul.mubr.bf16.gmra.mxu0 %v9511_v33  ;;  %v1809_v28 = vmax.f32 %v746_v19, 0.0  ;;  %v13443_v19 = vld [vmem:[#allocation81_spill] sm:$0xff] }
 0x27d   :  { %v2070_v40 = vmax.f32 %v1803_v37, %v1806_v42  ;;  %v1807_v22 = vmax.f32 %v1446_v20, 0.0  ;;  %v1450_v43 = vadd.f32 %v1449_v17, %v9196_v23  ;;  %3651 = vmatprep.mubr.bf16.mxu0 %v13223_v62  ;;  %v13439_v37 = vld [vmem:[#allocation75_spill] sm:$0xff]  ;;  %v13440_v20 = vld [vmem:[#allocation77_spill] sm:$0xff]  ;;  %v756_v3 = vadd.f32 %v13443_v19, %v9200_v11 }
 0x27e   :  { %v1451_v38 = vpop.f32.mrf.mxu0  ;;  %v1097_v42 = vadd.f32 %v13439_v37, %v9214_v41  ;;  %v1101_v17 = vadd.f32 %v13440_v20, %v9214_v41 }
 0x27f   :  { %v2071_v0 = vmax.f32 %v1804_v8, %v1807_v22  ;;  %v1452_v50 = vadd.f32 %v1451_v38, %v9210_v52  ;;  %v9645_v48 = vpack.c.bf16 %v2070_v40, %v2067_v2  ;;  %v1812_v44 = vmax.f32 %v1450_v43, 0.0  ;;  %v13442_v8 = vld [vmem:[#allocation78_spill] sm:$0xff] }
 0x280   :  { %v1453_v33 = vpop.f32.mrf.mxu0  ;;  %v1815_v2 = vmax.f32 %v750_v7, 0.0  ;;  %v1810_v37 = vmax.f32 %v1097_v42, 0.0  ;;  %v1816_v20 = vmax.f32 %v1101_v17, 0.0  ;;  %v13444_v7 = vld [vmem:[#allocation84_spill] sm:$0xff] }
 0x281   :  { %13438 = vst [vmem:[#allocation46_spill] sm:$0xff] %v9645_v48  ;;  %v9651_v36 = vpack.c.bf16 %v2071_v0, %v2068_v32  ;;  %v1454_v31 = vadd.f32 %v1453_v33, %v9196_v23  ;;  %3358 = vmatprep.mubr.bf16.mxu1 %v9645_v48  ;;  %v1813_v40 = vmax.f32 %v1452_v50, 0.0  ;;  %v2073_v43 = vmax.f32 %v1809_v28, %v1812_v44  ;;  %v13446_v44 = vld [vmem:[#allocation80_spill] sm:$0xff] }
 0x282   :  { %v1455_v51 = vpop.f32.mrf.mxu0  ;;  %3359 = vmatmul.mubr.bf16.gmra.mxu1 %v13442_v8  ;;  %v760_v50 = vadd.f32 %v13444_v7, %v9200_v11  ;;  %v1107_v28 = vadd.f32 %v13446_v44, %v9214_v41 }
 0x283   :  { %13441 = vst [vmem:[#allocation49_spill] sm:$0xff] %v9651_v36  ;;  %v1818_v22 = vmax.f32 %v1454_v31, 0.0  ;;  %v1456_v38 = vadd.f32 %v1455_v51, %v9210_v52  ;;  %v2074_v51 = vmax.f32 %v1810_v37, %v1813_v40  ;;  %v1821_v40 = vmax.f32 %v756_v3, 0.0  ;;  %v13450_v3 = vld [vmem:[#allocation86_spill] sm:$0xff] }
 0x284   :  { %v1459_v32 = vpop.f32.mrf.mxu0  ;;  %3652 = vmatmul.mubr.bf16.gmra.mxu0 %v9531_v6 }
 0x285   :  { %v2076_v33 = vmax.f32 %v1815_v2, %v1818_v22  ;;  %v1819_v0 = vmax.f32 %v1456_v38, 0.0  ;;  %v1460_v54 = vadd.f32 %v1459_v32, %v9196_v23  ;;  %3661 = vmatprep.mubr.bf16.mxu0 %v13223_v62  ;;  %v13447_v2 = vld [vmem:[#allocation82_spill] sm:$0xff] }
 0x286   :  { %v1461_v31 = vpop.f32.mrf.mxu0  ;;  %v1111_v22 = vadd.f32 %v13447_v2, %v9214_v41 }
 0x287   :  { %v2077_v42 = vmax.f32 %v1816_v20, %v1819_v0  ;;  %v1462_v17 = vadd.f32 %v1461_v31, %v9210_v52  ;;  %v9665_v8 = vpack.c.bf16 %v2076_v33, %v2073_v43  ;;  %v1824_v19 = vmax.f32 %v1460_v54, 0.0  ;;  %v13449_v20 = vld [vmem:[#allocation83_spill] sm:$0xff] }
 0x288   :  { %v1463_v38 = vpop.f32.mrf.mxu0  ;;  %v1827_v43 = vmax.f32 %v760_v50, 0.0  ;;  %v1822_v31 = vmax.f32 %v1107_v28, 0.0  ;;  %v1828_v44 = vmax.f32 %v1111_v22, 0.0  ;;  %v13451_v50 = vld [vmem:[#allocation89_spill] sm:$0xff] }
 0x289   :  { %13445 = vst [vmem:[#allocation45_spill] sm:$0xff] %v9665_v8  ;;  %v9671_v32 = vpack.c.bf16 %v2077_v42, %v2074_v51  ;;  %v1464_v6 = vadd.f32 %v1463_v38, %v9196_v23  ;;  %3368 = vmatprep.mubr.bf16.mxu1 %v9665_v8  ;;  %v1825_v33 = vmax.f32 %v1462_v17, 0.0  ;;  %v2079_v51 = vmax.f32 %v1821_v40, %v1824_v19  ;;  %v13453_v19 = vld [vmem:[#allocation85_spill] sm:$0xff] }
 0x28a   :  { %v1465_v37 = vpop.f32.mrf.mxu0  ;;  %3369 = vmatmul.mubr.bf16.gmra.mxu1 %v13449_v20  ;;  %v766_v20 = vadd.f32 %v13450_v3, %v9200_v11  ;;  %v1117_v40 = vadd.f32 %v13453_v19, %v9214_v41 }
 0x28b   :  { %13448 = vst [vmem:[#allocation47_spill] sm:$0xff] %v9671_v32  ;;  %v1830_v0 = vmax.f32 %v1464_v6, 0.0  ;;  %v1466_v7 = vadd.f32 %v1465_v37, %v9210_v52  ;;  %v770_v6 = vadd.f32 %v13451_v50, %v9200_v11  ;;  %v2080_v37 = vmax.f32 %v1822_v31, %v1825_v33 }
 0x28c   :  { %v1469_v2 = vpop.f32.mrf.mxu0  ;;  %3662 = vmatmul.mubr.bf16.gmra.mxu0 %v9551_v63  ;;  %v1833_v33 = vmax.f32 %v766_v20, 0.0  ;;  %v13457_v20 = vld [vmem:[#allocation91_spill] sm:$0xff] }
 0x28d   :  { %v2082_v54 = vmax.f32 %v1827_v43, %v1830_v0  ;;  %v1831_v42 = vmax.f32 %v1466_v7, 0.0  ;;  %v1470_v38 = vadd.f32 %v1469_v2, %v9196_v23  ;;  %3671 = vmatprep.mubr.bf16.mxu0 %v13223_v62  ;;  %v13454_v43 = vld [vmem:[#allocation87_spill] sm:$0xff] }
 0x28e   :  { %v1471_v17 = vpop.f32.mrf.mxu0  ;;  %v1121_v0 = vadd.f32 %v13454_v43, %v9214_v41 }
 0x28f   :  { %v2083_v28 = vmax.f32 %v1828_v44, %v1831_v42  ;;  %v1472_v22 = vadd.f32 %v1471_v17, %v9210_v52  ;;  %v9685_v8 = vpack.c.bf16 %v2082_v54, %v2079_v51  ;;  %v1836_v3 = vmax.f32 %v1470_v38, 0.0  ;;  %v13456_v44 = vld [vmem:[#allocation88_spill] sm:$0xff] }
 0x290   :  { %v1473_v7 = vpop.f32.mrf.mxu0  ;;  %v1839_v51 = vmax.f32 %v770_v6, 0.0  ;;  %v1834_v17 = vmax.f32 %v1117_v40, 0.0  ;;  %v1840_v19 = vmax.f32 %v1121_v0, 0.0  ;;  %v13458_v6 = vld [vmem:[#allocation94_spill] sm:$0xff] }
 0x291   :  { %13452 = vst [vmem:[#allocation51_spill] sm:$0xff] %v9685_v8  ;;  %v9691_v2 = vpack.c.bf16 %v2083_v28, %v2080_v37  ;;  %v1474_v63 = vadd.f32 %v1473_v7, %v9196_v23  ;;  %3378 = vmatprep.mubr.bf16.mxu1 %v9685_v8  ;;  %v1837_v54 = vmax.f32 %v1472_v22, 0.0  ;;  %v2085_v37 = vmax.f32 %v1833_v33, %v1836_v3  ;;  %v13460_v3 = vld [vmem:[#allocation90_spill] sm:$0xff] }
 0x292   :  { %v1475_v31 = vpop.f32.mrf.mxu0  ;;  %3379 = vmatmul.mubr.bf16.gmra.mxu1 %v13456_v44  ;;  %v776_v44 = vadd.f32 %v13457_v20, %v9200_v11  ;;  %v1127_v33 = vadd.f32 %v13460_v3, %v9214_v41 }
 0x293   :  { %13455 = vst [vmem:[#allocation54_spill] sm:$0xff] %v9691_v2  ;;  %v1842_v42 = vmax.f32 %v1474_v63, 0.0  ;;  %v1476_v50 = vadd.f32 %v1475_v31, %v9210_v52  ;;  %v780_v63 = vadd.f32 %v13458_v6, %v9200_v11  ;;  %v2086_v31 = vmax.f32 %v1834_v17, %v1837_v54 }
 0x294   :  { %v1479_v43 = vpop.f32.mrf.mxu0  ;;  %3672 = vmatmul.mubr.bf16.gmra.mxu0 %v9571_v61  ;;  %v1845_v54 = vmax.f32 %v776_v44, 0.0  ;;  %v13464_v44 = vld [vmem:[#allocation96_spill] sm:$0xff] }
 0x295   :  { %v2088_v38 = vmax.f32 %v1839_v51, %v1842_v42  ;;  %v1843_v28 = vmax.f32 %v1476_v50, 0.0  ;;  %v1480_v7 = vadd.f32 %v1479_v43, %v9196_v23  ;;  %3681 = vmatprep.mubr.bf16.mxu0 %v13223_v62  ;;  %v13461_v51 = vld [vmem:[#allocation92_spill] sm:$0xff] }
 0x296   :  { %v1481_v22 = vpop.f32.mrf.mxu0  ;;  %v1131_v42 = vadd.f32 %v13461_v51, %v9214_v41 }
 0x297   :  { %v2089_v40 = vmax.f32 %v1840_v19, %v1843_v28  ;;  %v1482_v0 = vadd.f32 %v1481_v22, %v9210_v52  ;;  %v9705_v8 = vpack.c.bf16 %v2088_v38, %v2085_v37  ;;  %v1848_v20 = vmax.f32 %v1480_v7, 0.0  ;;  %v13463_v19 = vld [vmem:[#allocation93_spill] sm:$0xff] }
 0x298   :  { %v1483_v50 = vpop.f32.mrf.mxu0  ;;  %v1851_v37 = vmax.f32 %v780_v63, 0.0  ;;  %v1846_v22 = vmax.f32 %v1127_v33, 0.0  ;;  %v1852_v3 = vmax.f32 %v1131_v42, 0.0  ;;  %v13465_v63 = vld [vmem:[#allocation99_spill] sm:$0xff] }
 0x299   :  { %13459 = vst [vmem:[#allocation50_spill] sm:$0xff] %v9705_v8  ;;  %v9711_v43 = vpack.c.bf16 %v2089_v40, %v2086_v31  ;;  %v1484_v61 = vadd.f32 %v1483_v50, %v9196_v23  ;;  %3388 = vmatprep.mubr.bf16.mxu1 %v9705_v8  ;;  %v1849_v38 = vmax.f32 %v1482_v0, 0.0  ;;  %v2091_v31 = vmax.f32 %v1845_v54, %v1848_v20  ;;  %v13467_v20 = vld [vmem:[#allocation95_spill] sm:$0xff] }
 0x29a   :  { %v1485_v17 = vpop.f32.mrf.mxu0  ;;  %3389 = vmatmul.mubr.bf16.gmra.mxu1 %v13463_v19  ;;  %v786_v19 = vadd.f32 %v13464_v44, %v9200_v11  ;;  %v1137_v54 = vadd.f32 %v13467_v20, %v9214_v41 }
 0x29b   :  { %13462 = vst [vmem:[#allocation52_spill] sm:$0xff] %v9711_v43  ;;  %v1854_v28 = vmax.f32 %v1484_v61, 0.0  ;;  %v1486_v6 = vadd.f32 %v1485_v17, %v9210_v52  ;;  %v790_v61 = vadd.f32 %v13465_v63, %v9200_v11  ;;  %v2092_v17 = vmax.f32 %v1846_v22, %v1849_v38 }
 0x29c   :  { %v1489_v51 = vpop.f32.mrf.mxu0  ;;  %3682 = vmatmul.mubr.bf16.gmra.mxu0 %v9591_v57  ;;  %v1857_v38 = vmax.f32 %v786_v19, 0.0  ;;  %v1858_v20 = vmax.f32 %v1137_v54, 0.0  ;;  %v13471_v19 = vld [vmem:[#allocation104_spill] sm:$0xff] }
 0x29d   :  { %v2094_v7 = vmax.f32 %v1851_v37, %v1854_v28  ;;  %v1855_v40 = vmax.f32 %v1486_v6, 0.0  ;;  %v1490_v50 = vadd.f32 %v1489_v51, %v9196_v23  ;;  %3691 = vmatprep.mubr.bf16.mxu0 %v13223_v62  ;;  %v8109_v28 = vld [vmem:[#allocation2 + $0x464] ss:$24 sps:$4 sm:$0xff]   ;;  %v13468_v6 = vld [vmem:[#allocation97_spill] sm:$0xff] }
 0x29e   :  { %v1491_v0 = vpop.f32.mrf.mxu0  ;;  %v1141_v51 = vadd.f32 %v13468_v6, %v9214_v41  ;;  %4901 = vmatprep.subr.bf16.mxu0 %v8109_v28  ;;  %v800_v6 = vadd.f32 %v13471_v19, %v9200_v11 }
 0x29f   :  { %v2095_v33 = vmax.f32 %v1852_v3, %v1855_v40  ;;  %v1492_v42 = vadd.f32 %v1491_v0, %v9210_v52  ;;  %v9725_v8 = vpack.c.bf16 %v2094_v7, %v2091_v31  ;;  %v1860_v44 = vmax.f32 %v1490_v50, 0.0  ;;  %v13470_v3 = vld [vmem:[#allocation98_spill] sm:$0xff] }
 0x2a0   :  { %v1493_v37 = vpop.f32.mrf.mxu0  ;;  %v1863_v31 = vmax.f32 %v790_v61, 0.0 }
 0x2a1   :  { %13466 = vst [vmem:[#allocation56_spill] sm:$0xff] %v9725_v8  ;;  %v9731_v57 = vpack.c.bf16 %v2095_v33, %v2092_v17  ;;  %v1494_v63 = vadd.f32 %v1493_v37, %v9196_v23  ;;  %3398 = vmatprep.mubr.bf16.mxu1 %v9725_v8  ;;  %v1861_v7 = vmax.f32 %v1492_v42, 0.0  ;;  %v1864_v17 = vmax.f32 %v1141_v51, 0.0 }
 0x2a2   :  { %v1495_v22 = vpop.f32.mrf.mxu0  ;;  %3399 = vmatmul.mubr.bf16.gmra.mxu1 %v13470_v3  ;;  %v2097_v50 = vmax.f32 %v1857_v38, %v1860_v44  ;;  %v13474_v38 = vld [vmem:[#allocation100_spill] sm:$0xff] }
 0x2a3   :  { %13469 = vst [vmem:[#allocation59_spill] sm:$0xff] %v9731_v57  ;;  %v1866_v40 = vmax.f32 %v1494_v63, 0.0  ;;  %v1496_v0 = vadd.f32 %v1495_v22, %v9210_v52  ;;  %v2098_v42 = vmax.f32 %v1858_v20, %v1861_v7 }
 0x2a4   :  { %v1499_v48 = vpop.f32.mrf.mxu0  ;;  %3692 = vmatmul.mubr.bf16.gmra.mxu0 %v9611_v56  ;;  %v13473_v56 = vld [vmem:[#allocation101_spill] sm:$0xff] }
 0x2a5   :  { %v2100_v33 = vmax.f32 %v1863_v31, %v1866_v40  ;;  %v1867_v37 = vmax.f32 %v1496_v0, 0.0  ;;  %3701 = vmatprep.mubr.bf16.mxu0 %v13223_v62  ;;  %v1500_v28 = vadd.f32 %v1499_v48, %v9196_v23  ;;  %v796_v51 = vadd.f32 %v13473_v56, %v9200_v11  ;;  %v13475_v40 = vld [vmem:[#allocation102_spill] sm:$0xff] }
 0x2a6   :  { %v1501_v61 = vpop.f32.mrf.mxu0  ;;  %v1147_v31 = vadd.f32 %v13474_v38, %v9214_v41  ;;  %v1151_v0 = vadd.f32 %v13475_v40, %v9214_v41  ;;  %v1875_v56 = vmax.f32 %v800_v6, 0.0 }
 0x2a7   :  { %v2101_v63 = vmax.f32 %v1864_v17, %v1867_v37  ;;  %v1502_v22 = vadd.f32 %v1501_v61, %v9210_v52  ;;  %v9743_v54 = vpack.c.bf16 %v2100_v33, %v2097_v50  ;;  %v1872_v7 = vmax.f32 %v1500_v28, 0.0  ;;  %v13477_v50 = vld [vmem:[#allocation103_spill] sm:$0xff] }
 0x2a8   :  { %v1503_v44 = vpop.f32.mrf.mxu0  ;;  %v1869_v38 = vmax.f32 %v796_v51, 0.0 }
 0x2a9   :  { %13472 = vst [vmem:[#allocation55_spill] sm:$0xff] %v9743_v54  ;;  %v9751_v19 = vpack.c.bf16 %v2101_v63, %v2098_v42  ;;  %v1504_v48 = vadd.f32 %v1503_v44, %v9196_v23  ;;  %3408 = vmatprep.mubr.bf16.mxu1 %v9743_v54  ;;  %v1873_v33 = vmax.f32 %v1502_v22, 0.0  ;;  %v1870_v42 = vmax.f32 %v1147_v31, 0.0  ;;  %v13479_v31 = vld [vmem:[#allocation106_spill] sm:$0xff] }
 0x2aa   :  { %v1505_v20 = vpop.f32.mrf.mxu0  ;;  %v9755_v17 = vpop.f32.mrf.mxu1  ;;  %3409 = vmatmul.mubr.bf16.gmra.mxu1 %v13477_v50  ;;  %v1876_v63 = vmax.f32 %v1151_v0, 0.0  ;;  %v2103_v54 = vmax.f32 %v1869_v38, %v1872_v7  ;;  %v806_v0 = vadd.f32 %v13479_v31, %v9200_v11  ;;  %v13482_v38 = vld [vmem:[#allocation107_spill] sm:$0xff]  ;;  %v13483_v31 = vld [vmem:[#allocation108_spill] sm:$0xff] }
 0x2ab   :  { %13476 = vst [vmem:[#allocation57_spill] sm:$0xff] %v9751_v19  ;;  %v1878_v37 = vmax.f32 %v1504_v48, 0.0  ;;  %v1506_v61 = vadd.f32 %v1505_v20, %v9210_v52  ;;  %v13478_v48 = vld [vmem:[#allocation109_spill] sm:$0xff]  ;;  %v2104_v20 = vmax.f32 %v1870_v42, %v1873_v33 }
 0x2ac   :  { %v1509_v3 = vpop.f32.mrf.mxu0  ;;  %v9759_v40 = vpop.f32.mrf.mxu1  ;;  %3702 = vmatmul.mubr.bf16.gmra.mxu0 %v9631_v29  ;;  %v810_v51 = vadd.f32 %v13478_v48, %v9200_v11  ;;  %v1161_v29 = vadd.f32 %v13482_v38, %v9214_v41 }
 0x2ad   :  { %v2106_v44 = vmax.f32 %v1875_v56, %v1878_v37  ;;  %v1879_v28 = vmax.f32 %v1506_v61, 0.0  ;;  %3711 = vmatprep.mubr.bf16.mxu0 %v13223_v62  ;;  %v1510_v50 = vadd.f32 %v1509_v3, %v9196_v23  ;;  %v13481_v3 = vld [vmem:[#allocation105_spill] sm:$0xff] }
 0x2ae   :  { %v1511_v6 = vpop.f32.mrf.mxu0  ;;  %v9764_v22 = vpop.f32.mrf.mxu1  ;;  %v1157_v7 = vadd.f32 %v13481_v3, %v9214_v41  ;;  %v1881_v3 = vmax.f32 %v806_v0, 0.0 }
 0x2af   :  { %v2107_v8 = vmax.f32 %v1876_v63, %v1879_v28  ;;  %v1512_v9 = vadd.f32 %v1511_v6, %v9210_v52  ;;  %v9773_v61 = vpack.c.bf16 %v2106_v44, %v2103_v54  ;;  %v1884_v42 = vmax.f32 %v1510_v50, 0.0 }
 0x2b0   :  { %v1513_v56 = vpop.f32.mrf.mxu0  ;;  %v9771_v37 = vpop.f32.mrf.mxu1  ;;  %v1887_v6 = vmax.f32 %v810_v51, 0.0  ;;  %v1888_v50 = vmax.f32 %v1161_v29, 0.0 }
 0x2b1   :  { %13480 = vst [vmem:[#allocation61_spill] sm:$0xff] %v9773_v61  ;;  %v9779_v30 = vpack.c.bf16 %v2107_v8, %v2104_v20  ;;  %v1514_v33 = vadd.f32 %v1513_v56, %v9196_v23  ;;  %3418 = vmatprep.mubr.bf16.mxu1 %v9773_v61  ;;  %v1885_v48 = vmax.f32 %v1512_v9, 0.0  ;;  %v1882_v8 = vmax.f32 %v1157_v7, 0.0  ;;  %v13485_v7 = vld [vmem:[#allocation111_spill] sm:$0xff] }
 0x2b2   :  { %v1515_v63 = vpop.f32.mrf.mxu0  ;;  %v9783_v28 = vpop.f32.mrf.mxu1  ;;  %3419 = vmatmul.mubr.bf16.gmra.mxu1 %v13483_v31  ;;  %v2109_v61 = vmax.f32 %v1881_v3, %v1884_v42  ;;  %v816_v29 = vadd.f32 %v13485_v7, %v9200_v11  ;;  %v13488_v3 = vld [vmem:[#allocation112_spill] sm:$0xff]  ;;  %v13489_v7 = vld [vmem:[#allocation113_spill] sm:$0xff] }
 0x2b3   :  { %v1890_v54 = vmax.f32 %v1514_v33, 0.0  ;;  %v1516_v44 = vadd.f32 %v1515_v63, %v9210_v52  ;;  %v13484_v63 = vld [vmem:[#allocation114_spill] sm:$0xff]  ;;  %v2110_v31 = vmax.f32 %v1882_v8, %v1885_v48 }
 0x2b4   :  { %v1519_v5 = vpop.f32.mrf.mxu0  ;;  %v9787_v38 = vpop.f32.mrf.mxu1  ;;  %3712 = vmatmul.mubr.bf16.gmra.mxu0 %v9651_v36  ;;  %v820_v0 = vadd.f32 %v13484_v63, %v9200_v11  ;;  %v1171_v36 = vadd.f32 %v13488_v3, %v9214_v41 }
 0x2b5   :  { %v2112_v20 = vmax.f32 %v1887_v6, %v1890_v54  ;;  %v1891_v56 = vmax.f32 %v1516_v44, 0.0  ;;  %3721 = vmatprep.mubr.bf16.mxu0 %v13223_v62  ;;  %v1520_v9 = vadd.f32 %v1519_v5, %v9196_v23  ;;  %v13487_v5 = vld [vmem:[#allocation110_spill] sm:$0xff] }
 0x2b6   :  { %v1521_v51 = vpop.f32.mrf.mxu0  ;;  %v9792_v33 = vpop.f32.mrf.mxu1  ;;  %v1167_v42 = vadd.f32 %v13487_v5, %v9214_v41  ;;  %v1893_v5 = vmax.f32 %v816_v29, 0.0 }
 0x2b7   :  { %v2113_v46 = vmax.f32 %v1888_v50, %v1891_v56  ;;  %v1522_v12 = vadd.f32 %v1521_v51, %v9210_v52  ;;  %v9801_v44 = vpack.c.bf16 %v2112_v20, %v2109_v61  ;;  %v1896_v8 = vmax.f32 %v1520_v9, 0.0 }
 0x2b8   :  { %v1523_v6 = vpop.f32.mrf.mxu0  ;;  %v9799_v54 = vpop.f32.mrf.mxu1  ;;  %v1899_v51 = vmax.f32 %v820_v0, 0.0 }
 0x2b9   :  { %13486 = vst [vmem:[#allocation64_spill] sm:$0xff] %v9801_v44  ;;  %v9807_v1 = vpack.c.bf16 %v2113_v46, %v2110_v31  ;;  %v1524_v48 = vadd.f32 %v1523_v6, %v9196_v23  ;;  %3428 = vmatprep.mubr.bf16.mxu1 %v9801_v44  ;;  %v1897_v63 = vmax.f32 %v1522_v12, 0.0  ;;  %v1894_v46 = vmax.f32 %v1167_v42, 0.0  ;;  %v13491_v42 = vld [vmem:[#allocation116_spill] sm:$0xff] }
 0x2ba   :  { %v1525_v50 = vpop.f32.mrf.mxu0  ;;  %v9811_v56 = vpop.f32.mrf.mxu1  ;;  %3429 = vmatmul.mubr.bf16.gmra.mxu1 %v13489_v7  ;;  %v1900_v31 = vmax.f32 %v1171_v36, 0.0  ;;  %v2115_v44 = vmax.f32 %v1893_v5, %v1896_v8  ;;  %v826_v36 = vadd.f32 %v13491_v42, %v9200_v11  ;;  %v13494_v5 = vld [vmem:[#allocation117_spill] sm:$0xff]  ;;  %v13496_v42 = vld [vmem:[#allocation118_spill] sm:$0xff] }
 0x2bb   :  { %v1902_v61 = vmax.f32 %v1524_v48, 0.0  ;;  %v1526_v20 = vadd.f32 %v1525_v50, %v9210_v52  ;;  %v13490_v50 = vld [vmem:[#allocation119_spill] sm:$0xff]  ;;  %v2116_v7 = vmax.f32 %v1894_v46, %v1897_v63 }
 0x2bc   :  { %v1529_v58 = vpop.f32.mrf.mxu0  ;;  %v9815_v3 = vpop.f32.mrf.mxu1  ;;  %3722 = vmatmul.mubr.bf16.gmra.mxu0 %v9671_v32  ;;  %v830_v29 = vadd.f32 %v13490_v50, %v9200_v11  ;;  %v1181_v32 = vadd.f32 %v13494_v5, %v9214_v41 }
 0x2bd   :  { %v2118_v9 = vmax.f32 %v1899_v51, %v1902_v61  ;;  %v1903_v6 = vmax.f32 %v1526_v20, 0.0  ;;  %3731 = vmatprep.mubr.bf16.mxu0 %v13223_v62  ;;  %v1530_v12 = vadd.f32 %v1529_v58, %v9196_v23  ;;  %v13493_v58 = vld [vmem:[#allocation115_spill] sm:$0xff] }
 0x2be   :  { %v1531_v0 = vpop.f32.mrf.mxu0  ;;  %v9820_v48 = vpop.f32.mrf.mxu1  ;;  %v1177_v8 = vadd.f32 %v13493_v58, %v9214_v41  ;;  %v1905_v58 = vmax.f32 %v826_v36, 0.0 }
 0x2bf   :  { %v2119_v13 = vmax.f32 %v1900_v31, %v1903_v6  ;;  %v1532_v34 = vadd.f32 %v1531_v0, %v9210_v52  ;;  %v9829_v20 = vpack.c.bf16 %v2118_v9, %v2115_v44  ;;  %v1908_v46 = vmax.f32 %v1530_v12, 0.0 }
 0x2c0   :  { %v1533_v51 = vpop.f32.mrf.mxu0  ;;  %v9827_v61 = vpop.f32.mrf.mxu1  ;;  %v1911_v0 = vmax.f32 %v830_v29, 0.0 }
 0x2c1   :  { %13492 = vst [vmem:[#allocation60_spill] sm:$0xff] %v9829_v20  ;;  %v9835_v49 = vpack.c.bf16 %v2119_v13, %v2116_v7  ;;  %v1534_v63 = vadd.f32 %v1533_v51, %v9196_v23  ;;  %3438 = vmatprep.mubr.bf16.mxu1 %v9829_v20  ;;  %v1909_v50 = vmax.f32 %v1532_v34, 0.0  ;;  %v1906_v13 = vmax.f32 %v1177_v8, 0.0  ;;  %v13498_v8 = vld [vmem:[#allocation121_spill] sm:$0xff] }
 0x2c2   :  { %v1535_v31 = vpop.f32.mrf.mxu0  ;;  %v9839_v6 = vpop.f32.mrf.mxu1  ;;  %3439 = vmatmul.mubr.bf16.gmra.mxu1 %v13496_v42  ;;  %v1912_v7 = vmax.f32 %v1181_v32, 0.0  ;;  %v2121_v20 = vmax.f32 %v1905_v58, %v1908_v46  ;;  %v836_v32 = vadd.f32 %v13498_v8, %v9200_v11  ;;  %v13501_v58 = vld [vmem:[#allocation122_spill] sm:$0xff]  ;;  %v13503_v8 = vld [vmem:[#allocation123_spill] sm:$0xff] }
 0x2c3   :  { %13495 = vst [vmem:[#allocation62_spill] sm:$0xff] %v9835_v49  ;;  %v1914_v44 = vmax.f32 %v1534_v63, 0.0  ;;  %v1536_v9 = vadd.f32 %v1535_v31, %v9210_v52  ;;  %v13497_v31 = vld [vmem:[#allocation124_spill] sm:$0xff]  ;;  %v2122_v42 = vmax.f32 %v1906_v13, %v1909_v50 }
 0x2c4   :  { %v1539_v18 = vpop.f32.mrf.mxu0  ;;  %v9843_v5 = vpop.f32.mrf.mxu1  ;;  %3732 = vmatmul.mubr.bf16.gmra.mxu0 %v9691_v2  ;;  %v840_v36 = vadd.f32 %v13497_v31, %v9200_v11  ;;  %v1191_v2 = vadd.f32 %v13501_v58, %v9214_v41 }
 0x2c5   :  { %v2124_v12 = vmax.f32 %v1911_v0, %v1914_v44  ;;  %v1915_v51 = vmax.f32 %v1536_v9, 0.0  ;;  %3741 = vmatprep.mubr.bf16.mxu0 %v13223_v62  ;;  %v1540_v34 = vadd.f32 %v1539_v18, %v9196_v23  ;;  %v13500_v18 = vld [vmem:[#allocation120_spill] sm:$0xff] }
 0x2c6   :  { %v1541_v29 = vpop.f32.mrf.mxu0  ;;  %v9848_v63 = vpop.f32.mrf.mxu1  ;;  %v1187_v46 = vadd.f32 %v13500_v18, %v9214_v41  ;;  %v1917_v18 = vmax.f32 %v836_v32, 0.0 }
 0x2c7   :  { %v2125_v14 = vmax.f32 %v1912_v7, %v1915_v51  ;;  %v1542_v26 = vadd.f32 %v1541_v29, %v9210_v52  ;;  %v9857_v9 = vpack.c.bf16 %v2124_v12, %v2121_v20  ;;  %v1920_v13 = vmax.f32 %v1540_v34, 0.0 }
 0x2c8   :  { %v1543_v0 = vpop.f32.mrf.mxu0  ;;  %v9855_v44 = vpop.f32.mrf.mxu1  ;;  %v1923_v29 = vmax.f32 %v840_v36, 0.0 }
 0x2c9   :  { %13499 = vst [vmem:[#allocation66_spill] sm:$0xff] %v9857_v9  ;;  %v9863_v27 = vpack.c.bf16 %v2125_v14, %v2122_v42  ;;  %v1544_v50 = vadd.f32 %v1543_v0, %v9196_v23  ;;  %3448 = vmatprep.mubr.bf16.mxu1 %v9857_v9  ;;  %v1921_v31 = vmax.f32 %v1542_v26, 0.0  ;;  %v1918_v14 = vmax.f32 %v1187_v46, 0.0  ;;  %v13505_v46 = vld [vmem:[#allocation126_spill] sm:$0xff] }
 0x2ca   :  { %v1545_v7 = vpop.f32.mrf.mxu0  ;;  %v9867_v51 = vpop.f32.mrf.mxu1  ;;  %3449 = vmatmul.mubr.bf16.gmra.mxu1 %v13503_v8  ;;  %v1924_v42 = vmax.f32 %v1191_v2, 0.0  ;;  %v2127_v9 = vmax.f32 %v1917_v18, %v1920_v13  ;;  %v846_v2 = vadd.f32 %v13505_v46, %v9200_v11  ;;  %v13508_v18 = vld [vmem:[#allocation127_spill] sm:$0xff]  ;;  %v13510_v46 = vld [vmem:[#allocation128_spill] sm:$0xff] }
 0x2cb   :  { %13502 = vst [vmem:[#allocation69_spill] sm:$0xff] %v9863_v27  ;;  %v1926_v20 = vmax.f32 %v1544_v50, 0.0  ;;  %v1546_v12 = vadd.f32 %v1545_v7, %v9210_v52  ;;  %v13504_v7 = vld [vmem:[#allocation129_spill] sm:$0xff]  ;;  %v2128_v8 = vmax.f32 %v1918_v14, %v1921_v31 }
 0x2cc   :  { %v1549_v4 = vpop.f32.mrf.mxu0  ;;  %v9871_v58 = vpop.f32.mrf.mxu1  ;;  %3742 = vmatmul.mubr.bf16.gmra.mxu0 %v9711_v43  ;;  %v850_v32 = vadd.f32 %v13504_v7, %v9200_v11  ;;  %v1201_v43 = vadd.f32 %v13508_v18, %v9214_v41 }
 0x2cd   :  { %v2130_v34 = vmax.f32 %v1923_v29, %v1926_v20  ;;  %v1927_v0 = vmax.f32 %v1546_v12, 0.0  ;;  %3751 = vmatprep.mubr.bf16.mxu0 %v13223_v62  ;;  %v1550_v26 = vadd.f32 %v1549_v4, %v9196_v23  ;;  %v13507_v4 = vld [vmem:[#allocation125_spill] sm:$0xff] }
 0x2ce   :  { %v1551_v36 = vpop.f32.mrf.mxu0  ;;  %v9876_v50 = vpop.f32.mrf.mxu1  ;;  %v1197_v13 = vadd.f32 %v13507_v4, %v9214_v41  ;;  %v1929_v4 = vmax.f32 %v846_v2, 0.0  ;;  %v1936_v18 = vmax.f32 %v1201_v43, 0.0 }
 0x2cf   :  { %v2131_v15 = vmax.f32 %v1924_v42, %v1927_v0  ;;  %v1552_v59 = vadd.f32 %v1551_v36, %v9210_v52  ;;  %v9885_v12 = vpack.c.bf16 %v2130_v34, %v2127_v9  ;;  %v1932_v14 = vmax.f32 %v1550_v26, 0.0 }
 0x2d0   :  { %v1553_v29 = vpop.f32.mrf.mxu0  ;;  %v9883_v20 = vpop.f32.mrf.mxu1  ;;  %v1935_v36 = vmax.f32 %v850_v32, 0.0  ;;  %v1930_v26 = vmax.f32 %v1197_v13, 0.0 }
 0x2d1   :  { %13506 = vst [vmem:[#allocation65_spill] sm:$0xff] %v9885_v12  ;;  %v9891_v10 = vpack.c.bf16 %v2131_v15, %v2128_v8  ;;  %v1554_v31 = vadd.f32 %v1553_v29, %v9196_v23  ;;  %3458 = vmatprep.mubr.bf16.mxu1 %v9885_v12  ;;  %v1933_v7 = vmax.f32 %v1552_v59, 0.0  ;;  %v2384_v15 = vld [vmem:[%s12995_s4] sm:$0x3f]  ;;  %v13512_v59 = vld [vmem:[#allocation134_spill] sm:$0xff] }
 0x2d2   :  { %v1555_v42 = vpop.f32.mrf.mxu0  ;;  %v9895_v0 = vpop.f32.mrf.mxu1  ;;  %3459 = vmatmul.mubr.bf16.gmra.mxu1 %v13510_v46 }
 0x2d3   :  { %13509 = vst [vmem:[#allocation67_spill] sm:$0xff] %v9891_v10  ;;  %v1938_v9 = vmax.f32 %v1554_v31, 0.0  ;;  %v1556_v34 = vadd.f32 %v1555_v42, %v9210_v52  ;;  %v860_v31 = vadd.f32 %v13512_v59, %v9200_v11  ;;  %v2133_v42 = vmax.f32 %v1929_v4, %v1932_v14  ;;  %v13514_v10 = vld [vmem:[#allocation8_spill] sm:$0xff] }
 0x2d4   :  { %v1559_v8 = vpop.f32.mrf.mxu0  ;;  %v9902_v29 = vpop.f32.mrf.mxu1  ;;  %3752 = vmatmul.mubr.bf16.gmra.mxu0 %v9731_v57  ;;  %v13515_v16 = vsub.s32 0, %v13514_v10  ;;  %v2134_v57 = vmax.f32 %v1930_v26, %v1933_v7  ;;  %v13518_v14 = vld [vmem:[#allocation132_spill] sm:$0xff] }
 0x2d5   :  { %13511 = vst [vmem:[#allocation71_spill] sm:$0xff] %v9902_v29  ;;  %v2136_v12 = vmax.f32 %v1935_v36, %v1938_v9  ;;  %v1939_v32 = vmax.f32 %v1556_v34, 0.0  ;;  %3761 = vmatprep.mubr.bf16.mxu0 %v13223_v62  ;;  %v1560_v2 = vadd.f32 %v1559_v8, %v9196_v23  ;;  %v13516_v36 = vld [vmem:[#allocation130_spill] sm:$0xff]  ;;  %v13517_v34 = vld [vmem:[#allocation131_spill] sm:$0xff]  ;;  %v1211_v4 = vadd.f32 %v13518_v14, %v9214_v41 }
 0x2d6   :  { %v1561_v46 = vpop.f32.mrf.mxu0  ;;  %v9909_v21 = vpop.f32.mrf.mxu1  ;;  %v9913_v29 = vrot.slane %v2384_v15, %v13515_v16  ;;  %v1207_v9 = vadd.f32 %v13516_v36, %v9214_v41  ;;  %v856_v59 = vadd.f32 %v13517_v34, %v9200_v11  ;;  %v13520_v16 = vsub.s32 1, %v13514_v10 }
 0x2d7   :  { %13513 = vst [vmem:[#allocation74_spill] sm:$0xff] %v9909_v21  ;;  %v2137_v13 = vmax.f32 %v1936_v18, %v1939_v32  ;;  %v1562_v43 = vadd.f32 %v1561_v46, %v9210_v52  ;;  %v9924_v21 = vpack.c.bf16 %v2136_v12, %v2133_v42  ;;  %v1947_v18 = vmax.f32 %v860_v31, 0.0 }
 0x2d8   :  { %v1563_v8 = vpop.f32.mrf.mxu0  ;;  %v9922_v47 = vpop.f32.mrf.mxu1  ;;  %v9928_v7 = vrot.slane %v2384_v15, %v13520_v16  ;;  %v1944_v32 = vmax.f32 %v1560_v2, 0.0  ;;  %v3171_v41 = vadd.f32 %v9755_v17, %v9913_v29  ;;  %v13522_v15 = vld [vmem:[#allocation133_spill] sm:$0xff]  ;;  %v1948_v14 = vmax.f32 %v1211_v4, 0.0 }
 0x2d9   :  { %13519 = vst [vmem:[#allocation70_spill] sm:$0xff] %v9924_v21  ;;  %v9930_v26 = vpack.c.bf16 %v2137_v13, %v2134_v57  ;;  %v1564_v46 = vadd.f32 %v1563_v8, %v9196_v23  ;;  %3468 = vmatprep.mubr.bf16.mxu1 %v9924_v21  ;;  %v1945_v12 = vmax.f32 %v1562_v43, 0.0  ;;  %v1942_v57 = vmax.f32 %v1207_v9, 0.0 }
 0x2da   :  { %v1565_v11 = vpop.f32.mrf.mxu0  ;;  %v9934_v36 = vpop.f32.mrf.mxu1  ;;  %3469 = vmatmul.mubr.bf16.gmra.mxu1 %v13522_v15  ;;  %v1941_v13 = vmax.f32 %v856_v59, 0.0  ;;  %v3173_v2 = vadd.f32 %v9759_v40, %v9928_v7  ;;  %v3175_v59 = vadd.f32 %v9764_v22, %v9913_v29 }
 0x2db   :  { %13521 = vst [vmem:[#allocation72_spill] sm:$0xff] %v9930_v26  ;;  %v1950_v42 = vmax.f32 %v1564_v46, 0.0  ;;  %v1566_v34 = vadd.f32 %v1565_v11, %v9210_v52  ;;  %v2140_v4 = vmax.f32 %v1942_v57, %v1945_v12  ;;  %v3181_v12 = vadd.f32 %v9783_v28, %v9913_v29 }
 0x2dc   :  { %v9940_v23 = vpop.f32.mrf.mxu1  ;;  %v3523_v31 = vpop.f32.mrf.mxu0  ;;  %3762 = vmatmul.mubr.bf16.gmra.mxu0 %v9751_v19  ;;  %v2139_v52 = vmax.f32 %v1941_v13, %v1944_v32 }
 0x2dd   :  { %v2142_v8 = vmax.f32 %v1947_v18, %v1950_v42  ;;  %v1951_v16 = vmax.f32 %v1566_v34, 0.0  ;;  %v9945_v17 = vadd.f32 %v3523_v31, %v3171_v41  ;;  %3771 = vmatprep.mubr.bf16.mxu0 %v13223_v62  ;;  %v3177_v41 = vadd.f32 %v9771_v37, %v9928_v7 }
 0x2de   :  { %v9948_v43 = vpop.f32.mrf.mxu1  ;;  %v3525_v9 = vpop.f32.mrf.mxu0 }
 0x2df   :  { %v2143_v46 = vmax.f32 %v1948_v14, %v1951_v16  ;;  %v9952_v11 = vadd.f32 %v3525_v9, %v3173_v2  ;;  %v9956_v18 = vpack.c.bf16 %v2142_v8, %v2139_v52  ;;  %v3183_v14 = vadd.f32 %v9787_v38, %v9928_v7  ;;  %v8092_v38 = vld [vmem:[#allocation2 + $0x160] ss:$24 sps:$4 sm:$0xff]  }
 0x2e0   :  { %v9954_v19 = vpop.f32.mrf.mxu1  ;;  %v3527_v40 = vpop.f32.mrf.mxu0  ;;  %v3185_v8 = vadd.f32 %v9792_v33, %v9913_v29 }
 0x2e1   :  { %13523 = vst [vmem:[#allocation76_spill] sm:$0xff] %v9952_v11  ;;  %13524 = vst [vmem:[#allocation79_spill] sm:$0xff] %v9956_v18  ;;  %v9960_v42 = vpack.c.bf16 %v2143_v46, %v2140_v4  ;;  %v9962_v32 = vadd.f32 %v3527_v40, %v3175_v59  ;;  %3478 = vmatprep.mubr.bf16.mxu1 %v9956_v18  ;;  %v3187_v59 = vadd.f32 %v9799_v54, %v9928_v7 }
 0x2e2   :  { %v9965_v34 = vpop.f32.mrf.mxu1  ;;  %v3529_v22 = vpop.f32.mrf.mxu0  ;;  %3479 = vmatmul.mubr.bf16.gmra.mxu1 %v9233_v39  ;;  %v3193_v54 = vadd.f32 %v9815_v3, %v9928_v7  ;;  %v3197_v3 = vadd.f32 %v9827_v61, %v9928_v7 }
 0x2e3   :  { %13525 = vst [vmem:[#allocation75_spill] sm:$0xff] %v9960_v42  ;;  %v9970_v57 = vadd.f32 %v3529_v22, %v3177_v41  ;;  %3874 = vmatprep.mubr.bf16.mxu1 %v9247_v25  ;;  %v8100_v41 = vld [vmem:[#allocation2 + $0x134] ss:$24 sps:$4 sm:$0xff]   ;;  %v3191_v22 = vadd.f32 %v9811_v56, %v9913_v29  ;;  %v8098_v56 = vld [vmem:[#allocation2 + $0x130] ss:$24 sps:$4 sm:$0xff]  }
 0x2e4   :  { %v9973_v13 = vpop.f32.mrf.mxu1  ;;  %v3533_v37 = vpop.f32.mrf.mxu0  ;;  %3772 = vmatmul.mubr.bf16.gmra.mxu0 %v9779_v30 }
 0x2e5   :  { %13526 = vst [vmem:[#allocation77_spill] sm:$0xff] %v9970_v57  ;;  %v9978_v31 = vadd.f32 %v3533_v37, %v3181_v12  ;;  %3781 = vmatprep.mubr.bf16.mxu0 %v13223_v62 }
 0x2e6   :  { %v9981_v2 = vpop.f32.mrf.mxu1  ;;  %v3535_v28 = vpop.f32.mrf.mxu0 }
 0x2e7   :  { %v9985_v16 = vadd.f32 %v3535_v28, %v3183_v14 }
 0x2e8   :  { %v9987_v52 = vpop.f32.mrf.mxu1  ;;  %v3537_v9 = vpop.f32.mrf.mxu0 }
 0x2e9   :  { %13527 = vst [vmem:[#allocation81_spill] sm:$0xff] %v9985_v16  ;;  %v9991_v4 = vadd.f32 %v3537_v9, %v3185_v8  ;;  %v8103_v9 = vld [vmem:[#allocation2 + $0x104] ss:$24 sps:$4 sm:$0xff]  }
 0x2ea   :  { %v9993_v46 = vpop.f32.mrf.mxu1  ;;  %v3539_v40 = vpop.f32.mrf.mxu0  ;;  %3875 = vmatmul.mubr.bf16.vlgmr.msra.gmra.mxu1 %v8610_v35 }
 0x2eb   :  { %v9997_v12 = vadd.f32 %v3539_v40, %v3187_v59  ;;  %3884 = vmatprep.mubr.bf16.mxu1 %v9270_v45  ;;  %4549 = vmatpush1.bf16.msra.mxu1 %v8092_v38  ;;  %v3195_v59 = vadd.f32 %v9820_v48, %v9913_v29  ;;  %v3201_v48 = vadd.f32 %v9839_v6, %v9913_v29  ;;  %v8104_v6 = vld [vmem:[#allocation2 + $0xd0] ss:$24 sps:$4 sm:$0xff]  }
 0x2ec   :  { %v10001_v33 = vpop.f32.mrf.mxu1  ;;  %v3543_v37 = vpop.f32.mrf.mxu0  ;;  %3782 = vmatmul.mubr.bf16.gmra.mxu0 %v9807_v1  ;;  %4550 = vmatprep.subr.bf16.mxu1 %v8100_v41  ;;  %v8106_v41 = vld [vmem:[#allocation2 + $0xd4] ss:$24 sps:$4 sm:$0xff]  }
 0x2ed   :  { %13528 = vst [vmem:[#allocation84_spill] sm:$0xff] %v9997_v12  ;;  %v10006_v14 = vadd.f32 %v3543_v37, %v3191_v22  ;;  %3791 = vmatprep.mubr.bf16.mxu0 %v13223_v62  ;;  %v8101_v22 = vld [vmem:[#allocation2 + $0x100] ss:$24 sps:$4 sm:$0xff]  }
 0x2ee   :  { %v10009_v28 = vpop.f32.mrf.mxu1  ;;  %v3545_v8 = vpop.f32.mrf.mxu0 }
 0x2ef   :  { %v10013_v40 = vadd.f32 %v3545_v8, %v3193_v54  ;;  %4551 = vmatpush1.bf16.msra.mxu1 %v8098_v56 }
 0x2f0   :  { %v10015_v12 = vpop.f32.mrf.mxu1  ;;  %v3547_v16 = vpop.f32.mrf.mxu0  ;;  %4552 = vmatprep.subr.bf16.mxu1 %v8103_v9 }
 0x2f1   :  { %13529 = vst [vmem:[#allocation80_spill] sm:$0xff] %v10013_v40  ;;  %v10019_v38 = vadd.f32 %v3547_v16, %v3195_v59  ;;  %v3203_v16 = vadd.f32 %v9843_v5, %v9928_v7  ;;  %v8112_v59 = vld [vmem:[#allocation2 + $0xa4] ss:$24 sps:$4 sm:$0xff]   ;;  %v3207_v5 = vadd.f32 %v9855_v44, %v9928_v7 }
 0x2f2   :  { %v10021_v37 = vpop.f32.mrf.mxu1  ;;  %v3549_v57 = vpop.f32.mrf.mxu0  ;;  %3885 = vmatmul.mubr.bf16.gmra.mxu1 %v8631_v55 }
 0x2f3   :  { %v10025_v54 = vadd.f32 %v3549_v57, %v3197_v3  ;;  %3894 = vmatprep.mubr.bf16.mxu1 %v9293_v53  ;;  %4553 = vmatpush1.bf16.msra.mxu1 %v8101_v22  ;;  %v3205_v3 = vadd.f32 %v9848_v63, %v9913_v29  ;;  %v8110_v22 = vld [vmem:[#allocation2 + $0xa0] ss:$24 sps:$4 sm:$0xff]   ;;  %v3211_v63 = vadd.f32 %v9867_v51, %v9913_v29  ;;  %v8113_v51 = vld [vmem:[#allocation2 + $0x70] ss:$24 sps:$4 sm:$0xff]  }
 0x2f4   :  { %v10029_v8 = vpop.f32.mrf.mxu1  ;;  %v3553_v61 = vpop.f32.mrf.mxu0  ;;  %3792 = vmatmul.mubr.bf16.gmra.mxu0 %v9835_v49  ;;  %4554 = vmatprep.subr.bf16.mxu1 %v8106_v41  ;;  %v8115_v41 = vld [vmem:[#allocation2 + $0x74] ss:$24 sps:$4 sm:$0xff]  }
 0x2f5   :  { %13530 = vst [vmem:[#allocation82_spill] sm:$0xff] %v10025_v54  ;;  %v10034_v56 = vadd.f32 %v3553_v61, %v3201_v48  ;;  %3801 = vmatprep.mubr.bf16.mxu0 %v13223_v62 }
 0x2f6   :  { %v10037_v57 = vpop.f32.mrf.mxu1  ;;  %v3555_v9 = vpop.f32.mrf.mxu0 }
 0x2f7   :  { %13531 = vst [vmem:[#allocation86_spill] sm:$0xff] %v10034_v56  ;;  %v10041_v54 = vadd.f32 %v3555_v9, %v3203_v16  ;;  %4555 = vmatpush1.bf16.msra.mxu1 %v8104_v6 }
 0x2f8   :  { %v10043_v40 = vpop.f32.mrf.mxu1  ;;  %v3557_v11 = vpop.f32.mrf.mxu0  ;;  %4556 = vmatprep.subr.bf16.mxu1 %v8112_v59 }
 0x2f9   :  { %13532 = vst [vmem:[#allocation89_spill] sm:$0xff] %v10041_v54  ;;  %v10047_v48 = vadd.f32 %v3557_v11, %v3205_v3  ;;  %v3213_v11 = vadd.f32 %v9871_v58, %v9928_v7  ;;  %v8121_v3 = vld [vmem:[#allocation2 + $0x44] ss:$24 sps:$4 sm:$0xff]   ;;  %v3217_v58 = vadd.f32 %v9883_v20, %v9928_v7 }
 0x2fa   :  { %v10049_v61 = vpop.f32.mrf.mxu1  ;;  %v3559_v56 = vpop.f32.mrf.mxu0  ;;  %3895 = vmatmul.mubr.bf16.gmra.mxu1 %v8652_v24 }
 0x2fb   :  { %13533 = vst [vmem:[#allocation85_spill] sm:$0xff] %v10047_v48  ;;  %v10053_v16 = vadd.f32 %v3559_v56, %v3207_v5  ;;  %3904 = vmatprep.mubr.bf16.mxu1 %v9316_v60  ;;  %4557 = vmatpush1.bf16.msra.mxu1 %v8110_v22  ;;  %v3215_v5 = vadd.f32 %v9876_v50, %v9913_v29  ;;  %v8119_v22 = vld [vmem:[#allocation2 + $0x40] ss:$24 sps:$4 sm:$0xff]  }
 0x2fc   :  { %v10057_v9 = vpop.f32.mrf.mxu1  ;;  %v3563_v44 = vpop.f32.mrf.mxu0  ;;  %3802 = vmatmul.mubr.bf16.gmra.mxu0 %v9863_v27  ;;  %4558 = vmatprep.subr.bf16.mxu1 %v8115_v41  ;;  %v8124_v41 = vld [vmem:[#allocation2 + $0x14] ss:$24 sps:$4 sm:$0xff]   ;;  %v3221_v50 = vadd.f32 %v9895_v0, %v9913_v29  ;;  %v8122_v0 = vld [vmem:[#allocation2 + $0x10] ss:$24 sps:$4 sm:$0xff]  }
 0x2fd   :  { %13534 = vst [vmem:[#allocation87_spill] sm:$0xff] %v10053_v16  ;;  %v10062_v6 = vadd.f32 %v3563_v44, %v3211_v63  ;;  %3811 = vmatprep.mubr.bf16.mxu0 %v13223_v62 }
 0x2fe   :  { %v10065_v56 = vpop.f32.mrf.mxu1  ;;  %v3565_v59 = vpop.f32.mrf.mxu0 }
 0x2ff   :  { %13535 = vst [vmem:[#allocation91_spill] sm:$0xff] %v10062_v6  ;;  %v10069_v16 = vadd.f32 %v3565_v59, %v3213_v11  ;;  %4559 = vmatpush1.bf16.msra.mxu1 %v8113_v51  ;;  %v13539_v59 = vld [vmem:[#allocation10_spill] sm:$0xff]  ;;  %v13542_v51 = vld [vmem:[#allocation71_spill] sm:$0xff] }
 0x300   :  { %v10071_v54 = vpop.f32.mrf.mxu1  ;;  %v3567_v48 = vpop.f32.mrf.mxu0  ;;  %4560 = vmatprep.subr.bf16.mxu1 %v8121_v3 }
 0x301   :  { %13536 = vst [vmem:[#allocation94_spill] sm:$0xff] %v10069_v16  ;;  %v10075_v63 = vadd.f32 %v3567_v48, %v3215_v5  ;;  %v13540_v16 = vld [vmem:[#allocation140_spill] sm:$0xff]  ;;  %v13541_v48 = vld [vmem:[#allocation67_spill] sm:$0xff]  ;;  %v3223_v5 = vadd.f32 %v13542_v51, %v9928_v7 }
 0x302   :  { %v10077_v44 = vpop.f32.mrf.mxu1  ;;  %v3569_v6 = vpop.f32.mrf.mxu0  ;;  %3905 = vmatmul.mubr.bf16.gmra.mxu1 %v13539_v59 }
 0x303   :  { %13537 = vst [vmem:[#allocation90_spill] sm:$0xff] %v10075_v63  ;;  %v10081_v11 = vadd.f32 %v3569_v6, %v3217_v58  ;;  %3914 = vmatprep.mubr.bf16.mxu1 %v13540_v16  ;;  %4561 = vmatpush1.bf16.msra.mxu1 %v8119_v22  ;;  %v8130_v58 = vld [vmem:[#allocation2 + $0x2e4] ss:$24 sps:$4 sm:$0xff]   ;;  %v8128_v22 = vld [vmem:[#allocation2 + $0x2e0] ss:$24 sps:$4 sm:$0xff]  }
 0x304   :  { %v10085_v27 = vpop.f32.mrf.mxu1  ;;  %v3573_v20 = vpop.f32.mrf.mxu0  ;;  %3812 = vmatmul.mubr.bf16.gmra.mxu0 %v13541_v48  ;;  %4562 = vmatprep.subr.bf16.mxu1 %v8124_v41  ;;  %v8133_v41 = vld [vmem:[#allocation2 + $0x2b4] ss:$24 sps:$4 sm:$0xff]  }
 0x305   :  { %13538 = vst [vmem:[#allocation92_spill] sm:$0xff] %v10081_v11  ;;  %v10090_v63 = vadd.f32 %v3573_v20, %v3221_v50  ;;  %3821 = vmatprep.mubr.bf16.mxu0 %v13223_v62  ;;  %v13544_v11 = vld [vmem:[#allocation74_spill] sm:$0xff]  ;;  %v3227_v50 = vadd.f32 %v9922_v47, %v9928_v7 }
 0x306   :  { %v10093_v6 = vpop.f32.mrf.mxu1  ;;  %v3575_v3 = vpop.f32.mrf.mxu0  ;;  %v3225_v16 = vadd.f32 %v13544_v11, %v9913_v29  ;;  %v3231_v11 = vadd.f32 %v9934_v36, %v9913_v29  ;;  %v8131_v36 = vld [vmem:[#allocation2 + $0x2b0] ss:$24 sps:$4 sm:$0xff]  }
 0x307   :  { %13543 = vst [vmem:[#allocation96_spill] sm:$0xff] %v10090_v63  ;;  %v10097_v59 = vadd.f32 %v3575_v3, %v3223_v5  ;;  %4563 = vmatpush1.bf16.msra.mxu1 %v8122_v0  ;;  %v13548_v3 = vld [vmem:[#allocation11_spill] sm:$0xff] }
 0x308   :  { %v10099_v48 = vpop.f32.mrf.mxu1  ;;  %v3577_v60 = vpop.f32.mrf.mxu0  ;;  %4564 = vmatprep.subr.bf16.mxu1 %v8130_v58  ;;  %v3235_v58 = vadd.f32 %v9948_v43, %v9913_v29  ;;  %v3241_v43 = vadd.f32 %v9965_v34, %v9913_v29 }
 0x309   :  { %13545 = vst [vmem:[#allocation99_spill] sm:$0xff] %v10097_v59  ;;  %v10103_v20 = vadd.f32 %v3577_v60, %v3225_v16  ;;  %v13549_v59 = vld [vmem:[#allocation142_spill] sm:$0xff]  ;;  %v3233_v60 = vadd.f32 %v9940_v23, %v9928_v7  ;;  %v3237_v23 = vadd.f32 %v9954_v19, %v9928_v7 }
 0x30a   :  { %v10105_v51 = vpop.f32.mrf.mxu1  ;;  %v3579_v63 = vpop.f32.mrf.mxu0  ;;  %3915 = vmatmul.mubr.bf16.gmra.mxu1 %v13548_v3 }
 0x30b   :  { %13546 = vst [vmem:[#allocation95_spill] sm:$0xff] %v10103_v20  ;;  %v10109_v5 = vadd.f32 %v3579_v63, %v3227_v50  ;;  %3924 = vmatprep.mubr.bf16.mxu1 %v13549_v59  ;;  %4565 = vmatpush2.bf16.msra.mxu1 %v8128_v22  ;;  %v8137_v22 = vld [vmem:[#allocation2 + $0x280] ss:$24 sps:$4 sm:$0xff]  }
 0x30c   :  { %v10113_v24 = vpop.f32.mrf.mxu1  ;;  %v3583_v47 = vpop.f32.mrf.mxu0  ;;  %3822 = vmatmul.mubr.bf16.gmra.mxu0 %v9930_v26  ;;  %4566 = vmatprep.subr.bf16.mxu1 %v8133_v41  ;;  %v13568_v59 = vld [vmem:[#allocation15_spill] sm:$0xff] }
 0x30d   :  { %13547 = vst [vmem:[#allocation97_spill] sm:$0xff] %v10109_v5  ;;  %v10118_v16 = vadd.f32 %v3583_v47, %v3231_v11  ;;  %3831 = vmatprep.mubr.bf16.mxu0 %v13223_v62  ;;  %v8139_v5 = vld [vmem:[#allocation2 + $0x284] ss:$24 sps:$4 sm:$0xff]  }
 0x30e   :  { %v10121_v63 = vpop.f32.mrf.mxu1  ;;  %v3585_v0 = vpop.f32.mrf.mxu0 }
 0x30f   :  { %13550 = vst [vmem:[#allocation104_spill] sm:$0xff] %v10118_v16  ;;  %v10125_v50 = vadd.f32 %v3585_v0, %v3233_v60  ;;  %4567 = vmatpush2.bf16.msra.mxu1 %v8131_v36  ;;  %v13554_v60 = vld [vmem:[#allocation12_spill] sm:$0xff] }
 0x310   :  { %v10127_v20 = vpop.f32.mrf.mxu1  ;;  %v3587_v26 = vpop.f32.mrf.mxu0  ;;  %4568 = vmatprep.subr.bf16.mxu1 %v8139_v5  ;;  %v13555_v0 = vld [vmem:[#allocation144_spill] sm:$0xff] }
 0x311   :  { %13551 = vst [vmem:[#allocation101_spill] sm:$0xff] %v10125_v50  ;;  %v10131_v11 = vadd.f32 %v3587_v26, %v3235_v58  ;;  %v3243_v26 = vadd.f32 %v9973_v13, %v9928_v7 }
 0x312   :  { %v10133_v47 = vpop.f32.mrf.mxu1  ;;  %v3589_v16 = vpop.f32.mrf.mxu0  ;;  %3925 = vmatmul.mubr.bf16.gmra.mxu1 %v13554_v60 }
 0x313   :  { %13552 = vst [vmem:[#allocation100_spill] sm:$0xff] %v10131_v11  ;;  %v10137_v41 = vadd.f32 %v3589_v16, %v3237_v23  ;;  %3934 = vmatprep.mubr.bf16.mxu1 %v13555_v0  ;;  %4569 = vmatpush2.bf16.msra.mxu1 %v8137_v22  ;;  %v3245_v16 = vadd.f32 %v9981_v2, %v9913_v29  ;;  %v13560_v2 = vld [vmem:[#allocation14_spill] sm:$0xff] }
 0x314   :  { %v10141_v50 = vpop.f32.mrf.mxu1  ;;  %v3593_v19 = vpop.f32.mrf.mxu0  ;;  %3832 = vmatmul.mubr.bf16.gmra.mxu0 %v9960_v42  ;;  %v3247_v11 = vadd.f32 %v9987_v52, %v9928_v7  ;;  %v3251_v42 = vadd.f32 %v9993_v46, %v9913_v29  ;;  %v13562_v52 = vld [vmem:[#allocation135_spill] sm:$0xff]  ;;  %v8116_v46 = vld [vmem:[#allocation2 + $0x430] ss:$24 sps:$4 sm:$0xff]  }
 0x315   :  { %13553 = vst [vmem:[#allocation102_spill] sm:$0xff] %v10137_v41  ;;  %v10146_v36 = vadd.f32 %v3593_v19, %v3241_v43  ;;  %4227 = vmatprep.mubr.bf16.mxu0 %v13223_v62  ;;  %v8107_v43 = vld [vmem:[#allocation2 + $0x460] ss:$24 sps:$4 sm:$0xff]  }
 0x316   :  { %v10149_v34 = vpop.f32.mrf.mxu1  ;;  %v3595_v5 = vpop.f32.mrf.mxu0 }
 0x317   :  { %13556 = vst [vmem:[#allocation109_spill] sm:$0xff] %v10146_v36  ;;  %v10153_v58 = vadd.f32 %v3595_v5, %v3243_v26  ;;  %v8118_v36 = vld [vmem:[#allocation2 + $0x434] ss:$24 sps:$4 sm:$0xff]   ;;  %v13561_v26 = vld [vmem:[#allocation16_spill] sm:$0xff] }
 0x318   :  { %v10155_v23 = vpop.f32.mrf.mxu1  ;;  %v3597_v41 = vpop.f32.mrf.mxu0 }
 0x319   :  { %13557 = vst [vmem:[#allocation106_spill] sm:$0xff] %v10153_v58  ;;  %v10159_v13 = vadd.f32 %v3597_v41, %v3245_v16  ;;  %v3253_v41 = vadd.f32 %v10001_v33, %v9928_v7  ;;  %v3257_v33 = vadd.f32 %v10015_v12, %v9928_v7 }
 0x31a   :  { %v10161_v19 = vpop.f32.mrf.mxu1  ;;  %v3599_v22 = vpop.f32.mrf.mxu0  ;;  %3935 = vmatmul.mubr.bf16.gmra.mxu1 %v13560_v2  ;;  %v8142_v2 = vld [vmem:[#allocation2 + $0x254] ss:$24 sps:$4 sm:$0xff]  }
 0x31b   :  { %13558 = vst [vmem:[#allocation105_spill] sm:$0xff] %v10159_v13  ;;  %v10165_v0 = vadd.f32 %v3599_v22, %v3247_v11  ;;  %3944 = vmatprep.mubr.bf16.mxu1 %v13561_v26  ;;  %v3255_v13 = vadd.f32 %v10009_v28, %v9913_v29  ;;  %4570 = vmatprep.subr.bf16.mxu1 %v8142_v2  ;;  %v8136_v28 = vld [vmem:[#allocation2 + $0x3d4] ss:$24 sps:$4 sm:$0xff]  }
 0x31c   :  { %v10169_v5 = vpop.f32.mrf.mxu1  ;;  %v3603_v58 = vpop.f32.mrf.mxu0  ;;  %4228 = vmatmul.mubr.bf16.vlgmr.msra.gmra.mxu0 %v13562_v52  ;;  %v8140_v52 = vld [vmem:[#allocation2 + $0x250] ss:$24 sps:$4 sm:$0xff]   ;;  %v3263_v2 = vadd.f32 %v10029_v8, %v9928_v7  ;;  %v3267_v8 = vadd.f32 %v10043_v40, %v9928_v7 }
 0x31d   :  { %13559 = vst [vmem:[#allocation107_spill] sm:$0xff] %v10165_v0  ;;  %v10174_v16 = vadd.f32 %v3603_v58, %v3251_v42  ;;  %4902 = vmatpush1.bf16.msra.mxu0 %v8107_v43  ;;  %4237 = vmatprep.mubr.bf16.mxu0 %v13223_v62  ;;  %v8127_v0 = vld [vmem:[#allocation2 + $0x404] ss:$24 sps:$4 sm:$0xff]   ;;  %v8125_v43 = vld [vmem:[#allocation2 + $0x400] ss:$24 sps:$4 sm:$0xff]  }
 0x31e   :  { %v10177_v11 = vpop.f32.mrf.mxu1  ;;  %v3605_v22 = vpop.f32.mrf.mxu0  ;;  %4903 = vmatprep.subr.bf16.mxu0 %v8118_v36  ;;  %4571 = vmatpush2.bf16.msra.mxu1 %v8140_v52 }
 0x31f   :  { %13563 = vst [vmem:[#allocation114_spill] sm:$0xff] %v10174_v16  ;;  %v10181_v26 = vadd.f32 %v3605_v22, %v3253_v41  ;;  %v3261_v41 = vadd.f32 %v10021_v37, %v9913_v29  ;;  %v8134_v37 = vld [vmem:[#allocation2 + $0x3d0] ss:$24 sps:$4 sm:$0xff]  }
 0x320   :  { %v10183_v60 = vpop.f32.mrf.mxu1  ;;  %v3607_v42 = vpop.f32.mrf.mxu0 }
 0x321   :  { %13564 = vst [vmem:[#allocation111_spill] sm:$0xff] %v10181_v26  ;;  %v10187_v58 = vadd.f32 %v3607_v42, %v3255_v13  ;;  %4904 = vmatpush1.bf16.msra.mxu0 %v8116_v46  ;;  %v13567_v26 = vld [vmem:[#allocation18_spill] sm:$0xff]  ;;  %v13569_v46 = vld [vmem:[#allocation136_spill] sm:$0xff] }
 0x322   :  { %v10189_v36 = vpop.f32.mrf.mxu1  ;;  %v3609_v16 = vpop.f32.mrf.mxu0  ;;  %4905 = vmatprep.subr.bf16.mxu0 %v8127_v0  ;;  %3945 = vmatmul.mubr.bf16.gmra.mxu1 %v13567_v26  ;;  %v8145_v42 = vld [vmem:[#allocation2 + $0x3a4] ss:$24 sps:$4 sm:$0xff]  }
 0x323   :  { %13565 = vst [vmem:[#allocation110_spill] sm:$0xff] %v10187_v58  ;;  %v10193_v22 = vadd.f32 %v3609_v16, %v3257_v33  ;;  %3954 = vmatprep.mubr.bf16.mxu1 %v13568_v59  ;;  %v3265_v33 = vadd.f32 %v10037_v57, %v9913_v29 }
 0x324   :  { %v10197_v12 = vpop.f32.mrf.mxu1  ;;  %v3613_v13 = vpop.f32.mrf.mxu0  ;;  %4238 = vmatmul.mubr.bf16.gmra.mxu0 %v13569_v46 }
 0x325   :  { %13566 = vst [vmem:[#allocation112_spill] sm:$0xff] %v10193_v22  ;;  %v10202_v0 = vadd.f32 %v3613_v13, %v3261_v41  ;;  %4247 = vmatprep.mubr.bf16.mxu0 %v13223_v62  ;;  %4906 = vmatpush1.bf16.msra.mxu0 %v8125_v43  ;;  %v8143_v43 = vld [vmem:[#allocation2 + $0x3a0] ss:$24 sps:$4 sm:$0xff]  }
 0x326   :  { %v10205_v52 = vpop.f32.mrf.mxu1  ;;  %v3615_v16 = vpop.f32.mrf.mxu0  ;;  %4907 = vmatprep.subr.bf16.mxu0 %v8136_v28  ;;  %v3271_v28 = vadd.f32 %v10049_v61, %v9913_v29 }
 0x327   :  { %13570 = vst [vmem:[#allocation119_spill] sm:$0xff] %v10202_v0  ;;  %v10209_v22 = vadd.f32 %v3615_v16, %v3263_v2  ;;  %v13574_v2 = vld [vmem:[#allocation23_spill] sm:$0xff]  ;;  %v13575_v16 = vld [vmem:[#allocation21_spill] sm:$0xff] }
 0x328   :  { %v10211_v58 = vpop.f32.mrf.mxu1  ;;  %v3617_v46 = vpop.f32.mrf.mxu0 }
 0x329   :  { %13571 = vst [vmem:[#allocation116_spill] sm:$0xff] %v10209_v22  ;;  %v10215_v41 = vadd.f32 %v3617_v46, %v3265_v33  ;;  %4908 = vmatpush1.bf16.msra.mxu0 %v8134_v37  ;;  %v13576_v46 = vld [vmem:[#allocation137_spill] sm:$0xff]  ;;  %v3273_v37 = vadd.f32 %v10057_v9, %v9928_v7  ;;  %v3277_v9 = vadd.f32 %v10071_v54, %v9928_v7  ;;  %v13583_v54 = vld [vmem:[#allocation139_spill] sm:$0xff] }
 0x32a   :  { %v10217_v13 = vpop.f32.mrf.mxu1  ;;  %v3619_v0 = vpop.f32.mrf.mxu0  ;;  %4909 = vmatprep.subr.bf16.mxu0 %v8145_v42  ;;  %3955 = vmatmul.mubr.bf16.gmra.mxu1 %v13574_v2  ;;  %v3275_v42 = vadd.f32 %v10065_v56, %v9913_v29  ;;  %v3281_v56 = vadd.f32 %v10077_v44, %v9913_v29 }
 0x32b   :  { %13572 = vst [vmem:[#allocation115_spill] sm:$0xff] %v10215_v41  ;;  %v10221_v57 = vadd.f32 %v3619_v0, %v3267_v8  ;;  %3964 = vmatprep.mubr.bf16.mxu1 %v13575_v16  ;;  %v8148_v41 = vld [vmem:[#allocation2 + $0x224] ss:$24 sps:$4 sm:$0xff]  }
 0x32c   :  { %v10225_v22 = vpop.f32.mrf.mxu1  ;;  %v3623_v40 = vpop.f32.mrf.mxu0  ;;  %4248 = vmatmul.mubr.bf16.gmra.mxu0 %v13576_v46  ;;  %4572 = vmatprep.subr.bf16.mxu1 %v8148_v41  ;;  %v3283_v41 = vadd.f32 %v10085_v27, %v9928_v7 }
 0x32d   :  { %13573 = vst [vmem:[#allocation117_spill] sm:$0xff] %v10221_v57  ;;  %v10230_v33 = vadd.f32 %v3623_v40, %v3271_v28  ;;  %4257 = vmatprep.mubr.bf16.mxu0 %v13223_v62  ;;  %4910 = vmatpush1.bf16.msra.mxu0 %v8143_v43  ;;  %v8146_v57 = vld [vmem:[#allocation2 + $0x220] ss:$24 sps:$4 sm:$0xff]  }
 0x32e   :  { %v10233_v61 = vpop.f32.mrf.mxu1  ;;  %v3625_v0 = vpop.f32.mrf.mxu0  ;;  %4573 = vmatpush2.bf16.msra.mxu1 %v8146_v57 }
 0x32f   :  { %13577 = vst [vmem:[#allocation124_spill] sm:$0xff] %v10230_v33  ;;  %v10237_v8 = vadd.f32 %v3625_v0, %v3273_v37  ;;  %v13581_v0 = vld [vmem:[#allocation28_spill] sm:$0xff] }
 0x330   :  { %v10239_v16 = vpop.f32.mrf.mxu1  ;;  %v3627_v46 = vpop.f32.mrf.mxu0 }
 0x331   :  { %13578 = vst [vmem:[#allocation121_spill] sm:$0xff] %v10237_v8  ;;  %v10243_v28 = vadd.f32 %v3627_v46, %v3275_v42  ;;  %v13582_v8 = vld [vmem:[#allocation20_spill] sm:$0xff]  ;;  %v3285_v42 = vadd.f32 %v10093_v6, %v9913_v29  ;;  %v13589_v6 = vld [vmem:[#allocation26_spill] sm:$0xff] }
 0x332   :  { %v10245_v43 = vpop.f32.mrf.mxu1  ;;  %v3629_v40 = vpop.f32.mrf.mxu0  ;;  %3965 = vmatmul.mubr.bf16.gmra.mxu1 %v13581_v0  ;;  %v8154_v0 = vld [vmem:[#allocation2 + $0x374] ss:$24 sps:$4 sm:$0xff]  }
 0x333   :  { %13579 = vst [vmem:[#allocation120_spill] sm:$0xff] %v10243_v28  ;;  %v10249_v37 = vadd.f32 %v3629_v40, %v3277_v9  ;;  %3974 = vmatprep.mubr.bf16.mxu1 %v13582_v8  ;;  %v3287_v28 = vadd.f32 %v10099_v48, %v9928_v7  ;;  %v13588_v8 = vld [vmem:[#allocation33_spill] sm:$0xff]  ;;  %v3293_v48 = vadd.f32 %v10113_v24, %v9928_v7 }
 0x334   :  { %v10253_v33 = vpop.f32.mrf.mxu1  ;;  %v3633_v2 = vpop.f32.mrf.mxu0  ;;  %4258 = vmatmul.mubr.bf16.gmra.mxu0 %v13583_v54  ;;  %v3297_v24 = vadd.f32 %v10127_v20, %v9928_v7  ;;  %4911 = vmatprep.subr.bf16.mxu0 %v8154_v0 }
 0x335   :  { %13580 = vst [vmem:[#allocation122_spill] sm:$0xff] %v10249_v37  ;;  %v10258_v46 = vadd.f32 %v3633_v2, %v3281_v56  ;;  %4267 = vmatprep.mubr.bf16.mxu0 %v13223_v62  ;;  %v3291_v56 = vadd.f32 %v10105_v51, %v9913_v29 }
 0x336   :  { %v10261_v57 = vpop.f32.mrf.mxu1  ;;  %v3635_v44 = vpop.f32.mrf.mxu0 }
 0x337   :  { %13584 = vst [vmem:[#allocation129_spill] sm:$0xff] %v10258_v46  ;;  %v10265_v9 = vadd.f32 %v3635_v44, %v3283_v41 }
 0x338   :  { %v10267_v40 = vpop.f32.mrf.mxu1  ;;  %v3637_v37 = vpop.f32.mrf.mxu0 }
 0x339   :  { %13585 = vst [vmem:[#allocation126_spill] sm:$0xff] %v10265_v9  ;;  %v10271_v54 = vadd.f32 %v3637_v37, %v3285_v42  ;;  %v13590_v9 = vld [vmem:[#allocation141_spill] sm:$0xff] }
 0x33a   :  { %v10273_v27 = vpop.f32.mrf.mxu1  ;;  %v3639_v2 = vpop.f32.mrf.mxu0  ;;  %3975 = vmatmul.mubr.bf16.gmra.mxu1 %v13588_v8  ;;  %v8152_v8 = vld [vmem:[#allocation2 + $0x370] ss:$24 sps:$4 sm:$0xff]  }
 0x33b   :  { %13586 = vst [vmem:[#allocation125_spill] sm:$0xff] %v10271_v54  ;;  %v10277_v46 = vadd.f32 %v3639_v2, %v3287_v28  ;;  %3984 = vmatprep.mubr.bf16.mxu1 %v13589_v6  ;;  %v3295_v28 = vadd.f32 %v10121_v63, %v9913_v29  ;;  %v8151_v54 = vld [vmem:[#allocation2 + $0x1f4] ss:$24 sps:$4 sm:$0xff]   ;;  %v3301_v63 = vadd.f32 %v10133_v47, %v9913_v29 }
 0x33c   :  { %v10281_v41 = vpop.f32.mrf.mxu1  ;;  %v3643_v44 = vpop.f32.mrf.mxu0  ;;  %4268 = vmatmul.mubr.bf16.gmra.mxu0 %v13590_v9  ;;  %4574 = vmatprep.subr.bf16.mxu1 %v8151_v54  ;;  %v3303_v54 = vadd.f32 %v10141_v50, %v9928_v7 }
 0x33d   :  { %13587 = vst [vmem:[#allocation127_spill] sm:$0xff] %v10277_v46  ;;  %v10286_v37 = vadd.f32 %v3643_v44, %v3291_v56  ;;  %4277 = vmatprep.mubr.bf16.mxu0 %v13223_v62  ;;  %v8149_v46 = vld [vmem:[#allocation2 + $0x1f0] ss:$24 sps:$4 sm:$0xff]   ;;  %4912 = vmatpush1.bf16.msra.mxu0 %v8152_v8  ;;  %v3305_v8 = vadd.f32 %v10149_v34, %v9913_v29  ;;  %v13603_v34 = vld [vmem:[#allocation31_spill] sm:$0xff] }
 0x33e   :  { %v10289_v42 = vpop.f32.mrf.mxu1  ;;  %v3645_v51 = vpop.f32.mrf.mxu0  ;;  %4575 = vmatpush2.bf16.msra.mxu1 %v8149_v46 }
 0x33f   :  { %13591 = vst [vmem:[#allocation134_spill] sm:$0xff] %v10286_v37  ;;  %v10293_v2 = vadd.f32 %v3645_v51, %v3293_v48  ;;  %v13595_v51 = vld [vmem:[#allocation38_spill] sm:$0xff] }
 0x340   :  { %v10295_v6 = vpop.f32.mrf.mxu1  ;;  %v3647_v9 = vpop.f32.mrf.mxu0 }
 0x341   :  { %13592 = vst [vmem:[#allocation8_spill] sm:$0xff] %v10293_v2  ;;  %v10299_v56 = vadd.f32 %v3647_v9, %v3295_v28  ;;  %v13596_v2 = vld [vmem:[#allocation25_spill] sm:$0xff]  ;;  %v13597_v9 = vld [vmem:[#allocation143_spill] sm:$0xff] }
 0x342   :  { %v10301_v44 = vpop.f32.mrf.mxu1  ;;  %v3649_v37 = vpop.f32.mrf.mxu0  ;;  %3985 = vmatmul.mubr.bf16.gmra.mxu1 %v13595_v51 }
 0x343   :  { %13593 = vst [vmem:[#allocation130_spill] sm:$0xff] %v10299_v56  ;;  %v10305_v48 = vadd.f32 %v3649_v37, %v3297_v24  ;;  %3994 = vmatprep.mubr.bf16.mxu1 %v13596_v2 }
 0x344   :  { %v10309_v59 = vpop.f32.mrf.mxu1  ;;  %v3653_v20 = vpop.f32.mrf.mxu0  ;;  %4278 = vmatmul.mubr.bf16.gmra.mxu0 %v13597_v9  ;;  %v13602_v9 = vld [vmem:[#allocation43_spill] sm:$0xff] }
 0x345   :  { %13594 = vst [vmem:[#allocation131_spill] sm:$0xff] %v10305_v48  ;;  %v10314_v0 = vadd.f32 %v3653_v20, %v3301_v63  ;;  %4287 = vmatprep.mubr.bf16.mxu0 %v13223_v62  ;;  %v3307_v48 = vadd.f32 %v10155_v23, %v9928_v7  ;;  %v3311_v20 = vadd.f32 %v10161_v19, %v9913_v29 }
 0x346   :  { %v10317_v47 = vpop.f32.mrf.mxu1  ;;  %v3655_v46 = vpop.f32.mrf.mxu0  ;;  %v3313_v23 = vadd.f32 %v10169_v5, %v9928_v7  ;;  %v3317_v5 = vadd.f32 %v10183_v60, %v9928_v7  ;;  %v13611_v60 = vld [vmem:[#allocation19_spill] sm:$0xff] }
 0x347   :  { %13598 = vst [vmem:[#allocation132_spill] sm:$0xff] %v10314_v0  ;;  %v10321_v37 = vadd.f32 %v3655_v46, %v3303_v54 }
 0x348   :  { %v10323_v28 = vpop.f32.mrf.mxu1  ;;  %v3657_v24 = vpop.f32.mrf.mxu0 }
 0x349   :  { %13599 = vst [vmem:[#allocation133_spill] sm:$0xff] %v10321_v37  ;;  %v10327_v56 = vadd.f32 %v3657_v24, %v3305_v8  ;;  %v13604_v37 = vld [vmem:[#allocation13_spill] sm:$0xff] }
 0x34a   :  { %v10329_v50 = vpop.f32.mrf.mxu1  ;;  %v3659_v63 = vpop.f32.mrf.mxu0  ;;  %3995 = vmatmul.mubr.bf16.gmra.mxu1 %v13602_v9 }
 0x34b   :  { %13600 = vst [vmem:[#allocation71_spill] sm:$0xff] %v10327_v56  ;;  %v10333_v0 = vadd.f32 %v3659_v63, %v3307_v48  ;;  %4004 = vmatprep.mubr.bf16.mxu1 %v13603_v34  ;;  %v3315_v48 = vadd.f32 %v10177_v11, %v9913_v29  ;;  %v8157_v56 = vld [vmem:[#allocation2 + $0x1c4] ss:$24 sps:$4 sm:$0xff]   ;;  %v3321_v11 = vadd.f32 %v10189_v36, %v9913_v29 }
 0x34c   :  { %v10337_v54 = vpop.f32.mrf.mxu1  ;;  %v3663_v46 = vpop.f32.mrf.mxu0  ;;  %4288 = vmatmul.mubr.bf16.gmra.mxu0 %v13604_v37  ;;  %4576 = vmatprep.subr.bf16.mxu1 %v8157_v56  ;;  %v3323_v56 = vadd.f32 %v10197_v12, %v9928_v7 }
 0x34d   :  { %13601 = vst [vmem:[#allocation74_spill] sm:$0xff] %v10333_v0  ;;  %v10342_v8 = vadd.f32 %v3663_v46, %v3311_v20  ;;  %4297 = vmatprep.mubr.bf16.mxu0 %v13223_v62  ;;  %v8155_v0 = vld [vmem:[#allocation2 + $0x1c0] ss:$24 sps:$4 sm:$0xff]  }
 0x34e   :  { %v10345_v24 = vpop.f32.mrf.mxu1  ;;  %v3665_v19 = vpop.f32.mrf.mxu0  ;;  %4577 = vmatpush2.bf16.msra.mxu1 %v8155_v0 }
 0x34f   :  { %13605 = vst [vmem:[#allocation11_spill] sm:$0xff] %v10342_v8  ;;  %v10349_v63 = vadd.f32 %v3665_v19, %v3313_v23  ;;  %v13609_v19 = vld [vmem:[#allocation48_spill] sm:$0xff] }
 0x350   :  { %v10351_v34 = vpop.f32.mrf.mxu1  ;;  %v3667_v37 = vpop.f32.mrf.mxu0 }
 0x351   :  { %13606 = vst [vmem:[#allocation18_spill] sm:$0xff] %v10349_v63  ;;  %v10355_v20 = vadd.f32 %v3667_v37, %v3315_v48  ;;  %v13610_v63 = vld [vmem:[#allocation30_spill] sm:$0xff] }
 0x352   :  { %v10357_v46 = vpop.f32.mrf.mxu1  ;;  %v3669_v8 = vpop.f32.mrf.mxu0  ;;  %4005 = vmatmul.mubr.bf16.gmra.mxu1 %v13609_v19  ;;  %v8163_v19 = vld [vmem:[#allocation2 + $0x344] ss:$24 sps:$4 sm:$0xff]  }
 0x353   :  { %13607 = vst [vmem:[#allocation145_spill] sm:$0xff] %v10355_v20  ;;  %v10361_v23 = vadd.f32 %v3669_v8, %v3317_v5  ;;  %4014 = vmatprep.mubr.bf16.mxu1 %v13610_v63  ;;  %v3325_v8 = vadd.f32 %v10205_v52, %v9913_v29  ;;  %v3327_v20 = vadd.f32 %v10211_v58, %v9928_v7  ;;  %v13616_v63 = vld [vmem:[#allocation53_spill] sm:$0xff]  ;;  %v13617_v52 = vld [vmem:[#allocation36_spill] sm:$0xff] }
 0x354   :  { %v10365_v9 = vpop.f32.mrf.mxu1  ;;  %v3673_v2 = vpop.f32.mrf.mxu0  ;;  %4298 = vmatmul.mubr.bf16.gmra.mxu0 %v13611_v60  ;;  %v3333_v58 = vadd.f32 %v10225_v22, %v9928_v7  ;;  %v3337_v22 = vadd.f32 %v10239_v16, %v9928_v7  ;;  %4913 = vmatprep.subr.bf16.mxu0 %v8163_v19 }
 0x355   :  { %13608 = vst [vmem:[#allocation146_spill] sm:$0xff] %v10361_v23  ;;  %v10370_v37 = vadd.f32 %v3673_v2, %v3321_v11  ;;  %4307 = vmatprep.mubr.bf16.mxu0 %v13223_v62  ;;  %v3331_v11 = vadd.f32 %v10217_v13, %v9913_v29 }
 0x356   :  { %v10373_v0 = vpop.f32.mrf.mxu1  ;;  %v3675_v36 = vpop.f32.mrf.mxu0 }
 0x357   :  { %13612 = vst [vmem:[#allocation147_spill] sm:$0xff] %v10370_v37  ;;  %v10377_v48 = vadd.f32 %v3675_v36, %v3323_v56 }
 0x358   :  { %v10379_v5 = vpop.f32.mrf.mxu1  ;;  %v3677_v23 = vpop.f32.mrf.mxu0 }
 0x359   :  { %13613 = vst [vmem:[#allocation148_spill] sm:$0xff] %v10377_v48  ;;  %v10383_v60 = vadd.f32 %v3677_v23, %v3325_v8  ;;  %v13618_v48 = vld [vmem:[#allocation17_spill] sm:$0xff] }
 0x35a   :  { %v10385_v12 = vpop.f32.mrf.mxu1  ;;  %v3679_v2 = vpop.f32.mrf.mxu0  ;;  %4015 = vmatmul.mubr.bf16.gmra.mxu1 %v13616_v63  ;;  %v8161_v63 = vld [vmem:[#allocation2 + $0x340] ss:$24 sps:$4 sm:$0xff]  }
 0x35b   :  { %13614 = vst [vmem:[#allocation149_spill] sm:$0xff] %v10383_v60  ;;  %v10389_v37 = vadd.f32 %v3679_v2, %v3327_v20  ;;  %4024 = vmatprep.mubr.bf16.mxu1 %v13617_v52  ;;  %v3335_v20 = vadd.f32 %v10233_v61, %v9913_v29  ;;  %v8160_v60 = vld [vmem:[#allocation2 + $0x194] ss:$24 sps:$4 sm:$0xff]   ;;  %v3341_v61 = vadd.f32 %v10245_v43, %v9913_v29 }
 0x35c   :  { %v10393_v56 = vpop.f32.mrf.mxu1  ;;  %v3683_v36 = vpop.f32.mrf.mxu0  ;;  %4308 = vmatmul.mubr.bf16.gmra.mxu0 %v13618_v48  ;;  %4578 = vmatprep.subr.bf16.mxu1 %v8160_v60  ;;  %v3343_v60 = vadd.f32 %v10253_v33, %v9928_v7  ;;  %v3347_v33 = vadd.f32 %v10267_v40, %v9928_v7  ;;  %v3353_v40 = vadd.f32 %v10281_v41, %v9928_v7 }
 0x35d   :  { %13615 = vst [vmem:[#allocation150_spill] sm:$0xff] %v10389_v37  ;;  %v10398_v23 = vadd.f32 %v3683_v36, %v3331_v11  ;;  %4317 = vmatprep.mubr.bf16.mxu0 %v13223_v62  ;;  %v8158_v37 = vld [vmem:[#allocation2 + $0x190] ss:$24 sps:$4 sm:$0xff]   ;;  %4914 = vmatpush1.bf16.msra.mxu0 %v8161_v63  ;;  %v3345_v63 = vadd.f32 %v10261_v57, %v9913_v29 }
 0x35e   :  { %v10401_v8 = vpop.f32.mrf.mxu1  ;;  %v3685_v13 = vpop.f32.mrf.mxu0  ;;  %4579 = vmatpush2.bf16.msra.mxu1 %v8158_v37  ;;  %v13631_v57 = vld [vmem:[#allocation41_spill] sm:$0xff] }
 0x35f   :  { %13619 = vst [vmem:[#allocation151_spill] sm:$0xff] %v10398_v23  ;;  %v10405_v2 = vadd.f32 %v3685_v13, %v3333_v58  ;;  %v13623_v13 = vld [vmem:[#allocation58_spill] sm:$0xff]  ;;  %6125 = vmatprep.subr.bf16.mxu1 %v13223_v62 }
 0x360   :  { %v10407_v52 = vpop.f32.mrf.mxu1  ;;  %v3687_v48 = vpop.f32.mrf.mxu0 }
 0x361   :  { %13620 = vst [vmem:[#allocation152_spill] sm:$0xff] %v10405_v2  ;;  %v10411_v11 = vadd.f32 %v3687_v48, %v3335_v20  ;;  %v13624_v2 = vld [vmem:[#allocation35_spill] sm:$0xff]  ;;  %v13625_v48 = vld [vmem:[#allocation24_spill] sm:$0xff] }
 0x362   :  { %v10413_v36 = vpop.f32.mrf.mxu1  ;;  %v3689_v23 = vpop.f32.mrf.mxu0  ;;  %4025 = vmatmul.mubr.bf16.gmra.mxu1 %v13623_v13 }
 0x363   :  { %13621 = vst [vmem:[#allocation153_spill] sm:$0xff] %v10411_v11  ;;  %v10417_v58 = vadd.f32 %v3689_v23, %v3337_v22  ;;  %4034 = vmatprep.mubr.bf16.mxu1 %v13624_v2 }
 0x364   :  { %v10421_v51 = vpop.f32.mrf.mxu1  ;;  %v3693_v16 = vpop.f32.mrf.mxu0  ;;  %4318 = vmatmul.mubr.bf16.gmra.mxu0 %v13625_v48  ;;  %v13630_v48 = vld [vmem:[#allocation63_spill] sm:$0xff] }
 0x365   :  { %13622 = vst [vmem:[#allocation154_spill] sm:$0xff] %v10417_v58  ;;  %v10426_v19 = vadd.f32 %v3693_v16, %v3341_v61  ;;  %4327 = vmatprep.mubr.bf16.mxu0 %v13223_v62 }
 0x366   :  { %v10430_v43 = vpop.f32.mrf.mxu1  ;;  %v3695_v37 = vpop.f32.mrf.mxu0 }
 0x367   :  { %13626 = vst [vmem:[#allocation58_spill] sm:$0xff] %v10426_v19  ;;  %v10434_v23 = vadd.f32 %v3695_v37, %v3343_v60  ;;  %v3351_v19 = vadd.f32 %v10273_v27, %v9913_v29 }
 0x368   :  { %v10436_v20 = vpop.f32.mrf.mxu1  ;;  %v3697_v22 = vpop.f32.mrf.mxu0 }
 0x369   :  { %13627 = vst [vmem:[#allocation35_spill] sm:$0xff] %v10434_v23  ;;  %v10440_v61 = vadd.f32 %v3697_v22, %v3345_v63  ;;  %v13632_v23 = vld [vmem:[#allocation22_spill] sm:$0xff] }
 0x36a   :  { %v10442_v16 = vpop.f32.mrf.mxu1  ;;  %v3699_v58 = vpop.f32.mrf.mxu0  ;;  %4035 = vmatmul.mubr.bf16.gmra.mxu1 %v13630_v48  ;;  %v13637_v48 = vld [vmem:[#allocation68_spill] sm:$0xff] }
 0x36b   :  { %13628 = vst [vmem:[#allocation155_spill] sm:$0xff] %v10440_v61  ;;  %v10446_v11 = vadd.f32 %v3699_v58, %v3347_v33  ;;  %4044 = vmatprep.mubr.bf16.mxu1 %v13631_v57  ;;  %v3355_v58 = vadd.f32 %v10289_v42, %v9913_v29  ;;  %v13638_v42 = vld [vmem:[#allocation40_spill] sm:$0xff] }
 0x36c   :  { %v10450_v60 = vpop.f32.mrf.mxu1  ;;  %v3703_v37 = vpop.f32.mrf.mxu0  ;;  %4328 = vmatmul.mubr.bf16.gmra.mxu0 %v13632_v23  ;;  %v3357_v23 = vadd.f32 %v10295_v6, %v9928_v7  ;;  %v3363_v6 = vadd.f32 %v10309_v59, %v9928_v7 }
 0x36d   :  { %13629 = vst [vmem:[#allocation156_spill] sm:$0xff] %v10446_v11  ;;  %v10455_v63 = vadd.f32 %v3703_v37, %v3351_v19  ;;  %4337 = vmatprep.mubr.bf16.mxu0 %v13223_v62  ;;  %v3361_v19 = vadd.f32 %v10301_v44, %v9913_v29 }
 0x36e   :  { %v10458_v22 = vpop.f32.mrf.mxu1  ;;  %v3705_v27 = vpop.f32.mrf.mxu0 }
 0x36f   :  { %13633 = vst [vmem:[#allocation157_spill] sm:$0xff] %v10455_v63  ;;  %v10462_v33 = vadd.f32 %v3705_v27, %v3353_v40  ;;  %v13639_v27 = vld [vmem:[#allocation29_spill] sm:$0xff] }
 0x370   :  { %v10464_v11 = vpop.f32.mrf.mxu1  ;;  %v3707_v61 = vpop.f32.mrf.mxu0 }
 0x371   :  { %13634 = vst [vmem:[#allocation158_spill] sm:$0xff] %v10462_v33  ;;  %v10468_v57 = vadd.f32 %v3707_v61, %v3355_v58 }
 0x372   :  { %v3709_v41 = vpop.f32.mrf.mxu0  ;;  %v10472_v37 = vpop.f32.mrf.mxu1  ;;  %4045 = vmatmul.mubr.bf16.gmra.mxu1 %v13637_v48 }
 0x373   :  { %13635 = vst [vmem:[#allocation159_spill] sm:$0xff] %v10468_v57  ;;  %v10474_v63 = vadd.f32 %v3709_v41, %v3357_v23  ;;  %4054 = vmatprep.mubr.bf16.mxu1 %v13638_v42  ;;  %v3365_v23 = vadd.f32 %v10317_v47, %v9913_v29  ;;  %v3367_v57 = vadd.f32 %v10323_v28, %v9928_v7  ;;  %v13644_v47 = vld [vmem:[#allocation73_spill] sm:$0xff] }
 0x374   :  { %v3713_v40 = vpop.f32.mrf.mxu0  ;;  %4338 = vmatmul.mubr.bf16.gmra.mxu0 %v13639_v27  ;;  %v10481_v61 = vpop.f32.mrf.mxu1  ;;  %v3373_v28 = vadd.f32 %v10337_v54, %v9928_v7 }
 0x375   :  { %13636 = vst [vmem:[#allocation160_spill] sm:$0xff] %v10474_v63  ;;  %v10483_v58 = vadd.f32 %v3713_v40, %v3361_v19  ;;  %4347 = vmatprep.mubr.bf16.mxu0 %v13223_v62  ;;  %v3371_v40 = vadd.f32 %v10329_v50, %v9913_v29 }
 0x376   :  { %v3715_v44 = vpop.f32.mrf.mxu0  ;;  %v10488_v41 = vpop.f32.mrf.mxu1 }
 0x377   :  { %13640 = vst [vmem:[#allocation161_spill] sm:$0xff] %v10483_v58  ;;  %v10490_v63 = vadd.f32 %v3715_v44, %v3363_v6  ;;  %v13645_v6 = vld [vmem:[#allocation46_spill] sm:$0xff] }
 0x378   :  { %v3717_v33 = vpop.f32.mrf.mxu0  ;;  %v10494_v27 = vpop.f32.mrf.mxu1 }
 0x379   :  { %13641 = vst [vmem:[#allocation162_spill] sm:$0xff] %v10490_v63  ;;  %v10496_v59 = vadd.f32 %v3717_v33, %v3365_v23  ;;  %v13646_v63 = vld [vmem:[#allocation27_spill] sm:$0xff] }
 0x37a   :  { %v3719_v19 = vpop.f32.mrf.mxu0  ;;  %v10500_v58 = vpop.f32.mrf.mxu1  ;;  %4055 = vmatmul.mubr.bf16.gmra.mxu1 %v13644_v47  ;;  %v3381_v47 = vadd.f32 %v10357_v46, %v9913_v29 }
 0x37b   :  { %13642 = vst [vmem:[#allocation163_spill] sm:$0xff] %v10496_v59  ;;  %v10502_v42 = vadd.f32 %v3719_v19, %v3367_v57  ;;  %4064 = vmatprep.mubr.bf16.mxu1 %v13645_v6  ;;  %v3375_v57 = vadd.f32 %v10345_v24, %v9913_v29 }
 0x37c   :  { %v3723_v44 = vpop.f32.mrf.mxu0  ;;  %4348 = vmatmul.mubr.bf16.gmra.mxu0 %v13646_v63  ;;  %v10509_v33 = vpop.f32.mrf.mxu1  ;;  %v3377_v63 = vadd.f32 %v10351_v34, %v9928_v7 }
 0x37d   :  { %13643 = vst [vmem:[#allocation164_spill] sm:$0xff] %v10502_v42  ;;  %v10511_v23 = vadd.f32 %v3723_v44, %v3371_v40  ;;  %4357 = vmatprep.mubr.bf16.mxu0 %v13223_v62  ;;  %v8165_v40 = vld [vmem:[#allocation2 + $0x310] ss:$24 sps:$4 sm:$0xff]   ;;  %v8167_v44 = vld [vmem:[#allocation2 + $0x314] ss:$24 sps:$4 sm:$0xff]  }
 0x37e   :  { %v3725_v50 = vpop.f32.mrf.mxu0  ;;  %v10516_v19 = vpop.f32.mrf.mxu1  ;;  %4915 = vmatprep.subr.bf16.mxu0 %v8167_v44 }
 0x37f   :  { %13647 = vst [vmem:[#allocation165_spill] sm:$0xff] %v10511_v23  ;;  %v10518_v42 = vadd.f32 %v3725_v50, %v3373_v28  ;;  %v13651_v28 = vld [vmem:[#allocation78_spill] sm:$0xff]  ;;  %v13652_v50 = vld [vmem:[#allocation45_spill] sm:$0xff]  ;;  %4916 = vmatpush1.bf16.msra.mxu0 %v8165_v40  ;;  %v3391_v40 = vadd.f32 %v10385_v12, %v9913_v29 }
 0x380   :  { %v3727_v59 = vpop.f32.mrf.mxu0  ;;  %v10522_v6 = vpop.f32.mrf.mxu1 }
 0x381   :  { %13648 = vst [vmem:[#allocation166_spill] sm:$0xff] %v10518_v42  ;;  %v10524_v54 = vadd.f32 %v3727_v59, %v3375_v57  ;;  %v13653_v42 = vld [vmem:[#allocation34_spill] sm:$0xff]  ;;  %v3383_v59 = vadd.f32 %v10365_v9, %v9928_v7 }
 0x382   :  { %v3729_v23 = vpop.f32.mrf.mxu0  ;;  %v10528_v48 = vpop.f32.mrf.mxu1  ;;  %4065 = vmatmul.mubr.bf16.gmra.mxu1 %v13651_v28 }
 0x383   :  { %13649 = vst [vmem:[#allocation167_spill] sm:$0xff] %v10524_v54  ;;  %v10530_v24 = vadd.f32 %v3729_v23, %v3377_v63  ;;  %4074 = vmatprep.mubr.bf16.mxu1 %v13652_v50  ;;  %v3385_v63 = vadd.f32 %v10373_v0, %v9913_v29  ;;  %v13658_v0 = vld [vmem:[#allocation83_spill] sm:$0xff] }
 0x384   :  { %v3733_v34 = vpop.f32.mrf.mxu0  ;;  %4358 = vmatmul.mubr.bf16.gmra.mxu0 %v13653_v42  ;;  %v10537_v57 = vpop.f32.mrf.mxu1  ;;  %v3387_v42 = vadd.f32 %v10379_v5, %v9928_v7  ;;  %v3393_v5 = vadd.f32 %v10393_v56, %v9928_v7 }
 0x385   :  { %13650 = vst [vmem:[#allocation168_spill] sm:$0xff] %v10530_v24  ;;  %v10539_v54 = vadd.f32 %v3733_v34, %v3381_v47  ;;  %4367 = vmatprep.mubr.bf16.mxu0 %v13223_v62 }
 0x386   :  { %v3735_v46 = vpop.f32.mrf.mxu0  ;;  %v10544_v23 = vpop.f32.mrf.mxu1 }
 0x387   :  { %13654 = vst [vmem:[#allocation78_spill] sm:$0xff] %v10539_v54  ;;  %v10546_v44 = vadd.f32 %v3735_v46, %v3383_v59  ;;  %v13659_v59 = vld [vmem:[#allocation51_spill] sm:$0xff] }
 0x388   :  { %v3737_v24 = vpop.f32.mrf.mxu0  ;;  %v10550_v9 = vpop.f32.mrf.mxu1 }
 0x389   :  { %13655 = vst [vmem:[#allocation169_spill] sm:$0xff] %v10546_v44  ;;  %v10552_v50 = vadd.f32 %v3737_v24, %v3385_v63  ;;  %v13660_v44 = vld [vmem:[#allocation32_spill] sm:$0xff] }
 0x38a   :  { %v3739_v47 = vpop.f32.mrf.mxu0  ;;  %v10556_v34 = vpop.f32.mrf.mxu1  ;;  %4075 = vmatmul.mubr.bf16.gmra.mxu1 %v13658_v0 }
 0x38b   :  { %13656 = vst [vmem:[#allocation170_spill] sm:$0xff] %v10552_v50  ;;  %v10558_v54 = vadd.f32 %v3739_v47, %v3387_v42  ;;  %4084 = vmatprep.mubr.bf16.mxu1 %v13659_v59  ;;  %v3395_v42 = vadd.f32 %v10401_v8, %v9913_v29  ;;  %v13665_v8 = vld [vmem:[#allocation88_spill] sm:$0xff] }
 0x38c   :  { %v3743_v46 = vpop.f32.mrf.mxu0  ;;  %4368 = vmatmul.mubr.bf16.gmra.mxu0 %v13660_v44  ;;  %v10565_v24 = vpop.f32.mrf.mxu1  ;;  %v3397_v44 = vadd.f32 %v10407_v52, %v9928_v7  ;;  %v3403_v52 = vadd.f32 %v10421_v51, %v9928_v7 }
 0x38d   :  { %13657 = vst [vmem:[#allocation171_spill] sm:$0xff] %v10558_v54  ;;  %v10567_v63 = vadd.f32 %v3743_v46, %v3391_v40  ;;  %4377 = vmatprep.mubr.bf16.mxu0 %v13223_v62  ;;  %v3401_v46 = vadd.f32 %v10413_v36, %v9913_v29 }
 0x38e   :  { %v3745_v12 = vpop.f32.mrf.mxu0  ;;  %v10572_v47 = vpop.f32.mrf.mxu1 }
 0x38f   :  { %13661 = vst [vmem:[#allocation172_spill] sm:$0xff] %v10567_v63  ;;  %v10574_v54 = vadd.f32 %v3745_v12, %v3393_v5  ;;  %v13666_v5 = vld [vmem:[#allocation50_spill] sm:$0xff] }
 0x390   :  { %v3747_v50 = vpop.f32.mrf.mxu0  ;;  %v10578_v59 = vpop.f32.mrf.mxu1 }
 0x391   :  { %13662 = vst [vmem:[#allocation173_spill] sm:$0xff] %v10574_v54  ;;  %v10580_v56 = vadd.f32 %v3747_v50, %v3395_v42  ;;  %v13667_v54 = vld [vmem:[#allocation39_spill] sm:$0xff] }
 0x392   :  { %v3749_v40 = vpop.f32.mrf.mxu0  ;;  %v10584_v63 = vpop.f32.mrf.mxu1  ;;  %4085 = vmatmul.mubr.bf16.gmra.mxu1 %v13665_v8 }
 0x393   :  { %13663 = vst [vmem:[#allocation174_spill] sm:$0xff] %v10580_v56  ;;  %v10586_v0 = vadd.f32 %v3749_v40, %v3397_v44  ;;  %4094 = vmatprep.mubr.bf16.mxu1 %v13666_v5  ;;  %v3405_v44 = vadd.f32 %v10430_v43, %v9913_v29  ;;  %v13672_v43 = vld [vmem:[#allocation93_spill] sm:$0xff] }
 0x394   :  { %v3753_v12 = vpop.f32.mrf.mxu0  ;;  %4378 = vmatmul.mubr.bf16.gmra.mxu0 %v13667_v54  ;;  %v10593_v50 = vpop.f32.mrf.mxu1  ;;  %v3407_v54 = vadd.f32 %v10436_v20, %v9928_v7  ;;  %v3413_v20 = vadd.f32 %v10450_v60, %v9928_v7 }
 0x395   :  { %13664 = vst [vmem:[#allocation175_spill] sm:$0xff] %v10586_v0  ;;  %v10595_v42 = vadd.f32 %v3753_v12, %v3401_v46  ;;  %4387 = vmatprep.mubr.bf16.mxu0 %v13223_v62  ;;  %v3411_v12 = vadd.f32 %v10442_v16, %v9913_v29 }
 0x396   :  { %v3755_v36 = vpop.f32.mrf.mxu0  ;;  %v10600_v40 = vpop.f32.mrf.mxu1 }
 0x397   :  { %13668 = vst [vmem:[#allocation176_spill] sm:$0xff] %v10595_v42  ;;  %v10602_v0 = vadd.f32 %v3755_v36, %v3403_v52  ;;  %v13673_v52 = vld [vmem:[#allocation56_spill] sm:$0xff] }
 0x398   :  { %v3757_v56 = vpop.f32.mrf.mxu0  ;;  %v10606_v5 = vpop.f32.mrf.mxu1 }
 0x399   :  { %13669 = vst [vmem:[#allocation177_spill] sm:$0xff] %v10602_v0  ;;  %v10608_v51 = vadd.f32 %v3757_v56, %v3405_v44  ;;  %v13674_v0 = vld [vmem:[#allocation37_spill] sm:$0xff] }
 0x39a   :  { %v3759_v46 = vpop.f32.mrf.mxu0  ;;  %v10612_v42 = vpop.f32.mrf.mxu1  ;;  %4095 = vmatmul.mubr.bf16.gmra.mxu1 %v13672_v43 }
 0x39b   :  { %13670 = vst [vmem:[#allocation178_spill] sm:$0xff] %v10608_v51  ;;  %v10614_v8 = vadd.f32 %v3759_v46, %v3407_v54  ;;  %4104 = vmatprep.mubr.bf16.mxu1 %v13673_v52  ;;  %v3415_v54 = vadd.f32 %v10458_v22, %v9913_v29  ;;  %v13679_v22 = vld [vmem:[#allocation98_spill] sm:$0xff] }
 0x39c   :  { %v3763_v36 = vpop.f32.mrf.mxu0  ;;  %4388 = vmatmul.mubr.bf16.gmra.mxu0 %v13674_v0  ;;  %v10621_v56 = vpop.f32.mrf.mxu1  ;;  %v3417_v0 = vadd.f32 %v10464_v11, %v9928_v7  ;;  %v3423_v11 = vadd.f32 %v10481_v61, %v9928_v7 }
 0x39d   :  { %13671 = vst [vmem:[#allocation179_spill] sm:$0xff] %v10614_v8  ;;  %v10623_v44 = vadd.f32 %v3763_v36, %v3411_v12  ;;  %4397 = vmatprep.mubr.bf16.mxu0 %v13223_v62  ;;  %v3421_v36 = vadd.f32 %v10472_v37, %v9913_v29 }
 0x39e   :  { %v3765_v16 = vpop.f32.mrf.mxu0  ;;  %v10628_v46 = vpop.f32.mrf.mxu1 }
 0x39f   :  { %13675 = vst [vmem:[#allocation180_spill] sm:$0xff] %v10623_v44  ;;  %v10630_v8 = vadd.f32 %v3765_v16, %v3413_v20  ;;  %v13680_v20 = vld [vmem:[#allocation55_spill] sm:$0xff] }
 0x3a0   :  { %v3767_v51 = vpop.f32.mrf.mxu0  ;;  %v10634_v52 = vpop.f32.mrf.mxu1 }
 0x3a1   :  { %13676 = vst [vmem:[#allocation181_spill] sm:$0xff] %v10630_v8  ;;  %v10636_v60 = vadd.f32 %v3767_v51, %v3415_v54  ;;  %v13681_v8 = vld [vmem:[#allocation44_spill] sm:$0xff] }
 0x3a2   :  { %v3769_v12 = vpop.f32.mrf.mxu0  ;;  %v10640_v44 = vpop.f32.mrf.mxu1  ;;  %4105 = vmatmul.mubr.bf16.gmra.mxu1 %v13679_v22 }
 0x3a3   :  { %13677 = vst [vmem:[#allocation182_spill] sm:$0xff] %v10636_v60  ;;  %v10642_v43 = vadd.f32 %v3769_v12, %v3417_v0  ;;  %4114 = vmatprep.mubr.bf16.mxu1 %v13680_v20  ;;  %v3425_v0 = vadd.f32 %v10488_v41, %v9913_v29  ;;  %v13686_v41 = vld [vmem:[#allocation103_spill] sm:$0xff] }
 0x3a4   :  { %v3773_v16 = vpop.f32.mrf.mxu0  ;;  %4398 = vmatmul.mubr.bf16.gmra.mxu0 %v13681_v8  ;;  %v10649_v51 = vpop.f32.mrf.mxu1  ;;  %v3427_v8 = vadd.f32 %v10494_v27, %v9928_v7  ;;  %v3433_v27 = vadd.f32 %v10509_v33, %v9928_v7 }
 0x3a5   :  { %13678 = vst [vmem:[#allocation183_spill] sm:$0xff] %v10642_v43  ;;  %v10651_v54 = vadd.f32 %v3773_v16, %v3421_v36  ;;  %4407 = vmatprep.mubr.bf16.mxu0 %v13223_v62  ;;  %v3431_v16 = vadd.f32 %v10500_v58, %v9913_v29 }
 0x3a6   :  { %v3775_v37 = vpop.f32.mrf.mxu0  ;;  %v10656_v12 = vpop.f32.mrf.mxu1 }
 0x3a7   :  { %13682 = vst [vmem:[#allocation184_spill] sm:$0xff] %v10651_v54  ;;  %v10658_v43 = vadd.f32 %v3775_v37, %v3423_v11  ;;  %v13687_v11 = vld [vmem:[#allocation61_spill] sm:$0xff] }
 0x3a8   :  { %v3777_v60 = vpop.f32.mrf.mxu0  ;;  %v10662_v20 = vpop.f32.mrf.mxu1 }
 0x3a9   :  { %13683 = vst [vmem:[#allocation185_spill] sm:$0xff] %v10658_v43  ;;  %v10664_v61 = vadd.f32 %v3777_v60, %v3425_v0  ;;  %v13688_v43 = vld [vmem:[#allocation42_spill] sm:$0xff] }
 0x3aa   :  { %v3779_v36 = vpop.f32.mrf.mxu0  ;;  %v10670_v22 = vpop.f32.mrf.mxu1  ;;  %4115 = vmatmul.mubr.bf16.gmra.mxu1 %v13686_v41 }
 0x3ab   :  { %13684 = vst [vmem:[#allocation186_spill] sm:$0xff] %v10664_v61  ;;  %v10668_v54 = vadd.f32 %v3779_v36, %v3427_v8  ;;  %4124 = vmatprep.mubr.bf16.mxu1 %v13687_v11  ;;  %v3435_v8 = vadd.f32 %v10516_v19, %v9913_v29  ;;  %v13693_v19 = vld [vmem:[#allocation108_spill] sm:$0xff] }
 0x3ac   :  { %v3783_v37 = vpop.f32.mrf.mxu0  ;;  %4408 = vmatmul.mubr.bf16.gmra.mxu0 %v13688_v43  ;;  %v10679_v0 = vpop.f32.mrf.mxu1  ;;  %v3437_v43 = vadd.f32 %v10522_v6, %v9928_v7  ;;  %v3443_v6 = vadd.f32 %v10537_v57, %v9928_v7 }
 0x3ad   :  { %13685 = vst [vmem:[#allocation187_spill] sm:$0xff] %v10668_v54  ;;  %v10677_v60 = vadd.f32 %v3783_v37, %v3431_v16  ;;  %4417 = vmatprep.mubr.bf16.mxu0 %v13223_v62  ;;  %v3441_v37 = vadd.f32 %v10528_v48, %v9913_v29 }
 0x3ae   :  { %v3785_v58 = vpop.f32.mrf.mxu0  ;;  %v10686_v54 = vpop.f32.mrf.mxu1 }
 0x3af   :  { %13689 = vst [vmem:[#allocation188_spill] sm:$0xff] %v10677_v60  ;;  %v10684_v36 = vadd.f32 %v3785_v58, %v3433_v27  ;;  %v13694_v27 = vld [vmem:[#allocation64_spill] sm:$0xff] }
 0x3b0   :  { %v3787_v61 = vpop.f32.mrf.mxu0  ;;  %v10692_v33 = vpop.f32.mrf.mxu1 }
 0x3b1   :  { %13690 = vst [vmem:[#allocation189_spill] sm:$0xff] %v10684_v36  ;;  %v10690_v11 = vadd.f32 %v3787_v61, %v3435_v8  ;;  %v13695_v36 = vld [vmem:[#allocation49_spill] sm:$0xff] }
 0x3b2   :  { %v3789_v16 = vpop.f32.mrf.mxu0  ;;  %v10698_v41 = vpop.f32.mrf.mxu1  ;;  %4125 = vmatmul.mubr.bf16.gmra.mxu1 %v13693_v19 }
 0x3b3   :  { %13691 = vst [vmem:[#allocation190_spill] sm:$0xff] %v10690_v11  ;;  %v10696_v60 = vadd.f32 %v3789_v16, %v3437_v43  ;;  %4134 = vmatprep.mubr.bf16.mxu1 %v13694_v27  ;;  %v3445_v43 = vadd.f32 %v10544_v23, %v9913_v29  ;;  %v13700_v23 = vld [vmem:[#allocation113_spill] sm:$0xff] }
 0x3b4   :  { %v3793_v58 = vpop.f32.mrf.mxu0  ;;  %4418 = vmatmul.mubr.bf16.gmra.mxu0 %v13695_v36  ;;  %v10707_v8 = vpop.f32.mrf.mxu1  ;;  %v3447_v36 = vadd.f32 %v10550_v9, %v9928_v7  ;;  %v3453_v9 = vadd.f32 %v10565_v24, %v9928_v7 }
 0x3b5   :  { %13692 = vst [vmem:[#allocation191_spill] sm:$0xff] %v10696_v60  ;;  %v10705_v61 = vadd.f32 %v3793_v58, %v3441_v37  ;;  %4427 = vmatprep.mubr.bf16.mxu0 %v13223_v62  ;;  %v3451_v58 = vadd.f32 %v10556_v34, %v9913_v29 }
 0x3b6   :  { %v3795_v48 = vpop.f32.mrf.mxu0  ;;  %v10714_v60 = vpop.f32.mrf.mxu1 }
 0x3b7   :  { %13696 = vst [vmem:[#allocation192_spill] sm:$0xff] %v10705_v61  ;;  %v10712_v16 = vadd.f32 %v3795_v48, %v3443_v6  ;;  %v13701_v6 = vld [vmem:[#allocation60_spill] sm:$0xff] }
 0x3b8   :  { %v3797_v11 = vpop.f32.mrf.mxu0  ;;  %v10720_v57 = vpop.f32.mrf.mxu1 }
 0x3b9   :  { %13697 = vst [vmem:[#allocation193_spill] sm:$0xff] %v10712_v16  ;;  %v10718_v27 = vadd.f32 %v3797_v11, %v3445_v43  ;;  %v13702_v16 = vld [vmem:[#allocation47_spill] sm:$0xff] }
 0x3ba   :  { %v3799_v37 = vpop.f32.mrf.mxu0  ;;  %v10726_v19 = vpop.f32.mrf.mxu1  ;;  %4135 = vmatmul.mubr.bf16.gmra.mxu1 %v13700_v23 }
 0x3bb   :  { %13698 = vst [vmem:[#allocation194_spill] sm:$0xff] %v10718_v27  ;;  %v10724_v61 = vadd.f32 %v3799_v37, %v3447_v36  ;;  %4144 = vmatprep.mubr.bf16.mxu1 %v13701_v6  ;;  %v3455_v36 = vadd.f32 %v10572_v47, %v9913_v29  ;;  %v13707_v47 = vld [vmem:[#allocation118_spill] sm:$0xff] }
 0x3bc   :  { %v3803_v48 = vpop.f32.mrf.mxu0  ;;  %4428 = vmatmul.mubr.bf16.gmra.mxu0 %v13702_v16  ;;  %v10735_v43 = vpop.f32.mrf.mxu1  ;;  %v3457_v16 = vadd.f32 %v10578_v59, %v9928_v7  ;;  %v3463_v59 = vadd.f32 %v10593_v50, %v9928_v7 }
 0x3bd   :  { %13699 = vst [vmem:[#allocation195_spill] sm:$0xff] %v10724_v61  ;;  %v10733_v11 = vadd.f32 %v3803_v48, %v3451_v58  ;;  %4437 = vmatprep.mubr.bf16.mxu0 %v13223_v62  ;;  %v3461_v48 = vadd.f32 %v10584_v63, %v9913_v29 }
 0x3be   :  { %v3805_v34 = vpop.f32.mrf.mxu0  ;;  %v10742_v61 = vpop.f32.mrf.mxu1 }
 0x3bf   :  { %13703 = vst [vmem:[#allocation196_spill] sm:$0xff] %v10733_v11  ;;  %v10740_v37 = vadd.f32 %v3805_v34, %v3453_v9  ;;  %v13708_v9 = vld [vmem:[#allocation66_spill] sm:$0xff] }
 0x3c0   :  { %v3807_v27 = vpop.f32.mrf.mxu0  ;;  %v10748_v24 = vpop.f32.mrf.mxu1 }
 0x3c1   :  { %13704 = vst [vmem:[#allocation197_spill] sm:$0xff] %v10740_v37  ;;  %v10746_v6 = vadd.f32 %v3807_v27, %v3455_v36  ;;  %v13709_v37 = vld [vmem:[#allocation54_spill] sm:$0xff] }
 0x3c2   :  { %v3809_v58 = vpop.f32.mrf.mxu0  ;;  %v10754_v23 = vpop.f32.mrf.mxu1  ;;  %4145 = vmatmul.mubr.bf16.gmra.mxu1 %v13707_v47 }
 0x3c3   :  { %13705 = vst [vmem:[#allocation198_spill] sm:$0xff] %v10746_v6  ;;  %v10752_v11 = vadd.f32 %v3809_v58, %v3457_v16  ;;  %4154 = vmatprep.mubr.bf16.mxu1 %v13708_v9  ;;  %v3465_v16 = vadd.f32 %v10600_v40, %v9913_v29  ;;  %v13714_v40 = vld [vmem:[#allocation123_spill] sm:$0xff] }
 0x3c4   :  { %v3813_v34 = vpop.f32.mrf.mxu0  ;;  %4438 = vmatmul.mubr.bf16.gmra.mxu0 %v13709_v37  ;;  %v10763_v36 = vpop.f32.mrf.mxu1  ;;  %v3467_v37 = vadd.f32 %v10606_v5, %v9928_v7  ;;  %v3473_v5 = vadd.f32 %v10621_v56, %v9928_v7 }
 0x3c5   :  { %13706 = vst [vmem:[#allocation199_spill] sm:$0xff] %v10752_v11  ;;  %v10761_v27 = vadd.f32 %v3813_v34, %v3461_v48  ;;  %4447 = vmatprep.mubr.bf16.mxu0 %v13223_v62  ;;  %v3471_v34 = vadd.f32 %v10612_v42, %v9913_v29 }
 0x3c6   :  { %v3815_v63 = vpop.f32.mrf.mxu0  ;;  %v10770_v11 = vpop.f32.mrf.mxu1 }
 0x3c7   :  { %13710 = vst [vmem:[#allocation200_spill] sm:$0xff] %v10761_v27  ;;  %v10768_v58 = vadd.f32 %v3815_v63, %v3463_v59  ;;  %v13715_v59 = vld [vmem:[#allocation65_spill] sm:$0xff] }
 0x3c8   :  { %v3817_v6 = vpop.f32.mrf.mxu0  ;;  %v10776_v50 = vpop.f32.mrf.mxu1 }
 0x3c9   :  { %13711 = vst [vmem:[#allocation201_spill] sm:$0xff] %v10768_v58  ;;  %v10774_v9 = vadd.f32 %v3817_v6, %v3465_v16  ;;  %v13716_v58 = vld [vmem:[#allocation52_spill] sm:$0xff] }
 0x3ca   :  { %v3819_v48 = vpop.f32.mrf.mxu0  ;;  %v10782_v47 = vpop.f32.mrf.mxu1  ;;  %4155 = vmatmul.mubr.bf16.gmra.mxu1 %v13714_v40 }
 0x3cb   :  { %13712 = vst [vmem:[#allocation202_spill] sm:$0xff] %v10774_v9  ;;  %v10780_v27 = vadd.f32 %v3819_v48, %v3467_v37  ;;  %4164 = vmatprep.mubr.bf16.mxu1 %v13715_v59  ;;  %v3475_v37 = vadd.f32 %v10628_v46, %v9913_v29  ;;  %v13721_v46 = vld [vmem:[#allocation128_spill] sm:$0xff] }
 0x3cc   :  { %v3823_v63 = vpop.f32.mrf.mxu0  ;;  %4448 = vmatmul.mubr.bf16.gmra.mxu0 %v13716_v58  ;;  %v10791_v16 = vpop.f32.mrf.mxu1  ;;  %v3477_v58 = vadd.f32 %v10634_v52, %v9928_v7  ;;  %v3483_v52 = vadd.f32 %v10649_v51, %v9928_v7 }
 0x3cd   :  { %13713 = vst [vmem:[#allocation203_spill] sm:$0xff] %v10780_v27  ;;  %v10789_v6 = vadd.f32 %v3823_v63, %v3471_v34  ;;  %4457 = vmatprep.mubr.bf16.mxu0 %v13223_v62  ;;  %v3481_v63 = vadd.f32 %v10640_v44, %v9913_v29 }
 0x3ce   :  { %v3825_v42 = vpop.f32.mrf.mxu0  ;;  %v10798_v27 = vpop.f32.mrf.mxu1 }
 0x3cf   :  { %13717 = vst [vmem:[#allocation204_spill] sm:$0xff] %v10789_v6  ;;  %v10796_v48 = vadd.f32 %v3825_v42, %v3473_v5  ;;  %v13722_v42 = vld [vmem:[#allocation59_spill] sm:$0xff] }
 0x3d0   :  { %v3827_v9 = vpop.f32.mrf.mxu0  ;;  %v10804_v56 = vpop.f32.mrf.mxu1 }
 0x3d1   :  { %13718 = vst [vmem:[#allocation205_spill] sm:$0xff] %v10796_v48  ;;  %v10802_v59 = vadd.f32 %v3827_v9, %v3475_v37 }
 0x3d2   :  { %v3829_v34 = vpop.f32.mrf.mxu0  ;;  %v10810_v40 = vpop.f32.mrf.mxu1  ;;  %4165 = vmatmul.mubr.bf16.gmra.mxu1 %v13721_v46 }
 0x3d3   :  { %13719 = vst [vmem:[#allocation206_spill] sm:$0xff] %v10802_v59  ;;  %v10808_v6 = vadd.f32 %v3829_v34, %v3477_v58  ;;  %4174 = vmatprep.mubr.bf16.mxu1 %v9924_v21  ;;  %v3485_v58 = vadd.f32 %v10656_v12, %v9913_v29  ;;  %v8228_v34 = vld [vmem:[%s12995_s4] sm:$0x3f] }
 0x3d4   :  { %v3833_v5 = vpop.f32.mrf.mxu0  ;;  %4458 = vmatmul.mubr.bf16.gmra.mxu0 %v13722_v42  ;;  %v10819_v37 = vpop.f32.mrf.mxu1 }
 0x3d5   :  { %13720 = vst [vmem:[#allocation207_spill] sm:$0xff] %v10808_v6  ;;  %v10817_v9 = vadd.f32 %v3833_v5, %v3481_v63  ;;  %4467 = vmatprep.mubr.bf16.mxu0 %v13223_v62  ;;  %v13724_v6 = vsub.s32 2, %v13514_v10  ;;  %v3487_v5 = vadd.f32 %v10662_v20, %v9928_v7  ;;  %v13729_v20 = vld [vmem:[#allocation57_spill] sm:$0xff] }
 0x3d6   :  { %v3835_v44 = vpop.f32.mrf.mxu0  ;;  %v10833_v51 = vpop.f32.mrf.mxu1 }
 0x3d7   :  { %13723 = vst [vmem:[#allocation128_spill] sm:$0xff] %v10817_v9  ;;  %v10829_v48 = vrot.slane %v8228_v34, %v13724_v6  ;;  %v10831_v59 = vadd.f32 %v3835_v44, %v3483_v52  ;;  %v13726_v9 = vsub.s32 3, %v13514_v10 }
 0x3d8   :  { %v3837_v63 = vpop.f32.mrf.mxu0  ;;  %v10843_v12 = vpop.f32.mrf.mxu1 }
 0x3d9   :  { %13725 = vst [vmem:[#allocation208_spill] sm:$0xff] %v10831_v59  ;;  %v10839_v42 = vrot.slane %v8228_v34, %v13726_v9  ;;  %v10841_v29 = vadd.f32 %v3837_v63, %v3485_v58  ;;  %v3877_v6 = vadd.f32 %v10670_v22, %v10829_v48  ;;  %v3881_v22 = vadd.f32 %v10686_v54, %v10829_v48 }
 0x3da   :  { %v3839_v21 = vpop.f32.mrf.mxu0  ;;  %v10849_v44 = vpop.f32.mrf.mxu1  ;;  %4175 = vmatmul.mubr.bf16.gmra.mxu1 %v13522_v15  ;;  %v5254_v59 = vmax.f32 %v9945_v17, 0.0 }
 0x3db   :  { %13727 = vst [vmem:[#allocation209_spill] sm:$0xff] %v10841_v29  ;;  %v10847_v52 = vadd.f32 %v3839_v21, %v3487_v5  ;;  %4184 = vmatprep.mubr.bf16.mxu1 %v9956_v18  ;;  %v3879_v9 = vadd.f32 %v10679_v0, %v10839_v42  ;;  %v3883_v29 = vadd.f32 %v10692_v33, %v10839_v42  ;;  %v5260_v33 = vmax.f32 %v9962_v32, 0.0 }
 0x3dc   :  { %v4229_v7 = vpop.f32.mrf.mxu0  ;;  %4468 = vmatmul.mubr.bf16.gmra.mxu0 %v13729_v20  ;;  %v10856_v58 = vpop.f32.mrf.mxu1  ;;  %v5266_v32 = vmax.f32 %v9978_v31, 0.0  ;;  %v3897_v31 = vadd.f32 %v10726_v19, %v10829_v48 }
 0x3dd   :  { %13728 = vst [vmem:[#allocation210_spill] sm:$0xff] %v10847_v52  ;;  %v10858_v34 = vadd.f32 %v4229_v7, %v3877_v6  ;;  %4477 = vmatprep.mubr.bf16.mxu0 %v13223_v62 }
 0x3de   :  { %v4231_v21 = vpop.f32.mrf.mxu0  ;;  %v10863_v63 = vpop.f32.mrf.mxu1 }
 0x3df   :  { %13730 = vst [vmem:[#allocation211_spill] sm:$0xff] %v10858_v34  ;;  %v4232_v5 = vadd.f32 %v4231_v21, %v3879_v9  ;;  %v3887_v34 = vadd.f32 %v10698_v41, %v10829_v48 }
 0x3e0   :  { %v4233_v52 = vpop.f32.mrf.mxu0  ;;  %v10868_v20 = vpop.f32.mrf.mxu1 }
 0x3e1   :  { %v5257_v0 = vmax.f32 %v4232_v5, 0.0  ;;  %v10870_v6 = vadd.f32 %v4233_v52, %v3881_v22  ;;  %v3889_v52 = vadd.f32 %v10707_v8, %v10839_v42  ;;  %v3893_v8 = vadd.f32 %v10720_v57, %v10839_v42 }
 0x3e2   :  { %v4235_v7 = vpop.f32.mrf.mxu0  ;;  %v10876_v54 = vpop.f32.mrf.mxu1  ;;  %4185 = vmatmul.mubr.bf16.gmra.mxu1 %v9233_v39 }
 0x3e3   :  { %v10874_v18 = vmax.f32 %v5254_v59, %v5257_v0  ;;  %v4236_v9 = vadd.f32 %v4235_v7, %v3883_v29  ;;  %4580 = vmatprep.mubr.bf16.mxu1 %v9247_v25  ;;  %v3891_v29 = vadd.f32 %v10714_v60, %v10829_v48  ;;  %v8164_v60 = vld [vmem:[%s12996_s5 + $0x38] sm:$0xff]  }
 0x3e4   :  { %v4239_v17 = vpop.f32.mrf.mxu0  ;;  %4478 = vmatmul.mubr.bf16.gmra.mxu0 %v9779_v30  ;;  %v10884_v22 = vpop.f32.mrf.mxu1 }
 0x3e5   :  { %v5263_v21 = vmax.f32 %v4236_v9, 0.0  ;;  %v10886_v41 = vadd.f32 %v4239_v17, %v3887_v34  ;;  %4487 = vmatprep.mubr.bf16.mxu0 %v13223_v62 }
 0x3e6   :  { %v4241_v59 = vpop.f32.mrf.mxu0  ;;  %v10893_v5 = vpop.f32.mrf.mxu1 }
 0x3e7   :  { %13731 = vst [vmem:[#allocation212_spill] sm:$0xff] %v10886_v41  ;;  %v10891_v25 = vmax.f32 %v5260_v33, %v5263_v21  ;;  %v4242_v0 = vadd.f32 %v4241_v59, %v3889_v52 }
 0x3e8   :  { %v4243_v7 = vpop.f32.mrf.mxu0  ;;  %v10900_v17 = vpop.f32.mrf.mxu1 }
 0x3e9   :  { %v5269_v9 = vmax.f32 %v4242_v0, 0.0  ;;  %v10902_v41 = vadd.f32 %v4243_v7, %v3891_v29  ;;  %v5272_v29 = vmax.f32 %v9991_v4, 0.0  ;;  %v3899_v0 = vadd.f32 %v10735_v43, %v10839_v42 }
 0x3ea   :  { %v4245_v33 = vpop.f32.mrf.mxu0  ;;  %v10911_v21 = vpop.f32.mrf.mxu1  ;;  %4581 = vmatmul.mubr.bf16.vlgmr.msra.gmra.mxu1 %v8610_v35  ;;  %v8168_v35 = vld [vmem:[%s12996_s5 + $0x30] sm:$0xff]   ;;  %v3901_v4 = vadd.f32 %v10742_v61, %v10829_v48  ;;  %v8169_v61 = vld [vmem:[%s12996_s5 + $0x28] sm:$0xff]  }
 0x3eb   :  { %v10909_v52 = vmax.f32 %v5266_v32, %v5269_v9  ;;  %v4246_v57 = vadd.f32 %v4245_v33, %v3893_v8  ;;  %4590 = vmatprep.mubr.bf16.mxu1 %v9270_v45  ;;  %6126 = vmatpush1.bf16.msra.mxu1 %v8164_v60  ;;  %v5278_v9 = vmax.f32 %v10006_v14, 0.0  ;;  %v3903_v33 = vadd.f32 %v10748_v24, %v10839_v42  ;;  %v10949_v14 = vld [vmem:[%s12996_s5 + $0xb8] sm:$0xff]  }
 0x3ec   :  { %v4249_v59 = vpop.f32.mrf.mxu0  ;;  %4488 = vmatmul.mubr.bf16.gmra.mxu0 %v9807_v1  ;;  %v10919_v34 = vpop.f32.mrf.mxu1  ;;  %6127 = vmatprep.subr.bf16.mxu1 %v13223_v62  ;;  %v3907_v24 = vadd.f32 %v10754_v23, %v10829_v48 }
 0x3ed   :  { %v5275_v7 = vmax.f32 %v4246_v57, 0.0  ;;  %v10921_v19 = vadd.f32 %v4249_v59, %v3897_v31  ;;  %4497 = vmatprep.mubr.bf16.mxu0 %v13223_v62  ;;  %7733 = vmatprep.subr.bf16.mxu0 %v10949_v14 }
 0x3ee   :  { %v4251_v45 = vpop.f32.mrf.mxu0  ;;  %v10932_v43 = vpop.f32.mrf.mxu1 }
 0x3ef   :  { %13732 = vst [vmem:[#allocation213_spill] sm:$0xff] %v10921_v19  ;;  %v10930_v32 = vmax.f32 %v5272_v29, %v5275_v7  ;;  %v4252_v8 = vadd.f32 %v4251_v45, %v3899_v0  ;;  %6128 = vmatpush1.bf16.msra.mxu1 %v8168_v35 }
 0x3f0   :  { %v4253_v60 = vpop.f32.mrf.mxu0  ;;  %v10939_v59 = vpop.f32.mrf.mxu1  ;;  %6129 = vmatprep.subr.bf16.mxu1 %v13223_v62 }
 0x3f1   :  { %v5281_v57 = vmax.f32 %v4252_v8, 0.0  ;;  %v10941_v19 = vadd.f32 %v4253_v60, %v3901_v4  ;;  %v5284_v4 = vmax.f32 %v10019_v38, 0.0  ;;  %v3909_v8 = vadd.f32 %v10763_v36, %v10839_v42 }
 0x3f2   :  { %v4255_v29 = vpop.f32.mrf.mxu0  ;;  %v10956_v7 = vpop.f32.mrf.mxu1  ;;  %4591 = vmatmul.mubr.bf16.gmra.mxu1 %v8631_v55  ;;  %v8170_v55 = vld [vmem:[%s12996_s5 + $0x20] sm:$0xff]   ;;  %v3911_v38 = vadd.f32 %v10770_v11, %v10829_v48  ;;  %v8171_v11 = vld [vmem:[%s12996_s5 + $0x18] sm:$0xff]  }
 0x3f3   :  { %v10954_v0 = vmax.f32 %v5278_v9, %v5281_v57  ;;  %v4256_v35 = vadd.f32 %v4255_v29, %v3903_v33  ;;  %4600 = vmatprep.mubr.bf16.mxu1 %v9293_v53  ;;  %6130 = vmatpush1.bf16.msra.mxu1 %v8169_v61  ;;  %v13736_v29 = vld [vmem:[#allocation86_spill] sm:$0xff]  ;;  %v3913_v61 = vadd.f32 %v10776_v50, %v10839_v42 }
 0x3f4   :  { %v4259_v45 = vpop.f32.mrf.mxu0  ;;  %4498 = vmatmul.mubr.bf16.gmra.mxu0 %v9835_v49  ;;  %v10965_v9 = vpop.f32.mrf.mxu1  ;;  %6131 = vmatprep.subr.bf16.mxu1 %v13223_v62 }
 0x3f5   :  { %13733 = vst [vmem:[#allocation214_spill] sm:$0xff] %v10954_v0  ;;  %v5287_v23 = vmax.f32 %v4256_v35, 0.0  ;;  %v10967_v60 = vadd.f32 %v4259_v45, %v3907_v24  ;;  %4507 = vmatprep.mubr.bf16.mxu0 %v13223_v62  ;;  %v5290_v24 = vmax.f32 %v13736_v29, 0.0  ;;  %v13741_v29 = vld [vmem:[#allocation69_spill] sm:$0xff] }
 0x3f6   :  { %v4261_v53 = vpop.f32.mrf.mxu0  ;;  %v10978_v36 = vpop.f32.mrf.mxu1 }
 0x3f7   :  { %13734 = vst [vmem:[#allocation215_spill] sm:$0xff] %v10967_v60  ;;  %v10976_v33 = vmax.f32 %v5284_v4, %v5287_v23  ;;  %v4262_v57 = vadd.f32 %v4261_v53, %v3909_v8  ;;  %6132 = vmatpush1.bf16.msra.mxu1 %v8170_v55  ;;  %v3917_v8 = vadd.f32 %v10782_v47, %v10829_v48 }
 0x3f8   :  { %v4263_v35 = vpop.f32.mrf.mxu0  ;;  %v10985_v60 = vpop.f32.mrf.mxu1  ;;  %6133 = vmatprep.subr.bf16.mxu1 %v13223_v62 }
 0x3f9   :  { %13735 = vst [vmem:[#allocation216_spill] sm:$0xff] %v10976_v33  ;;  %v5293_v31 = vmax.f32 %v4262_v57, 0.0  ;;  %v10987_v49 = vadd.f32 %v4263_v35, %v3911_v38  ;;  %v13739_v57 = vld [vmem:[#allocation9_spill] sm:$0xff]  ;;  %v13740_v38 = vld [vmem:[#allocation138_spill] sm:$0xff] }
 0x3fa   :  { %v4265_v4 = vpop.f32.mrf.mxu0  ;;  %v10997_v23 = vpop.f32.mrf.mxu1  ;;  %4601 = vmatmul.mubr.bf16.gmra.mxu1 %v13739_v57  ;;  %v13742_v35 = vld [vmem:[#allocation85_spill] sm:$0xff] }
 0x3fb   :  { %13737 = vst [vmem:[#allocation86_spill] sm:$0xff] %v10987_v49  ;;  %v10995_v50 = vmax.f32 %v5290_v24, %v5293_v31  ;;  %v4266_v53 = vadd.f32 %v4265_v4, %v3913_v61  ;;  %4610 = vmatprep.mubr.bf16.mxu1 %v13740_v38  ;;  %v5296_v45 = vmax.f32 %v13742_v35, 0.0  ;;  %v3919_v49 = vadd.f32 %v10791_v16, %v10839_v42  ;;  %v8172_v31 = vld [vmem:[%s12996_s5 + $0x10] sm:$0xff]  }
 0x3fc   :  { %v4269_v55 = vpop.f32.mrf.mxu0  ;;  %4508 = vmatmul.mubr.bf16.gmra.mxu0 %v13741_v29  ;;  %v11005_v33 = vpop.f32.mrf.mxu1  ;;  %6134 = vmatpush1.bf16.msra.mxu1 %v8171_v11  ;;  %v3921_v61 = vadd.f32 %v10798_v27, %v10829_v48  ;;  %v3923_v11 = vadd.f32 %v10804_v56, %v10839_v42  ;;  %v8173_v27 = vld [vmem:[%s12996_s5 + $0x8] sm:$0xff]  }
 0x3fd   :  { %13738 = vst [vmem:[#allocation217_spill] sm:$0xff] %v10995_v50  ;;  %v5299_v0 = vmax.f32 %v4266_v53, 0.0  ;;  %v11007_v47 = vadd.f32 %v4269_v55, %v3917_v8  ;;  %4517 = vmatprep.mubr.bf16.mxu0 %v13223_v62  ;;  %6135 = vmatprep.subr.bf16.mxu1 %v13223_v62  ;;  %v13745_v8 = vld [vmem:[#allocation91_spill] sm:$0xff] }
 0x3fe   :  { %v4271_v24 = vpop.f32.mrf.mxu0  ;;  %v11018_v16 = vpop.f32.mrf.mxu1  ;;  %v5302_v57 = vmax.f32 %v13745_v8, 0.0  ;;  %v13750_v8 = vld [vmem:[#allocation67_spill] sm:$0xff] }
 0x3ff   :  { %13743 = vst [vmem:[#allocation9_spill] sm:$0xff] %v11007_v47  ;;  %v11016_v4 = vmax.f32 %v5296_v45, %v5299_v0  ;;  %v4272_v53 = vadd.f32 %v4271_v24, %v3919_v49  ;;  %v3927_v0 = vadd.f32 %v10810_v40, %v10829_v48 }
 0x400   :  { %v4273_v38 = vpop.f32.mrf.mxu0  ;;  %v11025_v47 = vpop.f32.mrf.mxu1  ;;  %6136 = vmatpush1.bf16.msra.mxu1 %v8172_v31 }
 0x401   :  { %13744 = vst [vmem:[#allocation138_spill] sm:$0xff] %v11016_v4  ;;  %v5305_v35 = vmax.f32 %v4272_v53, 0.0  ;;  %v11027_v29 = vadd.f32 %v4273_v38, %v3921_v61  ;;  %6137 = vmatprep.subr.bf16.mxu1 %v13223_v62  ;;  %v13748_v53 = vld [vmem:[#allocation10_spill] sm:$0xff]  ;;  %v13749_v61 = vld [vmem:[#allocation140_spill] sm:$0xff] }
 0x402   :  { %v4275_v49 = vpop.f32.mrf.mxu0  ;;  %v11037_v45 = vpop.f32.mrf.mxu1  ;;  %4611 = vmatmul.mubr.bf16.gmra.mxu1 %v13748_v53  ;;  %v13751_v38 = vld [vmem:[#allocation90_spill] sm:$0xff] }
 0x403   :  { %13746 = vst [vmem:[#allocation85_spill] sm:$0xff] %v11027_v29  ;;  %v11035_v56 = vmax.f32 %v5302_v57, %v5305_v35  ;;  %v4276_v24 = vadd.f32 %v4275_v49, %v3923_v11  ;;  %4620 = vmatprep.mubr.bf16.mxu1 %v13749_v61  ;;  %v5308_v55 = vmax.f32 %v13751_v38, 0.0  ;;  %v3929_v29 = vadd.f32 %v10819_v37, %v10839_v42  ;;  %v8174_v57 = vld [vmem:[%s12996_s5] sm:$0xff]  }
 0x404   :  { %v4279_v31 = vpop.f32.mrf.mxu0  ;;  %4518 = vmatmul.mubr.bf16.gmra.mxu0 %v13750_v8  ;;  %v11045_v4 = vpop.f32.mrf.mxu1  ;;  %6138 = vmatpush1.bf16.msra.mxu1 %v8173_v27  ;;  %v3931_v35 = vadd.f32 %v10833_v51, %v10829_v48  ;;  %v3933_v27 = vadd.f32 %v10843_v12, %v10839_v42  ;;  %v8176_v51 = vld [vmem:[%s12996_s5 + $0x78] sm:$0xff]  }
 0x405   :  { %13747 = vst [vmem:[#allocation91_spill] sm:$0xff] %v11035_v56  ;;  %v5311_v50 = vmax.f32 %v4276_v24, 0.0  ;;  %v11047_v40 = vadd.f32 %v4279_v31, %v3927_v0  ;;  %4527 = vmatprep.mubr.bf16.mxu0 %v13223_v62  ;;  %6139 = vmatprep.subr.bf16.mxu1 %v13223_v62  ;;  %v13753_v0 = vld [vmem:[#allocation96_spill] sm:$0xff]  ;;  %v3939_v31 = vadd.f32 %v10856_v58, %v10839_v42 }
 0x406   :  { %v4281_v11 = vpop.f32.mrf.mxu0  ;;  %v11058_v37 = vpop.f32.mrf.mxu1  ;;  %v5314_v53 = vmax.f32 %v13753_v0, 0.0  ;;  %v13758_v0 = vld [vmem:[#allocation95_spill] sm:$0xff] }
 0x407   :  { %13752 = vst [vmem:[#allocation10_spill] sm:$0xff] %v11047_v40  ;;  %v11056_v49 = vmax.f32 %v5308_v55, %v5311_v50  ;;  %v4282_v24 = vadd.f32 %v4281_v11, %v3929_v29  ;;  %v3937_v29 = vadd.f32 %v10849_v44, %v10829_v48 }
 0x408   :  { %v4283_v61 = vpop.f32.mrf.mxu0  ;;  %v11065_v40 = vpop.f32.mrf.mxu1  ;;  %6140 = vmatpush1.bf16.msra.mxu1 %v8174_v57 }
 0x409   :  { %v5317_v38 = vmax.f32 %v4282_v24, 0.0  ;;  %v11067_v8 = vadd.f32 %v4283_v61, %v3931_v35  ;;  %6141 = vmatprep.subr.bf16.mxu1 %v13223_v62  ;;  %v13756_v35 = vld [vmem:[#allocation142_spill] sm:$0xff]  ;;  %v13757_v24 = vld [vmem:[#allocation72_spill] sm:$0xff]  ;;  %v5320_v61 = vmax.f32 %v13758_v0, 0.0 }
 0x40a   :  { %v4285_v50 = vpop.f32.mrf.mxu0  ;;  %v11077_v55 = vpop.f32.mrf.mxu1  ;;  %4621 = vmatmul.mubr.bf16.gmra.mxu1 %v13548_v3  ;;  %v8177_v3 = vld [vmem:[%s12996_s5 + $0x70] sm:$0xff]  }
 0x40b   :  { %13754 = vst [vmem:[#allocation140_spill] sm:$0xff] %v11067_v8  ;;  %v11075_v12 = vmax.f32 %v5314_v53, %v5317_v38  ;;  %v4286_v11 = vadd.f32 %v4285_v50, %v3933_v27  ;;  %4630 = vmatprep.mubr.bf16.mxu1 %v13756_v35  ;;  %v3941_v27 = vadd.f32 %v10863_v63, %v10829_v48  ;;  %v8179_v63 = vld [vmem:[%s12996_s5 + $0x68] sm:$0xff]  }
 0x40c   :  { %v4289_v57 = vpop.f32.mrf.mxu0  ;;  %4528 = vmatmul.mubr.bf16.gmra.mxu0 %v13757_v24  ;;  %v11085_v56 = vpop.f32.mrf.mxu1  ;;  %6142 = vmatpush2.bf16.msra.mxu1 %v8176_v51  ;;  %v3943_v51 = vadd.f32 %v10868_v20, %v10839_v42 }
 0x40d   :  { %13755 = vst [vmem:[#allocation90_spill] sm:$0xff] %v11075_v12  ;;  %v5323_v8 = vmax.f32 %v4286_v11, 0.0  ;;  %v11087_v44 = vadd.f32 %v4289_v57, %v3937_v29  ;;  %4537 = vmatprep.mubr.bf16.mxu0 %v13223_v62  ;;  %6143 = vmatprep.subr.bf16.mxu1 %v13223_v62  ;;  %v13761_v29 = vld [vmem:[#allocation104_spill] sm:$0xff] }
 0x40e   :  { %v4291_v53 = vpop.f32.mrf.mxu0  ;;  %v11098_v58 = vpop.f32.mrf.mxu1  ;;  %v5326_v11 = vmax.f32 %v13761_v29, 0.0  ;;  %v13766_v29 = vld [vmem:[#allocation75_spill] sm:$0xff] }
 0x40f   :  { %13759 = vst [vmem:[#allocation96_spill] sm:$0xff] %v11087_v44  ;;  %v11096_v38 = vmax.f32 %v5320_v61, %v5323_v8  ;;  %v4292_v50 = vadd.f32 %v4291_v53, %v3939_v31  ;;  %v3947_v31 = vadd.f32 %v10876_v54, %v10829_v48 }
 0x410   :  { %v4293_v35 = vpop.f32.mrf.mxu0  ;;  %v11105_v44 = vpop.f32.mrf.mxu1  ;;  %6144 = vmatpush2.bf16.msra.mxu1 %v8177_v3 }
 0x411   :  { %13760 = vst [vmem:[#allocation142_spill] sm:$0xff] %v11096_v38  ;;  %v5329_v0 = vmax.f32 %v4292_v50, 0.0  ;;  %v11107_v24 = vadd.f32 %v4293_v35, %v3941_v27  ;;  %6145 = vmatprep.subr.bf16.mxu1 %v13223_v62  ;;  %v13764_v50 = vld [vmem:[#allocation12_spill] sm:$0xff] }
 0x412   :  { %v4295_v8 = vpop.f32.mrf.mxu0  ;;  %v11117_v61 = vpop.f32.mrf.mxu1  ;;  %4631 = vmatmul.mubr.bf16.gmra.mxu1 %v13764_v50  ;;  %v13765_v27 = vld [vmem:[#allocation144_spill] sm:$0xff] }
 0x413   :  { %13762 = vst [vmem:[#allocation95_spill] sm:$0xff] %v11107_v24  ;;  %v11115_v20 = vmax.f32 %v5326_v11, %v5329_v0  ;;  %v4296_v53 = vadd.f32 %v4295_v8, %v3943_v51  ;;  %4640 = vmatprep.mubr.bf16.mxu1 %v13765_v27  ;;  %v13767_v35 = vld [vmem:[#allocation100_spill] sm:$0xff]  ;;  %v3949_v24 = vadd.f32 %v10884_v22, %v10839_v42  ;;  %v13770_v22 = vld [vmem:[#allocation109_spill] sm:$0xff] }
 0x414   :  { %v4299_v3 = vpop.f32.mrf.mxu0  ;;  %4538 = vmatmul.mubr.bf16.gmra.mxu0 %v13766_v29  ;;  %v5332_v57 = vmax.f32 %v13767_v35, 0.0  ;;  %v11125_v38 = vpop.f32.mrf.mxu1  ;;  %6146 = vmatpush2.bf16.msra.mxu1 %v8179_v63  ;;  %v3951_v51 = vadd.f32 %v10893_v5, %v10829_v48 }
 0x415   :  { %13763 = vst [vmem:[#allocation104_spill] sm:$0xff] %v11115_v20  ;;  %v5335_v12 = vmax.f32 %v4296_v53, 0.0  ;;  %v11127_v54 = vadd.f32 %v4299_v3, %v3947_v31  ;;  %4933 = vmatprep.mubr.bf16.mxu0 %v13223_v62  ;;  %6147 = vmatprep.subr.bf16.mxu1 %v13223_v62  ;;  %v5338_v53 = vmax.f32 %v13770_v22, 0.0  ;;  %v3953_v31 = vadd.f32 %v10900_v17, %v10839_v42  ;;  %v13772_v22 = vld [vmem:[#allocation14_spill] sm:$0xff] }
 0x416   :  { %v4301_v11 = vpop.f32.mrf.mxu0  ;;  %v11135_v8 = vpop.f32.mrf.mxu1  ;;  %v3959_v20 = vadd.f32 %v10919_v34, %v10839_v42  ;;  %v13777_v34 = vld [vmem:[#allocation114_spill] sm:$0xff] }
 0x417   :  { %13768 = vst [vmem:[#allocation12_spill] sm:$0xff] %v11127_v54  ;;  %v11133_v0 = vmax.f32 %v5332_v57, %v5335_v12  ;;  %v4302_v50 = vadd.f32 %v4301_v11, %v3949_v24  ;;  %v8178_v12 = vld [vmem:[%s12996_s5 + $0xb0] sm:$0xff]   ;;  %v3957_v24 = vadd.f32 %v10911_v21, %v10829_v48 }
 0x418   :  { %v4303_v27 = vpop.f32.mrf.mxu0  ;;  %v11142_v35 = vpop.f32.mrf.mxu1 }
 0x419   :  { %13769 = vst [vmem:[#allocation144_spill] sm:$0xff] %v11133_v0  ;;  %v5341_v3 = vmax.f32 %v4302_v50, 0.0  ;;  %v11144_v54 = vadd.f32 %v4303_v27, %v3951_v51  ;;  %v13773_v50 = vld [vmem:[#allocation16_spill] sm:$0xff]  ;;  %v13774_v51 = vld [vmem:[#allocation135_spill] sm:$0xff]  ;;  %v13775_v27 = vld [vmem:[#allocation105_spill] sm:$0xff] }
 0x41a   :  { %v4305_v5 = vpop.f32.mrf.mxu0  ;;  %v11153_v11 = vpop.f32.mrf.mxu1  ;;  %4641 = vmatmul.mubr.bf16.gmra.mxu1 %v13772_v22 }
 0x41b   :  { %13771 = vst [vmem:[#allocation100_spill] sm:$0xff] %v11144_v54  ;;  %v11151_v57 = vmax.f32 %v5338_v53, %v5341_v3  ;;  %v4306_v17 = vadd.f32 %v4305_v5, %v3953_v31  ;;  %4650 = vmatprep.mubr.bf16.mxu1 %v13773_v50  ;;  %v5344_v54 = vmax.f32 %v13775_v27, 0.0  ;;  %v3961_v31 = vadd.f32 %v10932_v43, %v10829_v48  ;;  %v8180_v43 = vld [vmem:[%s12996_s5 + $0x60] sm:$0xff]  }
 0x41c   :  { %v4309_v63 = vpop.f32.mrf.mxu0  ;;  %4934 = vmatmul.mubr.bf16.vlgmr.msra.gmra.mxu0 %v13774_v51  ;;  %v11161_v29 = vpop.f32.mrf.mxu1  ;;  %6148 = vmatpush2.bf16.msra.mxu1 %v8180_v43  ;;  %v13790_v43 = vld [vmem:[#allocation137_spill] sm:$0xff] }
 0x41d   :  { %v5347_v0 = vmax.f32 %v4306_v17, 0.0  ;;  %v11163_v21 = vadd.f32 %v4309_v63, %v3957_v24  ;;  %4943 = vmatprep.mubr.bf16.mxu0 %v13223_v62  ;;  %7734 = vmatpush3.bf16.msra.mxu0 %v10949_v14  ;;  %v5350_v17 = vmax.f32 %v13777_v34, 0.0  ;;  %v3963_v63 = vadd.f32 %v10939_v59, %v10839_v42  ;;  %v13781_v34 = vld [vmem:[#allocation136_spill] sm:$0xff] }
 0x41e   :  { %v4311_v53 = vpop.f32.mrf.mxu0  ;;  %7735 = vmatprep.subr.bf16.mxu0 %v8178_v12  ;;  %v11171_v5 = vpop.f32.mrf.mxu1  ;;  %v3969_v24 = vadd.f32 %v10965_v9, %v10839_v42  ;;  %6149 = vmatprep.subr.bf16.mxu1 %v13223_v62  ;;  %v13785_v9 = vld [vmem:[#allocation119_spill] sm:$0xff] }
 0x41f   :  { %13776 = vst [vmem:[#allocation109_spill] sm:$0xff] %v11163_v21  ;;  %v11169_v3 = vmax.f32 %v5344_v54, %v5347_v0  ;;  %v4312_v22 = vadd.f32 %v4311_v53, %v3959_v20  ;;  %v3967_v54 = vadd.f32 %v10956_v7, %v10829_v48 }
 0x420   :  { %v4313_v50 = vpop.f32.mrf.mxu0  ;;  %v11178_v51 = vpop.f32.mrf.mxu1 }
 0x421   :  { %v5353_v14 = vmax.f32 %v4312_v22, 0.0  ;;  %v11180_v27 = vadd.f32 %v4313_v50, %v3961_v31  ;;  %7736 = vmatpush3.bf16.msra.mxu0 %v8178_v12  ;;  %v13780_v22 = vld [vmem:[#allocation15_spill] sm:$0xff]  ;;  %v13782_v12 = vld [vmem:[#allocation110_spill] sm:$0xff] }
 0x422   :  { %v4315_v20 = vpop.f32.mrf.mxu0  ;;  %v11189_v59 = vpop.f32.mrf.mxu1  ;;  %4651 = vmatmul.mubr.bf16.gmra.mxu1 %v13567_v26  ;;  %v5356_v50 = vmax.f32 %v13782_v12, 0.0  ;;  %v3971_v26 = vadd.f32 %v10978_v36, %v10829_v48 }
 0x423   :  { %13778 = vst [vmem:[#allocation14_spill] sm:$0xff] %v11180_v27  ;;  %v11187_v0 = vmax.f32 %v5350_v17, %v5353_v14  ;;  %v4316_v53 = vadd.f32 %v4315_v20, %v3963_v63  ;;  %4660 = vmatprep.mubr.bf16.mxu1 %v13780_v22 }
 0x424   :  { %v4319_v31 = vpop.f32.mrf.mxu0  ;;  %4944 = vmatmul.mubr.bf16.gmra.mxu0 %v13781_v34  ;;  %v11197_v21 = vpop.f32.mrf.mxu1 }
 0x425   :  { %13779 = vst [vmem:[#allocation16_spill] sm:$0xff] %v11187_v0  ;;  %v5359_v27 = vmax.f32 %v4316_v53, 0.0  ;;  %v11199_v7 = vadd.f32 %v4319_v31, %v3967_v54  ;;  %4953 = vmatprep.mubr.bf16.mxu0 %v13223_v62  ;;  %v5362_v53 = vmax.f32 %v13785_v9, 0.0  ;;  %v3973_v54 = vadd.f32 %v10985_v60, %v10839_v42  ;;  %v13788_v9 = vld [vmem:[#allocation23_spill] sm:$0xff]  ;;  %v13789_v60 = vld [vmem:[#allocation21_spill] sm:$0xff] }
 0x426   :  { %v4321_v17 = vpop.f32.mrf.mxu0  ;;  %v11207_v14 = vpop.f32.mrf.mxu1 }
 0x427   :  { %13783 = vst [vmem:[#allocation135_spill] sm:$0xff] %v11199_v7  ;;  %v11205_v63 = vmax.f32 %v5356_v50, %v5359_v27  ;;  %v4322_v20 = vadd.f32 %v4321_v17, %v3969_v24  ;;  %v3977_v27 = vadd.f32 %v10997_v23, %v10829_v48 }
 0x428   :  { %v4323_v22 = vpop.f32.mrf.mxu0  ;;  %v11214_v34 = vpop.f32.mrf.mxu1 }
 0x429   :  { %13784 = vst [vmem:[#allocation105_spill] sm:$0xff] %v11205_v63  ;;  %v5365_v31 = vmax.f32 %v4322_v20, 0.0  ;;  %v11216_v12 = vadd.f32 %v4323_v22, %v3971_v26  ;;  %v13791_v20 = vld [vmem:[#allocation115_spill] sm:$0xff]  ;;  %v3979_v26 = vadd.f32 %v11005_v33, %v10839_v42  ;;  %v3983_v33 = vadd.f32 %v11025_v47, %v10839_v42 }
 0x42a   :  { %v4325_v36 = vpop.f32.mrf.mxu0  ;;  %v11222_v24 = vpop.f32.mrf.mxu1  ;;  %4661 = vmatmul.mubr.bf16.gmra.mxu1 %v13788_v9  ;;  %v5368_v0 = vmax.f32 %v13791_v20, 0.0  ;;  %v13794_v9 = vld [vmem:[#allocation124_spill] sm:$0xff]  ;;  %v3987_v47 = vadd.f32 %v11037_v45, %v10829_v48 }
 0x42b   :  { %13786 = vst [vmem:[#allocation114_spill] sm:$0xff] %v11216_v12  ;;  %v11220_v50 = vmax.f32 %v5362_v53, %v5365_v31  ;;  %v4326_v17 = vadd.f32 %v4325_v36, %v3973_v54  ;;  %4670 = vmatprep.mubr.bf16.mxu1 %v13789_v60  ;;  %v3981_v54 = vadd.f32 %v11018_v16, %v10829_v48  ;;  %v5374_v60 = vmax.f32 %v13794_v9, 0.0  ;;  %v8181_v16 = vld [vmem:[%s12996_s5 + $0xa8] sm:$0xff]   ;;  %v13797_v9 = vld [vmem:[#allocation28_spill] sm:$0xff] }
 0x42c   :  { %v4329_v7 = vpop.f32.mrf.mxu0  ;;  %4954 = vmatmul.mubr.bf16.gmra.mxu0 %v13790_v43  ;;  %v11230_v12 = vpop.f32.mrf.mxu1  ;;  %7737 = vmatprep.subr.bf16.mxu0 %v8181_v16 }
 0x42d   :  { %13787 = vst [vmem:[#allocation15_spill] sm:$0xff] %v11220_v50  ;;  %v5371_v22 = vmax.f32 %v4326_v17, 0.0  ;;  %v11232_v23 = vadd.f32 %v4329_v7, %v3977_v27  ;;  %4963 = vmatprep.mubr.bf16.mxu0 %v13223_v62  ;;  %v13799_v7 = vld [vmem:[#allocation139_spill] sm:$0xff]  ;;  %7738 = vmatpush3.bf16.msra.mxu0 %v8181_v16  ;;  %v13808_v16 = vld [vmem:[#allocation141_spill] sm:$0xff] }
 0x42e   :  { %v4331_v53 = vpop.f32.mrf.mxu0  ;;  %v11239_v36 = vpop.f32.mrf.mxu1 }
 0x42f   :  { %13792 = vst [vmem:[#allocation136_spill] sm:$0xff] %v11232_v23  ;;  %v11237_v31 = vmax.f32 %v5368_v0, %v5371_v22  ;;  %v4332_v43 = vadd.f32 %v4331_v53, %v3979_v26  ;;  %v8182_v26 = vld [vmem:[%s12996_s5 + $0x58] sm:$0xff]  }
 0x430   :  { %v4333_v20 = vpop.f32.mrf.mxu0  ;;  %v11246_v17 = vpop.f32.mrf.mxu1  ;;  %6150 = vmatpush2.bf16.msra.mxu1 %v8182_v26 }
 0x431   :  { %13793 = vst [vmem:[#allocation110_spill] sm:$0xff] %v11237_v31  ;;  %v5377_v27 = vmax.f32 %v4332_v43, 0.0  ;;  %v11248_v23 = vadd.f32 %v4333_v20, %v3981_v54  ;;  %v13798_v54 = vld [vmem:[#allocation20_spill] sm:$0xff]  ;;  %v3989_v31 = vadd.f32 %v11045_v4, %v10839_v42  ;;  %6151 = vmatprep.subr.bf16.mxu1 %v13223_v62  ;;  %v13803_v4 = vld [vmem:[#allocation129_spill] sm:$0xff] }
 0x432   :  { %v4335_v0 = vpop.f32.mrf.mxu0  ;;  %v11260_v53 = vpop.f32.mrf.mxu1  ;;  %4671 = vmatmul.mubr.bf16.gmra.mxu1 %v13797_v9 }
 0x433   :  { %13795 = vst [vmem:[#allocation119_spill] sm:$0xff] %v11248_v23  ;;  %v11258_v22 = vmax.f32 %v5374_v60, %v5377_v27  ;;  %v4336_v43 = vadd.f32 %v4335_v0, %v3983_v33  ;;  %4680 = vmatprep.mubr.bf16.mxu1 %v13798_v54  ;;  %v13800_v23 = vld [vmem:[#allocation120_spill] sm:$0xff]  ;;  %v3991_v27 = vadd.f32 %v11058_v37, %v10829_v48 }
 0x434   :  { %v4339_v20 = vpop.f32.mrf.mxu0  ;;  %4964 = vmatmul.mubr.bf16.gmra.mxu0 %v13799_v7  ;;  %v5380_v50 = vmax.f32 %v13800_v23, 0.0  ;;  %v11268_v45 = vpop.f32.mrf.mxu1 }
 0x435   :  { %13796 = vst [vmem:[#allocation23_spill] sm:$0xff] %v11258_v22  ;;  %v5383_v63 = vmax.f32 %v4336_v43, 0.0  ;;  %v11270_v60 = vadd.f32 %v4339_v20, %v3987_v47  ;;  %4973 = vmatprep.mubr.bf16.mxu0 %v13223_v62  ;;  %v5386_v43 = vmax.f32 %v13803_v4, 0.0  ;;  %v3993_v47 = vadd.f32 %v11065_v40, %v10839_v42  ;;  %v13806_v4 = vld [vmem:[#allocation33_spill] sm:$0xff]  ;;  %v13807_v40 = vld [vmem:[#allocation26_spill] sm:$0xff] }
 0x436   :  { %v4341_v33 = vpop.f32.mrf.mxu0  ;;  %v11277_v7 = vpop.f32.mrf.mxu1 }
 0x437   :  { %13801 = vst [vmem:[#allocation21_spill] sm:$0xff] %v11270_v60  ;;  %v11275_v0 = vmax.f32 %v5380_v50, %v5383_v63  ;;  %v4342_v23 = vadd.f32 %v4341_v33, %v3989_v31  ;;  %v3997_v50 = vadd.f32 %v11077_v55, %v10829_v48 }
 0x438   :  { %v4343_v9 = vpop.f32.mrf.mxu0  ;;  %v11285_v54 = vpop.f32.mrf.mxu1 }
 0x439   :  { %13802 = vst [vmem:[#allocation137_spill] sm:$0xff] %v11275_v0  ;;  %v5389_v26 = vmax.f32 %v4342_v23, 0.0  ;;  %v11287_v37 = vadd.f32 %v4343_v9, %v3991_v27  ;;  %v13809_v23 = vld [vmem:[#allocation125_spill] sm:$0xff]  ;;  %v3999_v27 = vadd.f32 %v11085_v56, %v10839_v42  ;;  %v4003_v56 = vadd.f32 %v11105_v44, %v10839_v42 }
 0x43a   :  { %v4345_v63 = vpop.f32.mrf.mxu0  ;;  %v11293_v20 = vpop.f32.mrf.mxu1  ;;  %4681 = vmatmul.mubr.bf16.gmra.mxu1 %v13806_v4  ;;  %v5392_v22 = vmax.f32 %v13809_v23, 0.0  ;;  %v13812_v4 = vld [vmem:[#allocation134_spill] sm:$0xff] }
 0x43b   :  { %13804 = vst [vmem:[#allocation115_spill] sm:$0xff] %v11287_v37  ;;  %v11291_v31 = vmax.f32 %v5386_v43, %v5389_v26  ;;  %v4346_v33 = vadd.f32 %v4345_v63, %v3993_v47  ;;  %4690 = vmatprep.mubr.bf16.mxu1 %v13807_v40  ;;  %v4001_v47 = vadd.f32 %v11098_v58, %v10829_v48  ;;  %v5398_v40 = vmax.f32 %v13812_v4, 0.0  ;;  %v8183_v58 = vld [vmem:[%s12996_s5 + $0x50] sm:$0xff]  }
 0x43c   :  { %v4349_v60 = vpop.f32.mrf.mxu0  ;;  %4974 = vmatmul.mubr.bf16.gmra.mxu0 %v13808_v16  ;;  %v11301_v37 = vpop.f32.mrf.mxu1  ;;  %v13815_v4 = vld [vmem:[#allocation38_spill] sm:$0xff]  ;;  %6152 = vmatpush2.bf16.msra.mxu1 %v8183_v58  ;;  %v13826_v58 = vld [vmem:[#allocation13_spill] sm:$0xff] }
 0x43d   :  { %13805 = vst [vmem:[#allocation124_spill] sm:$0xff] %v11291_v31  ;;  %v5395_v9 = vmax.f32 %v4346_v33, 0.0  ;;  %v11303_v55 = vadd.f32 %v4349_v60, %v3997_v50  ;;  %4983 = vmatprep.mubr.bf16.mxu0 %v13223_v62  ;;  %v4009_v31 = vadd.f32 %v11125_v38, %v10839_v42  ;;  %6153 = vmatprep.subr.bf16.mxu1 %v13223_v62  ;;  %v13821_v38 = vld [vmem:[#allocation132_spill] sm:$0xff] }
 0x43e   :  { %v4351_v43 = vpop.f32.mrf.mxu0  ;;  %v11310_v63 = vpop.f32.mrf.mxu1 }
 0x43f   :  { %13810 = vst [vmem:[#allocation28_spill] sm:$0xff] %v11303_v55  ;;  %v11308_v26 = vmax.f32 %v5392_v22, %v5395_v9  ;;  %v4352_v16 = vadd.f32 %v4351_v43, %v3999_v27  ;;  %v4007_v27 = vadd.f32 %v11117_v61, %v10829_v48 }
 0x440   :  { %v4353_v23 = vpop.f32.mrf.mxu0  ;;  %v11317_v33 = vpop.f32.mrf.mxu1 }
 0x441   :  { %13811 = vst [vmem:[#allocation20_spill] sm:$0xff] %v11308_v26  ;;  %v5401_v50 = vmax.f32 %v4352_v16, 0.0  ;;  %v11319_v55 = vadd.f32 %v4353_v23, %v4001_v47  ;;  %v13816_v16 = vld [vmem:[#allocation25_spill] sm:$0xff]  ;;  %v13817_v47 = vld [vmem:[#allocation143_spill] sm:$0xff]  ;;  %v13818_v23 = vld [vmem:[#allocation130_spill] sm:$0xff] }
 0x442   :  { %v4355_v22 = vpop.f32.mrf.mxu0  ;;  %v11328_v43 = vpop.f32.mrf.mxu1  ;;  %4691 = vmatmul.mubr.bf16.gmra.mxu1 %v13815_v4 }
 0x443   :  { %13813 = vst [vmem:[#allocation139_spill] sm:$0xff] %v11319_v55  ;;  %v11326_v9 = vmax.f32 %v5398_v40, %v5401_v50  ;;  %v4356_v44 = vadd.f32 %v4355_v22, %v4003_v56  ;;  %4700 = vmatprep.mubr.bf16.mxu1 %v13816_v16  ;;  %v5404_v55 = vmax.f32 %v13818_v23, 0.0  ;;  %v4011_v56 = vadd.f32 %v11135_v8, %v10829_v48 }
 0x444   :  { %v4359_v60 = vpop.f32.mrf.mxu0  ;;  %4984 = vmatmul.mubr.bf16.gmra.mxu0 %v13817_v47  ;;  %v11336_v0 = vpop.f32.mrf.mxu1 }
 0x445   :  { %13814 = vst [vmem:[#allocation120_spill] sm:$0xff] %v11326_v9  ;;  %v5407_v26 = vmax.f32 %v4356_v44, 0.0  ;;  %v11338_v61 = vadd.f32 %v4359_v60, %v4007_v27  ;;  %4993 = vmatprep.mubr.bf16.mxu0 %v13223_v62  ;;  %v5410_v44 = vmax.f32 %v13821_v38, 0.0  ;;  %v4013_v60 = vadd.f32 %v11142_v35, %v10839_v42  ;;  %v13824_v38 = vld [vmem:[#allocation43_spill] sm:$0xff] }
 0x446   :  { %v4361_v40 = vpop.f32.mrf.mxu0  ;;  %v11346_v22 = vpop.f32.mrf.mxu1  ;;  %v13825_v35 = vld [vmem:[#allocation31_spill] sm:$0xff] }
 0x447   :  { %13819 = vst [vmem:[#allocation129_spill] sm:$0xff] %v11338_v61  ;;  %v11344_v50 = vmax.f32 %v5404_v55, %v5407_v26  ;;  %v4362_v4 = vadd.f32 %v4361_v40, %v4009_v31  ;;  %v4017_v55 = vadd.f32 %v11153_v11, %v10829_v48 }
 0x448   :  { %v4363_v16 = vpop.f32.mrf.mxu0  ;;  %v11353_v47 = vpop.f32.mrf.mxu1 }
 0x449   :  { %13820 = vst [vmem:[#allocation33_spill] sm:$0xff] %v11344_v50  ;;  %v5413_v27 = vmax.f32 %v4362_v4, 0.0  ;;  %v11355_v23 = vadd.f32 %v4363_v16, %v4011_v56  ;;  %v13827_v4 = vld [vmem:[#allocation71_spill] sm:$0xff]  ;;  %v4019_v56 = vadd.f32 %v11161_v29, %v10839_v42  ;;  %v4023_v29 = vadd.f32 %v11178_v51, %v10839_v42 }
 0x44a   :  { %v4365_v8 = vpop.f32.mrf.mxu0  ;;  %v11361_v31 = vpop.f32.mrf.mxu1  ;;  %4701 = vmatmul.mubr.bf16.gmra.mxu1 %v13824_v38  ;;  %v5416_v9 = vmax.f32 %v13827_v4, 0.0  ;;  %v13830_v38 = vld [vmem:[#allocation11_spill] sm:$0xff]  ;;  %v4027_v51 = vadd.f32 %v11189_v59, %v10829_v48 }
 0x44b   :  { %13822 = vst [vmem:[#allocation26_spill] sm:$0xff] %v11355_v23  ;;  %v11359_v26 = vmax.f32 %v5410_v44, %v5413_v27  ;;  %v4366_v40 = vadd.f32 %v4365_v8, %v4013_v60  ;;  %4710 = vmatprep.mubr.bf16.mxu1 %v13825_v35  ;;  %v4021_v60 = vadd.f32 %v11171_v5, %v10829_v48  ;;  %v5422_v35 = vmax.f32 %v13830_v38, 0.0  ;;  %v8184_v5 = vld [vmem:[%s12996_s5 + $0xa0] sm:$0xff]  }
 0x44c   :  { %v4369_v61 = vpop.f32.mrf.mxu0  ;;  %4994 = vmatmul.mubr.bf16.gmra.mxu0 %v13826_v58  ;;  %v11369_v23 = vpop.f32.mrf.mxu1  ;;  %v13833_v38 = vld [vmem:[#allocation48_spill] sm:$0xff]  ;;  %7739 = vmatprep.subr.bf16.mxu0 %v8184_v5 }
 0x44d   :  { %13823 = vst [vmem:[#allocation141_spill] sm:$0xff] %v11359_v26  ;;  %v5419_v16 = vmax.f32 %v4366_v40, 0.0  ;;  %v11371_v11 = vadd.f32 %v4369_v61, %v4017_v55  ;;  %5003 = vmatprep.mubr.bf16.mxu0 %v13223_v62  ;;  %v13835_v61 = vld [vmem:[#allocation19_spill] sm:$0xff]  ;;  %7740 = vmatpush3.bf16.msra.mxu0 %v8184_v5  ;;  %v13843_v5 = vld [vmem:[#allocation17_spill] sm:$0xff] }
 0x44e   :  { %v4371_v44 = vpop.f32.mrf.mxu0  ;;  %v11378_v8 = vpop.f32.mrf.mxu1 }
 0x44f   :  { %13828 = vst [vmem:[#allocation125_spill] sm:$0xff] %v11371_v11  ;;  %v11376_v27 = vmax.f32 %v5416_v9, %v5419_v16  ;;  %v4372_v58 = vadd.f32 %v4371_v44, %v4019_v56  ;;  %v8185_v56 = vld [vmem:[%s12996_s5 + $0x48] sm:$0xff]  }
 0x450   :  { %v4373_v4 = vpop.f32.mrf.mxu0  ;;  %v11385_v40 = vpop.f32.mrf.mxu1  ;;  %6154 = vmatpush2.bf16.msra.mxu1 %v8185_v56 }
 0x451   :  { %13829 = vst [vmem:[#allocation134_spill] sm:$0xff] %v11376_v27  ;;  %v5425_v55 = vmax.f32 %v4372_v58, 0.0  ;;  %v11387_v11 = vadd.f32 %v4373_v4, %v4021_v60  ;;  %v13834_v60 = vld [vmem:[#allocation30_spill] sm:$0xff]  ;;  %v4029_v27 = vadd.f32 %v11197_v21, %v10839_v42  ;;  %6155 = vmatprep.subr.bf16.mxu1 %v13223_v62  ;;  %v13838_v21 = vld [vmem:[#allocation147_spill] sm:$0xff] }
 0x452   :  { %v4375_v9 = vpop.f32.mrf.mxu0  ;;  %v11399_v44 = vpop.f32.mrf.mxu1  ;;  %4711 = vmatmul.mubr.bf16.gmra.mxu1 %v13833_v38 }
 0x453   :  { %13831 = vst [vmem:[#allocation38_spill] sm:$0xff] %v11387_v11  ;;  %v11397_v16 = vmax.f32 %v5422_v35, %v5425_v55  ;;  %v4376_v58 = vadd.f32 %v4375_v9, %v4023_v29  ;;  %4720 = vmatprep.mubr.bf16.mxu1 %v13834_v60  ;;  %v13836_v11 = vld [vmem:[#allocation145_spill] sm:$0xff]  ;;  %v4031_v55 = vadd.f32 %v11207_v14, %v10829_v48 }
 0x454   :  { %v4379_v4 = vpop.f32.mrf.mxu0  ;;  %5004 = vmatmul.mubr.bf16.gmra.mxu0 %v13835_v61  ;;  %v5428_v26 = vmax.f32 %v13836_v11, 0.0  ;;  %v11407_v59 = vpop.f32.mrf.mxu1 }
 0x455   :  { %13832 = vst [vmem:[#allocation25_spill] sm:$0xff] %v11397_v16  ;;  %v5431_v50 = vmax.f32 %v4376_v58, 0.0  ;;  %v11409_v35 = vadd.f32 %v4379_v4, %v4027_v51  ;;  %5013 = vmatprep.mubr.bf16.mxu0 %v13223_v62  ;;  %v5434_v58 = vmax.f32 %v13838_v21, 0.0  ;;  %v4033_v51 = vadd.f32 %v11214_v34, %v10839_v42  ;;  %v13841_v21 = vld [vmem:[#allocation53_spill] sm:$0xff]  ;;  %v13842_v34 = vld [vmem:[#allocation36_spill] sm:$0xff] }
 0x456   :  { %v4381_v29 = vpop.f32.mrf.mxu0  ;;  %v11416_v61 = vpop.f32.mrf.mxu1 }
 0x457   :  { %13837 = vst [vmem:[#allocation143_spill] sm:$0xff] %v11409_v35  ;;  %v11414_v9 = vmax.f32 %v5428_v26, %v5431_v50  ;;  %v4382_v11 = vadd.f32 %v4381_v29, %v4029_v27  ;;  %v4037_v26 = vadd.f32 %v11222_v24, %v10829_v48 }
 0x458   :  { %v4383_v38 = vpop.f32.mrf.mxu0  ;;  %v11424_v60 = vpop.f32.mrf.mxu1 }
 0x459   :  { %v5437_v56 = vmax.f32 %v4382_v11, 0.0  ;;  %v11426_v14 = vadd.f32 %v4383_v38, %v4031_v55  ;;  %v13844_v11 = vld [vmem:[#allocation149_spill] sm:$0xff]  ;;  %v4039_v55 = vadd.f32 %v11230_v12, %v10839_v42  ;;  %v4043_v12 = vadd.f32 %v11246_v17, %v10839_v42 }
 0x45a   :  { %v4385_v50 = vpop.f32.mrf.mxu0  ;;  %v11432_v4 = vpop.f32.mrf.mxu1  ;;  %4721 = vmatmul.mubr.bf16.gmra.mxu1 %v13841_v21  ;;  %v5440_v16 = vmax.f32 %v13844_v11, 0.0  ;;  %v13846_v21 = vld [vmem:[#allocation151_spill] sm:$0xff] }
 0x45b   :  { %13839 = vst [vmem:[#allocation130_spill] sm:$0xff] %v11426_v14  ;;  %v11430_v27 = vmax.f32 %v5434_v58, %v5437_v56  ;;  %v4386_v29 = vadd.f32 %v4385_v50, %v4033_v51  ;;  %4730 = vmatprep.mubr.bf16.mxu1 %v13842_v34  ;;  %v4041_v51 = vadd.f32 %v11239_v36, %v10829_v48  ;;  %v5446_v34 = vmax.f32 %v13846_v21, 0.0  ;;  %v8186_v36 = vld [vmem:[%s12996_s5 + $0x40] sm:$0xff]   ;;  %v13850_v21 = vld [vmem:[#allocation153_spill] sm:$0xff] }
 0x45c   :  { %v4389_v35 = vpop.f32.mrf.mxu0  ;;  %5014 = vmatmul.mubr.bf16.gmra.mxu0 %v13843_v5  ;;  %v11440_v14 = vpop.f32.mrf.mxu1  ;;  %6156 = vmatpush2.bf16.msra.mxu1 %v8186_v36 }
 0x45d   :  { %13840 = vst [vmem:[#allocation132_spill] sm:$0xff] %v11430_v27  ;;  %v5443_v38 = vmax.f32 %v4386_v29, 0.0  ;;  %v11442_v24 = vadd.f32 %v4389_v35, %v4037_v26  ;;  %5023 = vmatprep.mubr.bf16.mxu0 %v13223_v62  ;;  %v4049_v35 = vadd.f32 %v11268_v45, %v10839_v42 }
 0x45e   :  { %v4391_v58 = vpop.f32.mrf.mxu0  ;;  %v11449_v50 = vpop.f32.mrf.mxu1 }
 0x45f   :  { %13845 = vst [vmem:[#allocation43_spill] sm:$0xff] %v11442_v24  ;;  %v11447_v56 = vmax.f32 %v5440_v16, %v5443_v38  ;;  %v4392_v5 = vadd.f32 %v4391_v58, %v4039_v55  ;;  %v4047_v55 = vadd.f32 %v11260_v53, %v10829_v48 }
 0x460   :  { %v4393_v11 = vpop.f32.mrf.mxu0  ;;  %v11456_v29 = vpop.f32.mrf.mxu1 }
 0x461   :  { %v5449_v26 = vmax.f32 %v4392_v5, 0.0  ;;  %v11458_v24 = vadd.f32 %v4393_v11, %v4041_v51  ;;  %v13849_v51 = vld [vmem:[#allocation24_spill] sm:$0xff]  ;;  %v5452_v11 = vmax.f32 %v13850_v21, 0.0 }
 0x462   :  { %v4395_v16 = vpop.f32.mrf.mxu0  ;;  %v11467_v58 = vpop.f32.mrf.mxu1  ;;  %4731 = vmatmul.mubr.bf16.gmra.mxu1 %v13623_v13 }
 0x463   :  { %13847 = vst [vmem:[#allocation31_spill] sm:$0xff] %v11458_v24  ;;  %v11465_v38 = vmax.f32 %v5446_v34, %v5449_v26  ;;  %v4396_v17 = vadd.f32 %v4395_v16, %v4043_v12  ;;  %4740 = vmatprep.mubr.bf16.mxu1 %v13624_v2  ;;  %v4051_v2 = vadd.f32 %v11277_v7, %v10829_v48  ;;  %v13853_v16 = vld [vmem:[#allocation58_spill] sm:$0xff] }
 0x464   :  { %v4399_v5 = vpop.f32.mrf.mxu0  ;;  %5024 = vmatmul.mubr.bf16.gmra.mxu0 %v13849_v51  ;;  %v11475_v27 = vpop.f32.mrf.mxu1  ;;  %v5458_v51 = vmax.f32 %v13853_v16, 0.0  ;;  %v13856_v16 = vld [vmem:[#allocation63_spill] sm:$0xff] }
 0x465   :  { %13848 = vst [vmem:[#allocation13_spill] sm:$0xff] %v11465_v38  ;;  %v5455_v24 = vmax.f32 %v4396_v17, 0.0  ;;  %v11477_v53 = vadd.f32 %v4399_v5, %v4047_v55  ;;  %5033 = vmatprep.mubr.bf16.mxu0 %v13223_v62  ;;  %v4053_v17 = vadd.f32 %v11285_v54, %v10839_v42  ;;  %v13857_v54 = vld [vmem:[#allocation41_spill] sm:$0xff]  ;;  %v13858_v55 = vld [vmem:[#allocation22_spill] sm:$0xff] }
 0x466   :  { %v4401_v34 = vpop.f32.mrf.mxu0  ;;  %v11484_v12 = vpop.f32.mrf.mxu1 }
 0x467   :  { %13851 = vst [vmem:[#allocation71_spill] sm:$0xff] %v11477_v53  ;;  %v11482_v13 = vmax.f32 %v5452_v11, %v5455_v24  ;;  %v4402_v26 = vadd.f32 %v4401_v34, %v4049_v35  ;;  %v4057_v24 = vadd.f32 %v11293_v20, %v10829_v48 }
 0x468   :  { %v4403_v45 = vpop.f32.mrf.mxu0  ;;  %v11491_v36 = vpop.f32.mrf.mxu1 }
 0x469   :  { %13852 = vst [vmem:[#allocation11_spill] sm:$0xff] %v11482_v13  ;;  %v5461_v5 = vmax.f32 %v4402_v26, 0.0  ;;  %v11493_v21 = vadd.f32 %v4403_v45, %v4051_v2  ;;  %v13859_v26 = vld [vmem:[#allocation155_spill] sm:$0xff]  ;;  %v4059_v2 = vadd.f32 %v11301_v37, %v10839_v42  ;;  %v4063_v37 = vadd.f32 %v11317_v33, %v10839_v42 }
 0x46a   :  { %v4405_v7 = vpop.f32.mrf.mxu0  ;;  %v11499_v35 = vpop.f32.mrf.mxu1  ;;  %4741 = vmatmul.mubr.bf16.gmra.mxu1 %v13856_v16  ;;  %v5464_v38 = vmax.f32 %v13859_v26, 0.0  ;;  %v13862_v16 = vld [vmem:[#allocation157_spill] sm:$0xff] }
 0x46b   :  { %13854 = vst [vmem:[#allocation48_spill] sm:$0xff] %v11493_v21  ;;  %v11497_v11 = vmax.f32 %v5458_v51, %v5461_v5  ;;  %v4406_v34 = vadd.f32 %v4405_v7, %v4053_v17  ;;  %4750 = vmatprep.mubr.bf16.mxu1 %v13857_v54  ;;  %v4061_v17 = vadd.f32 %v11310_v63, %v10829_v48  ;;  %v5470_v54 = vmax.f32 %v13862_v16, 0.0  ;;  %v8187_v63 = vld [vmem:[%s12996_s5 + $0x98] sm:$0xff]   ;;  %v13865_v16 = vld [vmem:[#allocation68_spill] sm:$0xff] }
 0x46c   :  { %v4409_v53 = vpop.f32.mrf.mxu0  ;;  %5034 = vmatmul.mubr.bf16.gmra.mxu0 %v13858_v55  ;;  %v11507_v21 = vpop.f32.mrf.mxu1  ;;  %7741 = vmatprep.subr.bf16.mxu0 %v8187_v63 }
 0x46d   :  { %13855 = vst [vmem:[#allocation30_spill] sm:$0xff] %v11497_v11  ;;  %v5467_v45 = vmax.f32 %v4406_v34, 0.0  ;;  %v11509_v20 = vadd.f32 %v4409_v53, %v4057_v24  ;;  %5043 = vmatprep.mubr.bf16.mxu0 %v13223_v62  ;;  %v13868_v53 = vld [vmem:[#allocation159_spill] sm:$0xff]  ;;  %v4069_v11 = vadd.f32 %v11336_v0, %v10839_v42  ;;  %7742 = vmatpush3.bf16.msra.mxu0 %v8187_v63 }
 0x46e   :  { %v4411_v51 = vpop.f32.mrf.mxu0  ;;  %v11516_v7 = vpop.f32.mrf.mxu1 }
 0x46f   :  { %13860 = vst [vmem:[#allocation19_spill] sm:$0xff] %v11509_v20  ;;  %v11514_v5 = vmax.f32 %v5464_v38, %v5467_v45  ;;  %v4412_v55 = vadd.f32 %v4411_v51, %v4059_v2  ;;  %v4067_v2 = vadd.f32 %v11328_v43, %v10829_v48 }
 0x470   :  { %v4413_v26 = vpop.f32.mrf.mxu0  ;;  %v11523_v34 = vpop.f32.mrf.mxu1 }
 0x471   :  { %13861 = vst [vmem:[#allocation145_spill] sm:$0xff] %v11514_v5  ;;  %v5473_v24 = vmax.f32 %v4412_v55, 0.0  ;;  %v11525_v20 = vadd.f32 %v4413_v26, %v4061_v17  ;;  %v13866_v55 = vld [vmem:[#allocation40_spill] sm:$0xff]  ;;  %v13867_v26 = vld [vmem:[#allocation29_spill] sm:$0xff] }
 0x472   :  { %v4415_v38 = vpop.f32.mrf.mxu0  ;;  %v11534_v51 = vpop.f32.mrf.mxu1  ;;  %4751 = vmatmul.mubr.bf16.gmra.mxu1 %v13865_v16 }
 0x473   :  { %13863 = vst [vmem:[#allocation147_spill] sm:$0xff] %v11525_v20  ;;  %v11532_v45 = vmax.f32 %v5470_v54, %v5473_v24  ;;  %v4416_v33 = vadd.f32 %v4415_v38, %v4063_v37  ;;  %4760 = vmatprep.mubr.bf16.mxu1 %v13866_v55  ;;  %v5476_v20 = vmax.f32 %v13868_v53, 0.0  ;;  %v4071_v24 = vadd.f32 %v11346_v22, %v10829_v48  ;;  %v13871_v55 = vld [vmem:[#allocation161_spill] sm:$0xff] }
 0x474   :  { %v4419_v17 = vpop.f32.mrf.mxu0  ;;  %5044 = vmatmul.mubr.bf16.gmra.mxu0 %v13867_v26  ;;  %v11542_v43 = vpop.f32.mrf.mxu1  ;;  %v5482_v26 = vmax.f32 %v13871_v55, 0.0  ;;  %v13874_v55 = vld [vmem:[#allocation73_spill] sm:$0xff] }
 0x475   :  { %13864 = vst [vmem:[#allocation53_spill] sm:$0xff] %v11532_v45  ;;  %v5479_v5 = vmax.f32 %v4416_v33, 0.0  ;;  %v11544_v54 = vadd.f32 %v4419_v17, %v4067_v2  ;;  %5053 = vmatprep.mubr.bf16.mxu0 %v13223_v62  ;;  %v4073_v33 = vadd.f32 %v11353_v47, %v10839_v42  ;;  %v13875_v47 = vld [vmem:[#allocation46_spill] sm:$0xff]  ;;  %v13876_v2 = vld [vmem:[#allocation27_spill] sm:$0xff] }
 0x476   :  { %v4421_v37 = vpop.f32.mrf.mxu0  ;;  %v11551_v16 = vpop.f32.mrf.mxu1 }
 0x477   :  { %13869 = vst [vmem:[#allocation36_spill] sm:$0xff] %v11544_v54  ;;  %v11549_v38 = vmax.f32 %v5476_v20, %v5479_v5  ;;  %v4422_v53 = vadd.f32 %v4421_v37, %v4069_v11  ;;  %v4077_v20 = vadd.f32 %v11361_v31, %v10829_v48 }
 0x478   :  { %v4423_v0 = vpop.f32.mrf.mxu0  ;;  %v11558_v63 = vpop.f32.mrf.mxu1 }
 0x479   :  { %13870 = vst [vmem:[#allocation17_spill] sm:$0xff] %v11549_v38  ;;  %v5485_v17 = vmax.f32 %v4422_v53, 0.0  ;;  %v11560_v54 = vadd.f32 %v4423_v0, %v4071_v24  ;;  %v13877_v53 = vld [vmem:[#allocation163_spill] sm:$0xff]  ;;  %v4079_v24 = vadd.f32 %v11369_v23, %v10839_v42  ;;  %v4083_v23 = vadd.f32 %v11385_v40, %v10839_v42  ;;  %v13883_v40 = vld [vmem:[#allocation45_spill] sm:$0xff] }
 0x47a   :  { %v4425_v22 = vpop.f32.mrf.mxu0  ;;  %v11566_v11 = vpop.f32.mrf.mxu1  ;;  %4761 = vmatmul.mubr.bf16.gmra.mxu1 %v13874_v55  ;;  %v5488_v45 = vmax.f32 %v13877_v53, 0.0  ;;  %v13880_v55 = vld [vmem:[#allocation165_spill] sm:$0xff] }
 0x47b   :  { %13872 = vst [vmem:[#allocation149_spill] sm:$0xff] %v11560_v54  ;;  %v11564_v5 = vmax.f32 %v5482_v26, %v5485_v17  ;;  %v4426_v37 = vadd.f32 %v4425_v22, %v4073_v33  ;;  %4770 = vmatprep.mubr.bf16.mxu1 %v13875_v47  ;;  %v4081_v33 = vadd.f32 %v11378_v8, %v10829_v48  ;;  %v5494_v47 = vmax.f32 %v13880_v55, 0.0 }
 0x47c   :  { %v4429_v13 = vpop.f32.mrf.mxu0  ;;  %5054 = vmatmul.mubr.bf16.gmra.mxu0 %v13876_v2  ;;  %v11574_v54 = vpop.f32.mrf.mxu1 }
 0x47d   :  { %13873 = vst [vmem:[#allocation151_spill] sm:$0xff] %v11564_v5  ;;  %v5491_v0 = vmax.f32 %v4426_v37, 0.0  ;;  %v11576_v31 = vadd.f32 %v4429_v13, %v4077_v20  ;;  %5063 = vmatprep.mubr.bf16.mxu0 %v13223_v62  ;;  %v13884_v13 = vld [vmem:[#allocation34_spill] sm:$0xff] }
 0x47e   :  { %v4431_v26 = vpop.f32.mrf.mxu0  ;;  %v11583_v22 = vpop.f32.mrf.mxu1 }
 0x47f   :  { %13878 = vst [vmem:[#allocation24_spill] sm:$0xff] %v11576_v31  ;;  %v11581_v17 = vmax.f32 %v5488_v45, %v5491_v0  ;;  %v4432_v2 = vadd.f32 %v4431_v26, %v4079_v24  ;;  %v4087_v45 = vadd.f32 %v11399_v44, %v10829_v48 }
 0x480   :  { %v4433_v53 = vpop.f32.mrf.mxu0  ;;  %v11590_v37 = vpop.f32.mrf.mxu1 }
 0x481   :  { %13879 = vst [vmem:[#allocation153_spill] sm:$0xff] %v11581_v17  ;;  %v5497_v20 = vmax.f32 %v4432_v2, 0.0  ;;  %v11592_v31 = vadd.f32 %v4433_v53, %v4081_v33  ;;  %v13885_v2 = vld [vmem:[#allocation167_spill] sm:$0xff]  ;;  %v4089_v33 = vadd.f32 %v11407_v59, %v10839_v42  ;;  %v4093_v59 = vadd.f32 %v11424_v60, %v10839_v42 }
 0x482   :  { %v4435_v8 = vpop.f32.mrf.mxu0  ;;  %v11598_v24 = vpop.f32.mrf.mxu1  ;;  %4771 = vmatmul.mubr.bf16.gmra.mxu1 %v13651_v28  ;;  %v5500_v5 = vmax.f32 %v13885_v2, 0.0  ;;  %v4091_v28 = vadd.f32 %v11416_v61, %v10829_v48  ;;  %v13892_v60 = vld [vmem:[#allocation51_spill] sm:$0xff] }
 0x483   :  { %13881 = vst [vmem:[#allocation58_spill] sm:$0xff] %v11592_v31  ;;  %v11596_v0 = vmax.f32 %v5494_v47, %v5497_v20  ;;  %v4436_v26 = vadd.f32 %v4435_v8, %v4083_v23  ;;  %4780 = vmatprep.mubr.bf16.mxu1 %v13883_v40  ;;  %v13888_v8 = vld [vmem:[#allocation78_spill] sm:$0xff] }
 0x484   :  { %v4439_v55 = vpop.f32.mrf.mxu0  ;;  %5064 = vmatmul.mubr.bf16.gmra.mxu0 %v13884_v13  ;;  %v11606_v31 = vpop.f32.mrf.mxu1  ;;  %v5506_v40 = vmax.f32 %v13888_v8, 0.0  ;;  %v13891_v8 = vld [vmem:[#allocation83_spill] sm:$0xff] }
 0x485   :  { %13882 = vst [vmem:[#allocation63_spill] sm:$0xff] %v11596_v0  ;;  %v5503_v53 = vmax.f32 %v4436_v26, 0.0  ;;  %v11608_v44 = vadd.f32 %v4439_v55, %v4087_v45  ;;  %5073 = vmatprep.mubr.bf16.mxu0 %v13223_v62  ;;  %v13893_v45 = vld [vmem:[#allocation32_spill] sm:$0xff] }
 0x486   :  { %v4441_v47 = vpop.f32.mrf.mxu0  ;;  %v11615_v20 = vpop.f32.mrf.mxu1 }
 0x487   :  { %13886 = vst [vmem:[#allocation41_spill] sm:$0xff] %v11608_v44  ;;  %v11613_v23 = vmax.f32 %v5500_v5, %v5503_v53  ;;  %v4442_v13 = vadd.f32 %v4441_v47, %v4089_v33  ;;  %v4097_v5 = vadd.f32 %v11432_v4, %v10829_v48 }
 0x488   :  { %v4443_v2 = vpop.f32.mrf.mxu0  ;;  %v11622_v55 = vpop.f32.mrf.mxu1 }
 0x489   :  { %13887 = vst [vmem:[#allocation22_spill] sm:$0xff] %v11613_v23  ;;  %v5509_v26 = vmax.f32 %v4442_v13, 0.0  ;;  %v11624_v44 = vadd.f32 %v4443_v2, %v4091_v28  ;;  %v13894_v13 = vld [vmem:[#allocation170_spill] sm:$0xff]  ;;  %v4099_v28 = vadd.f32 %v11440_v14, %v10839_v42  ;;  %v13910_v23 = vld [vmem:[#allocation56_spill] sm:$0xff] }
 0x48a   :  { %v4445_v61 = vpop.f32.mrf.mxu0  ;;  %v11630_v33 = vpop.f32.mrf.mxu1  ;;  %4781 = vmatmul.mubr.bf16.gmra.mxu1 %v13891_v8  ;;  %v5512_v0 = vmax.f32 %v13894_v13, 0.0  ;;  %v8188_v14 = vld [vmem:[%s12996_s5 + $0x90] sm:$0xff]  }
 0x48b   :  { %13889 = vst [vmem:[#allocation155_spill] sm:$0xff] %v11624_v44  ;;  %v11628_v53 = vmax.f32 %v5506_v40, %v5509_v26  ;;  %v4446_v47 = vadd.f32 %v4445_v61, %v4093_v59  ;;  %4790 = vmatprep.mubr.bf16.mxu1 %v13892_v60  ;;  %v4101_v59 = vadd.f32 %v11449_v50, %v10829_v48 }
 0x48c   :  { %v4449_v17 = vpop.f32.mrf.mxu0  ;;  %5074 = vmatmul.mubr.bf16.gmra.mxu0 %v13893_v45  ;;  %v11638_v44 = vpop.f32.mrf.mxu1  ;;  %7743 = vmatprep.subr.bf16.mxu0 %v8188_v14 }
 0x48d   :  { %13890 = vst [vmem:[#allocation157_spill] sm:$0xff] %v11628_v53  ;;  %v5515_v2 = vmax.f32 %v4446_v47, 0.0  ;;  %v11640_v4 = vadd.f32 %v4449_v17, %v4097_v5  ;;  %5083 = vmatprep.mubr.bf16.mxu0 %v13223_v62  ;;  %v13897_v47 = vld [vmem:[#allocation172_spill] sm:$0xff]  ;;  %v4103_v17 = vadd.f32 %v11456_v29, %v10839_v42  ;;  %7744 = vmatpush3.bf16.msra.mxu0 %v8188_v14  ;;  %v13901_v5 = vld [vmem:[#allocation50_spill] sm:$0xff] }
 0x48e   :  { %v4451_v40 = vpop.f32.mrf.mxu0  ;;  %v11647_v61 = vpop.f32.mrf.mxu1  ;;  %v5518_v8 = vmax.f32 %v13897_v47, 0.0  ;;  %v13900_v29 = vld [vmem:[#allocation88_spill] sm:$0xff]  ;;  %v13903_v14 = vld [vmem:[#allocation174_spill] sm:$0xff] }
 0x48f   :  { %13895 = vst [vmem:[#allocation68_spill] sm:$0xff] %v11640_v4  ;;  %v11645_v26 = vmax.f32 %v5512_v0, %v5515_v2  ;;  %v4452_v45 = vadd.f32 %v4451_v40, %v4099_v28  ;;  %v4107_v2 = vadd.f32 %v11467_v58, %v10829_v48  ;;  %v4109_v58 = vadd.f32 %v11475_v27, %v10839_v42  ;;  %v8190_v27 = vld [vmem:[%s12996_s5 + $0x80] sm:$0xff]  }
 0x490   :  { %v4453_v60 = vpop.f32.mrf.mxu0  ;;  %v11657_v50 = vpop.f32.mrf.mxu1 }
 0x491   :  { %13896 = vst [vmem:[#allocation40_spill] sm:$0xff] %v11645_v26  ;;  %v5521_v13 = vmax.f32 %v4452_v45, 0.0  ;;  %v11659_v0 = vadd.f32 %v4453_v60, %v4101_v59  ;;  %v8189_v45 = vld [vmem:[%s12996_s5 + $0x88] sm:$0xff]   ;;  %v13902_v60 = vld [vmem:[#allocation39_spill] sm:$0xff] }
 0x492   :  { %v4455_v28 = vpop.f32.mrf.mxu0  ;;  %v11665_v47 = vpop.f32.mrf.mxu1  ;;  %4791 = vmatmul.mubr.bf16.gmra.mxu1 %v13900_v29  ;;  %7745 = vmatprep.subr.bf16.mxu0 %v8189_v45 }
 0x493   :  { %13898 = vst [vmem:[#allocation29_spill] sm:$0xff] %v11659_v0  ;;  %v11663_v40 = vmax.f32 %v5518_v8, %v5521_v13  ;;  %v4456_v4 = vadd.f32 %v4455_v28, %v4103_v17  ;;  %4800 = vmatprep.mubr.bf16.mxu1 %v13901_v5  ;;  %v5524_v0 = vmax.f32 %v13903_v14, 0.0  ;;  %7746 = vmatpush3.bf16.msra.mxu0 %v8189_v45  ;;  %v13911_v45 = vld [vmem:[#allocation37_spill] sm:$0xff] }
 0x494   :  { %v4459_v59 = vpop.f32.mrf.mxu0  ;;  %5084 = vmatmul.mubr.bf16.gmra.mxu0 %v13902_v60  ;;  %v11676_v13 = vpop.f32.mrf.mxu1  ;;  %v4111_v5 = vadd.f32 %v11484_v12, %v10829_v48  ;;  %7747 = vmatprep.subr.bf16.mxu0 %v8190_v27 }
 0x495   :  { %13899 = vst [vmem:[#allocation159_spill] sm:$0xff] %v11663_v40  ;;  %v5527_v8 = vmax.f32 %v4456_v4, 0.0  ;;  %v11678_v17 = vadd.f32 %v4459_v59, %v4107_v2  ;;  %5093 = vmatprep.mubr.bf16.mxu0 %v13223_v62  ;;  %v13906_v4 = vld [vmem:[#allocation176_spill] sm:$0xff] }
 0x496   :  { %v4461_v28 = vpop.f32.mrf.mxu0  ;;  %v11685_v60 = vpop.f32.mrf.mxu1  ;;  %v5530_v2 = vmax.f32 %v13906_v4, 0.0 }
 0x497   :  { %13904 = vst [vmem:[#allocation161_spill] sm:$0xff] %v11678_v17  ;;  %v11683_v29 = vmax.f32 %v5524_v0, %v5527_v8  ;;  %v4462_v14 = vadd.f32 %v4461_v28, %v4109_v58  ;;  %v4113_v17 = vadd.f32 %v11491_v36, %v10839_v42  ;;  %7748 = vmatpush3.bf16.msra.mxu0 %v8190_v27  ;;  %v13909_v36 = vld [vmem:[#allocation93_spill] sm:$0xff] }
 0x498   :  { %v4463_v59 = vpop.f32.mrf.mxu0  ;;  %v11695_v12 = vpop.f32.mrf.mxu1  ;;  %v4117_v8 = vadd.f32 %v11499_v35, %v10829_v48  ;;  %v4119_v27 = vadd.f32 %v11507_v21, %v10839_v42  ;;  %v4123_v21 = vadd.f32 %v11523_v34, %v10839_v42  ;;  %v13919_v34 = vld [vmem:[#allocation55_spill] sm:$0xff] }
 0x499   :  { %13905 = vst [vmem:[#allocation73_spill] sm:$0xff] %v11683_v29  ;;  %v5533_v53 = vmax.f32 %v4462_v14, 0.0  ;;  %v11697_v0 = vadd.f32 %v4463_v59, %v4111_v5  ;;  %v13912_v5 = vld [vmem:[#allocation178_spill] sm:$0xff] }
 0x49a   :  { %v4465_v58 = vpop.f32.mrf.mxu0  ;;  %v11703_v4 = vpop.f32.mrf.mxu1  ;;  %4801 = vmatmul.mubr.bf16.gmra.mxu1 %v13909_v36  ;;  %v5536_v59 = vmax.f32 %v13912_v5, 0.0 }
 0x49b   :  { %13907 = vst [vmem:[#allocation46_spill] sm:$0xff] %v11697_v0  ;;  %v11701_v28 = vmax.f32 %v5530_v2, %v5533_v53  ;;  %v4466_v26 = vadd.f32 %v4465_v58, %v4113_v17  ;;  %4810 = vmatprep.mubr.bf16.mxu1 %v13910_v23  ;;  %v4121_v17 = vadd.f32 %v11516_v7, %v10829_v48  ;;  %v13915_v58 = vld [vmem:[#allocation180_spill] sm:$0xff] }
 0x49c   :  { %v4469_v14 = vpop.f32.mrf.mxu0  ;;  %5094 = vmatmul.mubr.bf16.gmra.mxu0 %v13911_v45  ;;  %v11711_v40 = vpop.f32.mrf.mxu1  ;;  %v5542_v36 = vmax.f32 %v13915_v58, 0.0  ;;  %v13918_v58 = vld [vmem:[#allocation98_spill] sm:$0xff] }
 0x49d   :  { %13908 = vst [vmem:[#allocation27_spill] sm:$0xff] %v11701_v28  ;;  %v5539_v0 = vmax.f32 %v4466_v26, 0.0  ;;  %v11713_v35 = vadd.f32 %v4469_v14, %v4117_v8  ;;  %5103 = vmatprep.mubr.bf16.mxu0 %v13223_v62  ;;  %v13920_v26 = vld [vmem:[#allocation44_spill] sm:$0xff] }
 0x49e   :  { %v4471_v53 = vpop.f32.mrf.mxu0  ;;  %v11720_v2 = vpop.f32.mrf.mxu1 }
 0x49f   :  { %13913 = vst [vmem:[#allocation163_spill] sm:$0xff] %v11713_v35  ;;  %v11718_v23 = vmax.f32 %v5536_v59, %v5539_v0  ;;  %v4472_v45 = vadd.f32 %v4471_v53, %v4119_v27  ;;  %v4127_v0 = vadd.f32 %v11534_v51, %v10829_v48 }
 0x4a0   :  { %v4473_v5 = vpop.f32.mrf.mxu0  ;;  %v11727_v14 = vpop.f32.mrf.mxu1 }
 0x4a1   :  { %13914 = vst [vmem:[#allocation165_spill] sm:$0xff] %v11718_v23  ;;  %v5545_v8 = vmax.f32 %v4472_v45, 0.0  ;;  %v11729_v35 = vadd.f32 %v4473_v5, %v4121_v17  ;;  %v13921_v45 = vld [vmem:[#allocation182_spill] sm:$0xff]  ;;  %v4129_v17 = vadd.f32 %v11542_v43, %v10839_v42  ;;  %v4133_v43 = vadd.f32 %v11558_v63, %v10839_v42  ;;  %v13928_v63 = vld [vmem:[#allocation61_spill] sm:$0xff] }
 0x4a2   :  { %v4475_v7 = vpop.f32.mrf.mxu0  ;;  %v11735_v27 = vpop.f32.mrf.mxu1  ;;  %4811 = vmatmul.mubr.bf16.gmra.mxu1 %v13918_v58  ;;  %v5548_v28 = vmax.f32 %v13921_v45, 0.0  ;;  %v13924_v58 = vld [vmem:[#allocation184_spill] sm:$0xff] }
 0x4a3   :  { %13916 = vst [vmem:[#allocation45_spill] sm:$0xff] %v11729_v35  ;;  %v11733_v59 = vmax.f32 %v5542_v36, %v5545_v8  ;;  %v4476_v53 = vadd.f32 %v4475_v7, %v4123_v21  ;;  %4820 = vmatprep.mubr.bf16.mxu1 %v13919_v34  ;;  %v4131_v21 = vadd.f32 %v11551_v16, %v10829_v48  ;;  %v5554_v34 = vmax.f32 %v13924_v58, 0.0  ;;  %v13927_v58 = vld [vmem:[#allocation103_spill] sm:$0xff] }
 0x4a4   :  { %v4479_v29 = vpop.f32.mrf.mxu0  ;;  %5104 = vmatmul.mubr.bf16.gmra.mxu0 %v13920_v26  ;;  %v11743_v35 = vpop.f32.mrf.mxu1 }
 0x4a5   :  { %13917 = vst [vmem:[#allocation34_spill] sm:$0xff] %v11733_v59  ;;  %v5551_v5 = vmax.f32 %v4476_v53, 0.0  ;;  %v11745_v51 = vadd.f32 %v4479_v29, %v4127_v0  ;;  %5113 = vmatprep.mubr.bf16.mxu0 %v13223_v62  ;;  %v13929_v29 = vld [vmem:[#allocation42_spill] sm:$0xff] }
 0x4a6   :  { %v4481_v36 = vpop.f32.mrf.mxu0  ;;  %v11752_v7 = vpop.f32.mrf.mxu1 }
 0x4a7   :  { %13922 = vst [vmem:[#allocation167_spill] sm:$0xff] %v11745_v51  ;;  %v11750_v8 = vmax.f32 %v5548_v28, %v5551_v5  ;;  %v4482_v26 = vadd.f32 %v4481_v36, %v4129_v17  ;;  %v4137_v28 = vadd.f32 %v11566_v11, %v10829_v48 }
 0x4a8   :  { %v4483_v45 = vpop.f32.mrf.mxu0  ;;  %v11759_v53 = vpop.f32.mrf.mxu1 }
 0x4a9   :  { %13923 = vst [vmem:[#allocation78_spill] sm:$0xff] %v11750_v8  ;;  %v5557_v0 = vmax.f32 %v4482_v26, 0.0  ;;  %v11761_v51 = vadd.f32 %v4483_v45, %v4131_v21  ;;  %v13930_v26 = vld [vmem:[#allocation186_spill] sm:$0xff]  ;;  %v4139_v21 = vadd.f32 %v11574_v54, %v10839_v42  ;;  %v4143_v54 = vadd.f32 %v11590_v37, %v10839_v42  ;;  %v13937_v37 = vld [vmem:[#allocation64_spill] sm:$0xff] }
 0x4aa   :  { %v4485_v16 = vpop.f32.mrf.mxu0  ;;  %v11767_v36 = vpop.f32.mrf.mxu1  ;;  %4821 = vmatmul.mubr.bf16.gmra.mxu1 %v13927_v58  ;;  %v5560_v59 = vmax.f32 %v13930_v26, 0.0  ;;  %v13933_v58 = vld [vmem:[#allocation188_spill] sm:$0xff] }
 0x4ab   :  { %13925 = vst [vmem:[#allocation83_spill] sm:$0xff] %v11761_v51  ;;  %v11765_v5 = vmax.f32 %v5554_v34, %v5557_v0  ;;  %v4486_v17 = vadd.f32 %v4485_v16, %v4133_v43  ;;  %4830 = vmatprep.mubr.bf16.mxu1 %v13928_v63  ;;  %v4141_v43 = vadd.f32 %v11583_v22, %v10829_v48  ;;  %v5566_v63 = vmax.f32 %v13933_v58, 0.0  ;;  %v13936_v58 = vld [vmem:[#allocation108_spill] sm:$0xff] }
 0x4ac   :  { %v4489_v23 = vpop.f32.mrf.mxu0  ;;  %5114 = vmatmul.mubr.bf16.gmra.mxu0 %v13929_v29  ;;  %v11777_v11 = vpop.f32.mrf.mxu1 }
 0x4ad   :  { %13926 = vst [vmem:[#allocation51_spill] sm:$0xff] %v11765_v5  ;;  %v5563_v45 = vmax.f32 %v4486_v17, 0.0  ;;  %v11775_v51 = vadd.f32 %v4489_v23, %v4137_v28  ;;  %5123 = vmatprep.mubr.bf16.mxu0 %v13223_v62  ;;  %v13938_v23 = vld [vmem:[#allocation49_spill] sm:$0xff] }
 0x4ae   :  { %v4491_v34 = vpop.f32.mrf.mxu0  ;;  %v11784_v29 = vpop.f32.mrf.mxu1 }
 0x4af   :  { %13931 = vst [vmem:[#allocation32_spill] sm:$0xff] %v11775_v51  ;;  %v11782_v0 = vmax.f32 %v5560_v59, %v5563_v45  ;;  %v4492_v16 = vadd.f32 %v4491_v34, %v4139_v21  ;;  %v4147_v59 = vadd.f32 %v11598_v24, %v10829_v48 }
 0x4b0   :  { %v4493_v26 = vpop.f32.mrf.mxu0  ;;  %v11793_v51 = vpop.f32.mrf.mxu1 }
 0x4b1   :  { %13932 = vst [vmem:[#allocation170_spill] sm:$0xff] %v11782_v0  ;;  %v5569_v28 = vmax.f32 %v4492_v16, 0.0  ;;  %v11791_v17 = vadd.f32 %v4493_v26, %v4141_v43  ;;  %v13939_v43 = vld [vmem:[#allocation190_spill] sm:$0xff]  ;;  %v4149_v26 = vadd.f32 %v11606_v31, %v10839_v42  ;;  %v4153_v31 = vadd.f32 %v11622_v55, %v10839_v42  ;;  %v13946_v55 = vld [vmem:[#allocation60_spill] sm:$0xff] }
 0x4b2   :  { %v4495_v22 = vpop.f32.mrf.mxu0  ;;  %v11799_v34 = vpop.f32.mrf.mxu1  ;;  %4831 = vmatmul.mubr.bf16.gmra.mxu1 %v13936_v58  ;;  %v5572_v16 = vmax.f32 %v13939_v43, 0.0  ;;  %v13942_v58 = vld [vmem:[#allocation192_spill] sm:$0xff] }
 0x4b3   :  { %13934 = vst [vmem:[#allocation172_spill] sm:$0xff] %v11791_v17  ;;  %v11797_v21 = vmax.f32 %v5566_v63, %v5569_v28  ;;  %v4496_v45 = vadd.f32 %v4495_v22, %v4143_v54  ;;  %4840 = vmatprep.mubr.bf16.mxu1 %v13937_v37  ;;  %v4151_v54 = vadd.f32 %v11615_v20, %v10829_v48  ;;  %v5578_v37 = vmax.f32 %v13942_v58, 0.0  ;;  %v13945_v58 = vld [vmem:[#allocation113_spill] sm:$0xff] }
 0x4b4   :  { %v4499_v8 = vpop.f32.mrf.mxu0  ;;  %5124 = vmatmul.mubr.bf16.gmra.mxu0 %v13938_v23  ;;  %v11809_v24 = vpop.f32.mrf.mxu1 }
 0x4b5   :  { %13935 = vst [vmem:[#allocation88_spill] sm:$0xff] %v11797_v21  ;;  %v5575_v17 = vmax.f32 %v4496_v45, 0.0  ;;  %v11807_v5 = vadd.f32 %v4499_v8, %v4147_v59  ;;  %5133 = vmatprep.mubr.bf16.mxu0 %v13223_v62  ;;  %v13947_v8 = vld [vmem:[#allocation47_spill] sm:$0xff] }
 0x4b6   :  { %v4501_v63 = vpop.f32.mrf.mxu0  ;;  %v11816_v23 = vpop.f32.mrf.mxu1 }
 0x4b7   :  { %13940 = vst [vmem:[#allocation50_spill] sm:$0xff] %v11807_v5  ;;  %v11814_v28 = vmax.f32 %v5572_v16, %v5575_v17  ;;  %v4502_v22 = vadd.f32 %v4501_v63, %v4149_v26  ;;  %v4157_v17 = vadd.f32 %v11630_v33, %v10829_v48 }
 0x4b8   :  { %v4503_v43 = vpop.f32.mrf.mxu0  ;;  %v11825_v5 = vpop.f32.mrf.mxu1 }
 0x4b9   :  { %13941 = vst [vmem:[#allocation39_spill] sm:$0xff] %v11814_v28  ;;  %v5581_v59 = vmax.f32 %v4502_v22, 0.0  ;;  %v11823_v45 = vadd.f32 %v4503_v43, %v4151_v54  ;;  %v13948_v54 = vld [vmem:[#allocation194_spill] sm:$0xff]  ;;  %v4159_v43 = vadd.f32 %v11638_v44, %v10839_v42 }
 0x4ba   :  { %v4505_v20 = vpop.f32.mrf.mxu0  ;;  %v11831_v63 = vpop.f32.mrf.mxu1  ;;  %4841 = vmatmul.mubr.bf16.gmra.mxu1 %v13945_v58  ;;  %v5584_v22 = vmax.f32 %v13948_v54, 0.0  ;;  %v4163_v58 = vadd.f32 %v11657_v50, %v10839_v42  ;;  %v13954_v28 = vld [vmem:[#allocation118_spill] sm:$0xff] }
 0x4bb   :  { %13943 = vst [vmem:[#allocation174_spill] sm:$0xff] %v11823_v45  ;;  %v11829_v16 = vmax.f32 %v5578_v37, %v5581_v59  ;;  %v4506_v26 = vadd.f32 %v4505_v20, %v4153_v31  ;;  %4850 = vmatprep.mubr.bf16.mxu1 %v13946_v55  ;;  %v11847_v37 = vld [vmem:[%s12998_s7 + $0x18] sm:$0xff]   ;;  %v13955_v50 = vld [vmem:[#allocation66_spill] sm:$0xff] }
 0x4bc   :  { %v4509_v0 = vpop.f32.mrf.mxu0  ;;  %5134 = vmatmul.mubr.bf16.gmra.mxu0 %v13947_v8  ;;  %v11841_v33 = vpop.f32.mrf.mxu1  ;;  %v4161_v8 = vadd.f32 %v11647_v61, %v10829_v48  ;;  %7813 = vmatprep.subr.bf16.mxu1 %v11847_v37  ;;  %v13956_v55 = vld [vmem:[#allocation54_spill] sm:$0xff] }
 0x4bd   :  { %13944 = vst [vmem:[#allocation176_spill] sm:$0xff] %v11829_v16  ;;  %v5587_v45 = vmax.f32 %v4506_v26, 0.0  ;;  %v11839_v21 = vadd.f32 %v4509_v0, %v4157_v17  ;;  %5143 = vmatprep.mubr.bf16.mxu0 %v13223_v62  ;;  %v13951_v0 = vld [vmem:[#allocation196_spill] sm:$0xff] }
 0x4be   :  { %v4511_v31 = vpop.f32.mrf.mxu0  ;;  %v11853_v44 = vpop.f32.mrf.mxu1  ;;  %v5590_v17 = vmax.f32 %v13951_v0, 0.0 }
 0x4bf   :  { %13949 = vst [vmem:[#allocation93_spill] sm:$0xff] %v11839_v21  ;;  %v11851_v59 = vmax.f32 %v5584_v22, %v5587_v45  ;;  %v4512_v20 = vadd.f32 %v4511_v31, %v4159_v43  ;;  %v4167_v22 = vadd.f32 %v11665_v47, %v10829_v48 }
 0x4c0   :  { %v4513_v26 = vpop.f32.mrf.mxu0  ;;  %v11863_v61 = vpop.f32.mrf.mxu1 }
 0x4c1   :  { %13950 = vst [vmem:[#allocation56_spill] sm:$0xff] %v11851_v59  ;;  %v5593_v54 = vmax.f32 %v4512_v20, 0.0  ;;  %v11861_v21 = vadd.f32 %v4513_v26, %v4161_v8  ;;  %v13957_v8 = vld [vmem:[#allocation198_spill] sm:$0xff]  ;;  %v4169_v26 = vadd.f32 %v11676_v13, %v10839_v42  ;;  %v13965_v13 = vld [vmem:[#allocation52_spill] sm:$0xff] }
 0x4c2   :  { %v4515_v45 = vpop.f32.mrf.mxu0  ;;  %v11869_v0 = vpop.f32.mrf.mxu1  ;;  %4851 = vmatmul.mubr.bf16.gmra.mxu1 %v13954_v28  ;;  %v5596_v20 = vmax.f32 %v13957_v8, 0.0  ;;  %v4171_v28 = vadd.f32 %v11685_v60, %v10829_v48 }
 0x4c3   :  { %13952 = vst [vmem:[#allocation37_spill] sm:$0xff] %v11861_v21  ;;  %v11867_v43 = vmax.f32 %v5590_v17, %v5593_v54  ;;  %v4516_v31 = vadd.f32 %v4515_v45, %v4163_v58  ;;  %4860 = vmatprep.mubr.bf16.mxu1 %v13955_v50  ;;  %v13960_v45 = vld [vmem:[#allocation200_spill] sm:$0xff] }
 0x4c4   :  { %v4519_v38 = vpop.f32.mrf.mxu0  ;;  %5144 = vmatmul.mubr.bf16.gmra.mxu0 %v13956_v55  ;;  %v11879_v47 = vpop.f32.mrf.mxu1  ;;  %v5602_v50 = vmax.f32 %v13960_v45, 0.0  ;;  %v13963_v45 = vld [vmem:[#allocation123_spill] sm:$0xff] }
 0x4c5   :  { %13953 = vst [vmem:[#allocation178_spill] sm:$0xff] %v11867_v43  ;;  %v5599_v21 = vmax.f32 %v4516_v31, 0.0  ;;  %v11877_v16 = vadd.f32 %v4519_v38, %v4167_v22  ;;  %5153 = vmatprep.mubr.bf16.mxu0 %v13223_v62  ;;  %v4173_v38 = vadd.f32 %v11695_v12, %v10839_v42  ;;  %v13964_v12 = vld [vmem:[#allocation65_spill] sm:$0xff] }
 0x4c6   :  { %v4521_v17 = vpop.f32.mrf.mxu0  ;;  %v11886_v55 = vpop.f32.mrf.mxu1 }
 0x4c7   :  { %13958 = vst [vmem:[#allocation180_spill] sm:$0xff] %v11877_v16  ;;  %v11884_v58 = vmax.f32 %v5596_v20, %v5599_v21  ;;  %v4522_v54 = vadd.f32 %v4521_v17, %v4169_v26  ;;  %v4177_v21 = vadd.f32 %v11703_v4, %v10829_v48 }
 0x4c8   :  { %v4523_v8 = vpop.f32.mrf.mxu0  ;;  %v11895_v16 = vpop.f32.mrf.mxu1 }
 0x4c9   :  { %13959 = vst [vmem:[#allocation98_spill] sm:$0xff] %v11884_v58  ;;  %v5605_v22 = vmax.f32 %v4522_v54, 0.0  ;;  %v11893_v31 = vadd.f32 %v4523_v8, %v4171_v28  ;;  %v13966_v28 = vld [vmem:[#allocation202_spill] sm:$0xff]  ;;  %v4179_v8 = vadd.f32 %v11711_v40, %v10839_v42  ;;  %v4183_v40 = vadd.f32 %v11727_v14, %v10839_v42 }
 0x4ca   :  { %v4525_v60 = vpop.f32.mrf.mxu0  ;;  %v11901_v17 = vpop.f32.mrf.mxu1  ;;  %4861 = vmatmul.mubr.bf16.gmra.mxu1 %v13963_v45  ;;  %v5608_v54 = vmax.f32 %v13966_v28, 0.0  ;;  %v13969_v45 = vld [vmem:[#allocation204_spill] sm:$0xff]  ;;  %v13972_v14 = vld [vmem:[#allocation70_spill] sm:$0xff] }
 0x4cb   :  { %13961 = vst [vmem:[#allocation55_spill] sm:$0xff] %v11893_v31  ;;  %v11899_v20 = vmax.f32 %v5602_v50, %v5605_v22  ;;  %v4526_v26 = vadd.f32 %v4525_v60, %v4173_v38  ;;  %4870 = vmatprep.mubr.bf16.mxu1 %v13964_v12  ;;  %v4181_v38 = vadd.f32 %v11720_v2, %v10829_v48  ;;  %v5614_v12 = vmax.f32 %v13969_v45, 0.0 }
 0x4cc   :  { %v4529_v59 = vpop.f32.mrf.mxu0  ;;  %5154 = vmatmul.mubr.bf16.gmra.mxu0 %v13965_v13  ;;  %v11911_v4 = vpop.f32.mrf.mxu1 }
 0x4cd   :  { %13962 = vst [vmem:[#allocation44_spill] sm:$0xff] %v11899_v20  ;;  %v5611_v31 = vmax.f32 %v4526_v26, 0.0  ;;  %v11909_v43 = vadd.f32 %v4529_v59, %v4177_v21  ;;  %5163 = vmatprep.mubr.bf16.mxu0 %v13223_v62  ;;  %v13973_v59 = vld [vmem:[#allocation59_spill] sm:$0xff] }
 0x4ce   :  { %v4531_v50 = vpop.f32.mrf.mxu0  ;;  %v11918_v13 = vpop.f32.mrf.mxu1 }
 0x4cf   :  { %13967 = vst [vmem:[#allocation182_spill] sm:$0xff] %v11909_v43  ;;  %v11916_v22 = vmax.f32 %v5608_v54, %v5611_v31  ;;  %v4532_v60 = vadd.f32 %v4531_v50, %v4179_v8  ;;  %v4187_v31 = vadd.f32 %v11735_v27, %v10829_v48 }
 0x4d0   :  { %v4533_v28 = vpop.f32.mrf.mxu0  ;;  %v11927_v43 = vpop.f32.mrf.mxu1 }
 0x4d1   :  { %13968 = vst [vmem:[#allocation184_spill] sm:$0xff] %v11916_v22  ;;  %v5617_v21 = vmax.f32 %v4532_v60, 0.0  ;;  %v11925_v26 = vadd.f32 %v4533_v28, %v4181_v38  ;;  %v13974_v38 = vld [vmem:[#allocation206_spill] sm:$0xff]  ;;  %v4189_v28 = vadd.f32 %v11743_v35, %v10839_v42 }
 0x4d2   :  { %v4535_v2 = vpop.f32.mrf.mxu0  ;;  %v11933_v50 = vpop.f32.mrf.mxu1  ;;  %4871 = vmatmul.mubr.bf16.gmra.mxu1 %v13721_v46  ;;  %v5620_v60 = vmax.f32 %v13974_v38, 0.0  ;;  %v4191_v46 = vadd.f32 %v11752_v7, %v10829_v48  ;;  %v4193_v7 = vadd.f32 %v11759_v53, %v10839_v42  ;;  %v13982_v42 = vld [vmem:[#allocation79_spill] sm:$0xff] }
 0x4d3   :  { %13970 = vst [vmem:[#allocation103_spill] sm:$0xff] %v11925_v26  ;;  %v11931_v54 = vmax.f32 %v5614_v12, %v5617_v21  ;;  %v4536_v8 = vadd.f32 %v4535_v2, %v4183_v40  ;;  %4880 = vmatprep.mubr.bf16.mxu1 %v13972_v14  ;;  %v8229_v40 = vld [vmem:[%s12995_s4] sm:$0x3f] }
 0x4d4   :  { %v4539_v45 = vpop.f32.mrf.mxu0  ;;  %5164 = vmatmul.mubr.bf16.gmra.mxu0 %v13973_v59  ;;  %v11943_v27 = vpop.f32.mrf.mxu1  ;;  %v13976_v59 = vsub.s32 4, %v13514_v10 }
 0x4d5   :  { %13971 = vst [vmem:[#allocation61_spill] sm:$0xff] %v11931_v54  ;;  %v5623_v26 = vmax.f32 %v4536_v8, 0.0  ;;  %v11941_v20 = vadd.f32 %v4539_v45, %v4187_v31  ;;  %5173 = vmatprep.mubr.bf16.mxu0 %v13223_v62  ;;  %v13978_v8 = vld [vmem:[#allocation128_spill] sm:$0xff]  ;;  %v13979_v45 = vsub.s32 5, %v13514_v10 }
 0x4d6   :  { %v4541_v12 = vpop.f32.mrf.mxu0  ;;  %v11953_v21 = vrot.slane %v8229_v40, %v13976_v59  ;;  %v11957_v31 = vpop.f32.mrf.mxu1  ;;  %v5626_v14 = vmax.f32 %v13978_v8, 0.0  ;;  %v13983_v8 = vld [vmem:[#allocation57_spill] sm:$0xff] }
 0x4d7   :  { %13975 = vst [vmem:[#allocation42_spill] sm:$0xff] %v11941_v20  ;;  %v11955_v35 = vmax.f32 %v5620_v60, %v5623_v26  ;;  %v4542_v2 = vadd.f32 %v4541_v12, %v4189_v28  ;;  %v11962_v38 = vrot.slane %v8229_v40, %v13979_v45 }
 0x4d8   :  { %v4543_v48 = vpop.f32.mrf.mxu0  ;;  %v11970_v26 = vpop.f32.mrf.mxu1  ;;  %v4583_v28 = vadd.f32 %v11767_v36, %v11953_v21 }
 0x4d9   :  { %13977 = vst [vmem:[#allocation186_spill] sm:$0xff] %v11955_v35  ;;  %v5629_v59 = vmax.f32 %v4542_v2, 0.0  ;;  %v11968_v22 = vadd.f32 %v4543_v48, %v4191_v46  ;;  %v13984_v46 = vld [vmem:[#allocation209_spill] sm:$0xff]  ;;  %v4585_v45 = vadd.f32 %v11777_v11, %v11962_v38  ;;  %v4589_v11 = vadd.f32 %v11793_v51, %v11962_v38 }
 0x4da   :  { %v4545_v60 = vpop.f32.mrf.mxu0  ;;  %v11976_v40 = vpop.f32.mrf.mxu1  ;;  %4881 = vmatmul.mubr.bf16.gmra.mxu1 %v13522_v15  ;;  %v5632_v2 = vmax.f32 %v13984_v46, 0.0  ;;  %v4587_v15 = vadd.f32 %v11784_v29, %v11953_v21  ;;  %v13987_v29 = vld [vmem:[#allocation76_spill] sm:$0xff] }
 0x4db   :  { %13980 = vst [vmem:[#allocation188_spill] sm:$0xff] %v11968_v22  ;;  %v11974_v12 = vmax.f32 %v5626_v14, %v5629_v59  ;;  %v4546_v10 = vadd.f32 %v4545_v60, %v4193_v7  ;;  %4890 = vmatprep.mubr.bf16.mxu1 %v13982_v42  ;;  %v13986_v42 = vld [vmem:[#allocation211_spill] sm:$0xff] }
 0x4dc   :  { %v4935_v53 = vpop.f32.mrf.mxu0  ;;  %5174 = vmatmul.mubr.bf16.gmra.mxu0 %v13983_v8  ;;  %v11984_v20 = vpop.f32.mrf.mxu1  ;;  %v5256_v8 = vmax.f32 %v13986_v42, 0.0 }
 0x4dd   :  { %13981 = vst [vmem:[#allocation108_spill] sm:$0xff] %v11974_v12  ;;  %v5635_v48 = vmax.f32 %v4546_v10, 0.0  ;;  %v4936_v36 = vadd.f32 %v4935_v53, %v4583_v28  ;;  %5183 = vmatprep.mubr.bf16.mxu0 %v13223_v62 }
 0x4de   :  { %v4937_v14 = vpop.f32.mrf.mxu0  ;;  %v11991_v59 = vpop.f32.mrf.mxu1 }
 0x4df   :  { %v11989_v7 = vmax.f32 %v5632_v2, %v5635_v48  ;;  %v4938_v60 = vadd.f32 %v4937_v14, %v4585_v45  ;;  %v5258_v53 = vmax.f32 %v4936_v36, 0.0  ;;  %v5255_v2 = vmax.f32 %v13987_v29, 0.0  ;;  %v13988_v48 = vld [vmem:[#allocation77_spill] sm:$0xff] }
 0x4e0   :  { %v4939_v10 = vpop.f32.mrf.mxu0  ;;  %v11998_v22 = vpop.f32.mrf.mxu1  ;;  %v5261_v35 = vmax.f32 %v13988_v48, 0.0  ;;  %v4593_v45 = vadd.f32 %v11799_v34, %v11953_v21 }
 0x4e1   :  { %13985 = vst [vmem:[#allocation64_spill] sm:$0xff] %v11989_v7  ;;  %v5259_v46 = vmax.f32 %v4938_v60, 0.0  ;;  %v4940_v54 = vadd.f32 %v4939_v10, %v4587_v15  ;;  %v5262_v60 = vmax.f32 %v10870_v6, 0.0  ;;  %v4595_v15 = vadd.f32 %v11809_v24, %v11962_v38 }
 0x4e2   :  { %v4941_v58 = vpop.f32.mrf.mxu0  ;;  %v12006_v42 = vpop.f32.mrf.mxu1  ;;  %4891 = vmatmul.mubr.bf16.gmra.mxu1 %v9233_v39  ;;  %v5639_v29 = vmax.f32 %v5255_v2, %v5258_v53  ;;  %v4597_v39 = vadd.f32 %v11816_v23, %v11953_v21 }
 0x4e3   :  { %v12004_v14 = vmax.f32 %v5256_v8, %v5259_v46  ;;  %v5264_v51 = vmax.f32 %v4940_v54, 0.0  ;;  %v4942_v36 = vadd.f32 %v4941_v58, %v4589_v11  ;;  %v13989_v46 = vld [vmem:[#allocation212_spill] sm:$0xff] }
 0x4e4   :  { %v4945_v10 = vpop.f32.mrf.mxu0  ;;  %5184 = vmatmul.mubr.bf16.gmra.mxu0 %v9779_v30  ;;  %v12013_v34 = vpop.f32.mrf.mxu1  ;;  %v5268_v30 = vmax.f32 %v13989_v46, 0.0  ;;  %v4605_v46 = vadd.f32 %v11841_v33, %v11962_v38 }
 0x4e5   :  { %v5642_v48 = vmax.f32 %v5261_v35, %v5264_v51  ;;  %v5265_v28 = vmax.f32 %v4942_v36, 0.0  ;;  %v4946_v8 = vadd.f32 %v4945_v10, %v4593_v45  ;;  %5193 = vmatprep.mubr.bf16.mxu0 %v13223_v62  ;;  %v4599_v35 = vadd.f32 %v11825_v5, %v11962_v38  ;;  %v13991_v10 = vld [vmem:[#allocation84_spill] sm:$0xff] }
 0x4e6   :  { %v4947_v54 = vpop.f32.mrf.mxu0  ;;  %v12020_v6 = vpop.f32.mrf.mxu1 }
 0x4e7   :  { %v12018_v58 = vmax.f32 %v5262_v60, %v5265_v28  ;;  %v4948_v24 = vadd.f32 %v4947_v54, %v4595_v15  ;;  %v5831_v11 = vpack.c.bf16 %v5642_v48, %v5639_v29  ;;  %v5270_v2 = vmax.f32 %v4946_v8, 0.0  ;;  %v13990_v28 = vld [vmem:[#allocation81_spill] sm:$0xff] }
 0x4e8   :  { %v4949_v53 = vpop.f32.mrf.mxu0  ;;  %v12025_v51 = vpop.f32.mrf.mxu1  ;;  %v5267_v60 = vmax.f32 %v13990_v28, 0.0  ;;  %v5273_v15 = vmax.f32 %v13991_v10, 0.0  ;;  %v4603_v48 = vadd.f32 %v11831_v63, %v11953_v21  ;;  %v13993_v10 = vld [vmem:[#allocation213_spill] sm:$0xff] }
 0x4e9   :  { %v5271_v45 = vmax.f32 %v4948_v24, 0.0  ;;  %v4950_v36 = vadd.f32 %v4949_v53, %v4597_v39  ;;  %6157 = vmatprep.mubr.bf16.mxu1 %v5831_v11  ;;  %v13992_v39 = vpack.c.bf16 %v10891_v25, %v10874_v18  ;;  %v5274_v11 = vmax.f32 %v10902_v41, 0.0 }
 0x4ea   :  { %v4951_v29 = vpop.f32.mrf.mxu0  ;;  %v12035_v8 = vpop.f32.mrf.mxu1  ;;  %v5645_v63 = vmax.f32 %v5267_v60, %v5270_v2  ;;  %v4607_v41 = vadd.f32 %v11853_v44, %v11953_v21  ;;  %v4609_v2 = vadd.f32 %v11863_v61, %v11962_v38 }
 0x4eb   :  { %v12033_v54 = vmax.f32 %v5268_v30, %v5271_v45  ;;  %v5276_v5 = vmax.f32 %v4950_v36, 0.0  ;;  %v4952_v24 = vadd.f32 %v4951_v29, %v4599_v35  ;;  %6158 = vmatmul.mubr.bf16.vlgmr.msra.gmra.mxu1 %v13992_v39 }
 0x4ec   :  { %v4955_v53 = vpop.f32.mrf.mxu0  ;;  %5194 = vmatmul.mubr.bf16.gmra.mxu0 %v9807_v1  ;;  %7814 = vmatpush3.bf16.msra.mxu1 %v11847_v37  ;;  %v12045_v36 = vpop.f32.mrf.mxu1  ;;  %v5280_v37 = vmax.f32 %v13993_v10, 0.0  ;;  %v13997_v10 = vld [vmem:[#allocation62_spill] sm:$0xff] }
 0x4ed   :  { %v5648_v30 = vmax.f32 %v5273_v15, %v5276_v5  ;;  %v5277_v45 = vmax.f32 %v4952_v24, 0.0  ;;  %v4956_v35 = vadd.f32 %v4955_v53, %v4603_v48  ;;  %5203 = vmatprep.mubr.bf16.mxu0 %v13223_v62  ;;  %v13994_v24 = vld [vmem:[#allocation80_spill] sm:$0xff] }
 0x4ee   :  { %v4957_v18 = vpop.f32.mrf.mxu0  ;;  %v12052_v33 = vpop.f32.mrf.mxu1  ;;  %v5279_v39 = vmax.f32 %v13994_v24, 0.0 }
 0x4ef   :  { %v12050_v25 = vmax.f32 %v5274_v11, %v5277_v45  ;;  %v4958_v28 = vadd.f32 %v4957_v18, %v4605_v46  ;;  %v5834_v1 = vpack.c.bf16 %v5648_v30, %v5645_v63  ;;  %v5282_v29 = vmax.f32 %v4956_v35, 0.0  ;;  %v13995_v11 = vld [vmem:[#allocation82_spill] sm:$0xff] }
 0x4f0   :  { %v4959_v60 = vpop.f32.mrf.mxu0  ;;  %v12059_v5 = vpop.f32.mrf.mxu1  ;;  %v5285_v46 = vmax.f32 %v13995_v11, 0.0  ;;  %v4613_v63 = vadd.f32 %v11869_v0, %v11953_v21  ;;  %v13996_v35 = vpack.c.bf16 %v10930_v32, %v10909_v52  ;;  %v4617_v52 = vadd.f32 %v11886_v55, %v11953_v21  ;;  %v13998_v11 = vld [vmem:[#allocation215_spill] sm:$0xff] }
 0x4f1   :  { %v5283_v48 = vmax.f32 %v4958_v28, 0.0  ;;  %v4960_v44 = vadd.f32 %v4959_v60, %v4607_v41  ;;  %6165 = vmatprep.mubr.bf16.mxu1 %v5834_v1  ;;  %v5286_v41 = vmax.f32 %v10941_v19, 0.0  ;;  %v4615_v28 = vadd.f32 %v11879_v47, %v11962_v38 }
 0x4f2   :  { %v4961_v53 = vpop.f32.mrf.mxu0  ;;  %v12067_v45 = vpop.f32.mrf.mxu1  ;;  %v5651_v60 = vmax.f32 %v5279_v39, %v5282_v29  ;;  %v4619_v29 = vadd.f32 %v11895_v16, %v11962_v38 }
 0x4f3   :  { %v12065_v30 = vmax.f32 %v5280_v37, %v5283_v48  ;;  %v5288_v61 = vmax.f32 %v4960_v44, 0.0  ;;  %v4962_v18 = vadd.f32 %v4961_v53, %v4609_v2  ;;  %6166 = vmatmul.mubr.bf16.gmra.mxu1 %v13996_v35  ;;  %v5292_v53 = vmax.f32 %v13998_v11, 0.0  ;;  %v13999_v35 = vld [vmem:[#allocation89_spill] sm:$0xff] }
 0x4f4   :  { %v4965_v1 = vpop.f32.mrf.mxu0  ;;  %5204 = vmatmul.mubr.bf16.gmra.mxu0 %v13997_v10  ;;  %v12076_v48 = vpop.f32.mrf.mxu1 }
 0x4f5   :  { %v5654_v0 = vmax.f32 %v5285_v46, %v5288_v61  ;;  %v5289_v37 = vmax.f32 %v4962_v18, 0.0  ;;  %v4966_v44 = vadd.f32 %v4965_v1, %v4613_v63  ;;  %5213 = vmatprep.mubr.bf16.mxu0 %v13223_v62  ;;  %v14000_v1 = vld [vmem:[#allocation87_spill] sm:$0xff] }
 0x4f6   :  { %v4967_v2 = vpop.f32.mrf.mxu0  ;;  %v12083_v19 = vpop.f32.mrf.mxu1 }
 0x4f7   :  { %v12081_v32 = vmax.f32 %v5286_v41, %v5289_v37  ;;  %v4968_v47 = vadd.f32 %v4967_v2, %v4615_v28  ;;  %v5837_v24 = vpack.c.bf16 %v5654_v0, %v5651_v60  ;;  %v5294_v46 = vmax.f32 %v4966_v44, 0.0  ;;  %v14001_v2 = vld [vmem:[#allocation216_spill] sm:$0xff] }
 0x4f8   :  { %v4969_v39 = vpop.f32.mrf.mxu0  ;;  %v12088_v61 = vpop.f32.mrf.mxu1  ;;  %v5291_v41 = vmax.f32 %v13999_v35, 0.0  ;;  %v5297_v28 = vmax.f32 %v14000_v1, 0.0  ;;  %v4623_v60 = vadd.f32 %v11901_v17, %v11953_v21  ;;  %v14005_v1 = vld [vmem:[#allocation69_spill] sm:$0xff] }
 0x4f9   :  { %v5295_v63 = vmax.f32 %v4968_v47, 0.0  ;;  %v4970_v18 = vadd.f32 %v4969_v39, %v4617_v52  ;;  %6173 = vmatprep.mubr.bf16.mxu1 %v5837_v24  ;;  %v14002_v52 = vld [vmem:[#allocation214_spill] sm:$0xff]  ;;  %v4625_v39 = vadd.f32 %v11911_v4, %v11962_v38 }
 0x4fa   :  { %v4971_v10 = vpop.f32.mrf.mxu0  ;;  %v12098_v37 = vpop.f32.mrf.mxu1  ;;  %v14003_v47 = vpack.c.bf16 %v14001_v2, %v14002_v52  ;;  %v14004_v24 = vld [vmem:[#allocation86_spill] sm:$0xff]  ;;  %v5657_v55 = vmax.f32 %v5291_v41, %v5294_v46  ;;  %v4627_v2 = vadd.f32 %v11918_v13, %v11953_v21 }
 0x4fb   :  { %v12096_v0 = vmax.f32 %v5292_v53, %v5295_v63  ;;  %v5300_v16 = vmax.f32 %v4970_v18, 0.0  ;;  %v4972_v44 = vadd.f32 %v4971_v10, %v4619_v29  ;;  %v5298_v11 = vmax.f32 %v14004_v24, 0.0  ;;  %v8192_v29 = vld [vmem:[%s12998_s7 + $0x10] sm:$0xff]  }
 0x4fc   :  { %6174 = vmatmul.mubr.bf16.gmra.mxu1 %v14003_v47  ;;  %v4975_v35 = vpop.f32.mrf.mxu0  ;;  %5214 = vmatmul.mubr.bf16.gmra.mxu0 %v14005_v1  ;;  %v12107_v63 = vpop.f32.mrf.mxu1  ;;  %v14007_v1 = vld [vmem:[#allocation94_spill] sm:$0xff] }
 0x4fd   :  { %v5660_v17 = vmax.f32 %v5297_v28, %v5300_v16  ;;  %v5301_v53 = vmax.f32 %v4972_v44, 0.0  ;;  %v4976_v18 = vadd.f32 %v4975_v35, %v4623_v60  ;;  %5223 = vmatprep.mubr.bf16.mxu0 %v13223_v62  ;;  %7815 = vmatprep.subr.bf16.mxu1 %v8192_v29  ;;  %v14006_v28 = vld [vmem:[#allocation9_spill] sm:$0xff]  ;;  %v4629_v60 = vadd.f32 %v11927_v43, %v11962_v38 }
 0x4fe   :  { %v4977_v10 = vpop.f32.mrf.mxu0  ;;  %v12117_v52 = vpop.f32.mrf.mxu1  ;;  %v5304_v16 = vmax.f32 %v14006_v28, 0.0  ;;  %7816 = vmatpush3.bf16.msra.mxu1 %v8192_v29 }
 0x4ff   :  { %v12115_v4 = vmax.f32 %v5298_v11, %v5301_v53  ;;  %v4978_v46 = vadd.f32 %v4977_v10, %v4625_v39  ;;  %v5840_v41 = vpack.c.bf16 %v5660_v17, %v5657_v55  ;;  %v5306_v24 = vmax.f32 %v4976_v18, 0.0  ;;  %v14008_v55 = vld [vmem:[#allocation92_spill] sm:$0xff]  ;;  %v14009_v18 = vld [vmem:[#allocation138_spill] sm:$0xff] }
 0x500   :  { %v4979_v44 = vpop.f32.mrf.mxu0  ;;  %v12124_v13 = vpop.f32.mrf.mxu1  ;;  %v5303_v39 = vmax.f32 %v14007_v1, 0.0  ;;  %v5309_v17 = vmax.f32 %v14008_v55, 0.0  ;;  %v4633_v10 = vadd.f32 %v11933_v50, %v11953_v21  ;;  %v14013_v55 = vld [vmem:[#allocation67_spill] sm:$0xff] }
 0x501   :  { %v5307_v35 = vmax.f32 %v4978_v46, 0.0  ;;  %v4980_v11 = vadd.f32 %v4979_v44, %v4627_v2  ;;  %6181 = vmatprep.mubr.bf16.mxu1 %v5840_v41  ;;  %v14010_v46 = vld [vmem:[#allocation217_spill] sm:$0xff]  ;;  %v4635_v44 = vadd.f32 %v11943_v27, %v11962_v38 }
 0x502   :  { %v4981_v53 = vpop.f32.mrf.mxu0  ;;  %v12132_v28 = vpop.f32.mrf.mxu1  ;;  %v14011_v15 = vpack.c.bf16 %v14009_v18, %v14010_v46  ;;  %v14012_v2 = vld [vmem:[#allocation85_spill] sm:$0xff]  ;;  %v5663_v23 = vmax.f32 %v5303_v39, %v5306_v24 }
 0x503   :  { %v12130_v43 = vmax.f32 %v5304_v16, %v5307_v35  ;;  %v5312_v29 = vmax.f32 %v4980_v11, 0.0  ;;  %v4982_v47 = vadd.f32 %v4981_v53, %v4629_v60  ;;  %v5310_v41 = vmax.f32 %v14012_v2, 0.0  ;;  %v14014_v2 = vld [vmem:[#allocation10_spill] sm:$0xff] }
 0x504   :  { %6182 = vmatmul.mubr.bf16.gmra.mxu1 %v14011_v15  ;;  %v4985_v1 = vpop.f32.mrf.mxu0  ;;  %5224 = vmatmul.mubr.bf16.gmra.mxu0 %v14013_v55  ;;  %v12141_v35 = vpop.f32.mrf.mxu1  ;;  %v4637_v15 = vadd.f32 %v11957_v31, %v11953_v21  ;;  %v5316_v55 = vmax.f32 %v14014_v2, 0.0  ;;  %v14019_v2 = vld [vmem:[#allocation140_spill] sm:$0xff] }
 0x505   :  { %v5666_v50 = vmax.f32 %v5309_v17, %v5312_v29  ;;  %v5313_v16 = vmax.f32 %v4982_v47, 0.0  ;;  %v4986_v11 = vadd.f32 %v4985_v1, %v4633_v10  ;;  %5233 = vmatprep.mubr.bf16.mxu0 %v13223_v62  ;;  %v4639_v47 = vadd.f32 %v11970_v26, %v11962_v38  ;;  %v14020_v31 = vld [vmem:[#allocation72_spill] sm:$0xff] }
 0x506   :  { %v4987_v60 = vpop.f32.mrf.mxu0  ;;  %v12148_v18 = vpop.f32.mrf.mxu1 }
 0x507   :  { %v12146_v53 = vmax.f32 %v5310_v41, %v5313_v16  ;;  %v4988_v27 = vadd.f32 %v4987_v60, %v4635_v44  ;;  %v5843_v46 = vpack.c.bf16 %v5666_v50, %v5663_v23  ;;  %v5318_v39 = vmax.f32 %v4986_v11, 0.0  ;;  %v14015_v41 = vld [vmem:[#allocation99_spill] sm:$0xff]  ;;  %v14016_v16 = vld [vmem:[#allocation97_spill] sm:$0xff] }
 0x508   :  { %v4989_v24 = vpop.f32.mrf.mxu0  ;;  %v12153_v10 = vpop.f32.mrf.mxu1  ;;  %v5315_v1 = vmax.f32 %v14015_v41, 0.0  ;;  %v5321_v44 = vmax.f32 %v14016_v16, 0.0  ;;  %v4643_v50 = vadd.f32 %v11976_v40, %v11953_v21  ;;  %v4645_v41 = vadd.f32 %v11984_v20, %v11962_v38 }
 0x509   :  { %v5319_v17 = vmax.f32 %v4988_v27, 0.0  ;;  %v4990_v29 = vadd.f32 %v4989_v24, %v4637_v15  ;;  %6189 = vmatprep.mubr.bf16.mxu1 %v5843_v46  ;;  %v14017_v15 = vld [vmem:[#allocation91_spill] sm:$0xff]  ;;  %v5322_v24 = vmax.f32 %v14019_v2, 0.0  ;;  %v14021_v2 = vld [vmem:[#allocation96_spill] sm:$0xff] }
 0x50a   :  { %v4991_v23 = vpop.f32.mrf.mxu0  ;;  %v12163_v11 = vpop.f32.mrf.mxu1  ;;  %v14018_v46 = vpack.c.bf16 %v11056_v49, %v14017_v15  ;;  %v5669_v12 = vmax.f32 %v5315_v1, %v5318_v39  ;;  %v4647_v49 = vadd.f32 %v11991_v59, %v11953_v21  ;;  %v4649_v39 = vadd.f32 %v11998_v22, %v11962_v38 }
 0x50b   :  { %v12161_v60 = vmax.f32 %v5316_v55, %v5319_v17  ;;  %v5324_v26 = vmax.f32 %v4990_v29, 0.0  ;;  %v4992_v27 = vadd.f32 %v4991_v23, %v4639_v47 }
 0x50c   :  { %6190 = vmatmul.mubr.bf16.gmra.mxu1 %v14018_v46  ;;  %v4995_v16 = vpop.f32.mrf.mxu0  ;;  %5234 = vmatmul.mubr.bf16.gmra.mxu0 %v14020_v31  ;;  %v12172_v17 = vpop.f32.mrf.mxu1  ;;  %v5328_v31 = vmax.f32 %v14021_v2, 0.0 }
 0x50d   :  { %v5672_v40 = vmax.f32 %v5321_v44, %v5324_v26  ;;  %v5325_v55 = vmax.f32 %v4992_v27, 0.0  ;;  %v4996_v29 = vadd.f32 %v4995_v16, %v4643_v50  ;;  %5243 = vmatprep.mubr.bf16.mxu0 %v13223_v62  ;;  %v14022_v27 = vld [vmem:[#allocation101_spill] sm:$0xff]  ;;  %v14023_v16 = vld [vmem:[#allocation102_spill] sm:$0xff] }
 0x50e   :  { %v4997_v47 = vpop.f32.mrf.mxu0  ;;  %v12179_v15 = vpop.f32.mrf.mxu1 }
 0x50f   :  { %v12177_v23 = vmax.f32 %v5322_v24, %v5325_v55  ;;  %v4998_v20 = vadd.f32 %v4997_v47, %v4645_v41  ;;  %v5846_v46 = vpack.c.bf16 %v5672_v40, %v5669_v12  ;;  %v5330_v62 = vmax.f32 %v4996_v29, 0.0  ;;  %v14024_v29 = vld [vmem:[#allocation142_spill] sm:$0xff] }
 0x510   :  { %v4999_v1 = vpop.f32.mrf.mxu0  ;;  %v12186_v26 = vpop.f32.mrf.mxu1  ;;  %v5327_v24 = vmax.f32 %v14022_v27, 0.0  ;;  %v5333_v41 = vmax.f32 %v14023_v16, 0.0  ;;  %v4653_v40 = vadd.f32 %v12006_v42, %v11953_v21  ;;  %v14028_v16 = vld [vmem:[#allocation75_spill] sm:$0xff] }
 0x511   :  { %v5331_v50 = vmax.f32 %v4998_v20, 0.0  ;;  %v5000_v59 = vadd.f32 %v4999_v1, %v4647_v49  ;;  %6197 = vmatprep.mubr.bf16.mxu1 %v5846_v46  ;;  %v14025_v20 = vld [vmem:[#allocation90_spill] sm:$0xff]  ;;  %v14027_v49 = vld [vmem:[#allocation95_spill] sm:$0xff]  ;;  %v4655_v1 = vadd.f32 %v12013_v34, %v11962_v38 }
 0x512   :  { %v5001_v12 = vpop.f32.mrf.mxu0  ;;  %v12194_v47 = vpop.f32.mrf.mxu1  ;;  %v14026_v44 = vpack.c.bf16 %v14024_v29, %v14025_v20  ;;  %v5334_v46 = vmax.f32 %v14027_v49, 0.0  ;;  %v5675_v7 = vmax.f32 %v5327_v24, %v5330_v62  ;;  %v14030_v62 = vld [vmem:[#allocation12_spill] sm:$0xff] }
 0x513   :  { %v12192_v55 = vmax.f32 %v5328_v31, %v5331_v50  ;;  %v5336_v22 = vmax.f32 %v5000_v59, 0.0  ;;  %v5002_v2 = vadd.f32 %v5001_v12, %v4649_v39  ;;  %v14029_v39 = vpack.c.bf16 %v12018_v58, %v12004_v14 }
 0x514   :  { %6198 = vmatmul.mubr.bf16.gmra.mxu1 %v14026_v44  ;;  %v5005_v27 = vpop.f32.mrf.mxu0  ;;  %5244 = vmatmul.mubr.bf16.gmra.mxu0 %v14028_v16  ;;  %v12203_v50 = vpop.f32.mrf.mxu1  ;;  %v4657_v44 = vadd.f32 %v12020_v6, %v11953_v21  ;;  %v5340_v24 = vmax.f32 %v14030_v62, 0.0  ;;  %v14032_v16 = vld [vmem:[#allocation107_spill] sm:$0xff] }
 0x515   :  { %v5678_v42 = vmax.f32 %v5333_v41, %v5336_v22  ;;  %v5337_v31 = vmax.f32 %v5002_v2, 0.0  ;;  %v5006_v59 = vadd.f32 %v5005_v27, %v4653_v40  ;;  %7749 = vmatprep.mubr.bf16.mxu0 %v14029_v39  ;;  %v4659_v41 = vadd.f32 %v12025_v51, %v11962_v38 }
 0x516   :  { %v5007_v12 = vpop.f32.mrf.mxu0  ;;  %v12212_v34 = vpop.f32.mrf.mxu1 }
 0x517   :  { %v12210_v29 = vmax.f32 %v5334_v46, %v5337_v31  ;;  %v5008_v20 = vadd.f32 %v5007_v12, %v4655_v1  ;;  %v5849_v49 = vpack.c.bf16 %v5678_v42, %v5675_v7  ;;  %v5342_v22 = vmax.f32 %v5006_v59, 0.0  ;;  %v14031_v46 = vld [vmem:[#allocation106_spill] sm:$0xff]  ;;  %v14033_v12 = vld [vmem:[#allocation144_spill] sm:$0xff] }
 0x518   :  { %v5009_v40 = vpop.f32.mrf.mxu0  ;;  %v12217_v14 = vpop.f32.mrf.mxu1  ;;  %v5339_v27 = vmax.f32 %v14031_v46, 0.0  ;;  %v5345_v1 = vmax.f32 %v14032_v16, 0.0  ;;  %v4663_v42 = vadd.f32 %v12035_v8, %v11953_v21  ;;  %v14037_v16 = vpack.c.bf16 %v12050_v25, %v12033_v54 }
 0x519   :  { %v5343_v2 = vmax.f32 %v5008_v20, 0.0  ;;  %v5010_v58 = vadd.f32 %v5009_v40, %v4657_v44  ;;  %6205 = vmatprep.mubr.bf16.mxu1 %v5849_v49  ;;  %v5850_v6 = vpack.c.bf16 %v12210_v29, %v12192_v55  ;;  %v14034_v44 = vld [vmem:[#allocation104_spill] sm:$0xff]  ;;  %v4665_v40 = vadd.f32 %v12045_v36, %v11962_v38  ;;  %v14054_v29 = vld [vmem:[#allocation121_spill] sm:$0xff] }
 0x51a   :  { %v5011_v7 = vpop.f32.mrf.mxu0  ;;  %v12227_v59 = vpop.f32.mrf.mxu1  ;;  %v14035_v20 = vpack.c.bf16 %v14033_v12, %v14034_v44  ;;  %v14036_v49 = vld [vmem:[#allocation100_spill] sm:$0xff]  ;;  %v5681_v8 = vmax.f32 %v5339_v27, %v5342_v22  ;;  %v4667_v44 = vadd.f32 %v12052_v33, %v11953_v21  ;;  %v4669_v27 = vadd.f32 %v12059_v5, %v11962_v38 }
 0x51b   :  { %v12225_v31 = vmax.f32 %v5340_v24, %v5343_v2  ;;  %v5348_v51 = vmax.f32 %v5010_v58, 0.0  ;;  %v5012_v39 = vadd.f32 %v5011_v7, %v4659_v41  ;;  %v5346_v62 = vmax.f32 %v14036_v49, 0.0 }
 0x51c   :  { %6206 = vmatmul.mubr.bf16.gmra.mxu1 %v14035_v20  ;;  %v5015_v46 = vpop.f32.mrf.mxu0  ;;  %7750 = vmatmul.mubr.bf16.vlgmr.msra.gmra.mxu0 %v14037_v16  ;;  %v12238_v58 = vpop.f32.mrf.mxu1  ;;  %v14038_v7 = vpack.c.bf16 %v12081_v32, %v12065_v30 }
 0x51d   :  { %v5684_v24 = vmax.f32 %v5345_v1, %v5348_v51  ;;  %v5349_v2 = vmax.f32 %v5012_v39, 0.0  ;;  %v5016_v41 = vadd.f32 %v5015_v46, %v4663_v42  ;;  %v14039_v51 = vld [vmem:[#allocation111_spill] sm:$0xff]  ;;  %v14040_v39 = vld [vmem:[#allocation112_spill] sm:$0xff] }
 0x51e   :  { %7753 = vmatprep.mubr.bf16.mxu0 %v14038_v7  ;;  %v5017_v12 = vpop.f32.mrf.mxu0  ;;  %v12247_v20 = vpop.f32.mrf.mxu1  ;;  %v5351_v33 = vmax.f32 %v14039_v51, 0.0  ;;  %v5357_v49 = vmax.f32 %v14040_v39, 0.0  ;;  %v14043_v7 = vld [vmem:[#allocation14_spill] sm:$0xff] }
 0x51f   :  { %v12245_v36 = vmax.f32 %v5346_v62, %v5349_v2  ;;  %v5018_v54 = vadd.f32 %v5017_v12, %v4665_v40  ;;  %v5852_v25 = vpack.c.bf16 %v5684_v24, %v5681_v8  ;;  %v5354_v42 = vmax.f32 %v5016_v41, 0.0  ;;  %v14042_v2 = vld [vmem:[#allocation109_spill] sm:$0xff] }
 0x520   :  { %v5019_v22 = vpop.f32.mrf.mxu0  ;;  %v12253_v30 = vpop.f32.mrf.mxu1  ;;  %v4673_v40 = vadd.f32 %v12067_v45, %v11953_v21  ;;  %v14041_v24 = vpack.c.bf16 %v11169_v3, %v11151_v57  ;;  %v5352_v41 = vmax.f32 %v14042_v2, 0.0  ;;  %v5358_v12 = vmax.f32 %v14043_v7, 0.0 }
 0x521   :  { %v5853_v1 = vpack.c.bf16 %v12245_v36, %v12225_v31  ;;  %v5020_v32 = vadd.f32 %v5019_v22, %v4667_v44  ;;  %6213 = vmatprep.mubr.bf16.mxu1 %v5852_v25  ;;  %v5355_v46 = vmax.f32 %v5018_v54, 0.0  ;;  %v4675_v44 = vadd.f32 %v12076_v48, %v11962_v38 }
 0x522   :  { %v5021_v62 = vpop.f32.mrf.mxu0  ;;  %v12259_v8 = vpop.f32.mrf.mxu1  ;;  %v14044_v45 = vpack.c.bf16 %v12115_v4, %v12096_v0  ;;  %v5687_v54 = vmax.f32 %v5351_v33, %v5354_v42  ;;  %v14045_v57 = vpack.c.bf16 %v12146_v53, %v12130_v43  ;;  %v4677_v3 = vadd.f32 %v12083_v19, %v11953_v21  ;;  %v14046_v53 = vld [vmem:[#allocation116_spill] sm:$0xff] }
 0x523   :  { %v5360_v16 = vmax.f32 %v5020_v32, 0.0  ;;  %v5022_v5 = vadd.f32 %v5021_v62, %v4669_v27  ;;  %v12278_v48 = vmax.f32 %v5352_v41, %v5355_v46  ;;  %v5363_v46 = vmax.f32 %v14046_v53, 0.0 }
 0x524   :  { %6214 = vmatmul.mubr.bf16.gmra.mxu1 %v14041_v24  ;;  %v5025_v25 = vpop.f32.mrf.mxu0  ;;  %7754 = vmatmul.mubr.bf16.gmra.mxu0 %v14044_v45  ;;  %v12271_v27 = vpop.f32.mrf.mxu1  ;;  %v4683_v41 = vadd.f32 %v12098_v37, %v11953_v21  ;;  %v14049_v45 = vld [vmem:[#allocation16_spill] sm:$0xff]  ;;  %v14053_v37 = vpack.c.bf16 %v12177_v23, %v12161_v60  ;;  %v4699_v31 = vadd.f32 %v12153_v10, %v11962_v38  ;;  %v14063_v10 = vld [vmem:[#allocation137_spill] sm:$0xff] }
 0x525   :  { %v5690_v22 = vmax.f32 %v5357_v49, %v5360_v16  ;;  %v5361_v32 = vmax.f32 %v5022_v5, 0.0  ;;  %v5026_v51 = vadd.f32 %v5025_v25, %v4673_v40  ;;  %7757 = vmatprep.mubr.bf16.mxu0 %v14045_v57  ;;  %v4679_v49 = vadd.f32 %v12088_v61, %v11962_v38  ;;  %v14047_v5 = vld [vmem:[#allocation117_spill] sm:$0xff] }
 0x526   :  { %v5027_v39 = vpop.f32.mrf.mxu0  ;;  %v12282_v0 = vpop.f32.mrf.mxu1  ;;  %v5369_v24 = vmax.f32 %v14047_v5, 0.0  ;;  %v14048_v25 = vld [vmem:[#allocation105_spill] sm:$0xff] }
 0x527   :  { %v12280_v62 = vmax.f32 %v5358_v12, %v5361_v32  ;;  %v5028_v4 = vadd.f32 %v5027_v39, %v4675_v44  ;;  %v5855_v42 = vpack.c.bf16 %v5690_v22, %v5687_v54  ;;  %v5366_v40 = vmax.f32 %v5026_v51, 0.0  ;;  %v14051_v22 = vld [vmem:[#allocation135_spill] sm:$0xff]  ;;  %v14052_v51 = vld [vmem:[#allocation114_spill] sm:$0xff] }
 0x528   :  { %v5029_v33 = vpop.f32.mrf.mxu0  ;;  %v12286_v16 = vpop.f32.mrf.mxu1  ;;  %v14050_v54 = vpack.c.bf16 %v14048_v25, %v14049_v45  ;;  %v5364_v32 = vmax.f32 %v14051_v22, 0.0  ;;  %v5370_v57 = vmax.f32 %v14052_v51, 0.0 }
 0x529   :  { %v5030_v43 = vadd.f32 %v5029_v33, %v4677_v3  ;;  %6221 = vmatprep.mubr.bf16.mxu1 %v5855_v42  ;;  %v5856_v19 = vpack.c.bf16 %v12280_v62, %v12278_v48  ;;  %v5367_v7 = vmax.f32 %v5028_v4, 0.0  ;;  %v4685_v3 = vadd.f32 %v12107_v63, %v11962_v38 }
 0x52a   :  { %v5031_v2 = vpop.f32.mrf.mxu0  ;;  %v12294_v44 = vpop.f32.mrf.mxu1  ;;  %v5693_v48 = vmax.f32 %v5363_v46, %v5366_v40  ;;  %v4689_v46 = vadd.f32 %v12124_v13, %v11962_v38  ;;  %v14056_v13 = vld [vmem:[#allocation110_spill] sm:$0xff] }
 0x52b   :  { %v5372_v12 = vmax.f32 %v5030_v43, 0.0  ;;  %v5032_v61 = vadd.f32 %v5031_v2, %v4679_v49  ;;  %v4687_v49 = vadd.f32 %v12117_v52, %v11953_v21  ;;  %v5694_v63 = vmax.f32 %v5364_v32, %v5367_v7  ;;  %v14055_v52 = vld [vmem:[#allocation122_spill] sm:$0xff]  ;;  %v14057_v32 = vld [vmem:[#allocation15_spill] sm:$0xff] }
 0x52c   :  { %6222 = vmatmul.mubr.bf16.gmra.mxu1 %v14050_v54  ;;  %v5035_v39 = vpop.f32.mrf.mxu0  ;;  %7758 = vmatmul.mubr.bf16.gmra.mxu0 %v14053_v37  ;;  %v12306_v42 = vpop.f32.mrf.mxu1  ;;  %v14058_v51 = vpack.c.bf16 %v14056_v13, %v14057_v32  ;;  %v14064_v13 = vld [vmem:[#allocation23_spill] sm:$0xff] }
 0x52d   :  { %v5696_v62 = vmax.f32 %v5369_v24, %v5372_v12  ;;  %v5373_v4 = vmax.f32 %v5032_v61, 0.0  ;;  %v5036_v33 = vadd.f32 %v5035_v39, %v4683_v41  ;;  %7761 = vmatprep.mubr.bf16.mxu0 %v5850_v6  ;;  %v5375_v6 = vmax.f32 %v14054_v29, 0.0  ;;  %v14060_v39 = vld [vmem:[#allocation119_spill] sm:$0xff]  ;;  %v14061_v29 = vld [vmem:[#allocation126_spill] sm:$0xff] }
 0x52e   :  { %v5037_v43 = vpop.f32.mrf.mxu0  ;;  %v12313_v5 = vpop.f32.mrf.mxu1  ;;  %v5381_v12 = vmax.f32 %v14055_v52, 0.0  ;;  %v4693_v61 = vadd.f32 %v12132_v28, %v11953_v21  ;;  %v5382_v37 = vmax.f32 %v14060_v39, 0.0  ;;  %v14065_v32 = vpack.c.bf16 %v14063_v10, %v14064_v13  ;;  %v14071_v10 = vld [vmem:[#allocation124_spill] sm:$0xff] }
 0x52f   :  { %v5697_v53 = vmax.f32 %v5370_v57, %v5373_v4  ;;  %v5038_v60 = vadd.f32 %v5037_v43, %v4685_v3  ;;  %v5858_v23 = vpack.c.bf16 %v5696_v62, %v5693_v48  ;;  %v5378_v2 = vmax.f32 %v5036_v33, 0.0  ;;  %v14059_v57 = vld [vmem:[#allocation136_spill] sm:$0xff] }
 0x530   :  { %v5039_v40 = vpop.f32.mrf.mxu0  ;;  %v12317_v41 = vpop.f32.mrf.mxu1  ;;  %v5376_v3 = vmax.f32 %v14059_v57, 0.0  ;;  %v4695_v48 = vadd.f32 %v12141_v35, %v11962_v38 }
 0x531   :  { %v5859_v24 = vpack.c.bf16 %v5697_v53, %v5694_v63  ;;  %v5040_v55 = vadd.f32 %v5039_v40, %v4687_v49  ;;  %6229 = vmatprep.mubr.bf16.mxu1 %v5858_v23  ;;  %v5379_v25 = vmax.f32 %v5038_v60, 0.0  ;;  %v5699_v28 = vmax.f32 %v5375_v6, %v5378_v2 }
 0x532   :  { %v5041_v7 = vpop.f32.mrf.mxu0  ;;  %v12323_v54 = vpop.f32.mrf.mxu1  ;;  %v4697_v63 = vadd.f32 %v12148_v18, %v11953_v21  ;;  %v5387_v6 = vmax.f32 %v14061_v29, 0.0  ;;  %v14062_v18 = vld [vmem:[#allocation127_spill] sm:$0xff] }
 0x533   :  { %v5384_v45 = vmax.f32 %v5040_v55, 0.0  ;;  %v5042_v22 = vadd.f32 %v5041_v7, %v4689_v46  ;;  %v5700_v60 = vmax.f32 %v5376_v3, %v5379_v25  ;;  %v5393_v52 = vmax.f32 %v14062_v18, 0.0  ;;  %v14067_v3 = vld [vmem:[#allocation115_spill] sm:$0xff] }
 0x534   :  { %6230 = vmatmul.mubr.bf16.gmra.mxu1 %v14058_v51  ;;  %v5045_v62 = vpop.f32.mrf.mxu0  ;;  %7762 = vmatmul.mubr.bf16.gmra.mxu0 %v5853_v1  ;;  %v12335_v49 = vpop.f32.mrf.mxu1  ;;  %v4703_v7 = vadd.f32 %v12163_v11, %v11953_v21  ;;  %v14066_v51 = vld [vmem:[#allocation21_spill] sm:$0xff]  ;;  %v5394_v39 = vmax.f32 %v14067_v3, 0.0 }
 0x535   :  { %v5702_v4 = vmax.f32 %v5381_v12, %v5384_v45  ;;  %v5385_v33 = vmax.f32 %v5042_v22, 0.0  ;;  %v5046_v43 = vadd.f32 %v5045_v62, %v4693_v61  ;;  %7765 = vmatprep.mubr.bf16.mxu0 %v5856_v19  ;;  %v5388_v57 = vmax.f32 %v14066_v51, 0.0 }
 0x536   :  { %v5047_v53 = vpop.f32.mrf.mxu0  ;;  %v12339_v40 = vpop.f32.mrf.mxu1 }
 0x537   :  { %v5703_v23 = vmax.f32 %v5382_v37, %v5385_v33  ;;  %v5048_v35 = vadd.f32 %v5047_v53, %v4695_v48  ;;  %v5861_v46 = vpack.c.bf16 %v5702_v4, %v5699_v28  ;;  %v5390_v36 = vmax.f32 %v5046_v43, 0.0  ;;  %v8193_v43 = vld [vmem:[%s12998_s7 + $0x8] sm:$0xff]  }
 0x538   :  { %v5049_v55 = vpop.f32.mrf.mxu0  ;;  %v12343_v1 = vpop.f32.mrf.mxu1  ;;  %v4705_v37 = vadd.f32 %v12172_v17, %v11962_v38  ;;  %7817 = vmatprep.subr.bf16.mxu1 %v8193_v43 }
 0x539   :  { %v5050_v2 = vadd.f32 %v5049_v55, %v4697_v63  ;;  %6237 = vmatprep.mubr.bf16.mxu1 %v5861_v46  ;;  %v5862_v19 = vpack.c.bf16 %v5703_v23, %v5700_v60  ;;  %v5391_v61 = vmax.f32 %v5048_v35, 0.0  ;;  %v5705_v62 = vmax.f32 %v5387_v6, %v5390_v36  ;;  %7818 = vmatpush3.bf16.msra.mxu1 %v8193_v43  ;;  %v14069_v6 = vld [vmem:[#allocation131_spill] sm:$0xff] }
 0x53a   :  { %v5051_v12 = vpop.f32.mrf.mxu0  ;;  %v12349_v45 = vpop.f32.mrf.mxu1  ;;  %v4707_v63 = vadd.f32 %v12179_v15, %v11953_v21  ;;  %v4709_v55 = vadd.f32 %v12186_v26, %v11962_v38  ;;  %v14068_v15 = vld [vmem:[#allocation8_spill] sm:$0xff]  ;;  %v5405_v18 = vmax.f32 %v14069_v6, 0.0 }
 0x53b   :  { %v5396_v25 = vmax.f32 %v5050_v2, 0.0  ;;  %v5052_v22 = vadd.f32 %v5051_v12, %v4699_v31  ;;  %v5706_v60 = vmax.f32 %v5388_v57, %v5391_v61  ;;  %v5399_v29 = vmax.f32 %v14068_v15, 0.0  ;;  %v14070_v26 = vld [vmem:[#allocation20_spill] sm:$0xff]  ;;  %v14074_v57 = vld [vmem:[#allocation139_spill] sm:$0xff] }
 0x53c   :  { %6238 = vmatmul.mubr.bf16.gmra.mxu1 %v14065_v32  ;;  %v5055_v48 = vpop.f32.mrf.mxu0  ;;  %7766 = vmatmul.mubr.bf16.gmra.mxu0 %v5859_v24  ;;  %v12358_v4 = vpop.f32.mrf.mxu1  ;;  %v4713_v12 = vadd.f32 %v12194_v47, %v11953_v21  ;;  %v14072_v13 = vpack.c.bf16 %v14070_v26, %v14071_v10  ;;  %v14073_v32 = vld [vmem:[#allocation28_spill] sm:$0xff]  ;;  %v5406_v3 = vmax.f32 %v14074_v57, 0.0  ;;  %v14080_v10 = vld [vmem:[#allocation129_spill] sm:$0xff]  ;;  %v4725_v57 = vadd.f32 %v12238_v58, %v11962_v38 }
 0x53d   :  { %v5708_v11 = vmax.f32 %v5393_v52, %v5396_v25  ;;  %v5397_v28 = vmax.f32 %v5052_v22, 0.0  ;;  %v5056_v33 = vadd.f32 %v5055_v48, %v4703_v7  ;;  %7769 = vmatprep.mubr.bf16.mxu0 %v5862_v19  ;;  %v5400_v51 = vmax.f32 %v14073_v32, 0.0  ;;  %v14081_v32 = vld [vmem:[#allocation26_spill] sm:$0xff] }
 0x53e   :  { %v5057_v53 = vpop.f32.mrf.mxu0  ;;  %v12365_v17 = vpop.f32.mrf.mxu1  ;;  %v4729_v58 = vadd.f32 %v12253_v30, %v11962_v38  ;;  %v14084_v30 = vld [vmem:[#allocation134_spill] sm:$0xff] }
 0x53f   :  { %v5709_v23 = vmax.f32 %v5394_v39, %v5397_v28  ;;  %v5058_v24 = vadd.f32 %v5057_v53, %v4705_v37  ;;  %v5864_v35 = vpack.c.bf16 %v5708_v11, %v5705_v62  ;;  %v5402_v36 = vmax.f32 %v5056_v33, 0.0 }
 0x540   :  { %v5059_v46 = vpop.f32.mrf.mxu0  ;;  %v12369_v2 = vpop.f32.mrf.mxu1  ;;  %v4715_v39 = vadd.f32 %v12203_v50, %v11962_v38  ;;  %v4717_v33 = vadd.f32 %v12212_v34, %v11953_v21  ;;  %v4719_v50 = vadd.f32 %v12217_v14, %v11962_v38  ;;  %v14076_v34 = vld [vmem:[#allocation74_spill] sm:$0xff]  ;;  %v14077_v14 = vld [vmem:[#allocation33_spill] sm:$0xff] }
 0x541   :  { %v5865_v31 = vpack.c.bf16 %v5709_v23, %v5706_v60  ;;  %v5060_v19 = vadd.f32 %v5059_v46, %v4707_v63  ;;  %6245 = vmatprep.mubr.bf16.mxu1 %v5864_v35  ;;  %v5403_v7 = vmax.f32 %v5058_v24, 0.0  ;;  %v5711_v48 = vmax.f32 %v5399_v29, %v5402_v36 }
 0x542   :  { %v5061_v52 = vpop.f32.mrf.mxu0  ;;  %v12375_v25 = vpop.f32.mrf.mxu1  ;;  %v5417_v29 = vmax.f32 %v14076_v34, 0.0 }
 0x543   :  { %v5408_v61 = vmax.f32 %v5060_v19, 0.0  ;;  %v5062_v22 = vadd.f32 %v5061_v52, %v4709_v55  ;;  %v5712_v63 = vmax.f32 %v5400_v51, %v5403_v7  ;;  %v14075_v19 = vld [vmem:[#allocation133_spill] sm:$0xff]  ;;  %v5418_v51 = vmax.f32 %v14081_v32, 0.0 }
 0x544   :  { %6246 = vmatmul.mubr.bf16.gmra.mxu1 %v14072_v13  ;;  %v5065_v37 = vpop.f32.mrf.mxu0  ;;  %7770 = vmatmul.mubr.bf16.gmra.mxu0 %v5865_v31  ;;  %v12384_v11 = vpop.f32.mrf.mxu1  ;;  %v5411_v15 = vmax.f32 %v14075_v19, 0.0  ;;  %v5412_v13 = vmax.f32 %v14080_v10, 0.0  ;;  %v14088_v10 = vld [vmem:[#allocation38_spill] sm:$0xff]  ;;  %v4735_v32 = vadd.f32 %v12271_v27, %v11962_v38  ;;  %v4739_v27 = vadd.f32 %v12286_v16, %v11962_v38  ;;  %v14091_v16 = vld [vmem:[#allocation25_spill] sm:$0xff] }
 0x545   :  { %v5714_v47 = vmax.f32 %v5405_v18, %v5408_v61  ;;  %v5409_v62 = vmax.f32 %v5062_v22, 0.0  ;;  %v5066_v28 = vadd.f32 %v5065_v37, %v4713_v12  ;;  %v4723_v18 = vadd.f32 %v12227_v59, %v11953_v21  ;;  %v14078_v22 = vld [vmem:[#allocation120_spill] sm:$0xff] }
 0x546   :  { %v5067_v43 = vpop.f32.mrf.mxu0  ;;  %v12388_v60 = vpop.f32.mrf.mxu1  ;;  %v14079_v26 = vpack.c.bf16 %v14077_v14, %v14078_v22  ;;  %v14087_v22 = vld [vmem:[#allocation125_spill] sm:$0xff] }
 0x547   :  { %v5715_v53 = vmax.f32 %v5406_v3, %v5409_v62  ;;  %v5068_v23 = vadd.f32 %v5067_v43, %v4715_v39  ;;  %v5867_v24 = vpack.c.bf16 %v5714_v47, %v5711_v48  ;;  %v5414_v46 = vmax.f32 %v5066_v28, 0.0 }
 0x548   :  { %v5069_v35 = vpop.f32.mrf.mxu0  ;;  %v12392_v55 = vpop.f32.mrf.mxu1  ;;  %v4727_v62 = vadd.f32 %v12247_v20, %v11953_v21  ;;  %v14083_v20 = vld [vmem:[#allocation146_spill] sm:$0xff] }
 0x549   :  { %v5070_v31 = vadd.f32 %v5069_v35, %v4717_v33  ;;  %6253 = vmatprep.mubr.bf16.mxu1 %v5867_v24  ;;  %v5868_v36 = vpack.c.bf16 %v5715_v53, %v5712_v63  ;;  %v5415_v52 = vmax.f32 %v5068_v23, 0.0  ;;  %v5717_v39 = vmax.f32 %v5411_v15, %v5414_v46 }
 0x54a   :  { %v5071_v6 = vpop.f32.mrf.mxu0  ;;  %v12398_v7 = vpop.f32.mrf.mxu1  ;;  %v5429_v15 = vmax.f32 %v14083_v20, 0.0 }
 0x54b   :  { %v5420_v12 = vmax.f32 %v5070_v31, 0.0  ;;  %v5072_v61 = vadd.f32 %v5071_v6, %v4719_v50  ;;  %7773 = vmatprep.mubr.bf16.mxu0 %v5868_v36  ;;  %v5718_v33 = vmax.f32 %v5412_v13, %v5415_v52  ;;  %v14082_v36 = vld [vmem:[#allocation18_spill] sm:$0xff]  ;;  %v5430_v13 = vmax.f32 %v14088_v10, 0.0 }
 0x54c   :  { %6254 = vmatmul.mubr.bf16.gmra.mxu1 %v14079_v26  ;;  %v5075_v3 = vpop.f32.mrf.mxu0  ;;  %v12407_v48 = vpop.f32.mrf.mxu1  ;;  %v5423_v19 = vmax.f32 %v14082_v36, 0.0  ;;  %v5424_v26 = vmax.f32 %v14087_v22, 0.0 }
 0x54d   :  { %v5720_v59 = vmax.f32 %v5417_v29, %v5420_v12  ;;  %v5421_v37 = vmax.f32 %v5072_v61, 0.0  ;;  %v5076_v47 = vadd.f32 %v5075_v3, %v4723_v18  ;;  %v4733_v29 = vadd.f32 %v12259_v8, %v11953_v21  ;;  %v14085_v61 = vld [vmem:[#allocation141_spill] sm:$0xff] }
 0x54e   :  { %v5077_v28 = vpop.f32.mrf.mxu0  ;;  %v12411_v63 = vpop.f32.mrf.mxu1  ;;  %v14086_v14 = vpack.c.bf16 %v14084_v30, %v14085_v61  ;;  %v14093_v30 = vld [vmem:[#allocation143_spill] sm:$0xff] }
 0x54f   :  { %v5721_v43 = vmax.f32 %v5418_v51, %v5421_v37  ;;  %v5078_v53 = vadd.f32 %v5077_v28, %v4725_v57  ;;  %v5870_v23 = vpack.c.bf16 %v5720_v59, %v5717_v39  ;;  %v5426_v50 = vmax.f32 %v5076_v47, 0.0 }
 0x550   :  { %v5079_v24 = vpop.f32.mrf.mxu0  ;;  %v12415_v46 = vpop.f32.mrf.mxu1  ;;  %v4737_v37 = vadd.f32 %v12282_v0, %v11953_v21  ;;  %v14090_v0 = vld [vmem:[#allocation150_spill] sm:$0xff]  ;;  %v5436_v61 = vmax.f32 %v14093_v30, 0.0  ;;  %v4755_v30 = vadd.f32 %v12335_v49, %v11962_v38 }
 0x551   :  { %v5871_v35 = vpack.c.bf16 %v5721_v43, %v5718_v33  ;;  %v5080_v31 = vadd.f32 %v5079_v24, %v4727_v62  ;;  %6261 = vmatprep.mubr.bf16.mxu1 %v5870_v23  ;;  %v5427_v6 = vmax.f32 %v5078_v53, 0.0  ;;  %v5723_v57 = vmax.f32 %v5423_v19, %v5426_v50 }
 0x552   :  { %v5081_v34 = vpop.f32.mrf.mxu0  ;;  %v12421_v52 = vpop.f32.mrf.mxu1  ;;  %v5441_v19 = vmax.f32 %v14090_v0, 0.0 }
 0x553   :  { %v5432_v18 = vmax.f32 %v5080_v31, 0.0  ;;  %v5082_v12 = vadd.f32 %v5081_v34, %v4729_v58  ;;  %7774 = vmatmul.mubr.bf16.gmra.mxu0 %v5871_v35  ;;  %v5724_v62 = vmax.f32 %v5424_v26, %v5427_v6  ;;  %v14089_v31 = vld [vmem:[#allocation148_spill] sm:$0xff]  ;;  %v4745_v26 = vadd.f32 %v12306_v42, %v11962_v38 }
 0x554   :  { %6262 = vmatmul.mubr.bf16.gmra.mxu1 %v14086_v14  ;;  %v5085_v51 = vpop.f32.mrf.mxu0  ;;  %v12430_v39 = vpop.f32.mrf.mxu1  ;;  %v5435_v36 = vmax.f32 %v14089_v31, 0.0  ;;  %v14094_v14 = vld [vmem:[#allocation130_spill] sm:$0xff]  ;;  %v4749_v42 = vadd.f32 %v12317_v41, %v11962_v38  ;;  %v14097_v41 = vld [vmem:[#allocation132_spill] sm:$0xff] }
 0x555   :  { %v5726_v8 = vmax.f32 %v5429_v15, %v5432_v18  ;;  %v5433_v3 = vmax.f32 %v5082_v12, 0.0  ;;  %v5086_v59 = vadd.f32 %v5085_v51, %v4733_v29  ;;  %v4743_v15 = vadd.f32 %v12294_v44, %v11953_v21 }
 0x556   :  { %v5087_v47 = vpop.f32.mrf.mxu0  ;;  %v12434_v33 = vpop.f32.mrf.mxu1  ;;  %v14092_v12 = vpack.c.bf16 %v11414_v9, %v14091_v16  ;;  %v5442_v22 = vmax.f32 %v14094_v14, 0.0  ;;  %v14100_v16 = vld [vmem:[#allocation31_spill] sm:$0xff] }
 0x557   :  { %v5727_v28 = vmax.f32 %v5430_v13, %v5433_v3  ;;  %v5088_v43 = vadd.f32 %v5087_v47, %v4735_v32  ;;  %v5873_v53 = vpack.c.bf16 %v5726_v8, %v5723_v57  ;;  %v5438_v24 = vmax.f32 %v5086_v59, 0.0 }
 0x558   :  { %v5089_v23 = vpop.f32.mrf.mxu0  ;;  %v12438_v58 = vpop.f32.mrf.mxu1  ;;  %v4747_v8 = vadd.f32 %v12313_v5, %v11953_v21  ;;  %v14096_v5 = vld [vmem:[#allocation154_spill] sm:$0xff] }
 0x559   :  { %v5090_v35 = vadd.f32 %v5089_v23, %v4737_v37  ;;  %6269 = vmatprep.mubr.bf16.mxu1 %v5873_v53  ;;  %v5874_v50 = vpack.c.bf16 %v5727_v28, %v5724_v62  ;;  %v5439_v34 = vmax.f32 %v5088_v43, 0.0  ;;  %v5729_v13 = vmax.f32 %v5435_v36, %v5438_v24  ;;  %v14095_v24 = vld [vmem:[#allocation152_spill] sm:$0xff] }
 0x55a   :  { %v5091_v20 = vpop.f32.mrf.mxu0  ;;  %v12444_v6 = vpop.f32.mrf.mxu1  ;;  %v4753_v36 = vadd.f32 %v12323_v54, %v11953_v21 }
 0x55b   :  { %v5444_v29 = vmax.f32 %v5090_v35, 0.0  ;;  %v5092_v18 = vadd.f32 %v5091_v20, %v4739_v27  ;;  %7777 = vmatprep.mubr.bf16.mxu0 %v5874_v50  ;;  %v5730_v3 = vmax.f32 %v5436_v61, %v5439_v34  ;;  %v5447_v35 = vmax.f32 %v14095_v24, 0.0 }
 0x55c   :  { %6270 = vmatmul.mubr.bf16.gmra.mxu1 %v14092_v12  ;;  %v5095_v10 = vpop.f32.mrf.mxu0  ;;  %v12453_v51 = vpop.f32.mrf.mxu1  ;;  %v5453_v50 = vmax.f32 %v14096_v5, 0.0  ;;  %v14098_v34 = vpack.c.bf16 %v11447_v56, %v14097_v41  ;;  %v5454_v12 = vmax.f32 %v14100_v16, 0.0  ;;  %v8194_v56 = vld [vmem:[%s12998_s7] sm:$0xff]  }
 0x55d   :  { %v5732_v44 = vmax.f32 %v5441_v19, %v5444_v29  ;;  %v5445_v32 = vmax.f32 %v5092_v18, 0.0  ;;  %v5096_v57 = vadd.f32 %v5095_v10, %v4743_v15  ;;  %v14099_v29 = vld [vmem:[#allocation43_spill] sm:$0xff]  ;;  %7819 = vmatprep.subr.bf16.mxu1 %v8194_v56 }
 0x55e   :  { %v5097_v9 = vpop.f32.mrf.mxu0  ;;  %v12457_v37 = vpop.f32.mrf.mxu1  ;;  %v5448_v18 = vmax.f32 %v14099_v29, 0.0  ;;  %7820 = vmatpush3.bf16.msra.mxu1 %v8194_v56 }
 0x55f   :  { %v5733_v59 = vmax.f32 %v5442_v22, %v5445_v32  ;;  %v5098_v47 = vadd.f32 %v5097_v9, %v4745_v26  ;;  %v5876_v62 = vpack.c.bf16 %v5732_v44, %v5729_v13  ;;  %v5450_v53 = vmax.f32 %v5096_v57, 0.0 }
 0x560   :  { %v5099_v28 = vpop.f32.mrf.mxu0  ;;  %v12461_v23 = vpop.f32.mrf.mxu1  ;;  %v4757_v13 = vadd.f32 %v12339_v40, %v11953_v21  ;;  %v14101_v40 = vld [vmem:[#allocation35_spill] sm:$0xff] }
 0x561   :  { %v5877_v43 = vpack.c.bf16 %v5733_v59, %v5730_v3  ;;  %v5100_v27 = vadd.f32 %v5099_v28, %v4747_v8  ;;  %6277 = vmatprep.mubr.bf16.mxu1 %v5876_v62  ;;  %v5451_v0 = vmax.f32 %v5098_v47, 0.0  ;;  %v5735_v14 = vmax.f32 %v5447_v35, %v5450_v53  ;;  %v14102_v53 = vld [vmem:[#allocation156_spill] sm:$0xff] }
 0x562   :  { %v5101_v31 = vpop.f32.mrf.mxu0  ;;  %v12467_v20 = vpop.f32.mrf.mxu1  ;;  %v4759_v59 = vadd.f32 %v12343_v1, %v11962_v38  ;;  %v4763_v35 = vadd.f32 %v12349_v45, %v11953_v21  ;;  %v14103_v1 = vld [vmem:[#allocation11_spill] sm:$0xff] }
 0x563   :  { %v5456_v19 = vmax.f32 %v5100_v27, 0.0  ;;  %v5102_v15 = vadd.f32 %v5101_v31, %v4749_v42  ;;  %7778 = vmatmul.mubr.bf16.gmra.mxu0 %v5877_v43  ;;  %v5736_v32 = vmax.f32 %v5448_v18, %v5451_v0  ;;  %v5459_v43 = vmax.f32 %v14101_v40, 0.0  ;;  %v14104_v0 = vld [vmem:[#allocation13_spill] sm:$0xff] }
 0x564   :  { %6278 = vmatmul.mubr.bf16.gmra.mxu1 %v14098_v34  ;;  %v5105_v61 = vpop.f32.mrf.mxu0  ;;  %v12476_v26 = vpop.f32.mrf.mxu1  ;;  %v5465_v27 = vmax.f32 %v14102_v53, 0.0  ;;  %v14107_v34 = vld [vmem:[#allocation48_spill] sm:$0xff]  ;;  %v4765_v18 = vadd.f32 %v12358_v4, %v11962_v38  ;;  %v4769_v4 = vadd.f32 %v12369_v2, %v11962_v38  ;;  %v14110_v2 = vld [vmem:[#allocation145_spill] sm:$0xff] }
 0x565   :  { %v5738_v54 = vmax.f32 %v5453_v50, %v5456_v19  ;;  %v5457_v22 = vmax.f32 %v5102_v15, 0.0  ;;  %v5106_v10 = vadd.f32 %v5105_v61, %v4753_v36  ;;  %v14105_v19 = vpack.c.bf16 %v14103_v1, %v14104_v0  ;;  %v14106_v15 = vld [vmem:[#allocation71_spill] sm:$0xff] }
 0x566   :  { %v5107_v44 = vpop.f32.mrf.mxu0  ;;  %v12483_v8 = vpop.f32.mrf.mxu1  ;;  %v5460_v41 = vmax.f32 %v14106_v15, 0.0  ;;  %v5466_v29 = vmax.f32 %v14107_v34, 0.0  ;;  %v14114_v0 = vld [vmem:[#allocation147_spill] sm:$0xff]  ;;  %v4775_v15 = vadd.f32 %v12384_v11, %v11962_v38  ;;  %v4779_v11 = vadd.f32 %v12392_v55, %v11962_v38  ;;  %v14117_v55 = vld [vmem:[#allocation17_spill] sm:$0xff] }
 0x567   :  { %v5739_v57 = vmax.f32 %v5454_v12, %v5457_v22  ;;  %v5108_v49 = vadd.f32 %v5107_v44, %v4755_v30  ;;  %v5879_v9 = vpack.c.bf16 %v5738_v54, %v5735_v14  ;;  %v5462_v47 = vmax.f32 %v5106_v10, 0.0 }
 0x568   :  { %v5109_v3 = vpop.f32.mrf.mxu0  ;;  %v12487_v62 = vpop.f32.mrf.mxu1  ;;  %v4767_v54 = vadd.f32 %v12365_v17, %v11953_v21  ;;  %v14109_v17 = vld [vmem:[#allocation160_spill] sm:$0xff] }
 0x569   :  { %v5110_v28 = vadd.f32 %v5109_v3, %v4757_v13  ;;  %6285 = vmatprep.mubr.bf16.mxu1 %v5879_v9  ;;  %v5880_v42 = vpack.c.bf16 %v5739_v57, %v5736_v32  ;;  %v5463_v5 = vmax.f32 %v5108_v49, 0.0  ;;  %v5741_v12 = vmax.f32 %v5459_v43, %v5462_v47  ;;  %v14108_v47 = vld [vmem:[#allocation158_spill] sm:$0xff] }
 0x56a   :  { %v5111_v24 = vpop.f32.mrf.mxu0  ;;  %v12493_v31 = vpop.f32.mrf.mxu1  ;;  %v4773_v43 = vadd.f32 %v12375_v25, %v11953_v21 }
 0x56b   :  { %v5468_v50 = vmax.f32 %v5110_v28, 0.0  ;;  %v5112_v36 = vadd.f32 %v5111_v24, %v4759_v59  ;;  %7781 = vmatprep.mubr.bf16.mxu0 %v5880_v42  ;;  %v5742_v10 = vmax.f32 %v5460_v41, %v5463_v5  ;;  %v5471_v28 = vmax.f32 %v14108_v47, 0.0  ;;  %v14111_v5 = vld [vmem:[#allocation30_spill] sm:$0xff] }
 0x56c   :  { %6286 = vmatmul.mubr.bf16.gmra.mxu1 %v14105_v19  ;;  %v5115_v16 = vpop.f32.mrf.mxu0  ;;  %v12502_v61 = vpop.f32.mrf.mxu1  ;;  %v5477_v42 = vmax.f32 %v14109_v17, 0.0  ;;  %v5478_v19 = vmax.f32 %v14114_v0, 0.0 }
 0x56d   :  { %v5744_v45 = vmax.f32 %v5465_v27, %v5468_v50  ;;  %v5469_v30 = vmax.f32 %v5112_v36, 0.0  ;;  %v5116_v14 = vadd.f32 %v5115_v16, %v4763_v35  ;;  %v14112_v50 = vpack.c.bf16 %v14110_v2, %v14111_v5  ;;  %v14113_v36 = vld [vmem:[#allocation19_spill] sm:$0xff]  ;;  %v14121_v5 = vld [vmem:[#allocation149_spill] sm:$0xff] }
 0x56e   :  { %v5117_v22 = vpop.f32.mrf.mxu0  ;;  %v12506_v13 = vpop.f32.mrf.mxu1  ;;  %v5472_v1 = vmax.f32 %v14113_v36, 0.0  ;;  %v4785_v36 = vadd.f32 %v12407_v48, %v11962_v38  ;;  %v4789_v48 = vadd.f32 %v12415_v46, %v11962_v38  ;;  %v14124_v46 = vld [vmem:[#allocation153_spill] sm:$0xff] }
 0x56f   :  { %v5745_v56 = vmax.f32 %v5466_v29, %v5469_v30  ;;  %v5118_v44 = vadd.f32 %v5117_v22, %v4765_v18  ;;  %v5882_v32 = vpack.c.bf16 %v5744_v45, %v5741_v12  ;;  %v5474_v9 = vmax.f32 %v5116_v14, 0.0 }
 0x570   :  { %v5119_v57 = vpop.f32.mrf.mxu0  ;;  %v12510_v3 = vpop.f32.mrf.mxu1  ;;  %v4777_v12 = vadd.f32 %v12388_v60, %v11953_v21  ;;  %v14116_v60 = vld [vmem:[#allocation164_spill] sm:$0xff] }
 0x571   :  { %v5883_v49 = vpack.c.bf16 %v5745_v56, %v5742_v10  ;;  %v5120_v59 = vadd.f32 %v5119_v57, %v4767_v54  ;;  %6293 = vmatprep.mubr.bf16.mxu1 %v5882_v32  ;;  %v5475_v53 = vmax.f32 %v5118_v44, 0.0  ;;  %v5747_v34 = vmax.f32 %v5471_v28, %v5474_v9 }
 0x572   :  { %v5121_v40 = vpop.f32.mrf.mxu0  ;;  %v12516_v24 = vpop.f32.mrf.mxu1  ;;  %v4783_v28 = vadd.f32 %v12398_v7, %v11953_v21 }
 0x573   :  { %v5480_v27 = vmax.f32 %v5120_v59, 0.0  ;;  %v5122_v35 = vadd.f32 %v5121_v40, %v4769_v4  ;;  %7782 = vmatmul.mubr.bf16.gmra.mxu0 %v5883_v49  ;;  %v5748_v30 = vmax.f32 %v5472_v1, %v5475_v53  ;;  %v14115_v49 = vld [vmem:[#allocation162_spill] sm:$0xff]  ;;  %v5489_v59 = vmax.f32 %v14116_v60, 0.0  ;;  %v14118_v53 = vld [vmem:[#allocation53_spill] sm:$0xff] }
 0x574   :  { %6294 = vmatmul.mubr.bf16.gmra.mxu1 %v14112_v50  ;;  %v5125_v41 = vpop.f32.mrf.mxu0  ;;  %v12525_v18 = vpop.f32.mrf.mxu1  ;;  %v5483_v9 = vmax.f32 %v14115_v49, 0.0  ;;  %v5490_v50 = vmax.f32 %v14121_v5, 0.0 }
 0x575   :  { %v5750_v25 = vmax.f32 %v5477_v42, %v5480_v27  ;;  %v5481_v29 = vmax.f32 %v5122_v35, 0.0  ;;  %v5126_v16 = vadd.f32 %v5125_v41, %v4773_v43  ;;  %v14119_v27 = vpack.c.bf16 %v14117_v55, %v14118_v53  ;;  %v14120_v35 = vld [vmem:[#allocation36_spill] sm:$0xff]  ;;  %v14128_v53 = vld [vmem:[#allocation58_spill] sm:$0xff] }
 0x576   :  { %v5127_v45 = vpop.f32.mrf.mxu0  ;;  %v12529_v54 = vpop.f32.mrf.mxu1  ;;  %v5484_v2 = vmax.f32 %v14120_v35, 0.0  ;;  %v4795_v35 = vadd.f32 %v12430_v39, %v11962_v38  ;;  %v4799_v39 = vadd.f32 %v12438_v58, %v11962_v38  ;;  %v14131_v58 = vld [vmem:[#allocation22_spill] sm:$0xff] }
 0x577   :  { %v5751_v14 = vmax.f32 %v5478_v19, %v5481_v29  ;;  %v5128_v22 = vadd.f32 %v5127_v45, %v4775_v15  ;;  %v5885_v10 = vpack.c.bf16 %v5750_v25, %v5747_v34  ;;  %v5486_v44 = vmax.f32 %v5126_v16, 0.0 }
 0x578   :  { %v5129_v56 = vpop.f32.mrf.mxu0  ;;  %v12533_v32 = vpop.f32.mrf.mxu1  ;;  %v4787_v34 = vadd.f32 %v12411_v63, %v11953_v21  ;;  %v14123_v63 = vld [vmem:[#allocation168_spill] sm:$0xff] }
 0x579   :  { %v5130_v57 = vadd.f32 %v5129_v56, %v4777_v12  ;;  %6301 = vmatprep.mubr.bf16.mxu1 %v5885_v10  ;;  %v5886_v4 = vpack.c.bf16 %v5751_v14, %v5748_v30  ;;  %v5487_v17 = vmax.f32 %v5128_v22, 0.0  ;;  %v5753_v0 = vmax.f32 %v5483_v9, %v5486_v44  ;;  %v14122_v44 = vld [vmem:[#allocation166_spill] sm:$0xff] }
 0x57a   :  { %v5131_v47 = vpop.f32.mrf.mxu0  ;;  %v12539_v40 = vpop.f32.mrf.mxu1  ;;  %v4793_v9 = vadd.f32 %v12421_v52, %v11953_v21 }
 0x57b   :  { %v5492_v42 = vmax.f32 %v5130_v57, 0.0  ;;  %v5132_v43 = vadd.f32 %v5131_v47, %v4779_v11  ;;  %7785 = vmatprep.mubr.bf16.mxu0 %v5886_v4  ;;  %v5754_v29 = vmax.f32 %v5484_v2, %v5487_v17  ;;  %v5495_v57 = vmax.f32 %v14122_v44, 0.0  ;;  %v14125_v17 = vld [vmem:[#allocation151_spill] sm:$0xff] }
 0x57c   :  { %6302 = vmatmul.mubr.bf16.gmra.mxu1 %v14119_v27  ;;  %v5135_v1 = vpop.f32.mrf.mxu0  ;;  %v12548_v15 = vpop.f32.mrf.mxu1  ;;  %v5501_v4 = vmax.f32 %v14123_v63, 0.0  ;;  %v5502_v27 = vmax.f32 %v14128_v53, 0.0 }
 0x57d   :  { %v5756_v7 = vmax.f32 %v5489_v59, %v5492_v42  ;;  %v5493_v19 = vmax.f32 %v5132_v43, 0.0  ;;  %v5136_v41 = vadd.f32 %v5135_v1, %v4783_v28  ;;  %v14126_v42 = vpack.c.bf16 %v14124_v46, %v14125_v17  ;;  %v14127_v43 = vld [vmem:[#allocation24_spill] sm:$0xff]  ;;  %v14135_v17 = vld [vmem:[#allocation155_spill] sm:$0xff] }
 0x57e   :  { %v5137_v25 = vpop.f32.mrf.mxu0  ;;  %v12552_v12 = vpop.f32.mrf.mxu1  ;;  %v5496_v55 = vmax.f32 %v14127_v43, 0.0  ;;  %v4805_v43 = vadd.f32 %v12453_v51, %v11962_v38  ;;  %v4809_v51 = vadd.f32 %v12461_v23, %v11962_v38  ;;  %v14138_v23 = vld [vmem:[#allocation40_spill] sm:$0xff] }
 0x57f   :  { %v5757_v16 = vmax.f32 %v5490_v50, %v5493_v19  ;;  %v5138_v45 = vadd.f32 %v5137_v25, %v4785_v36  ;;  %v5888_v30 = vpack.c.bf16 %v5756_v7, %v5753_v0  ;;  %v5498_v10 = vmax.f32 %v5136_v41, 0.0 }
 0x580   :  { %v5139_v14 = vpop.f32.mrf.mxu0  ;;  %v12556_v56 = vpop.f32.mrf.mxu1  ;;  %v4797_v0 = vadd.f32 %v12434_v33, %v11953_v21  ;;  %v14130_v33 = vld [vmem:[#allocation171_spill] sm:$0xff] }
 0x581   :  { %v5889_v22 = vpack.c.bf16 %v5757_v16, %v5754_v29  ;;  %v5140_v11 = vadd.f32 %v5139_v14, %v4787_v34  ;;  %6309 = vmatprep.mubr.bf16.mxu1 %v5888_v30  ;;  %v5499_v60 = vmax.f32 %v5138_v45, 0.0  ;;  %v5759_v5 = vmax.f32 %v5495_v57, %v5498_v10 }
 0x582   :  { %v5141_v49 = vpop.f32.mrf.mxu0  ;;  %v12562_v47 = vpop.f32.mrf.mxu1  ;;  %v4803_v57 = vadd.f32 %v12444_v6, %v11953_v21 }
 0x583   :  { %v5504_v59 = vmax.f32 %v5140_v11, 0.0  ;;  %v5142_v28 = vadd.f32 %v5141_v49, %v4789_v48  ;;  %7786 = vmatmul.mubr.bf16.gmra.mxu0 %v5889_v22  ;;  %v5760_v19 = vmax.f32 %v5496_v55, %v5499_v60  ;;  %v14129_v22 = vld [vmem:[#allocation169_spill] sm:$0xff]  ;;  %v5513_v11 = vmax.f32 %v14130_v33, 0.0  ;;  %v14132_v60 = vld [vmem:[#allocation63_spill] sm:$0xff] }
 0x584   :  { %6310 = vmatmul.mubr.bf16.gmra.mxu1 %v14126_v42  ;;  %v5145_v2 = vpop.f32.mrf.mxu0  ;;  %v12571_v36 = vpop.f32.mrf.mxu1  ;;  %v5507_v10 = vmax.f32 %v14129_v22, 0.0  ;;  %v5514_v42 = vmax.f32 %v14135_v17, 0.0 }
 0x585   :  { %v5762_v52 = vmax.f32 %v5501_v4, %v5504_v59  ;;  %v5505_v50 = vmax.f32 %v5142_v28, 0.0  ;;  %v5146_v1 = vadd.f32 %v5145_v2, %v4793_v9  ;;  %v14133_v59 = vpack.c.bf16 %v14131_v58, %v14132_v60  ;;  %v14134_v28 = vld [vmem:[#allocation41_spill] sm:$0xff] }
 0x586   :  { %v5147_v7 = vpop.f32.mrf.mxu0  ;;  %v12575_v34 = vpop.f32.mrf.mxu1  ;;  %v5508_v46 = vmax.f32 %v14134_v28, 0.0  ;;  %v14142_v60 = vld [vmem:[#allocation29_spill] sm:$0xff]  ;;  %v4815_v28 = vadd.f32 %v12476_v26, %v11962_v38  ;;  %v4819_v26 = vadd.f32 %v12487_v62, %v11962_v38 }
 0x587   :  { %v5763_v41 = vmax.f32 %v5502_v27, %v5505_v50  ;;  %v5148_v25 = vadd.f32 %v5147_v7, %v4795_v35  ;;  %v5891_v29 = vpack.c.bf16 %v5762_v52, %v5759_v5  ;;  %v5510_v45 = vmax.f32 %v5146_v1, 0.0  ;;  %v14145_v62 = vld [vmem:[#allocation73_spill] sm:$0xff] }
 0x588   :  { %v5149_v16 = vpop.f32.mrf.mxu0  ;;  %v12579_v30 = vpop.f32.mrf.mxu1  ;;  %v4807_v5 = vadd.f32 %v12457_v37, %v11953_v21  ;;  %v14137_v37 = vld [vmem:[#allocation175_spill] sm:$0xff] }
 0x589   :  { %v5150_v14 = vadd.f32 %v5149_v16, %v4797_v0  ;;  %6317 = vmatprep.mubr.bf16.mxu1 %v5891_v29  ;;  %v5892_v48 = vpack.c.bf16 %v5763_v41, %v5760_v19  ;;  %v5511_v63 = vmax.f32 %v5148_v25, 0.0  ;;  %v5765_v53 = vmax.f32 %v5507_v10, %v5510_v45  ;;  %v14136_v45 = vld [vmem:[#allocation173_spill] sm:$0xff] }
 0x58a   :  { %v5151_v44 = vpop.f32.mrf.mxu0  ;;  %v12585_v49 = vpop.f32.mrf.mxu1  ;;  %v4813_v10 = vadd.f32 %v12467_v20, %v11953_v21 }
 0x58b   :  { %v5516_v4 = vmax.f32 %v5150_v14, 0.0  ;;  %v5152_v9 = vadd.f32 %v5151_v44, %v4799_v39  ;;  %7789 = vmatprep.mubr.bf16.mxu0 %v5892_v48  ;;  %v5766_v50 = vmax.f32 %v5508_v46, %v5511_v63  ;;  %v5519_v14 = vmax.f32 %v14136_v45, 0.0  ;;  %v14139_v63 = vld [vmem:[#allocation157_spill] sm:$0xff] }
 0x58c   :  { %6318 = vmatmul.mubr.bf16.gmra.mxu1 %v14133_v59  ;;  %v5155_v55 = vpop.f32.mrf.mxu0  ;;  %v12594_v35 = vpop.f32.mrf.mxu1  ;;  %v5525_v48 = vmax.f32 %v14137_v37, 0.0  ;;  %v5526_v59 = vmax.f32 %v14142_v60, 0.0 }
 0x58d   :  { %v5768_v6 = vmax.f32 %v5513_v11, %v5516_v4  ;;  %v5517_v27 = vmax.f32 %v5152_v9, 0.0  ;;  %v5156_v2 = vadd.f32 %v5155_v55, %v4803_v57  ;;  %v14140_v4 = vpack.c.bf16 %v14138_v23, %v14139_v63  ;;  %v14141_v9 = vld [vmem:[#allocation68_spill] sm:$0xff]  ;;  %v14149_v63 = vld [vmem:[#allocation46_spill] sm:$0xff] }
 0x58e   :  { %v5157_v52 = vpop.f32.mrf.mxu0  ;;  %v12598_v0 = vpop.f32.mrf.mxu1  ;;  %v5520_v58 = vmax.f32 %v14141_v9, 0.0  ;;  %v4825_v9 = vadd.f32 %v12502_v61, %v11962_v38  ;;  %v4829_v61 = vadd.f32 %v12510_v3, %v11962_v38  ;;  %v14152_v3 = vld [vmem:[#allocation165_spill] sm:$0xff] }
 0x58f   :  { %v5769_v1 = vmax.f32 %v5514_v42, %v5517_v27  ;;  %v5158_v7 = vadd.f32 %v5157_v52, %v4805_v43  ;;  %v5894_v19 = vpack.c.bf16 %v5768_v6, %v5765_v53  ;;  %v5522_v29 = vmax.f32 %v5156_v2, 0.0 }
 0x590   :  { %v5159_v41 = vpop.f32.mrf.mxu0  ;;  %v12602_v16 = vpop.f32.mrf.mxu1  ;;  %v4817_v53 = vadd.f32 %v12483_v8, %v11953_v21  ;;  %v14144_v8 = vld [vmem:[#allocation179_spill] sm:$0xff] }
 0x591   :  { %v5895_v25 = vpack.c.bf16 %v5769_v1, %v5766_v50  ;;  %v5160_v39 = vadd.f32 %v5159_v41, %v4807_v5  ;;  %6325 = vmatprep.mubr.bf16.mxu1 %v5894_v19  ;;  %v5523_v33 = vmax.f32 %v5158_v7, 0.0  ;;  %v5771_v17 = vmax.f32 %v5519_v14, %v5522_v29 }
 0x592   :  { %v5161_v22 = vpop.f32.mrf.mxu0  ;;  %v12608_v44 = vpop.f32.mrf.mxu1  ;;  %v4823_v14 = vadd.f32 %v12493_v31, %v11953_v21 }
 0x593   :  { %v5528_v11 = vmax.f32 %v5160_v39, 0.0  ;;  %v5162_v57 = vadd.f32 %v5161_v22, %v4809_v51  ;;  %7790 = vmatmul.mubr.bf16.gmra.mxu0 %v5895_v25  ;;  %v5772_v27 = vmax.f32 %v5520_v58, %v5523_v33  ;;  %v14143_v25 = vld [vmem:[#allocation177_spill] sm:$0xff]  ;;  %v5537_v39 = vmax.f32 %v14144_v8, 0.0  ;;  %v14146_v33 = vld [vmem:[#allocation159_spill] sm:$0xff] }
 0x594   :  { %6326 = vmatmul.mubr.bf16.gmra.mxu1 %v14140_v4  ;;  %v5165_v46 = vpop.f32.mrf.mxu0  ;;  %v12617_v43 = vpop.f32.mrf.mxu1  ;;  %v5531_v29 = vmax.f32 %v14143_v25, 0.0  ;;  %v5538_v4 = vmax.f32 %v14149_v63, 0.0 }
 0x595   :  { %v5774_v20 = vmax.f32 %v5525_v48, %v5528_v11  ;;  %v5529_v42 = vmax.f32 %v5162_v57, 0.0  ;;  %v5166_v55 = vadd.f32 %v5165_v46, %v4813_v10  ;;  %v14147_v11 = vpack.c.bf16 %v14145_v62, %v14146_v33  ;;  %v14148_v57 = vld [vmem:[#allocation161_spill] sm:$0xff] }
 0x596   :  { %v5167_v6 = vpop.f32.mrf.mxu0  ;;  %v12621_v5 = vpop.f32.mrf.mxu1  ;;  %v5532_v23 = vmax.f32 %v14148_v57, 0.0  ;;  %v14156_v33 = vld [vmem:[#allocation45_spill] sm:$0xff]  ;;  %v4835_v57 = vadd.f32 %v12525_v18, %v11962_v38  ;;  %v4839_v18 = vadd.f32 %v12533_v32, %v11962_v38  ;;  %v14159_v32 = vld [vmem:[#allocation78_spill] sm:$0xff] }
 0x597   :  { %v5775_v2 = vmax.f32 %v5526_v59, %v5529_v42  ;;  %v5168_v52 = vadd.f32 %v5167_v6, %v4815_v28  ;;  %v5897_v50 = vpack.c.bf16 %v5774_v20, %v5771_v17  ;;  %v5534_v7 = vmax.f32 %v5166_v55, 0.0 }
 0x598   :  { %v5169_v1 = vpop.f32.mrf.mxu0  ;;  %v12625_v19 = vpop.f32.mrf.mxu1  ;;  %v4827_v17 = vadd.f32 %v12506_v13, %v11953_v21  ;;  %v14151_v13 = vld [vmem:[#allocation183_spill] sm:$0xff] }
 0x599   :  { %v5170_v41 = vadd.f32 %v5169_v1, %v4817_v53  ;;  %6333 = vmatprep.mubr.bf16.mxu1 %v5897_v50  ;;  %v5898_v51 = vpack.c.bf16 %v5775_v2, %v5772_v27  ;;  %v5535_v37 = vmax.f32 %v5168_v52, 0.0  ;;  %v5777_v60 = vmax.f32 %v5531_v29, %v5534_v7  ;;  %v14150_v7 = vld [vmem:[#allocation181_spill] sm:$0xff] }
 0x59a   :  { %v5171_v45 = vpop.f32.mrf.mxu0  ;;  %v12631_v22 = vpop.f32.mrf.mxu1  ;;  %v4833_v29 = vadd.f32 %v12516_v24, %v11953_v21 }
 0x59b   :  { %v5540_v48 = vmax.f32 %v5170_v41, 0.0  ;;  %v5172_v10 = vadd.f32 %v5171_v45, %v4819_v26  ;;  %7793 = vmatprep.mubr.bf16.mxu0 %v5898_v51  ;;  %v5778_v42 = vmax.f32 %v5532_v23, %v5535_v37  ;;  %v5543_v41 = vmax.f32 %v14150_v7, 0.0  ;;  %v14153_v37 = vld [vmem:[#allocation27_spill] sm:$0xff] }
 0x59c   :  { %6334 = vmatmul.mubr.bf16.gmra.mxu1 %v14147_v11  ;;  %v5175_v58 = vpop.f32.mrf.mxu0  ;;  %v12640_v28 = vpop.f32.mrf.mxu1  ;;  %v5549_v51 = vmax.f32 %v14151_v13, 0.0  ;;  %v5550_v11 = vmax.f32 %v14156_v33, 0.0 }
 0x59d   :  { %v5780_v31 = vmax.f32 %v5537_v39, %v5540_v48  ;;  %v5541_v59 = vmax.f32 %v5172_v10, 0.0  ;;  %v5176_v46 = vadd.f32 %v5175_v58, %v4823_v14  ;;  %v14154_v48 = vpack.c.bf16 %v14152_v3, %v14153_v37  ;;  %v14155_v10 = vld [vmem:[#allocation163_spill] sm:$0xff] }
 0x59e   :  { %v5177_v20 = vpop.f32.mrf.mxu0  ;;  %v12644_v53 = vpop.f32.mrf.mxu1  ;;  %v5544_v62 = vmax.f32 %v14155_v10, 0.0  ;;  %v14163_v37 = vld [vmem:[#allocation83_spill] sm:$0xff]  ;;  %v4845_v10 = vadd.f32 %v12548_v15, %v11962_v38  ;;  %v4849_v15 = vadd.f32 %v12556_v56, %v11962_v38 }
 0x59f   :  { %v5781_v55 = vmax.f32 %v5538_v4, %v5541_v59  ;;  %v5178_v6 = vadd.f32 %v5177_v20, %v4825_v9  ;;  %v5900_v27 = vpack.c.bf16 %v5780_v31, %v5777_v60  ;;  %v5546_v50 = vmax.f32 %v5176_v46, 0.0  ;;  %v14167_v56 = vld [vmem:[#allocation51_spill] sm:$0xff] }
 0x5a0   :  { %v5179_v2 = vpop.f32.mrf.mxu0  ;;  %v12648_v1 = vpop.f32.mrf.mxu1  ;;  %v4837_v60 = vadd.f32 %v12529_v54, %v11953_v21  ;;  %v14158_v54 = vld [vmem:[#allocation187_spill] sm:$0xff] }
 0x5a1   :  { %v5901_v52 = vpack.c.bf16 %v5781_v55, %v5778_v42  ;;  %v5180_v26 = vadd.f32 %v5179_v2, %v4827_v17  ;;  %6341 = vmatprep.mubr.bf16.mxu1 %v5900_v27  ;;  %v5547_v8 = vmax.f32 %v5178_v6, 0.0  ;;  %v5783_v63 = vmax.f32 %v5543_v41, %v5546_v50 }
 0x5a2   :  { %v5181_v25 = vpop.f32.mrf.mxu0  ;;  %v12654_v45 = vpop.f32.mrf.mxu1  ;;  %v4843_v41 = vadd.f32 %v12539_v40, %v11953_v21 }
 0x5a3   :  { %v5552_v39 = vmax.f32 %v5180_v26, 0.0  ;;  %v5182_v14 = vadd.f32 %v5181_v25, %v4829_v61  ;;  %7794 = vmatmul.mubr.bf16.gmra.mxu0 %v5901_v52  ;;  %v5784_v59 = vmax.f32 %v5544_v62, %v5547_v8  ;;  %v14157_v52 = vld [vmem:[#allocation185_spill] sm:$0xff]  ;;  %v5561_v26 = vmax.f32 %v14158_v54, 0.0  ;;  %v14160_v8 = vld [vmem:[#allocation34_spill] sm:$0xff] }
 0x5a4   :  { %6342 = vmatmul.mubr.bf16.gmra.mxu1 %v14154_v48  ;;  %v5185_v23 = vpop.f32.mrf.mxu0  ;;  %v12663_v9 = vpop.f32.mrf.mxu1  ;;  %v5555_v50 = vmax.f32 %v14157_v52, 0.0  ;;  %v5562_v48 = vmax.f32 %v14163_v37, 0.0 }
 0x5a5   :  { %v5786_v24 = vmax.f32 %v5549_v51, %v5552_v39  ;;  %v5553_v4 = vmax.f32 %v5182_v14, 0.0  ;;  %v5186_v58 = vadd.f32 %v5185_v23, %v4833_v29  ;;  %v14161_v39 = vpack.c.bf16 %v14159_v32, %v14160_v8  ;;  %v14162_v14 = vld [vmem:[#allocation167_spill] sm:$0xff]  ;;  %v14170_v8 = vld [vmem:[#allocation172_spill] sm:$0xff] }
 0x5a6   :  { %v5187_v31 = vpop.f32.mrf.mxu0  ;;  %v12667_v17 = vpop.f32.mrf.mxu1  ;;  %v5556_v3 = vmax.f32 %v14162_v14, 0.0  ;;  %v4855_v14 = vadd.f32 %v12571_v36, %v11962_v38  ;;  %v4859_v36 = vadd.f32 %v12579_v30, %v11962_v38  ;;  %v14174_v30 = vld [vmem:[#allocation88_spill] sm:$0xff] }
 0x5a7   :  { %v5787_v46 = vmax.f32 %v5550_v11, %v5553_v4  ;;  %v5188_v20 = vadd.f32 %v5187_v31, %v4835_v57  ;;  %v5903_v42 = vpack.c.bf16 %v5786_v24, %v5783_v63  ;;  %v5558_v6 = vmax.f32 %v5186_v58, 0.0 }
 0x5a8   :  { %v5189_v55 = vpop.f32.mrf.mxu0  ;;  %v12671_v27 = vpop.f32.mrf.mxu1  ;;  %v4847_v63 = vadd.f32 %v12552_v12, %v11953_v21 }
 0x5a9   :  { %v5190_v2 = vadd.f32 %v5189_v55, %v4837_v60  ;;  %6349 = vmatprep.mubr.bf16.mxu1 %v5903_v42  ;;  %v5904_v61 = vpack.c.bf16 %v5787_v46, %v5784_v59  ;;  %v5559_v13 = vmax.f32 %v5188_v20, 0.0  ;;  %v5789_v33 = vmax.f32 %v5555_v50, %v5558_v6  ;;  %v14164_v6 = vld [vmem:[#allocation189_spill] sm:$0xff] }
 0x5aa   :  { %v5191_v7 = vpop.f32.mrf.mxu0  ;;  %v4853_v50 = vadd.f32 %v12562_v47, %v11953_v21 }
 0x5ab   :  { %v5564_v51 = vmax.f32 %v5190_v2, 0.0  ;;  %v5192_v25 = vadd.f32 %v5191_v7, %v4839_v18  ;;  %v12677_v29 = vpop.f32.mrf.mxu1  ;;  %7797 = vmatprep.mubr.bf16.mxu0 %v5904_v61  ;;  %v5790_v4 = vmax.f32 %v5556_v3, %v5559_v13  ;;  %v5567_v2 = vmax.f32 %v14164_v6, 0.0  ;;  %v14165_v61 = vld [vmem:[#allocation191_spill] sm:$0xff]  ;;  %v14166_v13 = vld [vmem:[#allocation170_spill] sm:$0xff] }
 0x5ac   :  { %6350 = vmatmul.mubr.bf16.gmra.mxu1 %v14161_v39  ;;  %v5195_v62 = vpop.f32.mrf.mxu0  ;;  %v5573_v12 = vmax.f32 %v14165_v61, 0.0  ;;  %v5574_v39 = vmax.f32 %v14170_v8, 0.0 }
 0x5ad   :  { %v5792_v40 = vmax.f32 %v5561_v26, %v5564_v51  ;;  %v5565_v11 = vmax.f32 %v5192_v25, 0.0  ;;  %v5196_v57 = vadd.f32 %v5195_v62, %v4843_v41  ;;  %v6161_v23 = vpop.f32.mrf.mxu1  ;;  %v14168_v51 = vpack.c.bf16 %v14166_v13, %v14167_v56  ;;  %v14169_v25 = vld [vmem:[#allocation32_spill] sm:$0xff] }
 0x5ae   :  { %v5197_v24 = vpop.f32.mrf.mxu0  ;;  %v5568_v32 = vmax.f32 %v14169_v25, 0.0  ;;  %v4865_v56 = vadd.f32 %v12594_v35, %v11962_v38  ;;  %v4869_v35 = vadd.f32 %v12602_v16, %v11962_v38  ;;  %v14181_v16 = vld [vmem:[#allocation176_spill] sm:$0xff] }
 0x5af   :  { %v5793_v58 = vmax.f32 %v5562_v48, %v5565_v11  ;;  %v5198_v60 = vadd.f32 %v5197_v24, %v4845_v10  ;;  %v12688_v31 = vpop.f32.mrf.mxu1  ;;  %v5906_v59 = vpack.c.bf16 %v5792_v40, %v5789_v33  ;;  %v5570_v42 = vmax.f32 %v5196_v57, 0.0 }
 0x5b0   :  { %v5199_v46 = vpop.f32.mrf.mxu0  ;;  %v4857_v33 = vadd.f32 %v12575_v34, %v11953_v21 }
 0x5b1   :  { %v5907_v20 = vpack.c.bf16 %v5793_v58, %v5790_v4  ;;  %v5200_v55 = vadd.f32 %v5199_v46, %v4847_v63  ;;  %v6164_v18 = vpop.f32.mrf.mxu1  ;;  %6357 = vmatprep.mubr.bf16.mxu1 %v5906_v59  ;;  %v5571_v54 = vmax.f32 %v5198_v60, 0.0  ;;  %v5795_v37 = vmax.f32 %v5567_v2, %v5570_v42  ;;  %v14172_v42 = vld [vmem:[#allocation195_spill] sm:$0xff] }
 0x5b2   :  { %v5201_v52 = vpop.f32.mrf.mxu0  ;;  %v5585_v34 = vmax.f32 %v14172_v42, 0.0  ;;  %v4863_v18 = vadd.f32 %v12585_v49, %v11953_v21  ;;  %v14180_v42 = vld [vmem:[#allocation56_spill] sm:$0xff] }
 0x5b3   :  { %v5576_v26 = vmax.f32 %v5200_v55, 0.0  ;;  %v5202_v7 = vadd.f32 %v5201_v52, %v4849_v15  ;;  %v12696_v41 = vpop.f32.mrf.mxu1  ;;  %7798 = vmatmul.mubr.bf16.gmra.mxu0 %v5907_v20  ;;  %v5796_v11 = vmax.f32 %v5568_v32, %v5571_v54  ;;  %v14171_v15 = vld [vmem:[#allocation193_spill] sm:$0xff]  ;;  %v14173_v52 = vld [vmem:[#allocation39_spill] sm:$0xff]  ;;  %v14176_v54 = vld [vmem:[#allocation50_spill] sm:$0xff] }
 0x5b4   :  { %6358 = vmatmul.mubr.bf16.gmra.mxu1 %v14168_v51  ;;  %v5205_v3 = vpop.f32.mrf.mxu0  ;;  %v5579_v20 = vmax.f32 %v14171_v15, 0.0 }
 0x5b5   :  { %v5798_v47 = vmax.f32 %v5573_v12, %v5576_v26  ;;  %v5577_v48 = vmax.f32 %v5202_v7, 0.0  ;;  %v5206_v10 = vadd.f32 %v5205_v3, %v4853_v50  ;;  %v6169_v62 = vpop.f32.mrf.mxu1  ;;  %v14175_v50 = vpack.c.bf16 %v14173_v52, %v14174_v30  ;;  %v14177_v7 = vld [vmem:[#allocation174_spill] sm:$0xff] }
 0x5b6   :  { %v5207_v40 = vpop.f32.mrf.mxu0  ;;  %v5580_v26 = vmax.f32 %v14176_v54, 0.0  ;;  %v5586_v13 = vmax.f32 %v14177_v7, 0.0  ;;  %v4877_v7 = vadd.f32 %v12621_v5, %v11953_v21 }
 0x5b7   :  { %v5799_v57 = vmax.f32 %v5574_v39, %v5577_v48  ;;  %v5208_v23 = vadd.f32 %v5207_v40, %v4855_v14  ;;  %v12707_v63 = vpop.f32.mrf.mxu1  ;;  %v5909_v24 = vpack.c.bf16 %v5798_v47, %v5795_v37  ;;  %v5582_v58 = vmax.f32 %v5206_v10, 0.0 }
 0x5b8   :  { %v5209_v4 = vpop.f32.mrf.mxu0  ;;  %v4867_v14 = vadd.f32 %v12598_v0, %v11953_v21 }
 0x5b9   :  { %v5210_v60 = vadd.f32 %v5209_v4, %v4857_v33  ;;  %v6172_v59 = vpop.f32.mrf.mxu1  ;;  %6365 = vmatprep.mubr.bf16.mxu1 %v5909_v24  ;;  %v5910_v46 = vpack.c.bf16 %v5799_v57, %v5796_v11  ;;  %v5583_v6 = vmax.f32 %v5208_v23, 0.0  ;;  %v5801_v25 = vmax.f32 %v5579_v20, %v5582_v58  ;;  %v14178_v24 = vld [vmem:[#allocation197_spill] sm:$0xff] }
 0x5ba   :  { %v5211_v55 = vpop.f32.mrf.mxu0  ;;  %v5591_v4 = vmax.f32 %v14178_v24, 0.0  ;;  %v14187_v24 = vld [vmem:[#allocation98_spill] sm:$0xff] }
 0x5bb   :  { %v5588_v2 = vmax.f32 %v5210_v60, 0.0  ;;  %v5212_v61 = vadd.f32 %v5211_v55, %v4859_v36  ;;  %7801 = vmatprep.mubr.bf16.mxu0 %v5910_v46  ;;  %v5802_v37 = vmax.f32 %v5580_v26, %v5583_v6  ;;  %v14179_v36 = vld [vmem:[#allocation199_spill] sm:$0xff]  ;;  %v4873_v60 = vadd.f32 %v12608_v44, %v11953_v21  ;;  %v14183_v55 = vld [vmem:[#allocation93_spill] sm:$0xff] }
 0x5bc   :  { %v12715_v12 = vpop.f32.mrf.mxu1  ;;  %6366 = vmatmul.mubr.bf16.gmra.mxu1 %v14175_v50  ;;  %v5215_v51 = vpop.f32.mrf.mxu0  ;;  %v5597_v0 = vmax.f32 %v14179_v36, 0.0  ;;  %v14184_v6 = vld [vmem:[#allocation37_spill] sm:$0xff]  ;;  %v14190_v36 = vld [vmem:[#allocation180_spill] sm:$0xff] }
 0x5bd   :  { %v5804_v49 = vmax.f32 %v5585_v34, %v5588_v2  ;;  %v5589_v32 = vmax.f32 %v5212_v61, 0.0  ;;  %v5216_v8 = vadd.f32 %v5215_v51, %v4863_v18  ;;  %v14182_v34 = vpack.c.bf16 %v14180_v42, %v14181_v16 }
 0x5be   :  { %v6177_v39 = vpop.f32.mrf.mxu1  ;;  %v5217_v3 = vpop.f32.mrf.mxu0  ;;  %v5592_v18 = vmax.f32 %v14183_v55, 0.0  ;;  %v5598_v2 = vmax.f32 %v14184_v6, 0.0  ;;  %v4875_v61 = vadd.f32 %v12617_v43, %v11962_v38  ;;  %v4879_v43 = vadd.f32 %v12625_v19, %v11962_v38  ;;  %v14188_v19 = vld [vmem:[#allocation178_spill] sm:$0xff] }
 0x5bf   :  { %v5805_v47 = vmax.f32 %v5586_v13, %v5589_v32  ;;  %v5218_v48 = vadd.f32 %v5217_v3, %v4865_v56  ;;  %v5912_v62 = vpack.c.bf16 %v5804_v49, %v5801_v25  ;;  %v5594_v11 = vmax.f32 %v5216_v8, 0.0 }
 0x5c0   :  { %v12726_v10 = vpop.f32.mrf.mxu1  ;;  %v5219_v33 = vpop.f32.mrf.mxu0  ;;  %v4887_v55 = vadd.f32 %v12644_v53, %v11953_v21 }
 0x5c1   :  { %v5913_v40 = vpack.c.bf16 %v5805_v47, %v5802_v37  ;;  %v5220_v57 = vadd.f32 %v5219_v33, %v4867_v14  ;;  %6373 = vmatprep.mubr.bf16.mxu1 %v5912_v62  ;;  %v5595_v59 = vmax.f32 %v5218_v48, 0.0  ;;  %v5807_v30 = vmax.f32 %v5591_v4, %v5594_v11  ;;  %v14185_v47 = vld [vmem:[#allocation201_spill] sm:$0xff]  ;;  %v14186_v62 = vld [vmem:[#allocation203_spill] sm:$0xff] }
 0x5c2   :  { %v6180_v23 = vpop.f32.mrf.mxu1  ;;  %v5221_v58 = vpop.f32.mrf.mxu0  ;;  %v5603_v48 = vmax.f32 %v14185_v47, 0.0  ;;  %v5609_v5 = vmax.f32 %v14186_v62, 0.0  ;;  %v14189_v4 = vpack.c.bf16 %v14187_v24, %v14188_v19  ;;  %v14197_v47 = vld [vmem:[#allocation182_spill] sm:$0xff]  ;;  %v14198_v62 = vld [vmem:[#allocation103_spill] sm:$0xff]  ;;  %v4897_v19 = vadd.f32 %v12667_v17, %v11953_v21 }
 0x5c3   :  { %v5600_v46 = vmax.f32 %v5220_v57, 0.0  ;;  %v5222_v15 = vadd.f32 %v5221_v58, %v4869_v35  ;;  %7802 = vmatmul.mubr.bf16.gmra.mxu0 %v5913_v40  ;;  %v5808_v56 = vmax.f32 %v5592_v18, %v5595_v59  ;;  %v4883_v35 = vadd.f32 %v12631_v22, %v11953_v21  ;;  %v14191_v58 = vld [vmem:[#allocation55_spill] sm:$0xff] }
 0x5c4   :  { %v12734_v20 = vpop.f32.mrf.mxu1  ;;  %6374 = vmatmul.mubr.bf16.gmra.mxu1 %v14182_v34  ;;  %v5225_v52 = vpop.f32.mrf.mxu0  ;;  %v4885_v59 = vadd.f32 %v12640_v28, %v11962_v38  ;;  %v4889_v28 = vadd.f32 %v12648_v1, %v11962_v38  ;;  %v14195_v1 = vld [vmem:[#allocation44_spill] sm:$0xff] }
 0x5c5   :  { %v5810_v44 = vmax.f32 %v5597_v0, %v5600_v46  ;;  %v5601_v50 = vmax.f32 %v5222_v15, 0.0  ;;  %v5226_v54 = vadd.f32 %v5225_v52, %v4873_v60  ;;  %v5604_v0 = vmax.f32 %v14190_v36, 0.0 }
 0x5c6   :  { %v6185_v26 = vpop.f32.mrf.mxu1  ;;  %v5227_v13 = vpop.f32.mrf.mxu0  ;;  %v5610_v60 = vmax.f32 %v14191_v58, 0.0 }
 0x5c7   :  { %v5811_v51 = vmax.f32 %v5598_v2, %v5601_v50  ;;  %v5228_v25 = vadd.f32 %v5227_v13, %v4875_v61  ;;  %v5915_v32 = vpack.c.bf16 %v5810_v44, %v5807_v30  ;;  %v5606_v39 = vmax.f32 %v5226_v54, 0.0  ;;  %v14192_v13 = vld [vmem:[#allocation205_spill] sm:$0xff] }
 0x5c8   :  { %v12745_v49 = vpop.f32.mrf.mxu1  ;;  %v5229_v8 = vpop.f32.mrf.mxu0 }
 0x5c9   :  { %v5230_v14 = vadd.f32 %v5229_v8, %v4877_v7  ;;  %6381 = vmatprep.mubr.bf16.mxu1 %v5915_v32  ;;  %v5916_v37 = vpack.c.bf16 %v5811_v51, %v5808_v56  ;;  %v5607_v40 = vmax.f32 %v5228_v25, 0.0  ;;  %v5813_v15 = vmax.f32 %v5603_v48, %v5606_v39  ;;  %v14193_v51 = vld [vmem:[#allocation207_spill] sm:$0xff] }
 0x5ca   :  { %v6188_v3 = vpop.f32.mrf.mxu1  ;;  %v5231_v33 = vpop.f32.mrf.mxu0  ;;  %v5615_v56 = vmax.f32 %v14192_v13, 0.0  ;;  %v5621_v53 = vmax.f32 %v14193_v51, 0.0  ;;  %v4893_v32 = vadd.f32 %v12654_v45, %v11953_v21  ;;  %v5616_v48 = vmax.f32 %v14197_v47, 0.0  ;;  %v14200_v21 = vld [vmem:[#allocation210_spill] sm:$0xff] }
 0x5cb   :  { %v5612_v11 = vmax.f32 %v5230_v14, 0.0  ;;  %v5232_v57 = vadd.f32 %v5231_v33, %v4879_v43  ;;  %7805 = vmatprep.mubr.bf16.mxu0 %v5916_v37  ;;  %v5814_v6 = vmax.f32 %v5604_v0, %v5607_v40  ;;  %v14194_v3 = vld [vmem:[#allocation184_spill] sm:$0xff]  ;;  %v4895_v33 = vadd.f32 %v12663_v9, %v11962_v38 }
 0x5cc   :  { %v12753_v23 = vpop.f32.mrf.mxu1  ;;  %6382 = vmatmul.mubr.bf16.gmra.mxu1 %v14189_v4  ;;  %v5235_v46 = vpop.f32.mrf.mxu0  ;;  %v14196_v37 = vpack.c.bf16 %v14194_v3, %v14195_v1  ;;  %v4899_v9 = vadd.f32 %v12671_v27, %v11962_v38  ;;  %v5633_v17 = vmax.f32 %v14200_v21, 0.0  ;;  %v14201_v38 = vld [vmem:[#allocation186_spill] sm:$0xff]  ;;  %v14202_v27 = vld [vmem:[#allocation61_spill] sm:$0xff] }
 0x5cd   :  { %v5816_v22 = vmax.f32 %v5609_v5, %v5612_v11  ;;  %v5613_v42 = vmax.f32 %v5232_v57, 0.0  ;;  %v5236_v16 = vadd.f32 %v5235_v46, %v4883_v35  ;;  %v5622_v5 = vmax.f32 %v14198_v62, 0.0 }
 0x5ce   :  { %v6193_v34 = vpop.f32.mrf.mxu1  ;;  %v5237_v18 = vpop.f32.mrf.mxu0 }
 0x5cf   :  { %v5817_v2 = vmax.f32 %v5610_v60, %v5613_v42  ;;  %v5238_v61 = vadd.f32 %v5237_v18, %v4885_v59  ;;  %v5918_v30 = vpack.c.bf16 %v5816_v22, %v5813_v15  ;;  %v5618_v54 = vmax.f32 %v5236_v16, 0.0  ;;  %v14199_v34 = vld [vmem:[#allocation208_spill] sm:$0xff] }
 0x5d0   :  { %v12764_v52 = vpop.f32.mrf.mxu1  ;;  %v5239_v44 = vpop.f32.mrf.mxu0 }
 0x5d1   :  { %v5919_v50 = vpack.c.bf16 %v5817_v2, %v5814_v6  ;;  %v5240_v26 = vadd.f32 %v5239_v44, %v4887_v55  ;;  %6389 = vmatprep.mubr.bf16.mxu1 %v5918_v30  ;;  %v5619_v8 = vmax.f32 %v5238_v61, 0.0  ;;  %v5819_v40 = vmax.f32 %v5615_v56, %v5618_v54  ;;  %v12792_v6 = vld [vmem:[%s12997_s6] ss:$0 sm:$0xff] }
 0x5d2   :  { %v6196_v7 = vpop.f32.mrf.mxu1  ;;  %v5241_v25 = vpop.f32.mrf.mxu0  ;;  %v5627_v55 = vmax.f32 %v14199_v34, 0.0  ;;  %v6163_v47 = vadd.f32 %v12792_v6, %v12688_v31  ;;  %v6168_v62 = vadd.f32 %v12792_v6, %v12696_v41  ;;  %v6184_v34 = vadd.f32 %v12792_v6, %v12734_v20 }
 0x5d3   :  { %v5624_v43 = vmax.f32 %v5240_v26, 0.0  ;;  %v5242_v39 = vadd.f32 %v5241_v25, %v4889_v28  ;;  %7806 = vmatmul.mubr.bf16.gmra.mxu0 %v5919_v50  ;;  %v5820_v36 = vmax.f32 %v5616_v48, %v5619_v8  ;;  %v14203_v28 = vpack.c.bf16 %v14201_v38, %v14202_v27  ;;  %v14204_v50 = vld [vmem:[#allocation42_spill] sm:$0xff]  ;;  %v14205_v7 = vld [vmem:[#allocation188_spill] sm:$0xff] }
 0x5d4   :  { %v12772_v14 = vpop.f32.mrf.mxu1  ;;  %6390 = vmatmul.mubr.bf16.gmra.mxu1 %v14196_v37  ;;  %v5245_v35 = vpop.f32.mrf.mxu0  ;;  %v5628_v54 = vmax.f32 %v14204_v50, 0.0  ;;  %v5634_v13 = vmax.f32 %v14205_v7, 0.0  ;;  %v6192_v20 = vadd.f32 %v12792_v6, %v12753_v23 }
 0x5d5   :  { %v5822_v45 = vmax.f32 %v5621_v53, %v5624_v43  ;;  %v5625_v11 = vmax.f32 %v5242_v39, 0.0  ;;  %v5246_v57 = vadd.f32 %v5245_v35, %v4893_v32  ;;  %v6160_v32 = vadd.f32 %v12792_v6, %v12677_v29 }
 0x5d6   :  { %v6201_v24 = vpop.f32.mrf.mxu1  ;;  %v5247_v4 = vpop.f32.mrf.mxu0  ;;  %v6171_v43 = vadd.f32 %v12792_v6, %v12707_v63 }
 0x5d7   :  { %v5823_v0 = vmax.f32 %v5622_v5, %v5625_v11  ;;  %v5248_v58 = vadd.f32 %v5247_v4, %v4895_v33  ;;  %v5921_v59 = vpack.c.bf16 %v5822_v45, %v5819_v40  ;;  %v5630_v15 = vmax.f32 %v5246_v57, 0.0  ;;  %v14206_v11 = vld [vmem:[#allocation64_spill] sm:$0xff] }
 0x5d8   :  { %v12783_v60 = vpop.f32.mrf.mxu1  ;;  %v5249_v46 = vpop.f32.mrf.mxu0  ;;  %v14207_v57 = vld [vmem:[#allocation108_spill] sm:$0xff] }
 0x5d9   :  { %v5250_v22 = vadd.f32 %v5249_v46, %v4897_v19  ;;  %6397 = vmatprep.mubr.bf16.mxu1 %v5921_v59  ;;  %v5922_v16 = vpack.c.bf16 %v5823_v0, %v5820_v36  ;;  %v5631_v2 = vmax.f32 %v5248_v58, 0.0  ;;  %v5825_v56 = vmax.f32 %v5627_v55, %v5630_v15 }
 0x5da   :  { %v6204_v42 = vpop.f32.mrf.mxu1  ;;  %v5251_v18 = vpop.f32.mrf.mxu0  ;;  %v14208_v24 = vpack.c.bf16 %v14206_v11, %v14207_v57  ;;  %v6176_v59 = vadd.f32 %v12792_v6, %v12715_v12  ;;  %v6187_v46 = vadd.f32 %v12792_v6, %v12745_v49 }
 0x5db   :  { %v5636_v61 = vmax.f32 %v5250_v22, 0.0  ;;  %v5252_v30 = vadd.f32 %v5251_v18, %v4899_v9  ;;  %7809 = vmatprep.mubr.bf16.mxu0 %v5922_v16  ;;  %v5826_v39 = vmax.f32 %v5628_v54, %v5631_v2  ;;  %v6179_v42 = vadd.f32 %v12792_v6, %v12726_v10 }
 0x5dc   :  { %v12794_v44 = vpop.f32.mrf.mxu1  ;;  %6398 = vmatmul.mubr.bf16.gmra.mxu1 %v14203_v28  ;;  %v7751_v26 = vpop.f32.mrf.mxu0  ;;  %v6203_v54 = vadd.f32 %v12792_v6, %v12783_v60 }
 0x5dd   :  { %v5828_v51 = vmax.f32 %v5633_v17, %v5636_v61  ;;  %v5637_v53 = vmax.f32 %v5252_v30, 0.0  ;;  %v6457_v45 = vadd.f32 %v7751_v26, %v6168_v62 }
 0x5de   :  { %v6209_v25 = vpop.f32.mrf.mxu1  ;;  %v6448_v8 = vpop.f32.mrf.mxu0 }
 0x5df   :  { %v5829_v3 = vmax.f32 %v5634_v13, %v5637_v53  ;;  %v5924_v37 = vpack.c.bf16 %v5828_v51, %v5825_v56  ;;  %v6449_v33 = vadd.f32 %v6448_v8, %v6160_v32  ;;  %v6705_v9 = vmax.f32 %v6457_v45, 0.0 }
 0x5e0   :  { %v12805_v1 = vpop.f32.mrf.mxu1  ;;  %v7752_v48 = vpop.f32.mrf.mxu0  ;;  %v6195_v56 = vadd.f32 %v12792_v6, %v12764_v52  ;;  %v6200_v53 = vadd.f32 %v12792_v6, %v12772_v14  ;;  %v6208_v14 = vadd.f32 %v12792_v6, %v12794_v44 }
 0x5e1   :  { %v5925_v5 = vpack.c.bf16 %v5829_v3, %v5826_v39  ;;  %v6460_v29 = vadd.f32 %v7752_v48, %v6171_v43  ;;  %6405 = vmatprep.mubr.bf16.mxu1 %v5924_v37  ;;  %v6703_v4 = vmax.f32 %v6449_v33, 0.0  ;;  %v6211_v45 = vadd.f32 %v12792_v6, %v12805_v1 }
 0x5e2   :  { %v6212_v35 = vpop.f32.mrf.mxu1  ;;  %v6451_v40 = vpop.f32.mrf.mxu0 }
 0x5e3   :  { %v6452_v19 = vadd.f32 %v6451_v40, %v6163_v47  ;;  %7810 = vmatmul.mubr.bf16.gmra.mxu0 %v5925_v5  ;;  %v6706_v36 = vmax.f32 %v6460_v29, 0.0 }
 0x5e4   :  { %v12811_v63 = vpop.f32.mrf.mxu1  ;;  %6406 = vmatmul.mubr.bf16.gmra.mxu1 %v14208_v24  ;;  %v7755_v31 = vpop.f32.mrf.mxu0 }
 0x5e5   :  { %v6704_v0 = vmax.f32 %v6452_v19, 0.0  ;;  %v6768_v55 = vpack.c.bf16 %v6706_v36, %v6705_v9  ;;  %v6473_v2 = vadd.f32 %v7755_v31, %v6184_v34  ;;  %v6216_v57 = vadd.f32 %v12792_v6, %v12811_v63 }
 0x5e6   :  { %v6217_v41 = vpop.f32.mrf.mxu1  ;;  %v6464_v58 = vpop.f32.mrf.mxu0 }
 0x5e7   :  { %v6767_v15 = vpack.c.bf16 %v6704_v0, %v6703_v4  ;;  %v6465_v18 = vadd.f32 %v6464_v58, %v6176_v59  ;;  %v6709_v26 = vmax.f32 %v6473_v2, 0.0 }
 0x5e8   :  { %v6218_v22 = vpop.f32.mrf.mxu1  ;;  %v7756_v16 = vpop.f32.mrf.mxu0 }
 0x5e9   :  { %v6476_v17 = vadd.f32 %v7756_v16, %v6187_v46  ;;  %7821 = vmatprep.mubr.msk.bf16.mxu1 %vm6838_vm1, %v6767_v15  ;;  %v6707_v38 = vmax.f32 %v6465_v18, 0.0  ;;  %v6219_v33 = vadd.f32 %v12792_v6, %v6218_v22 }
 0x5ea   :  { %v6220_v21 = vpop.f32.mrf.mxu1  ;;  %v6467_v12 = vpop.f32.mrf.mxu0 }
 0x5eb   :  { %v6468_v49 = vadd.f32 %v6467_v12, %v6179_v42  ;;  %v6710_v27 = vmax.f32 %v6476_v17, 0.0 }
 0x5ec   :  { %v6223_v61 = vpop.f32.mrf.mxu1  ;;  %7822 = vmatmul.mubr.msk.bf16.vlgmr.msra.gmra.mxu1 %vm6838_vm1, %v6768_v55  ;;  %v7759_v30 = vpop.f32.mrf.mxu0 }
 0x5ed   :  { %v6708_v10 = vmax.f32 %v6468_v49, 0.0  ;;  %v6770_v25 = vpack.c.bf16 %v6710_v27, %v6709_v26  ;;  %v6489_v39 = vadd.f32 %v7759_v30, %v6200_v53  ;;  %v6224_v63 = vadd.f32 %v12792_v6, %v6223_v61 }
 0x5ee   :  { %v6225_v28 = vpop.f32.mrf.mxu1  ;;  %v6480_v50 = vpop.f32.mrf.mxu0 }
 0x5ef   :  { %v6769_v7 = vpack.c.bf16 %v6708_v10, %v6707_v38  ;;  %v6481_v32 = vadd.f32 %v6480_v50, %v6192_v20  ;;  %v6713_v35 = vmax.f32 %v6489_v39, 0.0 }
 0x5f0   :  { %v6226_v13 = vpop.f32.mrf.mxu1  ;;  %v7760_v51 = vpop.f32.mrf.mxu0 }
 0x5f1   :  { %v6492_v43 = vadd.f32 %v7760_v51, %v6203_v54  ;;  %7825 = vmatprep.mubr.msk.bf16.mxu1 %vm6838_vm1, %v6769_v7  ;;  %v6711_v47 = vmax.f32 %v6481_v32, 0.0  ;;  %v6227_v55 = vadd.f32 %v12792_v6, %v6226_v13 }
 0x5f2   :  { %v6228_v8 = vpop.f32.mrf.mxu1  ;;  %v6483_v23 = vpop.f32.mrf.mxu0 }
 0x5f3   :  { %v6484_v60 = vadd.f32 %v6483_v23, %v6195_v56  ;;  %v6714_v48 = vmax.f32 %v6492_v43, 0.0 }
 0x5f4   :  { %v6231_v3 = vpop.f32.mrf.mxu1  ;;  %7826 = vmatmul.mubr.msk.bf16.gmra.mxu1 %vm6838_vm1, %v6770_v25  ;;  %v7763_v37 = vpop.f32.mrf.mxu0 }
 0x5f5   :  { %v6712_v52 = vmax.f32 %v6484_v60, 0.0  ;;  %v6772_v24 = vpack.c.bf16 %v6714_v48, %v6713_v35  ;;  %v6505_v44 = vadd.f32 %v7763_v37, %v6216_v57  ;;  %v6232_v21 = vadd.f32 %v12792_v6, %v6231_v3 }
 0x5f6   :  { %v6233_v62 = vpop.f32.mrf.mxu1  ;;  %v6496_v5 = vpop.f32.mrf.mxu0 }
 0x5f7   :  { %v6771_v29 = vpack.c.bf16 %v6712_v52, %v6711_v47  ;;  %v6497_v19 = vadd.f32 %v6496_v5, %v6208_v14  ;;  %v6717_v22 = vmax.f32 %v6505_v44, 0.0 }
 0x5f8   :  { %v6234_v40 = vpop.f32.mrf.mxu1  ;;  %v7764_v11 = vpop.f32.mrf.mxu0 }
 0x5f9   :  { %v6508_v4 = vadd.f32 %v7764_v11, %v6219_v33  ;;  %7829 = vmatprep.mubr.msk.bf16.mxu1 %vm6838_vm1, %v6771_v29  ;;  %v6715_v59 = vmax.f32 %v6497_v19, 0.0  ;;  %v6235_v42 = vadd.f32 %v12792_v6, %v6234_v40 }
 0x5fa   :  { %v6236_v31 = vpop.f32.mrf.mxu1  ;;  %v6499_v36 = vpop.f32.mrf.mxu0 }
 0x5fb   :  { %v6500_v41 = vadd.f32 %v6499_v36, %v6211_v45  ;;  %v6718_v46 = vmax.f32 %v6508_v4, 0.0 }
 0x5fc   :  { %v6239_v0 = vpop.f32.mrf.mxu1  ;;  %7830 = vmatmul.mubr.msk.bf16.gmra.mxu1 %vm6838_vm1, %v6772_v24  ;;  %v7767_v58 = vpop.f32.mrf.mxu0 }
 0x5fd   :  { %v6716_v1 = vmax.f32 %v6500_v41, 0.0  ;;  %v6774_v17 = vpack.c.bf16 %v6718_v46, %v6717_v22  ;;  %v6521_v38 = vadd.f32 %v7767_v58, %v6232_v21  ;;  %v6240_v7 = vadd.f32 %v12792_v6, %v6239_v0 }
 0x5fe   :  { %v6241_v9 = vpop.f32.mrf.mxu1  ;;  %v6512_v15 = vpop.f32.mrf.mxu0 }
 0x5ff   :  { %v6773_v16 = vpack.c.bf16 %v6716_v1, %v6715_v59  ;;  %v6513_v12 = vadd.f32 %v6512_v15, %v6224_v63  ;;  %v6721_v13 = vmax.f32 %v6521_v38, 0.0 }
 0x600   :  { %v6242_v34 = vpop.f32.mrf.mxu1  ;;  %v7768_v18 = vpop.f32.mrf.mxu0 }
 0x601   :  { %v6524_v49 = vadd.f32 %v7768_v18, %v6235_v42  ;;  %7833 = vmatprep.mubr.msk.bf16.mxu1 %vm6838_vm1, %v6773_v16  ;;  %v6719_v28 = vmax.f32 %v6513_v12, 0.0  ;;  %v6243_v8 = vadd.f32 %v12792_v6, %v6242_v34 }
 0x602   :  { %v6244_v2 = vpop.f32.mrf.mxu1  ;;  %v6515_v30 = vpop.f32.mrf.mxu0 }
 0x603   :  { %v6516_v61 = vadd.f32 %v6515_v30, %v6227_v55  ;;  %v6722_v50 = vmax.f32 %v6524_v49, 0.0 }
 0x604   :  { %v6247_v27 = vpop.f32.mrf.mxu1  ;;  %7834 = vmatmul.mubr.msk.bf16.gmra.mxu1 %vm6838_vm1, %v6774_v17  ;;  %v7771_v10 = vpop.f32.mrf.mxu0 }
 0x605   :  { %v6720_v20 = vmax.f32 %v6516_v61, 0.0  ;;  %v6248_v56 = vadd.f32 %v12792_v6, %v6247_v27  ;;  %v6776_v43 = vpack.c.bf16 %v6722_v50, %v6721_v13 }
 0x606   :  { %v6249_v54 = vpop.f32.mrf.mxu1  ;;  %v6528_v26 = vpop.f32.mrf.mxu0 }
 0x607   :  { %v6775_v51 = vpack.c.bf16 %v6720_v20, %v6719_v28  ;;  %v6529_v23 = vadd.f32 %v6528_v26, %v6240_v7  ;;  %v6537_v37 = vadd.f32 %v7771_v10, %v6248_v56 }
 0x608   :  { %v6250_v53 = vpop.f32.mrf.mxu1  ;;  %v7772_v32 = vpop.f32.mrf.mxu0 }
 0x609   :  { %v6251_v25 = vadd.f32 %v12792_v6, %v6250_v53  ;;  %7837 = vmatprep.mubr.msk.bf16.mxu1 %vm6838_vm1, %v6775_v51  ;;  %v6723_v52 = vmax.f32 %v6529_v23, 0.0  ;;  %v6725_v33 = vmax.f32 %v6537_v37, 0.0 }
 0x60a   :  { %v6252_v39 = vpop.f32.mrf.mxu1  ;;  %v6531_v60 = vpop.f32.mrf.mxu0 }
 0x60b   :  { %v6540_v3 = vadd.f32 %v7772_v32, %v6251_v25  ;;  %v6532_v48 = vadd.f32 %v6531_v60, %v6243_v8 }
 0x60c   :  { %v6255_v47 = vpop.f32.mrf.mxu1  ;;  %7838 = vmatmul.mubr.msk.bf16.gmra.mxu1 %vm6838_vm1, %v6776_v43 }
 0x60d   :  { %v6726_v62 = vmax.f32 %v6540_v3, 0.0  ;;  %v6724_v5 = vmax.f32 %v6532_v48, 0.0  ;;  %v6256_v4 = vadd.f32 %v12792_v6, %v6255_v47 }
 0x60e   :  { %v6257_v14 = vpop.f32.mrf.mxu1 }
 0x60f   :  { %v6777_v35 = vpack.c.bf16 %v6724_v5, %v6723_v52  ;;  %v6778_v40 = vpack.c.bf16 %v6726_v62, %v6725_v33 }
 0x610   :  { %v6258_v29 = vpop.f32.mrf.mxu1 }
 0x611   :  { %7841 = vmatprep.mubr.msk.bf16.mxu1 %vm6838_vm1, %v6777_v35  ;;  %v6259_v0 = vadd.f32 %v12792_v6, %v6258_v29 }
 0x612   :  { %v6260_v45 = vpop.f32.mrf.mxu1 }
 0x613   :  { %v7775_v57 = vpop.f32.mrf.mxu0 }
 0x614   :  { %v6263_v11 = vpop.f32.mrf.mxu1  ;;  %7842 = vmatmul.mubr.msk.bf16.gmra.mxu1 %vm6838_vm1, %v6778_v40 }
 0x615   :  { %v6264_v24 = vadd.f32 %v12792_v6, %v6263_v11  ;;  %v6544_v31 = vpop.f32.mrf.mxu0 }
 0x616   :  { %v6265_v19 = vpop.f32.mrf.mxu1  ;;  %v6545_v41 = vadd.f32 %v6544_v31, %v6256_v4 }
 0x617   :  { %v7776_v44 = vpop.f32.mrf.mxu0  ;;  %v6553_v59 = vadd.f32 %v7775_v57, %v6264_v24 }
 0x618   :  { %v6266_v36 = vpop.f32.mrf.mxu1  ;;  %v6727_v22 = vmax.f32 %v6545_v41, 0.0 }
 0x619   :  { %v6267_v58 = vadd.f32 %v12792_v6, %v6266_v36  ;;  %v6547_v1 = vpop.f32.mrf.mxu0  ;;  %v6729_v34 = vmax.f32 %v6553_v59, 0.0 }
 0x61a   :  { %v6268_v46 = vpop.f32.mrf.mxu1  ;;  %v6548_v15 = vadd.f32 %v6547_v1, %v6259_v0 }
 0x61b   :  { %v6556_v9 = vadd.f32 %v7776_v44, %v6267_v58 }
 0x61c   :  { %v6271_v63 = vpop.f32.mrf.mxu1  ;;  %v6728_v16 = vmax.f32 %v6548_v15, 0.0 }
 0x61d   :  { %v6730_v42 = vmax.f32 %v6556_v9, 0.0  ;;  %v6272_v61 = vadd.f32 %v12792_v6, %v6271_v63 }
 0x61e   :  { %v6273_v55 = vpop.f32.mrf.mxu1  ;;  %v6779_v18 = vpack.c.bf16 %v6728_v16, %v6727_v22 }
 0x61f   :  { %v6780_v21 = vpack.c.bf16 %v6730_v42, %v6729_v34 }
 0x620   :  { %v6274_v17 = vpop.f32.mrf.mxu1  ;;  %7845 = vmatprep.mubr.msk.bf16.mxu1 %vm6838_vm1, %v6779_v18 }
 0x621   :  { %7846 = vmatmul.mubr.msk.bf16.gmra.mxu1 %vm6838_vm1, %v6780_v21  ;;  %v6275_v50 = vadd.f32 %v12792_v6, %v6274_v17 }
 0x622   :  { %v6276_v12 = vpop.f32.mrf.mxu1 }
 0x623   :  { %v7779_v49 = vpop.f32.mrf.mxu0 }
 0x624   :  { %v6279_v2 = vpop.f32.mrf.mxu1 }
 0x625   :  { %v6280_v30 = vadd.f32 %v12792_v6, %v6279_v2  ;;  %v6560_v27 = vpop.f32.mrf.mxu0 }
 0x626   :  { %v6281_v38 = vpop.f32.mrf.mxu1  ;;  %v6561_v20 = vadd.f32 %v6560_v27, %v6272_v61 }
 0x627   :  { %v7780_v28 = vpop.f32.mrf.mxu0  ;;  %v6569_v26 = vadd.f32 %v7779_v49, %v6280_v30 }
 0x628   :  { %v6282_v10 = vpop.f32.mrf.mxu1  ;;  %v6731_v25 = vmax.f32 %v6561_v20, 0.0 }
 0x629   :  { %v6283_v54 = vadd.f32 %v12792_v6, %v6282_v10  ;;  %v6563_v13 = vpop.f32.mrf.mxu0  ;;  %v6733_v43 = vmax.f32 %v6569_v26, 0.0 }
 0x62a   :  { %v6284_v7 = vpop.f32.mrf.mxu1  ;;  %v6564_v51 = vadd.f32 %v6563_v13, %v6275_v50 }
 0x62b   :  { %v6572_v56 = vadd.f32 %v7780_v28, %v6283_v54 }
 0x62c   :  { %v6287_v53 = vpop.f32.mrf.mxu1  ;;  %v6732_v8 = vmax.f32 %v6564_v51, 0.0 }
 0x62d   :  { %v6734_v32 = vmax.f32 %v6572_v56, 0.0  ;;  %v6288_v14 = vadd.f32 %v12792_v6, %v6287_v53 }
 0x62e   :  { %v6289_v23 = vpop.f32.mrf.mxu1  ;;  %v6781_v39 = vpack.c.bf16 %v6732_v8, %v6731_v25 }
 0x62f   :  { %v6782_v3 = vpack.c.bf16 %v6734_v32, %v6733_v43 }
 0x630   :  { %v6290_v60 = vpop.f32.mrf.mxu1  ;;  %7849 = vmatprep.mubr.msk.bf16.mxu1 %vm6838_vm1, %v6781_v39 }
 0x631   :  { %7850 = vmatmul.mubr.msk.bf16.gmra.mxu1 %vm6838_vm1, %v6782_v3  ;;  %v6291_v29 = vadd.f32 %v12792_v6, %v6290_v60 }
 0x632   :  { %v6292_v37 = vpop.f32.mrf.mxu1 }
 0x633   :  { %v7783_v48 = vpop.f32.mrf.mxu0 }
 0x634   :  { %v6295_v47 = vpop.f32.mrf.mxu1 }
 0x635   :  { %v6296_v52 = vadd.f32 %v12792_v6, %v6295_v47  ;;  %v6576_v5 = vpop.f32.mrf.mxu0 }
 0x636   :  { %v6297_v62 = vpop.f32.mrf.mxu1  ;;  %v6577_v40 = vadd.f32 %v6576_v5, %v6288_v14 }
 0x637   :  { %v7784_v35 = vpop.f32.mrf.mxu0  ;;  %v6585_v11 = vadd.f32 %v7783_v48, %v6296_v52 }
 0x638   :  { %v6298_v33 = vpop.f32.mrf.mxu1  ;;  %v6735_v36 = vmax.f32 %v6577_v40, 0.0 }
 0x639   :  { %v6299_v45 = vadd.f32 %v12792_v6, %v6298_v33  ;;  %v6579_v24 = vpop.f32.mrf.mxu0  ;;  %v6737_v41 = vmax.f32 %v6585_v11, 0.0 }
 0x63a   :  { %v6300_v57 = vpop.f32.mrf.mxu1  ;;  %v6580_v31 = vadd.f32 %v6579_v24, %v6291_v29 }
 0x63b   :  { %v6588_v19 = vadd.f32 %v7784_v35, %v6299_v45 }
 0x63c   :  { %v6303_v4 = vpop.f32.mrf.mxu1  ;;  %v6736_v0 = vmax.f32 %v6580_v31, 0.0 }
 0x63d   :  { %v6738_v44 = vmax.f32 %v6588_v19, 0.0  ;;  %v6304_v34 = vadd.f32 %v12792_v6, %v6303_v4 }
 0x63e   :  { %v6305_v58 = vpop.f32.mrf.mxu1  ;;  %v6783_v59 = vpack.c.bf16 %v6736_v0, %v6735_v36 }
 0x63f   :  { %v6784_v46 = vpack.c.bf16 %v6738_v44, %v6737_v41 }
 0x640   :  { %v6306_v1 = vpop.f32.mrf.mxu1  ;;  %7853 = vmatprep.mubr.msk.bf16.mxu1 %vm6838_vm1, %v6783_v59 }
 0x641   :  { %7854 = vmatmul.mubr.msk.bf16.gmra.mxu1 %vm6838_vm1, %v6784_v46  ;;  %v6307_v21 = vadd.f32 %v12792_v6, %v6306_v1 }
 0x642   :  { %v6308_v9 = vpop.f32.mrf.mxu1 }
 0x643   :  { %v7787_v63 = vpop.f32.mrf.mxu0 }
 0x644   :  { %v6311_v15 = vpop.f32.mrf.mxu1 }
 0x645   :  { %v6312_v22 = vadd.f32 %v12792_v6, %v6311_v15  ;;  %v6592_v16 = vpop.f32.mrf.mxu0 }
 0x646   :  { %v6313_v42 = vpop.f32.mrf.mxu1  ;;  %v6593_v17 = vadd.f32 %v6592_v16, %v6304_v34 }
 0x647   :  { %v7788_v18 = vpop.f32.mrf.mxu0  ;;  %v6601_v2 = vadd.f32 %v7787_v63, %v6312_v22 }
 0x648   :  { %v6314_v55 = vpop.f32.mrf.mxu1  ;;  %v6739_v10 = vmax.f32 %v6593_v17, 0.0 }
 0x649   :  { %v6315_v12 = vadd.f32 %v12792_v6, %v6314_v55  ;;  %v6595_v30 = vpop.f32.mrf.mxu0  ;;  %v6741_v20 = vmax.f32 %v6601_v2, 0.0 }
 0x64a   :  { %v6316_v49 = vpop.f32.mrf.mxu1  ;;  %v6596_v27 = vadd.f32 %v6595_v30, %v6307_v21 }
 0x64b   :  { %v6604_v38 = vadd.f32 %v7788_v18, %v6315_v12 }
 0x64c   :  { %v6319_v61 = vpop.f32.mrf.mxu1  ;;  %v6740_v50 = vmax.f32 %v6596_v27, 0.0 }
 0x64d   :  { %v6742_v28 = vmax.f32 %v6604_v38, 0.0  ;;  %v6320_v43 = vadd.f32 %v12792_v6, %v6319_v61 }
 0x64e   :  { %v6321_v54 = vpop.f32.mrf.mxu1  ;;  %v6785_v26 = vpack.c.bf16 %v6740_v50, %v6739_v10 }
 0x64f   :  { %v6786_v7 = vpack.c.bf16 %v6742_v28, %v6741_v20 }
 0x650   :  { %v6322_v13 = vpop.f32.mrf.mxu1  ;;  %7857 = vmatprep.mubr.msk.bf16.mxu1 %vm6838_vm1, %v6785_v26 }
 0x651   :  { %7858 = vmatmul.mubr.msk.bf16.gmra.mxu1 %vm6838_vm1, %v6786_v7  ;;  %v6323_v3 = vadd.f32 %v12792_v6, %v6322_v13 }
 0x652   :  { %v6324_v56 = vpop.f32.mrf.mxu1 }
 0x653   :  { %v7791_v53 = vpop.f32.mrf.mxu0 }
 0x654   :  { %v6327_v51 = vpop.f32.mrf.mxu1 }
 0x655   :  { %v6328_v25 = vadd.f32 %v12792_v6, %v6327_v51  ;;  %v6608_v8 = vpop.f32.mrf.mxu0 }
 0x656   :  { %v6329_v32 = vpop.f32.mrf.mxu1  ;;  %v6609_v60 = vadd.f32 %v6608_v8, %v6320_v43 }
 0x657   :  { %v7792_v39 = vpop.f32.mrf.mxu0  ;;  %v6617_v47 = vadd.f32 %v7791_v53, %v6328_v25 }
 0x658   :  { %v6330_v23 = vpop.f32.mrf.mxu1  ;;  %v6743_v33 = vmax.f32 %v6609_v60, 0.0 }
 0x659   :  { %v6331_v37 = vadd.f32 %v12792_v6, %v6330_v23  ;;  %v6611_v52 = vpop.f32.mrf.mxu0  ;;  %v6745_v40 = vmax.f32 %v6617_v47, 0.0 }
 0x65a   :  { %v6332_v48 = vpop.f32.mrf.mxu1  ;;  %v6612_v5 = vadd.f32 %v6611_v52, %v6323_v3 }
 0x65b   :  { %v6620_v62 = vadd.f32 %v7792_v39, %v6331_v37 }
 0x65c   :  { %v6335_v14 = vpop.f32.mrf.mxu1  ;;  %v6744_v29 = vmax.f32 %v6612_v5, 0.0 }
 0x65d   :  { %v6746_v35 = vmax.f32 %v6620_v62, 0.0  ;;  %v6336_v41 = vadd.f32 %v12792_v6, %v6335_v14 }
 0x65e   :  { %v6337_v45 = vpop.f32.mrf.mxu1  ;;  %v6787_v11 = vpack.c.bf16 %v6744_v29, %v6743_v33 }
 0x65f   :  { %v6788_v57 = vpack.c.bf16 %v6746_v35, %v6745_v40 }
 0x660   :  { %v6338_v24 = vpop.f32.mrf.mxu1  ;;  %7861 = vmatprep.mubr.msk.bf16.mxu1 %vm6838_vm1, %v6787_v11 }
 0x661   :  { %7862 = vmatmul.mubr.msk.bf16.gmra.mxu1 %vm6838_vm1, %v6788_v57  ;;  %v6339_v46 = vadd.f32 %v12792_v6, %v6338_v24 }
 0x662   :  { %v6340_v19 = vpop.f32.mrf.mxu1 }
 0x663   :  { %v7795_v4 = vpop.f32.mrf.mxu0 }
 0x664   :  { %v6343_v31 = vpop.f32.mrf.mxu1 }
 0x665   :  { %v6344_v36 = vadd.f32 %v12792_v6, %v6343_v31  ;;  %v6624_v0 = vpop.f32.mrf.mxu0 }
 0x666   :  { %v6345_v44 = vpop.f32.mrf.mxu1  ;;  %v6625_v1 = vadd.f32 %v6624_v0, %v6336_v41 }
 0x667   :  { %v7796_v59 = vpop.f32.mrf.mxu0  ;;  %v6633_v15 = vadd.f32 %v7795_v4, %v6344_v36 }
 0x668   :  { %v6346_v58 = vpop.f32.mrf.mxu1  ;;  %v6747_v55 = vmax.f32 %v6625_v1, 0.0 }
 0x669   :  { %v6347_v9 = vadd.f32 %v12792_v6, %v6346_v58  ;;  %v6627_v22 = vpop.f32.mrf.mxu0  ;;  %v6749_v17 = vmax.f32 %v6633_v15, 0.0 }
 0x66a   :  { %v6348_v63 = vpop.f32.mrf.mxu1  ;;  %v6628_v16 = vadd.f32 %v6627_v22, %v6339_v46 }
 0x66b   :  { %v6636_v42 = vadd.f32 %v7796_v59, %v6347_v9 }
 0x66c   :  { %v6351_v34 = vpop.f32.mrf.mxu1  ;;  %v6748_v21 = vmax.f32 %v6628_v16, 0.0 }
 0x66d   :  { %v6750_v18 = vmax.f32 %v6636_v42, 0.0  ;;  %v6352_v20 = vadd.f32 %v12792_v6, %v6351_v34 }
 0x66e   :  { %v6353_v12 = vpop.f32.mrf.mxu1  ;;  %v6789_v2 = vpack.c.bf16 %v6748_v21, %v6747_v55 }
 0x66f   :  { %v6790_v49 = vpack.c.bf16 %v6750_v18, %v6749_v17 }
 0x670   :  { %v6354_v30 = vpop.f32.mrf.mxu1  ;;  %7865 = vmatprep.mubr.msk.bf16.mxu1 %vm6838_vm1, %v6789_v2 }
 0x671   :  { %7866 = vmatmul.mubr.msk.bf16.gmra.mxu1 %vm6838_vm1, %v6790_v49  ;;  %v6355_v7 = vadd.f32 %v12792_v6, %v6354_v30 }
 0x672   :  { %v6356_v38 = vpop.f32.mrf.mxu1 }
 0x673   :  { %v7799_v61 = vpop.f32.mrf.mxu0 }
 0x674   :  { %v6359_v27 = vpop.f32.mrf.mxu1 }
 0x675   :  { %v6360_v10 = vadd.f32 %v12792_v6, %v6359_v27  ;;  %v6640_v50 = vpop.f32.mrf.mxu0 }
 0x676   :  { %v6361_v28 = vpop.f32.mrf.mxu1  ;;  %v6641_v13 = vadd.f32 %v6640_v50, %v6352_v20 }
 0x677   :  { %v7800_v26 = vpop.f32.mrf.mxu0  ;;  %v6649_v51 = vadd.f32 %v7799_v61, %v6360_v10 }
 0x678   :  { %v6362_v54 = vpop.f32.mrf.mxu1  ;;  %v6751_v23 = vmax.f32 %v6641_v13, 0.0 }
 0x679   :  { %v6363_v56 = vadd.f32 %v12792_v6, %v6362_v54  ;;  %v6643_v25 = vpop.f32.mrf.mxu0  ;;  %v6753_v60 = vmax.f32 %v6649_v51, 0.0 }
 0x67a   :  { %v6364_v53 = vpop.f32.mrf.mxu1  ;;  %v6644_v8 = vadd.f32 %v6643_v25, %v6355_v7 }
 0x67b   :  { %v6652_v32 = vadd.f32 %v7800_v26, %v6363_v56 }
 0x67c   :  { %v6367_v43 = vpop.f32.mrf.mxu1  ;;  %v6752_v3 = vmax.f32 %v6644_v8, 0.0 }
 0x67d   :  { %v6754_v39 = vmax.f32 %v6652_v32, 0.0  ;;  %v6368_v40 = vadd.f32 %v12792_v6, %v6367_v43 }
 0x67e   :  { %v6369_v37 = vpop.f32.mrf.mxu1  ;;  %v6791_v47 = vpack.c.bf16 %v6752_v3, %v6751_v23 }
 0x67f   :  { %v6792_v48 = vpack.c.bf16 %v6754_v39, %v6753_v60 }
 0x680   :  { %v6370_v52 = vpop.f32.mrf.mxu1  ;;  %7869 = vmatprep.mubr.msk.bf16.mxu1 %vm6838_vm1, %v6791_v47 }
 0x681   :  { %7870 = vmatmul.mubr.msk.bf16.gmra.mxu1 %vm6838_vm1, %v6792_v48  ;;  %v6371_v57 = vadd.f32 %v12792_v6, %v6370_v52 }
 0x682   :  { %v6372_v62 = vpop.f32.mrf.mxu1 }
 0x683   :  { %v7803_v14 = vpop.f32.mrf.mxu0 }
 0x684   :  { %v6375_v5 = vpop.f32.mrf.mxu1 }
 0x685   :  { %v6376_v33 = vadd.f32 %v12792_v6, %v6375_v5  ;;  %v6656_v29 = vpop.f32.mrf.mxu0 }
 0x686   :  { %v6377_v35 = vpop.f32.mrf.mxu1  ;;  %v6657_v24 = vadd.f32 %v6656_v29, %v6368_v40 }
 0x687   :  { %v7804_v11 = vpop.f32.mrf.mxu0  ;;  %v6665_v31 = vadd.f32 %v7803_v14, %v6376_v33  ;;  %v12920_v35 = vld [vmem:[%s12999_s8] ss:$0 sm:$0xff]  ;;  %s8278_s8 = smov [#allocation5]  }
 0x688   :  { %v6378_v45 = vpop.f32.mrf.mxu1  ;;  %v6755_v58 = vmax.f32 %v6657_v24, 0.0  ;;  %s7293_s11 = sshll.u32 %s8278_s8, 4  ;;  %s7294_s11 = int_to_ptr.vmem [resolvable:$true] %s7293_s11 }
 0x689   :  { %v6379_v19 = vadd.f32 %v12792_v6, %v6378_v45  ;;  %v6659_v36 = vpop.f32.mrf.mxu0  ;;  %v6757_v1 = vmax.f32 %v6665_v31, 0.0  ;;  %s8250_s12 = scalar_lea.vmem %s7294_s11, 8192  ;;  %p8255_p6 = scmp.lt.s32.totalorder %s7294_s11, %s7294_s11 }
 0x68a   :  { %v6380_v4 = vpop.f32.mrf.mxu1  ;;  %v6660_v0 = vadd.f32 %v6659_v36, %v6371_v57  ;;  %p8251_p5 = scmp.ne.s32.totalorder %s7294_s11, %s8250_s12  ;;  %p8256_p7 = scmp.lt.s32.totalorder %s8250_s12, %s8250_s12 }
 0x68b   :  { %v6668_v44 = vadd.f32 %v7804_v11, %v6379_v19 }
 0x68c   :  { %v6383_v41 = vpop.f32.mrf.mxu1  ;;  %v6756_v46 = vmax.f32 %v6660_v0, 0.0  ;;  %p8257_p8 = por %p8256_p7, %p8255_p6 }
 0x68d   :  { %v6758_v59 = vmax.f32 %v6668_v44, 0.0  ;;  %v6384_v17 = vadd.f32 %v12792_v6, %v6383_v41 }
 0x68e   :  { %v6385_v9 = vpop.f32.mrf.mxu1  ;;  %v6793_v15 = vpack.c.bf16 %v6756_v46, %v6755_v58  ;;  %p8258_p9 = pnand %p8257_p8, %p8251_p5 }
 0x68f   :  { %v6794_v63 = vpack.c.bf16 %v6758_v59, %v6757_v1 }
 0x690   :  { %v6386_v22 = vpop.f32.mrf.mxu1  ;;  %7873 = vmatprep.mubr.msk.bf16.mxu1 %vm6838_vm1, %v6793_v15 }
 0x691   :  { %7874 = vmatmul.mubr.msk.bf16.gmra.mxu1 %vm6838_vm1, %v6794_v63  ;;  %v6387_v49 = vadd.f32 %v12792_v6, %v6386_v22 }
 0x692   :  { %v6388_v42 = vpop.f32.mrf.mxu1 }
 0x693   :  { %v7807_v34 = vpop.f32.mrf.mxu0 }
 0x694   :  { %v6391_v16 = vpop.f32.mrf.mxu1 }
 0x695   :  { %v6392_v55 = vadd.f32 %v12792_v6, %v6391_v16  ;;  %v6672_v21 = vpop.f32.mrf.mxu0 }
 0x696   :  { %v6393_v18 = vpop.f32.mrf.mxu1  ;;  %v6673_v30 = vadd.f32 %v6672_v21, %v6384_v17 }
 0x697   :  { %v7808_v2 = vpop.f32.mrf.mxu0  ;;  %v6681_v27 = vadd.f32 %v7807_v34, %v6392_v55 }
 0x698   :  { %v6394_v12 = vpop.f32.mrf.mxu1  ;;  %v6759_v54 = vmax.f32 %v6673_v30, 0.0 }
 0x699   :  { %v6395_v38 = vadd.f32 %v12792_v6, %v6394_v12  ;;  %v6675_v10 = vpop.f32.mrf.mxu0  ;;  %v6761_v13 = vmax.f32 %v6681_v27, 0.0 }
 0x69a   :  { %v6396_v61 = vpop.f32.mrf.mxu1  ;;  %v6676_v50 = vadd.f32 %v6675_v10, %v6387_v49 }
 0x69b   :  { %v6684_v28 = vadd.f32 %v7808_v2, %v6395_v38 }
 0x69c   :  { %v6399_v20 = vpop.f32.mrf.mxu1  ;;  %v6760_v7 = vmax.f32 %v6676_v50, 0.0 }
 0x69d   :  { %v6762_v26 = vmax.f32 %v6684_v28, 0.0  ;;  %v6400_v60 = vadd.f32 %v12792_v6, %v6399_v20 }
 0x69e   :  { %v6401_v56 = vpop.f32.mrf.mxu1  ;;  %v6795_v51 = vpack.c.bf16 %v6760_v7, %v6759_v54 }
 0x69f   :  { %v6796_v53 = vpack.c.bf16 %v6762_v26, %v6761_v13 }
 0x6a0   :  { %v6402_v25 = vpop.f32.mrf.mxu1  ;;  %7877 = vmatprep.mubr.msk.bf16.mxu1 %vm6838_vm1, %v6795_v51 }
 0x6a1   :  { %7878 = vmatmul.mubr.msk.bf16.gmra.mxu1 %vm6838_vm1, %v6796_v53  ;;  %v6403_v48 = vadd.f32 %v12792_v6, %v6402_v25 }
 0x6a2   :  { %v6404_v32 = vpop.f32.mrf.mxu1 }
 0x6a3   :  { %v7811_v43 = vpop.f32.mrf.mxu0 }
 0x6a4   :  { %v6407_v8 = vpop.f32.mrf.mxu1 }
 0x6a5   :  { %v6408_v23 = vadd.f32 %v12792_v6, %v6407_v8  ;;  %v6688_v3 = vpop.f32.mrf.mxu0 }
 0x6a6   :  { %v6409_v39 = vpop.f32.mrf.mxu1  ;;  %v6689_v52 = vadd.f32 %v6688_v3, %v6400_v60 }
 0x6a7   :  { %v7812_v47 = vpop.f32.mrf.mxu0  ;;  %v6697_v5 = vadd.f32 %v7811_v43, %v6408_v23 }
 0x6a8   :  { %v6410_v37 = vpop.f32.mrf.mxu1  ;;  %v6763_v11 = vmax.f32 %v6689_v52, 0.0 }
 0x6a9   :  { %v6411_v62 = vadd.f32 %v12792_v6, %v6410_v37  ;;  %v6691_v33 = vpop.f32.mrf.mxu0  ;;  %v6765_v31 = vmax.f32 %v6697_v5, 0.0 }
 0x6aa   :  { %v6412_v14 = vpop.f32.mrf.mxu1  ;;  %v6692_v40 = vadd.f32 %v6691_v33, %v6403_v48 }
 0x6ab   :  { %v6700_v29 = vadd.f32 %v7812_v47, %v6411_v62 }
 0x6ac   :  { %v7823_v45 = vpop.f32.mrf.mxu1  ;;  %v6764_v24 = vmax.f32 %v6692_v40, 0.0 }
 0x6ad   :  { %v6766_v57 = vmax.f32 %v6700_v29, 0.0  ;;  %v6978_v19 = vadd.f32 %v7823_v45, %v12920_v35 }
 0x6ae   :  { %v6969_v4 = vpop.f32.mrf.mxu1  ;;  %v6797_v36 = vpack.c.bf16 %v6764_v24, %v6763_v11 }
 0x6af   :  { %7226 = vst [vmem:[#allocation5 + $0x10] sm:$0xff] %v6978_v19  ;;  %v6970_v6 = vadd.f32 %v12920_v35, %v6969_v4  ;;  %v6798_v44 = vpack.c.bf16 %v6766_v57, %v6765_v31 }
 0x6b0   :  { %v7824_v0 = vpop.f32.mrf.mxu1  ;;  %7881 = vmatprep.mubr.msk.bf16.mxu1 %vm6838_vm1, %v6797_v36 }
 0x6b1   :  { %7224 = vst [vmem:[#allocation5] sm:$0xff] %v6970_v6  ;;  %v6981_v41 = vadd.f32 %v7824_v0, %v12920_v35  ;;  %7882 = vmatmul.mubr.msk.bf16.gmra.mxu1 %vm6838_vm1, %v6798_v44 }
 0x6b2   :  { %v6972_v58 = vpop.f32.mrf.mxu1 }
 0x6b3   :  { %7227 = vst [vmem:[#allocation5 + $0x18] sm:$0xff] %v6981_v41  ;;  %v6973_v59 = vadd.f32 %v12920_v35, %v6972_v58 }
 0x6b4   :  { %v7827_v46 = vpop.f32.mrf.mxu1 }
 0x6b5   :  { %7225 = vst [vmem:[#allocation5 + $0x8] sm:$0xff] %v6973_v59  ;;  %v6994_v1 = vadd.f32 %v7827_v46, %v12920_v35 }
 0x6b6   :  { %v6985_v9 = vpop.f32.mrf.mxu1 }
 0x6b7   :  { %7230 = vst [vmem:[#allocation5 + $0x30] sm:$0xff] %v6994_v1  ;;  %v6986_v15 = vadd.f32 %v12920_v35, %v6985_v9 }
 0x6b8   :  { %v7828_v63 = vpop.f32.mrf.mxu1 }
 0x6b9   :  { %7228 = vst [vmem:[#allocation5 + $0x20] sm:$0xff] %v6986_v15  ;;  %v6997_v22 = vadd.f32 %v7828_v63, %v12920_v35 }
 0x6ba   :  { %v6988_v42 = vpop.f32.mrf.mxu1 }
 0x6bb   :  { %7231 = vst [vmem:[#allocation5 + $0x38] sm:$0xff] %v6997_v22  ;;  %v6989_v16 = vadd.f32 %v12920_v35, %v6988_v42 }
 0x6bc   :  { %v7831_v34 = vpop.f32.mrf.mxu1 }
 0x6bd   :  { %7229 = vst [vmem:[#allocation5 + $0x28] sm:$0xff] %v6989_v16  ;;  %v7010_v55 = vadd.f32 %v7831_v34, %v12920_v35 }
 0x6be   :  { %v7001_v18 = vpop.f32.mrf.mxu1 }
 0x6bf   :  { %7234 = vst [vmem:[#allocation5 + $0x50] sm:$0xff] %v7010_v55  ;;  %v7002_v21 = vadd.f32 %v12920_v35, %v7001_v18 }
 0x6c0   :  { %v7832_v17 = vpop.f32.mrf.mxu1 }
 0x6c1   :  { %7232 = vst [vmem:[#allocation5 + $0x40] sm:$0xff] %v7002_v21  ;;  %v7013_v12 = vadd.f32 %v7832_v17, %v12920_v35 }
 0x6c2   :  { %v7004_v2 = vpop.f32.mrf.mxu1 }
 0x6c3   :  { %7235 = vst [vmem:[#allocation5 + $0x58] sm:$0xff] %v7013_v12  ;;  %v7005_v49 = vadd.f32 %v12920_v35, %v7004_v2 }
 0x6c4   :  { %v7835_v30 = vpop.f32.mrf.mxu1 }
 0x6c5   :  { %7233 = vst [vmem:[#allocation5 + $0x48] sm:$0xff] %v7005_v49  ;;  %v7026_v38 = vadd.f32 %v7835_v30, %v12920_v35 }
 0x6c6   :  { %v7017_v27 = vpop.f32.mrf.mxu1 }
 0x6c7   :  { %7238 = vst [vmem:[#allocation5 + $0x70] sm:$0xff] %v7026_v38  ;;  %v7018_v61 = vadd.f32 %v12920_v35, %v7017_v27 }
 0x6c8   :  { %v7836_v10 = vpop.f32.mrf.mxu1 }
 0x6c9   :  { %7236 = vst [vmem:[#allocation5 + $0x60] sm:$0xff] %v7018_v61  ;;  %v7029_v28 = vadd.f32 %v7836_v10, %v12920_v35 }
 0x6ca   :  { %v7020_v50 = vpop.f32.mrf.mxu1 }
 0x6cb   :  { %7239 = vst [vmem:[#allocation5 + $0x78] sm:$0xff] %v7029_v28  ;;  %v7021_v20 = vadd.f32 %v12920_v35, %v7020_v50 }
 0x6cc   :  { %v7839_v54 = vpop.f32.mrf.mxu1 }
 0x6cd   :  { %7237 = vst [vmem:[#allocation5 + $0x68] sm:$0xff] %v7021_v20  ;;  %v7042_v26 = vadd.f32 %v7839_v54, %v12920_v35 }
 0x6ce   :  { %v7033_v7 = vpop.f32.mrf.mxu1 }
 0x6cf   :  { %7242 = vst [vmem:[#allocation5 + $0x90] sm:$0xff] %v7042_v26  ;;  %v7034_v13 = vadd.f32 %v12920_v35, %v7033_v7 }
 0x6d0   :  { %v7840_v56 = vpop.f32.mrf.mxu1 }
 0x6d1   :  { %7240 = vst [vmem:[#allocation5 + $0x80] sm:$0xff] %v7034_v13  ;;  %v7045_v51 = vadd.f32 %v7840_v56, %v12920_v35 }
 0x6d2   :  { %v7036_v53 = vpop.f32.mrf.mxu1 }
 0x6d3   :  { %7243 = vst [vmem:[#allocation5 + $0x98] sm:$0xff] %v7045_v51  ;;  %v7037_v25 = vadd.f32 %v12920_v35, %v7036_v53 }
 0x6d4   :  { %v7843_v32 = vpop.f32.mrf.mxu1 }
 0x6d5   :  { %7241 = vst [vmem:[#allocation5 + $0x88] sm:$0xff] %v7037_v25  ;;  %v7058_v8 = vadd.f32 %v7843_v32, %v12920_v35 }
 0x6d6   :  { %v7049_v43 = vpop.f32.mrf.mxu1 }
 0x6d7   :  { %7246 = vst [vmem:[#allocation5 + $0xb0] sm:$0xff] %v7058_v8  ;;  %v7050_v23 = vadd.f32 %v12920_v35, %v7049_v43 }
 0x6d8   :  { %v7844_v39 = vpop.f32.mrf.mxu1 }
 0x6d9   :  { %7244 = vst [vmem:[#allocation5 + $0xa0] sm:$0xff] %v7050_v23  ;;  %v7061_v3 = vadd.f32 %v7844_v39, %v12920_v35 }
 0x6da   :  { %v7052_v60 = vpop.f32.mrf.mxu1 }
 0x6db   :  { %7247 = vst [vmem:[#allocation5 + $0xb8] sm:$0xff] %v7061_v3  ;;  %v7053_v37 = vadd.f32 %v12920_v35, %v7052_v60 }
 0x6dd   :  { %7245 = vst [vmem:[#allocation5 + $0xa8] sm:$0xff] %v7053_v37 }
 0x6e1   :  { %v7847_v47 = vpop.f32.mrf.mxu1 }
 0x6e2   :  { %v7074_v48 = vadd.f32 %v7847_v47, %v12920_v35 }
 0x6e3   :  { %v7065_v52 = vpop.f32.mrf.mxu1 }
 0x6e4   :  { %7250 = vst [vmem:[#allocation5 + $0xd0] sm:$0xff] %v7074_v48  ;;  %v7066_v62 = vadd.f32 %v12920_v35, %v7065_v52 }
 0x6e5   :  { %v7848_v5 = vpop.f32.mrf.mxu1 }
 0x6e6   :  { %7248 = vst [vmem:[#allocation5 + $0xc0] sm:$0xff] %v7066_v62  ;;  %v7077_v14 = vadd.f32 %v7848_v5, %v12920_v35 }
 0x6e7   :  { %v7068_v33 = vpop.f32.mrf.mxu1 }
 0x6e8   :  { %7251 = vst [vmem:[#allocation5 + $0xd8] sm:$0xff] %v7077_v14  ;;  %v7069_v29 = vadd.f32 %v12920_v35, %v7068_v33 }
 0x6ea   :  { %7249 = vst [vmem:[#allocation5 + $0xc8] sm:$0xff] %v7069_v29 }
 0x6f1   :  { %v7851_v40 = vpop.f32.mrf.mxu1 }
 0x6f2   :  { %v7090_v45 = vadd.f32 %v7851_v40, %v12920_v35 }
 0x6f3   :  { %v7081_v11 = vpop.f32.mrf.mxu1 }
 0x6f4   :  { %7254 = vst [vmem:[#allocation5 + $0xf0] sm:$0xff] %v7090_v45  ;;  %v7082_v57 = vadd.f32 %v12920_v35, %v7081_v11 }
 0x6f5   :  { %v7852_v24 = vpop.f32.mrf.mxu1 }
 0x6f6   :  { %7252 = vst [vmem:[#allocation5 + $0xe0] sm:$0xff] %v7082_v57  ;;  %v7093_v19 = vadd.f32 %v7852_v24, %v12920_v35 }
 0x6f7   :  { %v7084_v31 = vpop.f32.mrf.mxu1 }
 0x6f8   :  { %7255 = vst [vmem:[#allocation5 + $0xf8] sm:$0xff] %v7093_v19  ;;  %v7085_v4 = vadd.f32 %v12920_v35, %v7084_v31 }
 0x6fa   :  { %7253 = vst [vmem:[#allocation5 + $0xe8] sm:$0xff] %v7085_v4 }
 0x701   :  { %v7855_v36 = vpop.f32.mrf.mxu1 }
 0x702   :  { %v7106_v6 = vadd.f32 %v7855_v36, %v12920_v35 }
 0x703   :  { %v7097_v44 = vpop.f32.mrf.mxu1 }
 0x704   :  { %7258 = vst [vmem:[#allocation5 + $0x110] sm:$0xff] %v7106_v6  ;;  %v7098_v0 = vadd.f32 %v12920_v35, %v7097_v44 }
 0x705   :  { %v7856_v41 = vpop.f32.mrf.mxu1 }
 0x706   :  { %7256 = vst [vmem:[#allocation5 + $0x100] sm:$0xff] %v7098_v0  ;;  %v7109_v58 = vadd.f32 %v7856_v41, %v12920_v35 }
 0x707   :  { %v7100_v59 = vpop.f32.mrf.mxu1 }
 0x708   :  { %7259 = vst [vmem:[#allocation5 + $0x118] sm:$0xff] %v7109_v58  ;;  %v7101_v46 = vadd.f32 %v12920_v35, %v7100_v59 }
 0x70a   :  { %7257 = vst [vmem:[#allocation5 + $0x108] sm:$0xff] %v7101_v46 }
 0x711   :  { %v7859_v1 = vpop.f32.mrf.mxu1 }
 0x712   :  { %v7122_v9 = vadd.f32 %v7859_v1, %v12920_v35 }
 0x713   :  { %v7113_v15 = vpop.f32.mrf.mxu1 }
 0x714   :  { %7262 = vst [vmem:[#allocation5 + $0x130] sm:$0xff] %v7122_v9  ;;  %v7114_v63 = vadd.f32 %v12920_v35, %v7113_v15 }
 0x715   :  { %v7860_v22 = vpop.f32.mrf.mxu1 }
 0x716   :  { %7260 = vst [vmem:[#allocation5 + $0x120] sm:$0xff] %v7114_v63  ;;  %v7125_v42 = vadd.f32 %v7860_v22, %v12920_v35 }
 0x717   :  { %v7116_v16 = vpop.f32.mrf.mxu1 }
 0x718   :  { %7263 = vst [vmem:[#allocation5 + $0x138] sm:$0xff] %v7125_v42  ;;  %v7117_v34 = vadd.f32 %v12920_v35, %v7116_v16 }
 0x71a   :  { %7261 = vst [vmem:[#allocation5 + $0x128] sm:$0xff] %v7117_v34 }
 0x721   :  { %v7863_v55 = vpop.f32.mrf.mxu1 }
 0x722   :  { %v7138_v18 = vadd.f32 %v7863_v55, %v12920_v35 }
 0x723   :  { %v7129_v21 = vpop.f32.mrf.mxu1 }
 0x724   :  { %7266 = vst [vmem:[#allocation5 + $0x150] sm:$0xff] %v7138_v18  ;;  %v7130_v17 = vadd.f32 %v12920_v35, %v7129_v21 }
 0x725   :  { %v7864_v12 = vpop.f32.mrf.mxu1 }
 0x726   :  { %7264 = vst [vmem:[#allocation5 + $0x140] sm:$0xff] %v7130_v17  ;;  %v7141_v2 = vadd.f32 %v7864_v12, %v12920_v35 }
 0x727   :  { %v7132_v49 = vpop.f32.mrf.mxu1 }
 0x728   :  { %7267 = vst [vmem:[#allocation5 + $0x158] sm:$0xff] %v7141_v2  ;;  %v7133_v30 = vadd.f32 %v12920_v35, %v7132_v49 }
 0x72a   :  { %7265 = vst [vmem:[#allocation5 + $0x148] sm:$0xff] %v7133_v30 }
 0x731   :  { %v7867_v38 = vpop.f32.mrf.mxu1 }
 0x732   :  { %v7154_v27 = vadd.f32 %v7867_v38, %v12920_v35 }
 0x733   :  { %v7145_v61 = vpop.f32.mrf.mxu1 }
 0x734   :  { %7270 = vst [vmem:[#allocation5 + $0x170] sm:$0xff] %v7154_v27  ;;  %v7146_v10 = vadd.f32 %v12920_v35, %v7145_v61 }
 0x735   :  { %v7868_v28 = vpop.f32.mrf.mxu1 }
 0x736   :  { %7268 = vst [vmem:[#allocation5 + $0x160] sm:$0xff] %v7146_v10  ;;  %v7157_v50 = vadd.f32 %v7868_v28, %v12920_v35 }
 0x737   :  { %v7148_v20 = vpop.f32.mrf.mxu1 }
 0x738   :  { %7271 = vst [vmem:[#allocation5 + $0x178] sm:$0xff] %v7157_v50  ;;  %v7149_v54 = vadd.f32 %v12920_v35, %v7148_v20 }
 0x73a   :  { %7269 = vst [vmem:[#allocation5 + $0x168] sm:$0xff] %v7149_v54 }
 0x741   :  { %v7871_v26 = vpop.f32.mrf.mxu1 }
 0x742   :  { %v7170_v7 = vadd.f32 %v7871_v26, %v12920_v35 }
 0x743   :  { %v7161_v13 = vpop.f32.mrf.mxu1 }
 0x744   :  { %7274 = vst [vmem:[#allocation5 + $0x190] sm:$0xff] %v7170_v7  ;;  %v7162_v56 = vadd.f32 %v12920_v35, %v7161_v13 }
 0x745   :  { %v7872_v51 = vpop.f32.mrf.mxu1 }
 0x746   :  { %7272 = vst [vmem:[#allocation5 + $0x180] sm:$0xff] %v7162_v56  ;;  %v7173_v53 = vadd.f32 %v7872_v51, %v12920_v35 }
 0x747   :  { %v7164_v25 = vpop.f32.mrf.mxu1 }
 0x748   :  { %7275 = vst [vmem:[#allocation5 + $0x198] sm:$0xff] %v7173_v53  ;;  %v7165_v32 = vadd.f32 %v12920_v35, %v7164_v25 }
 0x74a   :  { %7273 = vst [vmem:[#allocation5 + $0x188] sm:$0xff] %v7165_v32 }
 0x751   :  { %v7875_v8 = vpop.f32.mrf.mxu1 }
 0x752   :  { %v7186_v43 = vadd.f32 %v7875_v8, %v12920_v35 }
 0x753   :  { %v7177_v23 = vpop.f32.mrf.mxu1 }
 0x754   :  { %7278 = vst [vmem:[#allocation5 + $0x1b0] sm:$0xff] %v7186_v43  ;;  %v7178_v39 = vadd.f32 %v12920_v35, %v7177_v23 }
 0x755   :  { %v7876_v3 = vpop.f32.mrf.mxu1 }
 0x756   :  { %7276 = vst [vmem:[#allocation5 + $0x1a0] sm:$0xff] %v7178_v39  ;;  %v7189_v60 = vadd.f32 %v7876_v3, %v12920_v35 }
 0x757   :  { %v7180_v37 = vpop.f32.mrf.mxu1 }
 0x758   :  { %7279 = vst [vmem:[#allocation5 + $0x1b8] sm:$0xff] %v7189_v60  ;;  %v7181_v47 = vadd.f32 %v12920_v35, %v7180_v37 }
 0x75a   :  { %7277 = vst [vmem:[#allocation5 + $0x1a8] sm:$0xff] %v7181_v47 }
 0x761   :  { %v7879_v48 = vpop.f32.mrf.mxu1 }
 0x762   :  { %v7202_v52 = vadd.f32 %v7879_v48, %v12920_v35 }
 0x763   :  { %v7193_v62 = vpop.f32.mrf.mxu1 }
 0x764   :  { %7282 = vst [vmem:[#allocation5 + $0x1d0] sm:$0xff] %v7202_v52  ;;  %v7194_v5 = vadd.f32 %v12920_v35, %v7193_v62 }
 0x765   :  { %v7880_v14 = vpop.f32.mrf.mxu1 }
 0x766   :  { %7280 = vst [vmem:[#allocation5 + $0x1c0] sm:$0xff] %v7194_v5  ;;  %v7205_v33 = vadd.f32 %v7880_v14, %v12920_v35 }
 0x767   :  { %v7196_v29 = vpop.f32.mrf.mxu1 }
 0x768   :  { %7283 = vst [vmem:[#allocation5 + $0x1d8] sm:$0xff] %v7205_v33  ;;  %v7197_v40 = vadd.f32 %v12920_v35, %v7196_v29 }
 0x76a   :  { %7281 = vst [vmem:[#allocation5 + $0x1c8] sm:$0xff] %v7197_v40 }
 0x771   :  { %v7883_v45 = vpop.f32.mrf.mxu1 }
 0x772   :  { %v7218_v11 = vadd.f32 %v7883_v45, %v12920_v35 }
 0x773   :  { %v7209_v57 = vpop.f32.mrf.mxu1 }
 0x774   :  { %7286 = vst [vmem:[#allocation5 + $0x1f0] sm:$0xff] %v7218_v11  ;;  %v7210_v24 = vadd.f32 %v12920_v35, %v7209_v57 }
 0x775   :  { %v7884_v19 = vpop.f32.mrf.mxu1 }
 0x776   :  { %7284 = vst [vmem:[#allocation5 + $0x1e0] sm:$0xff] %v7210_v24  ;;  %v7221_v31 = vadd.f32 %v7884_v19, %v12920_v35 }
 0x777   :  { %v7212_v4 = vpop.f32.mrf.mxu1 }
 0x778   :  { %7287 = vst [vmem:[#allocation5 + $0x1f8] sm:$0xff] %v7221_v31  ;;  %v7213_v36 = vadd.f32 %v12920_v35, %v7212_v4 }
 0x77a   :  { %7285 = vst [vmem:[#allocation5 + $0x1e8] sm:$0xff] %v7213_v36 }
 0x77b   :  { %8261 = shalt.err (!%p8258_p9)
}
 0x77c   :  { %s8279_s13 = smov 128   ;;  %s8280_s14 = smov 8  }
 0x77d   :  { %7299 = dma.vmem_to_hbm [thread:$0]  %s7294_s11, 8192, %s13000_s9, [#allocation4], %s8279_s13, %s8279_s13, %s8280_s14  }
 0x77e   :  { %8272 = dma.done.wait [#allocation4], 8192  }
 0x77f   :  { %8273 = vsyncadd [#allocation4], 4294959104 }
 0x780   :  { %7303 = vsyncpa [#allocation3], 1 }
 0x781   :  { %7304 = vsyncpa [#allocation4], 1 }

</bundles_post_ra>
